<compile_context>
chip_gen: v7x
topology: tpu7x:2x2x1
jax: 0.10.0
libtpu: 0.0.40
codegen_flags: <defaults>
</compile_context>

<pallas_src>
import functools

import jax
import jax.numpy as jnp
from jax.experimental import pallas as pl
from jax.experimental.pallas import tpu as pltpu


LANE = 128           # channel padding target: lane-dense stores / MXU columns
PAD_L = 16           # left zero margin in halo scratch (bf16 (16,128) aligned)
VMEM_LIMIT = 32 * 1024 * 1024   # well under v7x's 64 MiB physical VMEM


# ---------------------------------------------------------------------------
# Fused kernel: whole backbone + projection head, one batch element per step.
# ---------------------------------------------------------------------------

def _acc_taps(read_tap, w_ref, rows, c):
    """Accumulate the 9 shifted-window matmuls of a 3x3 conv (bias NOT added).

    Starts the f32 accumulator from the first tap's dot so the 9 MXU matmuls
    can chain in the result buffer (MRB on v7x); bias is added by the caller
    exactly once after the loop.
    """
    acc = None
    for t in range(9):
        i, j = divmod(t, 3)
        patch = read_tap(i, j).reshape(rows, c)            # (H*W, C) bf16
        d = jnp.dot(patch, w_ref[t], preferred_element_type=jnp.float32)
        acc = d if acc is None else acc + d
    return acc


def _fused_kernel(x_ref, w1_ref, b1_ref, w2a_ref, b2a_ref, w2b_ref, b2b_ref,
                  d1w_ref, d1b_ref, d2w_ref, d2b_ref,
                  e_ref, z_ref, hs_ref, ys_ref, *, h, w, c, pad_l):
    """One batch element: conv1 -> conv2a -> conv2b+res+ReLU+GAP -> MLP head.

    x_ref : (1, H+2, W+2, C)  spatially padded bf16 input image
    w*    : (9, C, C) bf16 tap-major conv weights;  b* : (1, C) f32 biases
    d*w   : (C, C) bf16 dense weights;              d*b : (1, C) f32 biases
    e_ref : (1, 1, C) f32 pooled features;  z_ref : (1, 1, C) f32 projection
    hs/ys : (H+2, SW, C) bf16 VMEM halo scratch (interior at cols [pad_l, pad_l+W))
    """
    rows = h * w
    inv_hw = 1.0 / float(rows)

    # Zero the halo scratch every step: cheap (a few hundred KB of VMEM stores)
    # and safe even when the "parallel" batch axis is split across TCs
    # (a once-at-pid==0 init would be skipped on the second core).
    hs_ref[...] = jnp.zeros_like(hs_ref)
    ys_ref[...] = jnp.zeros_like(ys_ref)

    # ---- conv1 (stem) + ReLU ------------------------------------------------
    acc = _acc_taps(lambda i, j: x_ref[0, i:i + h, j:j + w, :], w1_ref, rows, c)
    h_act = jnp.maximum(acc + b1_ref[...], 0.0)            # bias once, f32
    hb = h_act.astype(jnp.bfloat16)                        # (rows, C) bf16
    hs_ref[1:h + 1, pad_l:pad_l + w, :] = hb.reshape(h, w, c)   # aligned store

    # ---- residual block: conv2a + ReLU ---------------------------------------
    acc = _acc_taps(
        lambda i, j: hs_ref[i:i + h, pad_l - 1 + j:pad_l - 1 + j + w, :],
        w2a_ref, rows, c)
    y_act = jnp.maximum(acc + b2a_ref[...], 0.0)
    ys_ref[1:h + 1, pad_l:pad_l + w, :] = y_act.astype(jnp.bfloat16).reshape(h, w, c)

    # ---- conv2b + residual add + ReLU + global average pool ------------------
    acc = _acc_taps(
        lambda i, j: ys_ref[i:i + h, pad_l - 1 + j:pad_l - 1 + j + w, :],
        w2b_ref, rows, c)
    skip = hb.astype(jnp.float32)                          # residual = bf16(h)
    act = jnp.maximum(acc + b2b_ref[...] + skip, 0.0)      # (rows, C) f32
    e = jnp.sum(act, axis=0, keepdims=True) * inv_hw       # (1, C) f32 GAP
    e_ref[...] = e.reshape(1, 1, c)

    # ---- projection head: dense2(relu(dense1(e))) ----------------------------
    # Broadcast the single row to 8 sublanes so the MXU matmul is M-aligned.
    e8 = jnp.broadcast_to(e.astype(jnp.bfloat16), (8, c))
    t = jnp.maximum(jnp.dot(e8, d1w_ref[...], preferred_element_type=jnp.float32)
                    + d1b_ref[...], 0.0)
    z = jnp.dot(t.astype(jnp.bfloat16), d2w_ref[...],
                preferred_element_type=jnp.float32) + d2b_ref[...]
    z_ref[...] = z[0:1].reshape(1, 1, c)


# ---------------------------------------------------------------------------
# pallas_call wrapper
# ---------------------------------------------------------------------------

def fused_forward(xp, p):
    """xp: (B, H+2, W+2, C) bf16 spatially padded input.  Returns (e, z) f32."""
    B, hp2, wp2, c = xp.shape
    H, W = hp2 - 2, wp2 - 2
    assert c == LANE and W % 16 == 0 and H >= 1          # bf16 (16,128) packing
    SW = PAD_L + W + 16                                  # scratch width (halo + margin)

    kern = functools.partial(_fused_kernel, h=H, w=W, c=c, pad_l=PAD_L)
    const3 = lambda b: (0, 0, 0)
    const2 = lambda b: (0, 0)

    e_p, z_p = pl.pallas_call(
        kern,
        grid=(B,),
        in_specs=(
            pl.BlockSpec((1, hp2, wp2, c), lambda b: (b, 0, 0, 0)),   # x (padded)
            pl.BlockSpec((9, c, c), const3), pl.BlockSpec((1, c), const2),  # conv1
            pl.BlockSpec((9, c, c), const3), pl.BlockSpec((1, c), const2),  # conv2a
            pl.BlockSpec((9, c, c), const3), pl.BlockSpec((1, c), const2),  # conv2b
            pl.BlockSpec((c, c), const2),    pl.BlockSpec((1, c), const2),  # dense1
            pl.BlockSpec((c, c), const2),    pl.BlockSpec((1, c), const2),  # dense2
        ),
        out_specs=(
            pl.BlockSpec((1, 1, c), lambda b: (b, 0, 0)),             # e
            pl.BlockSpec((1, 1, c), lambda b: (b, 0, 0)),             # z
        ),
        out_shape=(
            jax.ShapeDtypeStruct((B, 1, c), jnp.float32),
            jax.ShapeDtypeStruct((B, 1, c), jnp.float32),
        ),
        scratch_shapes=[
            pltpu.VMEM((hp2, SW, c), jnp.bfloat16),    # h (padded, resident)
            pltpu.VMEM((hp2, SW, c), jnp.bfloat16),    # y (padded, resident)
        ],
        compiler_params=pltpu.CompilerParams(
            dimension_semantics=("parallel",),         # batch -> megacore on v7x
            vmem_limit_bytes=VMEM_LIMIT),
    )(xp, p['conv1_w'], p['conv1_b'], p['conv2a_w'], p['conv2a_b'],
      p['conv2b_w'], p['conv2b_b'], p['dense1_w'], p['dense1_b'],
      p['dense2_w'], p['dense2_b'])
    return e_p.reshape(B, c), z_p.reshape(B, c)


# ---------------------------------------------------------------------------
# Parameters (synthetic, deterministic), pre-packed for the kernel:
#   conv weights: (9, Cin_pad, Cout_pad) bf16, tap-major (kh*3+kw)
#   dense weights: (Cin_pad, Cout_pad) bf16;  biases: (1, C_pad) f32
# Zero padding keeps padded lanes exactly zero through the whole network.
# ---------------------------------------------------------------------------

def _pad_to(x, shape):
    return jnp.pad(x, [(0, t - s) for s, t in zip(x.shape, shape)])


def init_params(key, *, c_in, n_feat, out_dim):
    ks = jax.random.split(key, 10)
    s = 0.1

    def conv_w(k, cout, cin):
        w = s * jax.random.normal(k, (cout, cin, 3, 3), jnp.float32)   # torch layout
        w = jnp.transpose(w, (2, 3, 1, 0)).reshape(9, cin, cout)       # (tap, Cin, Cout)
        return _pad_to(w, (9, LANE, LANE)).astype(jnp.bfloat16)

    def dense_w(k, cin, cout):
        w = s * jax.random.normal(k, (cout, cin), jnp.float32)         # torch (out, in)
        return _pad_to(w.T, (LANE, LANE)).astype(jnp.bfloat16)

    def bias(k, n):
        return _pad_to(s * jax.random.normal(k, (1, n), jnp.float32), (1, LANE))

    return {
        'conv1_w': conv_w(ks[0], n_feat, c_in),  'conv1_b': bias(ks[1], n_feat),
        'conv2a_w': conv_w(ks[2], n_feat, n_feat), 'conv2a_b': bias(ks[3], n_feat),
        'conv2b_w': conv_w(ks[4], n_feat, n_feat), 'conv2b_b': bias(ks[5], n_feat),
        'dense1_w': dense_w(ks[6], n_feat, n_feat), 'dense1_b': bias(ks[7], n_feat),
        'dense2_w': dense_w(ks[8], n_feat, out_dim), 'dense2_b': bias(ks[9], out_dim),
    }


# ---------------------------------------------------------------------------
# Forward pass (matches ResNetSimCLR.forward: returns (e, z))
# ---------------------------------------------------------------------------

def resnet_simclr_forward(x_nchw, params, *, n_feat, out_dim):
    # NCHW (PyTorch) -> NHWC, bf16 operands; ONE pad op: 1-px spatial halo +
    # channel zero-padding to 128 lanes.  Everything else happens in-kernel.
    x = jnp.transpose(x_nchw, (0, 2, 3, 1)).astype(jnp.bfloat16)
    B, H, W, cin = x.shape
    xp = jnp.pad(x, ((0, 0), (1, 1), (1, 1), (0, LANE - cin)))
    e_full, z_full = fused_forward(xp, params)
    return e_full[:, :n_feat], z_full[:, :out_dim]


# ---------------------------------------------------------------------------
# Plain-JAX reference (same math / cast points, no Pallas) for correctness
# ---------------------------------------------------------------------------

def _ref_conv(x_bf16, w9, b, relu):
    B, H, W, _ = x_bf16.shape
    xp = jnp.pad(x_bf16, ((0, 0), (1, 1), (1, 1), (0, 0)))
    acc = jnp.zeros((B, H, W, w9.shape[-1]), jnp.float32) + b.reshape(1, 1, 1, -1)
    for i in range(3):
        for j in range(3):
            acc = acc + jnp.einsum('bhwc,cd->bhwd', xp[:, i:i + H, j:j + W, :],
                                   w9[i * 3 + j],
                                   preferred_element_type=jnp.float32)
    return jnp.maximum(acc, 0.0) if relu else acc


def _reference_forward(x_cp_bf16, params, n_feat, out_dim):
    h = _ref_conv(x_cp_bf16, params['conv1_w'], params['conv1_b'], True)
    hb = h.astype(jnp.bfloat16)
    y = _ref_conv(hb, params['conv2a_w'], params['conv2a_b'], True)
    yb = y.astype(jnp.bfloat16)
    y2 = _ref_conv(yb, params['conv2b_w'], params['conv2b_b'], False)
    res = jnp.maximum(y2 + hb.astype(jnp.float32), 0.0)
    e = jnp.mean(res, axis=(1, 2))
    t = jnp.maximum(jnp.dot(e.astype(jnp.bfloat16), params['dense1_w'],
                            preferred_element_type=jnp.float32) + params['dense1_b'], 0.0)
    z = jnp.dot(t.astype(jnp.bfloat16), params['dense2_w'],
                preferred_element_type=jnp.float32) + params['dense2_b']
    return e[:, :n_feat], z[:, :out_dim]


# ---------------------------------------------------------------------------
if __name__ == "__main__":
    key = jax.random.PRNGKey(0)
    k_x, k_p = jax.random.split(key)

    B, C_IN, HW = 2, 4, 16
    N_FEAT, OUT_DIM = 16, 8

    x = jax.random.normal(k_x, (B, C_IN, HW, HW), jnp.float32)   # NCHW like PyTorch
    params = init_params(k_p, c_in=C_IN, n_feat=N_FEAT, out_dim=OUT_DIM)

    fwd = jax.jit(functools.partial(resnet_simclr_forward,
                                    n_feat=N_FEAT, out_dim=OUT_DIM))
    e, z = fwd(x, params)
    jax.block_until_ready((e, z))

    assert e.shape == (B, N_FEAT), e.shape
    assert z.shape == (B, OUT_DIM), z.shape
    assert bool(jnp.all(jnp.isfinite(e))) and bool(jnp.all(jnp.isfinite(z)))

    # Numerical check against the plain-JAX reference (same bf16 cast points).
    x_cp = jnp.pad(jnp.transpose(x, (0, 2, 3, 1)).astype(jnp.bfloat16),
                   ((0, 0), (0, 0), (0, 0), (0, LANE - C_IN)))
    e_ref, z_ref = _reference_forward(x_cp, params, N_FEAT, OUT_DIM)
    assert jnp.allclose(e, e_ref, atol=3e-3, rtol=3e-3), float(jnp.max(jnp.abs(e - e_ref)))
    assert jnp.allclose(z, z_ref, atol=3e-3, rtol=3e-3), float(jnp.max(jnp.abs(z - z_ref)))

    print("KERNEL_OK")
</pallas_src>

<mosaic_0001>
module attributes {stable_mosaic.version = 11 : i64} {
  func.func @_fused_kernel(%arg0: i32, %arg1: memref<1x18x18x128xbf16, #tpu.memory_space<vmem>>, %arg2: memref<9x128x128xbf16, #tpu.memory_space<vmem>>, %arg3: memref<1x128xf32, #tpu.memory_space<vmem>>, %arg4: memref<9x128x128xbf16, #tpu.memory_space<vmem>>, %arg5: memref<1x128xf32, #tpu.memory_space<vmem>>, %arg6: memref<9x128x128xbf16, #tpu.memory_space<vmem>>, %arg7: memref<1x128xf32, #tpu.memory_space<vmem>>, %arg8: memref<128x128xbf16, #tpu.memory_space<vmem>>, %arg9: memref<1x128xf32, #tpu.memory_space<vmem>>, %arg10: memref<128x128xbf16, #tpu.memory_space<vmem>>, %arg11: memref<1x128xf32, #tpu.memory_space<vmem>>, %arg12: memref<1x1x128xf32, #tpu.memory_space<vmem>>, %arg13: memref<1x1x128xf32, #tpu.memory_space<vmem>>, %arg14: memref<18x48x128xbf16, #tpu.memory_space<vmem>>, %arg15: memref<18x48x128xbf16, #tpu.memory_space<vmem>>) attributes {dimension_semantics = [#tpu.dimension_semantics<parallel>], iteration_bounds = array<i64: 2>, scalar_prefetch = 0 : i64, scratch_operands = 2 : i64, tpu.core_type = #tpu.core_type<tc>, window_params = [{transform_indices = @transform_0, window_bounds = array<i64: 1, 18, 18, 128>}, {pipeline_mode = #tpu.pipeline_mode<synchronous>, transform_indices = @transform_1, window_bounds = array<i64: 9, 128, 128>}, {pipeline_mode = #tpu.pipeline_mode<synchronous>, transform_indices = @transform_2, window_bounds = array<i64: 1, 128>}, {pipeline_mode = #tpu.pipeline_mode<synchronous>, transform_indices = @transform_3, window_bounds = array<i64: 9, 128, 128>}, {pipeline_mode = #tpu.pipeline_mode<synchronous>, transform_indices = @transform_4, window_bounds = array<i64: 1, 128>}, {pipeline_mode = #tpu.pipeline_mode<synchronous>, transform_indices = @transform_5, window_bounds = array<i64: 9, 128, 128>}, {pipeline_mode = #tpu.pipeline_mode<synchronous>, transform_indices = @transform_6, window_bounds = array<i64: 1, 128>}, {pipeline_mode = #tpu.pipeline_mode<synchronous>, transform_indices = @transform_7, window_bounds = array<i64: 128, 128>}, {pipeline_mode = #tpu.pipeline_mode<synchronous>, transform_indices = @transform_8, window_bounds = array<i64: 1, 128>}, {pipeline_mode = #tpu.pipeline_mode<synchronous>, transform_indices = @transform_9, window_bounds = array<i64: 128, 128>}, {pipeline_mode = #tpu.pipeline_mode<synchronous>, transform_indices = @transform_10, window_bounds = array<i64: 1, 128>}, {transform_indices = @transform_11, window_bounds = array<i64: 1, 1, 128>}, {transform_indices = @transform_12, window_bounds = array<i64: 1, 1, 128>}]} {
    %cst = arith.constant 0.000000e+00 : bf16
    %0 = vector.broadcast %cst : bf16 to vector<18x48x128xbf16>
    %c0 = arith.constant 0 : index
    %c0_0 = arith.constant 0 : index
    %c0_1 = arith.constant 0 : index
    %1 = vector.load %arg14[%c0, %c0_0, %c0_1] : memref<18x48x128xbf16, #tpu.memory_space<vmem>>, vector<18x48x128xbf16>
    tpu.vector_store %arg14[%c0, %c0_0, %c0_1], %0 {strides = array<i32>} : memref<18x48x128xbf16, #tpu.memory_space<vmem>>, vector<18x48x128xbf16>,
    %cst_2 = arith.constant 0.000000e+00 : bf16
    %2 = vector.broadcast %cst_2 : bf16 to vector<18x48x128xbf16>
    %c0_3 = arith.constant 0 : index
    %c0_4 = arith.constant 0 : index
    %c0_5 = arith.constant 0 : index
    %3 = vector.load %arg15[%c0_3, %c0_4, %c0_5] : memref<18x48x128xbf16, #tpu.memory_space<vmem>>, vector<18x48x128xbf16>
    tpu.vector_store %arg15[%c0_3, %c0_4, %c0_5], %2 {strides = array<i32>} : memref<18x48x128xbf16, #tpu.memory_space<vmem>>, vector<18x48x128xbf16>,
    %c0_6 = arith.constant 0 : index
    %c0_7 = arith.constant 0 : index
    %c0_8 = arith.constant 0 : index
    %c0_9 = arith.constant 0 : index
    %4 = vector.load %arg1[%c0_6, %c0_7, %c0_8, %c0_9] : memref<1x18x18x128xbf16, #tpu.memory_space<vmem>>, vector<1x16x16x128xbf16>
    %5 = vector.shape_cast %4 : vector<1x16x16x128xbf16> to vector<16x16x128xbf16>
    %6 = vector.shape_cast %5 : vector<16x16x128xbf16> to vector<256x128xbf16>
    %c0_10 = arith.constant 0 : index
    %c0_11 = arith.constant 0 : index
    %c0_12 = arith.constant 0 : index
    %7 = vector.load %arg2[%c0_10, %c0_11, %c0_12] : memref<9x128x128xbf16, #tpu.memory_space<vmem>>, vector<1x128x128xbf16>
    %8 = vector.shape_cast %7 : vector<1x128x128xbf16> to vector<128x128xbf16>
    %cst_13 = arith.constant dense<0.000000e+00> : vector<256x128xf32>
    %9 = tpu.matmul %6, %8, %cst_13 {dimension_numbers = #tpu.dot_dimension_numbers<[1], [0], [0], [1], [0, 0, 1, 1], [], []>} : vector<256x128xbf16>, vector<128x128xbf16>, vector<256x128xf32> -> vector<256x128xf32>
    %c0_14 = arith.constant 0 : index
    %c0_15 = arith.constant 0 : index
    %c1 = arith.constant 1 : index
    %c0_16 = arith.constant 0 : index
    %10 = vector.load %arg1[%c0_14, %c0_15, %c1, %c0_16] : memref<1x18x18x128xbf16, #tpu.memory_space<vmem>>, vector<1x16x16x128xbf16>
    %11 = vector.shape_cast %10 : vector<1x16x16x128xbf16> to vector<16x16x128xbf16>
    %12 = vector.shape_cast %11 : vector<16x16x128xbf16> to vector<256x128xbf16>
    %c1_17 = arith.constant 1 : index
    %c0_18 = arith.constant 0 : index
    %c0_19 = arith.constant 0 : index
    %13 = vector.load %arg2[%c1_17, %c0_18, %c0_19] : memref<9x128x128xbf16, #tpu.memory_space<vmem>>, vector<1x128x128xbf16>
    %14 = vector.shape_cast %13 : vector<1x128x128xbf16> to vector<128x128xbf16>
    %cst_20 = arith.constant dense<0.000000e+00> : vector<256x128xf32>
    %15 = tpu.matmul %12, %14, %cst_20 {dimension_numbers = #tpu.dot_dimension_numbers<[1], [0], [0], [1], [0, 0, 1, 1], [], []>} : vector<256x128xbf16>, vector<128x128xbf16>, vector<256x128xf32> -> vector<256x128xf32>
    %16 = arith.addf %9, %15 : vector<256x128xf32>
    %c0_21 = arith.constant 0 : index
    %c0_22 = arith.constant 0 : index
    %c2 = arith.constant 2 : index
    %c0_23 = arith.constant 0 : index
    %17 = vector.load %arg1[%c0_21, %c0_22, %c2, %c0_23] : memref<1x18x18x128xbf16, #tpu.memory_space<vmem>>, vector<1x16x16x128xbf16>
    %18 = vector.shape_cast %17 : vector<1x16x16x128xbf16> to vector<16x16x128xbf16>
    %19 = vector.shape_cast %18 : vector<16x16x128xbf16> to vector<256x128xbf16>
    %c2_24 = arith.constant 2 : index
    %c0_25 = arith.constant 0 : index
    %c0_26 = arith.constant 0 : index
    %20 = vector.load %arg2[%c2_24, %c0_25, %c0_26] : memref<9x128x128xbf16, #tpu.memory_space<vmem>>, vector<1x128x128xbf16>
    %21 = vector.shape_cast %20 : vector<1x128x128xbf16> to vector<128x128xbf16>
    %cst_27 = arith.constant dense<0.000000e+00> : vector<256x128xf32>
    %22 = tpu.matmul %19, %21, %cst_27 {dimension_numbers = #tpu.dot_dimension_numbers<[1], [0], [0], [1], [0, 0, 1, 1], [], []>} : vector<256x128xbf16>, vector<128x128xbf16>, vector<256x128xf32> -> vector<256x128xf32>
    %23 = arith.addf %16, %22 : vector<256x128xf32>
    %c0_28 = arith.constant 0 : index
    %c1_29 = arith.constant 1 : index
    %c0_30 = arith.constant 0 : index
    %c0_31 = arith.constant 0 : index
    %24 = vector.load %arg1[%c0_28, %c1_29, %c0_30, %c0_31] : memref<1x18x18x128xbf16, #tpu.memory_space<vmem>>, vector<1x16x16x128xbf16>
    %25 = vector.shape_cast %24 : vector<1x16x16x128xbf16> to vector<16x16x128xbf16>
    %26 = vector.shape_cast %25 : vector<16x16x128xbf16> to vector<256x128xbf16>
    %c3 = arith.constant 3 : index
    %c0_32 = arith.constant 0 : index
    %c0_33 = arith.constant 0 : index
    %27 = vector.load %arg2[%c3, %c0_32, %c0_33] : memref<9x128x128xbf16, #tpu.memory_space<vmem>>, vector<1x128x128xbf16>
    %28 = vector.shape_cast %27 : vector<1x128x128xbf16> to vector<128x128xbf16>
    %cst_34 = arith.constant dense<0.000000e+00> : vector<256x128xf32>
    %29 = tpu.matmul %26, %28, %cst_34 {dimension_numbers = #tpu.dot_dimension_numbers<[1], [0], [0], [1], [0, 0, 1, 1], [], []>} : vector<256x128xbf16>, vector<128x128xbf16>, vector<256x128xf32> -> vector<256x128xf32>
    %30 = arith.addf %23, %29 : vector<256x128xf32>
    %c0_35 = arith.constant 0 : index
    %c1_36 = arith.constant 1 : index
    %c1_37 = arith.constant 1 : index
    %c0_38 = arith.constant 0 : index
    %31 = vector.load %arg1[%c0_35, %c1_36, %c1_37, %c0_38] : memref<1x18x18x128xbf16, #tpu.memory_space<vmem>>, vector<1x16x16x128xbf16>
    %32 = vector.shape_cast %31 : vector<1x16x16x128xbf16> to vector<16x16x128xbf16>
    %33 = vector.shape_cast %32 : vector<16x16x128xbf16> to vector<256x128xbf16>
    %c4 = arith.constant 4 : index
    %c0_39 = arith.constant 0 : index
    %c0_40 = arith.constant 0 : index
    %34 = vector.load %arg2[%c4, %c0_39, %c0_40] : memref<9x128x128xbf16, #tpu.memory_space<vmem>>, vector<1x128x128xbf16>
    %35 = vector.shape_cast %34 : vector<1x128x128xbf16> to vector<128x128xbf16>
    %cst_41 = arith.constant dense<0.000000e+00> : vector<256x128xf32>
    %36 = tpu.matmul %33, %35, %cst_41 {dimension_numbers = #tpu.dot_dimension_numbers<[1], [0], [0], [1], [0, 0, 1, 1], [], []>} : vector<256x128xbf16>, vector<128x128xbf16>, vector<256x128xf32> -> vector<256x128xf32>
    %37 = arith.addf %30, %36 : vector<256x128xf32>
    %c0_42 = arith.constant 0 : index
    %c1_43 = arith.constant 1 : index
    %c2_44 = arith.constant 2 : index
    %c0_45 = arith.constant 0 : index
    %38 = vector.load %arg1[%c0_42, %c1_43, %c2_44, %c0_45] : memref<1x18x18x128xbf16, #tpu.memory_space<vmem>>, vector<1x16x16x128xbf16>
    %39 = vector.shape_cast %38 : vector<1x16x16x128xbf16> to vector<16x16x128xbf16>
    %40 = vector.shape_cast %39 : vector<16x16x128xbf16> to vector<256x128xbf16>
    %c5 = arith.constant 5 : index
    %c0_46 = arith.constant 0 : index
    %c0_47 = arith.constant 0 : index
    %41 = vector.load %arg2[%c5, %c0_46, %c0_47] : memref<9x128x128xbf16, #tpu.memory_space<vmem>>, vector<1x128x128xbf16>
    %42 = vector.shape_cast %41 : vector<1x128x128xbf16> to vector<128x128xbf16>
    %cst_48 = arith.constant dense<0.000000e+00> : vector<256x128xf32>
    %43 = tpu.matmul %40, %42, %cst_48 {dimension_numbers = #tpu.dot_dimension_numbers<[1], [0], [0], [1], [0, 0, 1, 1], [], []>} : vector<256x128xbf16>, vector<128x128xbf16>, vector<256x128xf32> -> vector<256x128xf32>
    %44 = arith.addf %37, %43 : vector<256x128xf32>
    %c0_49 = arith.constant 0 : index
    %c2_50 = arith.constant 2 : index
    %c0_51 = arith.constant 0 : index
    %c0_52 = arith.constant 0 : index
    %45 = vector.load %arg1[%c0_49, %c2_50, %c0_51, %c0_52] : memref<1x18x18x128xbf16, #tpu.memory_space<vmem>>, vector<1x16x16x128xbf16>
    %46 = vector.shape_cast %45 : vector<1x16x16x128xbf16> to vector<16x16x128xbf16>
    %47 = vector.shape_cast %46 : vector<16x16x128xbf16> to vector<256x128xbf16>
    %c6 = arith.constant 6 : index
    %c0_53 = arith.constant 0 : index
    %c0_54 = arith.constant 0 : index
    %48 = vector.load %arg2[%c6, %c0_53, %c0_54] : memref<9x128x128xbf16, #tpu.memory_space<vmem>>, vector<1x128x128xbf16>
    %49 = vector.shape_cast %48 : vector<1x128x128xbf16> to vector<128x128xbf16>
    %cst_55 = arith.constant dense<0.000000e+00> : vector<256x128xf32>
    %50 = tpu.matmul %47, %49, %cst_55 {dimension_numbers = #tpu.dot_dimension_numbers<[1], [0], [0], [1], [0, 0, 1, 1], [], []>} : vector<256x128xbf16>, vector<128x128xbf16>, vector<256x128xf32> -> vector<256x128xf32>
    %51 = arith.addf %44, %50 : vector<256x128xf32>
    %c0_56 = arith.constant 0 : index
    %c2_57 = arith.constant 2 : index
    %c1_58 = arith.constant 1 : index
    %c0_59 = arith.constant 0 : index
    %52 = vector.load %arg1[%c0_56, %c2_57, %c1_58, %c0_59] : memref<1x18x18x128xbf16, #tpu.memory_space<vmem>>, vector<1x16x16x128xbf16>
    %53 = vector.shape_cast %52 : vector<1x16x16x128xbf16> to vector<16x16x128xbf16>
    %54 = vector.shape_cast %53 : vector<16x16x128xbf16> to vector<256x128xbf16>
    %c7 = arith.constant 7 : index
    %c0_60 = arith.constant 0 : index
    %c0_61 = arith.constant 0 : index
    %55 = vector.load %arg2[%c7, %c0_60, %c0_61] : memref<9x128x128xbf16, #tpu.memory_space<vmem>>, vector<1x128x128xbf16>
    %56 = vector.shape_cast %55 : vector<1x128x128xbf16> to vector<128x128xbf16>
    %cst_62 = arith.constant dense<0.000000e+00> : vector<256x128xf32>
    %57 = tpu.matmul %54, %56, %cst_62 {dimension_numbers = #tpu.dot_dimension_numbers<[1], [0], [0], [1], [0, 0, 1, 1], [], []>} : vector<256x128xbf16>, vector<128x128xbf16>, vector<256x128xf32> -> vector<256x128xf32>
    %58 = arith.addf %51, %57 : vector<256x128xf32>
    %c0_63 = arith.constant 0 : index
    %c2_64 = arith.constant 2 : index
    %c2_65 = arith.constant 2 : index
    %c0_66 = arith.constant 0 : index
    %59 = vector.load %arg1[%c0_63, %c2_64, %c2_65, %c0_66] : memref<1x18x18x128xbf16, #tpu.memory_space<vmem>>, vector<1x16x16x128xbf16>
    %60 = vector.shape_cast %59 : vector<1x16x16x128xbf16> to vector<16x16x128xbf16>
    %61 = vector.shape_cast %60 : vector<16x16x128xbf16> to vector<256x128xbf16>
    %c8 = arith.constant 8 : index
    %c0_67 = arith.constant 0 : index
    %c0_68 = arith.constant 0 : index
    %62 = vector.load %arg2[%c8, %c0_67, %c0_68] : memref<9x128x128xbf16, #tpu.memory_space<vmem>>, vector<1x128x128xbf16>
    %63 = vector.shape_cast %62 : vector<1x128x128xbf16> to vector<128x128xbf16>
    %cst_69 = arith.constant dense<0.000000e+00> : vector<256x128xf32>
    %64 = tpu.matmul %61, %63, %cst_69 {dimension_numbers = #tpu.dot_dimension_numbers<[1], [0], [0], [1], [0, 0, 1, 1], [], []>} : vector<256x128xbf16>, vector<128x128xbf16>, vector<256x128xf32> -> vector<256x128xf32>
    %65 = arith.addf %58, %64 : vector<256x128xf32>
    %c0_70 = arith.constant 0 : index
    %c0_71 = arith.constant 0 : index
    %66 = vector.load %arg3[%c0_70, %c0_71] : memref<1x128xf32, #tpu.memory_space<vmem>>, vector<1x128xf32>
    %67 = vector.broadcast %66 : vector<1x128xf32> to vector<256x128xf32>
    %68 = arith.addf %65, %67 : vector<256x128xf32>
    %cst_72 = arith.constant 0.000000e+00 : f32
    %69 = vector.broadcast %cst_72 : f32 to vector<256x128xf32>
    %70 = arith.maximumf %68, %69 : vector<256x128xf32>
    %71 = arith.truncf %70 : vector<256x128xf32> to vector<256x128xbf16>
    %72 = vector.shape_cast %71 : vector<256x128xbf16> to vector<16x16x128xbf16>
    %c1_73 = arith.constant 1 : index
    %c16 = arith.constant 16 : index
    %c0_74 = arith.constant 0 : index
    %73 = vector.load %arg14[%c1_73, %c16, %c0_74] : memref<18x48x128xbf16, #tpu.memory_space<vmem>>, vector<16x16x128xbf16>
    tpu.vector_store %arg14[%c1_73, %c16, %c0_74], %72 {strides = array<i32>} : memref<18x48x128xbf16, #tpu.memory_space<vmem>>, vector<16x16x128xbf16>,
    %c0_75 = arith.constant 0 : index
    %c15 = arith.constant 15 : index
    %c0_76 = arith.constant 0 : index
    %74 = vector.load %arg14[%c0_75, %c15, %c0_76] : memref<18x48x128xbf16, #tpu.memory_space<vmem>>, vector<16x16x128xbf16>
    %75 = vector.shape_cast %74 : vector<16x16x128xbf16> to vector<256x128xbf16>
    %c0_77 = arith.constant 0 : index
    %c0_78 = arith.constant 0 : index
    %c0_79 = arith.constant 0 : index
    %76 = vector.load %arg4[%c0_77, %c0_78, %c0_79] : memref<9x128x128xbf16, #tpu.memory_space<vmem>>, vector<1x128x128xbf16>
    %77 = vector.shape_cast %76 : vector<1x128x128xbf16> to vector<128x128xbf16>
    %cst_80 = arith.constant dense<0.000000e+00> : vector<256x128xf32>
    %78 = tpu.matmul %75, %77, %cst_80 {dimension_numbers = #tpu.dot_dimension_numbers<[1], [0], [0], [1], [0, 0, 1, 1], [], []>} : vector<256x128xbf16>, vector<128x128xbf16>, vector<256x128xf32> -> vector<256x128xf32>
    %c0_81 = arith.constant 0 : index
    %c16_82 = arith.constant 16 : index
    %c0_83 = arith.constant 0 : index
    %79 = vector.load %arg14[%c0_81, %c16_82, %c0_83] : memref<18x48x128xbf16, #tpu.memory_space<vmem>>, vector<16x16x128xbf16>
    %80 = vector.shape_cast %79 : vector<16x16x128xbf16> to vector<256x128xbf16>
    %c1_84 = arith.constant 1 : index
    %c0_85 = arith.constant 0 : index
    %c0_86 = arith.constant 0 : index
    %81 = vector.load %arg4[%c1_84, %c0_85, %c0_86] : memref<9x128x128xbf16, #tpu.memory_space<vmem>>, vector<1x128x128xbf16>
    %82 = vector.shape_cast %81 : vector<1x128x128xbf16> to vector<128x128xbf16>
    %cst_87 = arith.constant dense<0.000000e+00> : vector<256x128xf32>
    %83 = tpu.matmul %80, %82, %cst_87 {dimension_numbers = #tpu.dot_dimension_numbers<[1], [0], [0], [1], [0, 0, 1, 1], [], []>} : vector<256x128xbf16>, vector<128x128xbf16>, vector<256x128xf32> -> vector<256x128xf32>
    %84 = arith.addf %78, %83 : vector<256x128xf32>
    %c0_88 = arith.constant 0 : index
    %c17 = arith.constant 17 : index
    %c0_89 = arith.constant 0 : index
    %85 = vector.load %arg14[%c0_88, %c17, %c0_89] : memref<18x48x128xbf16, #tpu.memory_space<vmem>>, vector<16x16x128xbf16>
    %86 = vector.shape_cast %85 : vector<16x16x128xbf16> to vector<256x128xbf16>
    %c2_90 = arith.constant 2 : index
    %c0_91 = arith.constant 0 : index
    %c0_92 = arith.constant 0 : index
    %87 = vector.load %arg4[%c2_90, %c0_91, %c0_92] : memref<9x128x128xbf16, #tpu.memory_space<vmem>>, vector<1x128x128xbf16>
    %88 = vector.shape_cast %87 : vector<1x128x128xbf16> to vector<128x128xbf16>
    %cst_93 = arith.constant dense<0.000000e+00> : vector<256x128xf32>
    %89 = tpu.matmul %86, %88, %cst_93 {dimension_numbers = #tpu.dot_dimension_numbers<[1], [0], [0], [1], [0, 0, 1, 1], [], []>} : vector<256x128xbf16>, vector<128x128xbf16>, vector<256x128xf32> -> vector<256x128xf32>
    %90 = arith.addf %84, %89 : vector<256x128xf32>
    %c1_94 = arith.constant 1 : index
    %c15_95 = arith.constant 15 : index
    %c0_96 = arith.constant 0 : index
    %91 = vector.load %arg14[%c1_94, %c15_95, %c0_96] : memref<18x48x128xbf16, #tpu.memory_space<vmem>>, vector<16x16x128xbf16>
    %92 = vector.shape_cast %91 : vector<16x16x128xbf16> to vector<256x128xbf16>
    %c3_97 = arith.constant 3 : index
    %c0_98 = arith.constant 0 : index
    %c0_99 = arith.constant 0 : index
    %93 = vector.load %arg4[%c3_97, %c0_98, %c0_99] : memref<9x128x128xbf16, #tpu.memory_space<vmem>>, vector<1x128x128xbf16>
    %94 = vector.shape_cast %93 : vector<1x128x128xbf16> to vector<128x128xbf16>
    %cst_100 = arith.constant dense<0.000000e+00> : vector<256x128xf32>
    %95 = tpu.matmul %92, %94, %cst_100 {dimension_numbers = #tpu.dot_dimension_numbers<[1], [0], [0], [1], [0, 0, 1, 1], [], []>} : vector<256x128xbf16>, vector<128x128xbf16>, vector<256x128xf32> -> vector<256x128xf32>
    %96 = arith.addf %90, %95 : vector<256x128xf32>
    %c1_101 = arith.constant 1 : index
    %c16_102 = arith.constant 16 : index
    %c0_103 = arith.constant 0 : index
    %97 = vector.load %arg14[%c1_101, %c16_102, %c0_103] : memref<18x48x128xbf16, #tpu.memory_space<vmem>>, vector<16x16x128xbf16>
    %98 = vector.shape_cast %97 : vector<16x16x128xbf16> to vector<256x128xbf16>
    %c4_104 = arith.constant 4 : index
    %c0_105 = arith.constant 0 : index
    %c0_106 = arith.constant 0 : index
    %99 = vector.load %arg4[%c4_104, %c0_105, %c0_106] : memref<9x128x128xbf16, #tpu.memory_space<vmem>>, vector<1x128x128xbf16>
    %100 = vector.shape_cast %99 : vector<1x128x128xbf16> to vector<128x128xbf16>
    %cst_107 = arith.constant dense<0.000000e+00> : vector<256x128xf32>
    %101 = tpu.matmul %98, %100, %cst_107 {dimension_numbers = #tpu.dot_dimension_numbers<[1], [0], [0], [1], [0, 0, 1, 1], [], []>} : vector<256x128xbf16>, vector<128x128xbf16>, vector<256x128xf32> -> vector<256x128xf32>
    %102 = arith.addf %96, %101 : vector<256x128xf32>
    %c1_108 = arith.constant 1 : index
    %c17_109 = arith.constant 17 : index
    %c0_110 = arith.constant 0 : index
    %103 = vector.load %arg14[%c1_108, %c17_109, %c0_110] : memref<18x48x128xbf16, #tpu.memory_space<vmem>>, vector<16x16x128xbf16>
    %104 = vector.shape_cast %103 : vector<16x16x128xbf16> to vector<256x128xbf16>
    %c5_111 = arith.constant 5 : index
    %c0_112 = arith.constant 0 : index
    %c0_113 = arith.constant 0 : index
    %105 = vector.load %arg4[%c5_111, %c0_112, %c0_113] : memref<9x128x128xbf16, #tpu.memory_space<vmem>>, vector<1x128x128xbf16>
    %106 = vector.shape_cast %105 : vector<1x128x128xbf16> to vector<128x128xbf16>
    %cst_114 = arith.constant dense<0.000000e+00> : vector<256x128xf32>
    %107 = tpu.matmul %104, %106, %cst_114 {dimension_numbers = #tpu.dot_dimension_numbers<[1], [0], [0], [1], [0, 0, 1, 1], [], []>} : vector<256x128xbf16>, vector<128x128xbf16>, vector<256x128xf32> -> vector<256x128xf32>
    %108 = arith.addf %102, %107 : vector<256x128xf32>
    %c2_115 = arith.constant 2 : index
    %c15_116 = arith.constant 15 : index
    %c0_117 = arith.constant 0 : index
    %109 = vector.load %arg14[%c2_115, %c15_116, %c0_117] : memref<18x48x128xbf16, #tpu.memory_space<vmem>>, vector<16x16x128xbf16>
    %110 = vector.shape_cast %109 : vector<16x16x128xbf16> to vector<256x128xbf16>
    %c6_118 = arith.constant 6 : index
    %c0_119 = arith.constant 0 : index
    %c0_120 = arith.constant 0 : index
    %111 = vector.load %arg4[%c6_118, %c0_119, %c0_120] : memref<9x128x128xbf16, #tpu.memory_space<vmem>>, vector<1x128x128xbf16>
    %112 = vector.shape_cast %111 : vector<1x128x128xbf16> to vector<128x128xbf16>
    %cst_121 = arith.constant dense<0.000000e+00> : vector<256x128xf32>
    %113 = tpu.matmul %110, %112, %cst_121 {dimension_numbers = #tpu.dot_dimension_numbers<[1], [0], [0], [1], [0, 0, 1, 1], [], []>} : vector<256x128xbf16>, vector<128x128xbf16>, vector<256x128xf32> -> vector<256x128xf32>
    %114 = arith.addf %108, %113 : vector<256x128xf32>
    %c2_122 = arith.constant 2 : index
    %c16_123 = arith.constant 16 : index
    %c0_124 = arith.constant 0 : index
    %115 = vector.load %arg14[%c2_122, %c16_123, %c0_124] : memref<18x48x128xbf16, #tpu.memory_space<vmem>>, vector<16x16x128xbf16>
    %116 = vector.shape_cast %115 : vector<16x16x128xbf16> to vector<256x128xbf16>
    %c7_125 = arith.constant 7 : index
    %c0_126 = arith.constant 0 : index
    %c0_127 = arith.constant 0 : index
    %117 = vector.load %arg4[%c7_125, %c0_126, %c0_127] : memref<9x128x128xbf16, #tpu.memory_space<vmem>>, vector<1x128x128xbf16>
    %118 = vector.shape_cast %117 : vector<1x128x128xbf16> to vector<128x128xbf16>
    %cst_128 = arith.constant dense<0.000000e+00> : vector<256x128xf32>
    %119 = tpu.matmul %116, %118, %cst_128 {dimension_numbers = #tpu.dot_dimension_numbers<[1], [0], [0], [1], [0, 0, 1, 1], [], []>} : vector<256x128xbf16>, vector<128x128xbf16>, vector<256x128xf32> -> vector<256x128xf32>
    %120 = arith.addf %114, %119 : vector<256x128xf32>
    %c2_129 = arith.constant 2 : index
    %c17_130 = arith.constant 17 : index
    %c0_131 = arith.constant 0 : index
    %121 = vector.load %arg14[%c2_129, %c17_130, %c0_131] : memref<18x48x128xbf16, #tpu.memory_space<vmem>>, vector<16x16x128xbf16>
    %122 = vector.shape_cast %121 : vector<16x16x128xbf16> to vector<256x128xbf16>
    %c8_132 = arith.constant 8 : index
    %c0_133 = arith.constant 0 : index
    %c0_134 = arith.constant 0 : index
    %123 = vector.load %arg4[%c8_132, %c0_133, %c0_134] : memref<9x128x128xbf16, #tpu.memory_space<vmem>>, vector<1x128x128xbf16>
    %124 = vector.shape_cast %123 : vector<1x128x128xbf16> to vector<128x128xbf16>
    %cst_135 = arith.constant dense<0.000000e+00> : vector<256x128xf32>
    %125 = tpu.matmul %122, %124, %cst_135 {dimension_numbers = #tpu.dot_dimension_numbers<[1], [0], [0], [1], [0, 0, 1, 1], [], []>} : vector<256x128xbf16>, vector<128x128xbf16>, vector<256x128xf32> -> vector<256x128xf32>
    %126 = arith.addf %120, %125 : vector<256x128xf32>
    %c0_136 = arith.constant 0 : index
    %c0_137 = arith.constant 0 : index
    %127 = vector.load %arg5[%c0_136, %c0_137] : memref<1x128xf32, #tpu.memory_space<vmem>>, vector<1x128xf32>
    %128 = vector.broadcast %127 : vector<1x128xf32> to vector<256x128xf32>
    %129 = arith.addf %126, %128 : vector<256x128xf32>
    %cst_138 = arith.constant 0.000000e+00 : f32
    %130 = vector.broadcast %cst_138 : f32 to vector<256x128xf32>
    %131 = arith.maximumf %129, %130 : vector<256x128xf32>
    %132 = arith.truncf %131 : vector<256x128xf32> to vector<256x128xbf16>
    %133 = vector.shape_cast %132 : vector<256x128xbf16> to vector<16x16x128xbf16>
    %c1_139 = arith.constant 1 : index
    %c16_140 = arith.constant 16 : index
    %c0_141 = arith.constant 0 : index
    %134 = vector.load %arg15[%c1_139, %c16_140, %c0_141] : memref<18x48x128xbf16, #tpu.memory_space<vmem>>, vector<16x16x128xbf16>
    tpu.vector_store %arg15[%c1_139, %c16_140, %c0_141], %133 {strides = array<i32>} : memref<18x48x128xbf16, #tpu.memory_space<vmem>>, vector<16x16x128xbf16>,
    %c0_142 = arith.constant 0 : index
    %c15_143 = arith.constant 15 : index
    %c0_144 = arith.constant 0 : index
    %135 = vector.load %arg15[%c0_142, %c15_143, %c0_144] : memref<18x48x128xbf16, #tpu.memory_space<vmem>>, vector<16x16x128xbf16>
    %136 = vector.shape_cast %135 : vector<16x16x128xbf16> to vector<256x128xbf16>
    %c0_145 = arith.constant 0 : index
    %c0_146 = arith.constant 0 : index
    %c0_147 = arith.constant 0 : index
    %137 = vector.load %arg6[%c0_145, %c0_146, %c0_147] : memref<9x128x128xbf16, #tpu.memory_space<vmem>>, vector<1x128x128xbf16>
    %138 = vector.shape_cast %137 : vector<1x128x128xbf16> to vector<128x128xbf16>
    %cst_148 = arith.constant dense<0.000000e+00> : vector<256x128xf32>
    %139 = tpu.matmul %136, %138, %cst_148 {dimension_numbers = #tpu.dot_dimension_numbers<[1], [0], [0], [1], [0, 0, 1, 1], [], []>} : vector<256x128xbf16>, vector<128x128xbf16>, vector<256x128xf32> -> vector<256x128xf32>
    %c0_149 = arith.constant 0 : index
    %c16_150 = arith.constant 16 : index
    %c0_151 = arith.constant 0 : index
    %140 = vector.load %arg15[%c0_149, %c16_150, %c0_151] : memref<18x48x128xbf16, #tpu.memory_space<vmem>>, vector<16x16x128xbf16>
    %141 = vector.shape_cast %140 : vector<16x16x128xbf16> to vector<256x128xbf16>
    %c1_152 = arith.constant 1 : index
    %c0_153 = arith.constant 0 : index
    %c0_154 = arith.constant 0 : index
    %142 = vector.load %arg6[%c1_152, %c0_153, %c0_154] : memref<9x128x128xbf16, #tpu.memory_space<vmem>>, vector<1x128x128xbf16>
    %143 = vector.shape_cast %142 : vector<1x128x128xbf16> to vector<128x128xbf16>
    %cst_155 = arith.constant dense<0.000000e+00> : vector<256x128xf32>
    %144 = tpu.matmul %141, %143, %cst_155 {dimension_numbers = #tpu.dot_dimension_numbers<[1], [0], [0], [1], [0, 0, 1, 1], [], []>} : vector<256x128xbf16>, vector<128x128xbf16>, vector<256x128xf32> -> vector<256x128xf32>
    %145 = arith.addf %139, %144 : vector<256x128xf32>
    %c0_156 = arith.constant 0 : index
    %c17_157 = arith.constant 17 : index
    %c0_158 = arith.constant 0 : index
    %146 = vector.load %arg15[%c0_156, %c17_157, %c0_158] : memref<18x48x128xbf16, #tpu.memory_space<vmem>>, vector<16x16x128xbf16>
    %147 = vector.shape_cast %146 : vector<16x16x128xbf16> to vector<256x128xbf16>
    %c2_159 = arith.constant 2 : index
    %c0_160 = arith.constant 0 : index
    %c0_161 = arith.constant 0 : index
    %148 = vector.load %arg6[%c2_159, %c0_160, %c0_161] : memref<9x128x128xbf16, #tpu.memory_space<vmem>>, vector<1x128x128xbf16>
    %149 = vector.shape_cast %148 : vector<1x128x128xbf16> to vector<128x128xbf16>
    %cst_162 = arith.constant dense<0.000000e+00> : vector<256x128xf32>
    %150 = tpu.matmul %147, %149, %cst_162 {dimension_numbers = #tpu.dot_dimension_numbers<[1], [0], [0], [1], [0, 0, 1, 1], [], []>} : vector<256x128xbf16>, vector<128x128xbf16>, vector<256x128xf32> -> vector<256x128xf32>
    %151 = arith.addf %145, %150 : vector<256x128xf32>
    %c1_163 = arith.constant 1 : index
    %c15_164 = arith.constant 15 : index
    %c0_165 = arith.constant 0 : index
    %152 = vector.load %arg15[%c1_163, %c15_164, %c0_165] : memref<18x48x128xbf16, #tpu.memory_space<vmem>>, vector<16x16x128xbf16>
    %153 = vector.shape_cast %152 : vector<16x16x128xbf16> to vector<256x128xbf16>
    %c3_166 = arith.constant 3 : index
    %c0_167 = arith.constant 0 : index
    %c0_168 = arith.constant 0 : index
    %154 = vector.load %arg6[%c3_166, %c0_167, %c0_168] : memref<9x128x128xbf16, #tpu.memory_space<vmem>>, vector<1x128x128xbf16>
    %155 = vector.shape_cast %154 : vector<1x128x128xbf16> to vector<128x128xbf16>
    %cst_169 = arith.constant dense<0.000000e+00> : vector<256x128xf32>
    %156 = tpu.matmul %153, %155, %cst_169 {dimension_numbers = #tpu.dot_dimension_numbers<[1], [0], [0], [1], [0, 0, 1, 1], [], []>} : vector<256x128xbf16>, vector<128x128xbf16>, vector<256x128xf32> -> vector<256x128xf32>
    %157 = arith.addf %151, %156 : vector<256x128xf32>
    %c1_170 = arith.constant 1 : index
    %c16_171 = arith.constant 16 : index
    %c0_172 = arith.constant 0 : index
    %158 = vector.load %arg15[%c1_170, %c16_171, %c0_172] : memref<18x48x128xbf16, #tpu.memory_space<vmem>>, vector<16x16x128xbf16>
    %159 = vector.shape_cast %158 : vector<16x16x128xbf16> to vector<256x128xbf16>
    %c4_173 = arith.constant 4 : index
    %c0_174 = arith.constant 0 : index
    %c0_175 = arith.constant 0 : index
    %160 = vector.load %arg6[%c4_173, %c0_174, %c0_175] : memref<9x128x128xbf16, #tpu.memory_space<vmem>>, vector<1x128x128xbf16>
    %161 = vector.shape_cast %160 : vector<1x128x128xbf16> to vector<128x128xbf16>
    %cst_176 = arith.constant dense<0.000000e+00> : vector<256x128xf32>
    %162 = tpu.matmul %159, %161, %cst_176 {dimension_numbers = #tpu.dot_dimension_numbers<[1], [0], [0], [1], [0, 0, 1, 1], [], []>} : vector<256x128xbf16>, vector<128x128xbf16>, vector<256x128xf32> -> vector<256x128xf32>
    %163 = arith.addf %157, %162 : vector<256x128xf32>
    %c1_177 = arith.constant 1 : index
    %c17_178 = arith.constant 17 : index
    %c0_179 = arith.constant 0 : index
    %164 = vector.load %arg15[%c1_177, %c17_178, %c0_179] : memref<18x48x128xbf16, #tpu.memory_space<vmem>>, vector<16x16x128xbf16>
    %165 = vector.shape_cast %164 : vector<16x16x128xbf16> to vector<256x128xbf16>
    %c5_180 = arith.constant 5 : index
    %c0_181 = arith.constant 0 : index
    %c0_182 = arith.constant 0 : index
    %166 = vector.load %arg6[%c5_180, %c0_181, %c0_182] : memref<9x128x128xbf16, #tpu.memory_space<vmem>>, vector<1x128x128xbf16>
    %167 = vector.shape_cast %166 : vector<1x128x128xbf16> to vector<128x128xbf16>
    %cst_183 = arith.constant dense<0.000000e+00> : vector<256x128xf32>
    %168 = tpu.matmul %165, %167, %cst_183 {dimension_numbers = #tpu.dot_dimension_numbers<[1], [0], [0], [1], [0, 0, 1, 1], [], []>} : vector<256x128xbf16>, vector<128x128xbf16>, vector<256x128xf32> -> vector<256x128xf32>
    %169 = arith.addf %163, %168 : vector<256x128xf32>
    %c2_184 = arith.constant 2 : index
    %c15_185 = arith.constant 15 : index
    %c0_186 = arith.constant 0 : index
    %170 = vector.load %arg15[%c2_184, %c15_185, %c0_186] : memref<18x48x128xbf16, #tpu.memory_space<vmem>>, vector<16x16x128xbf16>
    %171 = vector.shape_cast %170 : vector<16x16x128xbf16> to vector<256x128xbf16>
    %c6_187 = arith.constant 6 : index
    %c0_188 = arith.constant 0 : index
    %c0_189 = arith.constant 0 : index
    %172 = vector.load %arg6[%c6_187, %c0_188, %c0_189] : memref<9x128x128xbf16, #tpu.memory_space<vmem>>, vector<1x128x128xbf16>
    %173 = vector.shape_cast %172 : vector<1x128x128xbf16> to vector<128x128xbf16>
    %cst_190 = arith.constant dense<0.000000e+00> : vector<256x128xf32>
    %174 = tpu.matmul %171, %173, %cst_190 {dimension_numbers = #tpu.dot_dimension_numbers<[1], [0], [0], [1], [0, 0, 1, 1], [], []>} : vector<256x128xbf16>, vector<128x128xbf16>, vector<256x128xf32> -> vector<256x128xf32>
    %175 = arith.addf %169, %174 : vector<256x128xf32>
    %c2_191 = arith.constant 2 : index
    %c16_192 = arith.constant 16 : index
    %c0_193 = arith.constant 0 : index
    %176 = vector.load %arg15[%c2_191, %c16_192, %c0_193] : memref<18x48x128xbf16, #tpu.memory_space<vmem>>, vector<16x16x128xbf16>
    %177 = vector.shape_cast %176 : vector<16x16x128xbf16> to vector<256x128xbf16>
    %c7_194 = arith.constant 7 : index
    %c0_195 = arith.constant 0 : index
    %c0_196 = arith.constant 0 : index
    %178 = vector.load %arg6[%c7_194, %c0_195, %c0_196] : memref<9x128x128xbf16, #tpu.memory_space<vmem>>, vector<1x128x128xbf16>
    %179 = vector.shape_cast %178 : vector<1x128x128xbf16> to vector<128x128xbf16>
    %cst_197 = arith.constant dense<0.000000e+00> : vector<256x128xf32>
    %180 = tpu.matmul %177, %179, %cst_197 {dimension_numbers = #tpu.dot_dimension_numbers<[1], [0], [0], [1], [0, 0, 1, 1], [], []>} : vector<256x128xbf16>, vector<128x128xbf16>, vector<256x128xf32> -> vector<256x128xf32>
    %181 = arith.addf %175, %180 : vector<256x128xf32>
    %c2_198 = arith.constant 2 : index
    %c17_199 = arith.constant 17 : index
    %c0_200 = arith.constant 0 : index
    %182 = vector.load %arg15[%c2_198, %c17_199, %c0_200] : memref<18x48x128xbf16, #tpu.memory_space<vmem>>, vector<16x16x128xbf16>
    %183 = vector.shape_cast %182 : vector<16x16x128xbf16> to vector<256x128xbf16>
    %c8_201 = arith.constant 8 : index
    %c0_202 = arith.constant 0 : index
    %c0_203 = arith.constant 0 : index
    %184 = vector.load %arg6[%c8_201, %c0_202, %c0_203] : memref<9x128x128xbf16, #tpu.memory_space<vmem>>, vector<1x128x128xbf16>
    %185 = vector.shape_cast %184 : vector<1x128x128xbf16> to vector<128x128xbf16>
    %cst_204 = arith.constant dense<0.000000e+00> : vector<256x128xf32>
    %186 = tpu.matmul %183, %185, %cst_204 {dimension_numbers = #tpu.dot_dimension_numbers<[1], [0], [0], [1], [0, 0, 1, 1], [], []>} : vector<256x128xbf16>, vector<128x128xbf16>, vector<256x128xf32> -> vector<256x128xf32>
    %187 = arith.addf %181, %186 : vector<256x128xf32>
    %188 = arith.extf %71 : vector<256x128xbf16> to vector<256x128xf32>
    %c0_205 = arith.constant 0 : index
    %c0_206 = arith.constant 0 : index
    %189 = vector.load %arg7[%c0_205, %c0_206] : memref<1x128xf32, #tpu.memory_space<vmem>>, vector<1x128xf32>
    %190 = vector.broadcast %189 : vector<1x128xf32> to vector<256x128xf32>
    %191 = arith.addf %187, %190 : vector<256x128xf32>
    %192 = arith.addf %191, %188 : vector<256x128xf32>
    %cst_207 = arith.constant 0.000000e+00 : f32
    %193 = vector.broadcast %cst_207 : f32 to vector<256x128xf32>
    %194 = arith.maximumf %192, %193 : vector<256x128xf32>
    %cst_208 = arith.constant dense<0.000000e+00> : vector<128xf32>
    %195 = vector.multi_reduction <add>, %194, %cst_208 [0] : vector<256x128xf32> to vector<128xf32>
    %196 = vector.shape_cast %195 : vector<128xf32> to vector<1x128xf32>
    %cst_209 = arith.constant 3.906250e-03 : f32
    %197 = vector.broadcast %cst_209 : f32 to vector<1x128xf32>
    %198 = arith.mulf %196, %197 : vector<1x128xf32>
    %199 = vector.shape_cast %198 : vector<1x128xf32> to vector<1x1x128xf32>
    %c0_210 = arith.constant 0 : index
    %c0_211 = arith.constant 0 : index
    %c0_212 = arith.constant 0 : index
    %200 = vector.load %arg12[%c0_210, %c0_211, %c0_212] : memref<1x1x128xf32, #tpu.memory_space<vmem>>, vector<1x1x128xf32>
    tpu.vector_store %arg12[%c0_210, %c0_211, %c0_212], %199 {strides = array<i32>} : memref<1x1x128xf32, #tpu.memory_space<vmem>>, vector<1x1x128xf32>,
    %201 = arith.truncf %198 : vector<1x128xf32> to vector<1x128xbf16>
    %202 = vector.shape_cast %201 : vector<1x128xbf16> to vector<1x128xbf16>
    %203 = vector.broadcast %202 : vector<1x128xbf16> to vector<8x128xbf16>
    %c0_213 = arith.constant 0 : index
    %c0_214 = arith.constant 0 : index
    %204 = vector.load %arg8[%c0_213, %c0_214] : memref<128x128xbf16, #tpu.memory_space<vmem>>, vector<128x128xbf16>
    %cst_215 = arith.constant dense<0.000000e+00> : vector<8x128xf32>
    %205 = tpu.matmul %203, %204, %cst_215 {dimension_numbers = #tpu.dot_dimension_numbers<[1], [0], [0], [1], [0, 0, 1, 1], [], []>} : vector<8x128xbf16>, vector<128x128xbf16>, vector<8x128xf32> -> vector<8x128xf32>
    %c0_216 = arith.constant 0 : index
    %c0_217 = arith.constant 0 : index
    %206 = vector.load %arg9[%c0_216, %c0_217] : memref<1x128xf32, #tpu.memory_space<vmem>>, vector<1x128xf32>
    %207 = vector.broadcast %206 : vector<1x128xf32> to vector<8x128xf32>
    %208 = arith.addf %205, %207 : vector<8x128xf32>
    %cst_218 = arith.constant 0.000000e+00 : f32
    %209 = vector.broadcast %cst_218 : f32 to vector<8x128xf32>
    %210 = arith.maximumf %208, %209 : vector<8x128xf32>
    %211 = arith.truncf %210 : vector<8x128xf32> to vector<8x128xbf16>
    %c0_219 = arith.constant 0 : index
    %c0_220 = arith.constant 0 : index
    %212 = vector.load %arg10[%c0_219, %c0_220] : memref<128x128xbf16, #tpu.memory_space<vmem>>, vector<128x128xbf16>
    %cst_221 = arith.constant dense<0.000000e+00> : vector<8x128xf32>
    %213 = tpu.matmul %211, %212, %cst_221 {dimension_numbers = #tpu.dot_dimension_numbers<[1], [0], [0], [1], [0, 0, 1, 1], [], []>} : vector<8x128xbf16>, vector<128x128xbf16>, vector<8x128xf32> -> vector<8x128xf32>
    %c0_222 = arith.constant 0 : index
    %c0_223 = arith.constant 0 : index
    %214 = vector.load %arg11[%c0_222, %c0_223] : memref<1x128xf32, #tpu.memory_space<vmem>>, vector<1x128xf32>
    %215 = vector.broadcast %214 : vector<1x128xf32> to vector<8x128xf32>
    %216 = arith.addf %213, %215 : vector<8x128xf32>
    %217 = vector.extract_strided_slice %216 {offsets = [0, 0], sizes = [1, 128], strides = [1, 1]} : vector<8x128xf32> to vector<1x128xf32>
    %218 = vector.shape_cast %217 : vector<1x128xf32> to vector<1x1x128xf32>
    %c0_224 = arith.constant 0 : index
    %c0_225 = arith.constant 0 : index
    %c0_226 = arith.constant 0 : index
    %219 = vector.load %arg13[%c0_224, %c0_225, %c0_226] : memref<1x1x128xf32, #tpu.memory_space<vmem>>, vector<1x1x128xf32>
    tpu.vector_store %arg13[%c0_224, %c0_225, %c0_226], %218 {strides = array<i32>} : memref<1x1x128xf32, #tpu.memory_space<vmem>>, vector<1x1x128xf32>,
    return
  }
  func.func @transform_0(%arg0: i32) -> (i32, i32, i32, i32) {
    %c0_i32 = arith.constant 0 : i32
    %c0_i32_0 = arith.constant 0 : i32
    %c0_i32_1 = arith.constant 0 : i32
    %c0_i32_2 = arith.constant 0 : i32
    return %arg0, %c0_i32, %c0_i32_0, %c0_i32_1 : i32, i32, i32, i32
  }
  func.func @transform_1(%arg0: i32) -> (i32, i32, i32) {
    %c0_i32 = arith.constant 0 : i32
    %c0_i32_0 = arith.constant 0 : i32
    %c0_i32_1 = arith.constant 0 : i32
    %c0_i32_2 = arith.constant 0 : i32
    return %c0_i32, %c0_i32_0, %c0_i32_1 : i32, i32, i32
  }
  func.func @transform_2(%arg0: i32) -> (i32, i32) {
    %c0_i32 = arith.constant 0 : i32
    %c0_i32_0 = arith.constant 0 : i32
    %c0_i32_1 = arith.constant 0 : i32
    return %c0_i32, %c0_i32_0 : i32, i32
  }
  func.func @transform_3(%arg0: i32) -> (i32, i32, i32) {
    %c0_i32 = arith.constant 0 : i32
    %c0_i32_0 = arith.constant 0 : i32
    %c0_i32_1 = arith.constant 0 : i32
    %c0_i32_2 = arith.constant 0 : i32
    return %c0_i32, %c0_i32_0, %c0_i32_1 : i32, i32, i32
  }
  func.func @transform_4(%arg0: i32) -> (i32, i32) {
    %c0_i32 = arith.constant 0 : i32
    %c0_i32_0 = arith.constant 0 : i32
    %c0_i32_1 = arith.constant 0 : i32
    return %c0_i32, %c0_i32_0 : i32, i32
  }
  func.func @transform_5(%arg0: i32) -> (i32, i32, i32) {
    %c0_i32 = arith.constant 0 : i32
    %c0_i32_0 = arith.constant 0 : i32
    %c0_i32_1 = arith.constant 0 : i32
    %c0_i32_2 = arith.constant 0 : i32
    return %c0_i32, %c0_i32_0, %c0_i32_1 : i32, i32, i32
  }
  func.func @transform_6(%arg0: i32) -> (i32, i32) {
    %c0_i32 = arith.constant 0 : i32
    %c0_i32_0 = arith.constant 0 : i32
    %c0_i32_1 = arith.constant 0 : i32
    return %c0_i32, %c0_i32_0 : i32, i32
  }
  func.func @transform_7(%arg0: i32) -> (i32, i32) {
    %c0_i32 = arith.constant 0 : i32
    %c0_i32_0 = arith.constant 0 : i32
    %c0_i32_1 = arith.constant 0 : i32
    return %c0_i32, %c0_i32_0 : i32, i32
  }
  func.func @transform_8(%arg0: i32) -> (i32, i32) {
    %c0_i32 = arith.constant 0 : i32
    %c0_i32_0 = arith.constant 0 : i32
    %c0_i32_1 = arith.constant 0 : i32
    return %c0_i32, %c0_i32_0 : i32, i32
  }
  func.func @transform_9(%arg0: i32) -> (i32, i32) {
    %c0_i32 = arith.constant 0 : i32
    %c0_i32_0 = arith.constant 0 : i32
    %c0_i32_1 = arith.constant 0 : i32
    return %c0_i32, %c0_i32_0 : i32, i32
  }
  func.func @transform_10(%arg0: i32) -> (i32, i32) {
    %c0_i32 = arith.constant 0 : i32
    %c0_i32_0 = arith.constant 0 : i32
    %c0_i32_1 = arith.constant 0 : i32
    return %c0_i32, %c0_i32_0 : i32, i32
  }
  func.func @transform_11(%arg0: i32) -> (i32, i32, i32) {
    %c0_i32 = arith.constant 0 : i32
    %c0_i32_0 = arith.constant 0 : i32
    %c0_i32_1 = arith.constant 0 : i32
    return %arg0, %c0_i32, %c0_i32_0 : i32, i32, i32
  }
  func.func @transform_12(%arg0: i32) -> (i32, i32, i32) {
    %c0_i32 = arith.constant 0 : i32
    %c0_i32_0 = arith.constant 0 : i32
    %c0_i32_1 = arith.constant 0 : i32
    return %arg0, %c0_i32, %c0_i32_0 : i32, i32, i32
  }
}

</mosaic_0001>

<bundles_post_ra>
// kernel: resnet_simclr_forward.1
= control target key start
LH: loop header
LB: loop body
LE: loop exit
PB: predicated region body
PF: predicated region fallthrough
CT: control target
= control target key end

     0   :  { %s22017_s0 = inlined_call_operand.vmem [shape: bf16[2,18,18,128], index: 0, kind: input, shape index: {}]   ;;  %s22018_s1 = inlined_call_operand.vmem [shape: bf16[9,128,128], index: 1, kind: input, shape index: {}]   ;;  %s22019_s2 = inlined_call_operand.vmem [shape: f32[1,128], index: 2, kind: input, shape index: {}]   ;;  %s22020_s3 = inlined_call_operand.vmem [shape: bf16[9,128,128], index: 3, kind: input, shape index: {}]   ;;  %s22021_s4 = inlined_call_operand.vmem [shape: f32[1,128], index: 4, kind: input, shape index: {}]   ;;  %s22022_s5 = inlined_call_operand.hbm [shape: bf16[9,128,128], index: 5, kind: input, shape index: {}]   ;;  %s22023_s6 = inlined_call_operand.vmem [shape: f32[1,128], index: 6, kind: input, shape index: {}]   ;;  %s22024_s7 = inlined_call_operand.vmem [shape: bf16[128,128], index: 7, kind: input, shape index: {}]   ;;  %s22025_s8 = inlined_call_operand.hbm [shape: f32[1,128], index: 8, kind: input, shape index: {}]   ;;  %s22026_s9 = inlined_call_operand.hbm [shape: bf16[128,128], index: 9, kind: input, shape index: {}]   ;;  %s22027_s10 = inlined_call_operand.vmem [shape: f32[1,128], index: 10, kind: input, shape index: {}]   ;;  %s22028_s11 = inlined_call_operand.hbm [shape: f32[2,1,128], index: 11, kind: output, shape index: {0}]   ;;  %s22029_s12 = inlined_call_operand.hbm [shape: f32[2,1,128], index: 12, kind: output, shape index: {1}]  }
   0x1   :  { %22187 = sst [smem:[#allocation73_spill]] %s22025_s8 }
   0x2   :  { %18 = vsyncpa [#allocation5], 0 }
   0x3   :  { %19 = vsyncpa [#allocation8], 0 }
   0x4   :  { %20 = vsyncpa [#allocation6], 0 }
   0x5   :  { %22 = vsyncpa [#allocation6 + $0x1], 0 }
   0x6   :  { %23 = vsyncpa [#allocation12], 0 }
   0x7   :  { %25 = vsyncpa [#allocation12 + $0x1], 0  ;;  %s17926_s21 = smov 0   ;;  %s17928_s22 = smov 0  }
   0x8   :  { %s17930_s23 = smov 0   ;;  %s17932_s24 = smov 0  }
   0x9 LB: > { %22188 = sst [smem:[#allocation17_spill]] %s17837_s21  ;;  %s17947_s25 = sadd.s32 4294967295, %s17849_s24   ;;  %s17849_s24 = sphi %s17932_s24, %s22537_s24   ;;  %s17845_s23 = sphi %s17930_s23, %s22539_s23   ;;  %s17841_s22 = sphi %s17928_s22, %s22541_s22   ;;  %s17837_s21 = sphi %s17926_s21, %s22540_s21  }
   0xa   : > { %22189 = sst [smem:[#allocation18_spill]] %s17845_s23  ;;  %s13531_s26 = sadd.s32 4294967294, %s17849_s24  }
   0xb   : > { %22190 = sst [smem:[#allocation19_spill]] %s17849_s24  ;;  %s17951_s27 = sadd.s32 1, %s17849_s24  }
   0xc   : > { %22191 = sst [smem:[#allocation20_spill]] %s17951_s27  ;;  %s274_s28 = sadd.s32 1, %s17845_s23 }
   0xd   : > { %s271_s29 = ssub.s32 %s17849_s24, %s17951_s27  ;;  %p284_p0 = scmp.ne.s32.totalorder %s17845_s23, %s17841_s22 }
   0xe   : > { %p272_p1 = scmp.eq.s32.totalorder %s271_s29, 0  ;;  %p285_p2 = scmp.eq.s32.totalorder %s17947_s25, 1 }
   0xf   : > { %p290_p3 = scmp.ne.s32.totalorder %s17841_s22, %s17837_s21  ;;  %p291_p4 = scmp.eq.s32.totalorder %s13531_s26, 1 }
  0x10   : > { %s17962_s30 = scalar_select %p272_p1, %s17845_s23, %s274_s28  }
  0x11   : > { %p17964_p5 = por %p285_p2, %p284_p0  ;;  %p17968_p6 = por %p291_p4, %p290_p3 }
  0x12   : > { %22192 = sst [smem:[#allocation21_spill]] %s17962_s30  ;;  %p13532_p7 = scmp.ge.s32.totalorder %s17849_s24, 1 }
  0x13   : > { %s22193_s13 = scalar_select %p17964_p5, 1, 0 }
  0x14   : > { %s22194_s14 = scalar_select %p17968_p6, 1, 0 }
  0x15   : > { %p324_p8 = scmp.lt.s32.totalorder %s17849_s24, 3  ;;  %p22034_p9 = scmp.eq.s32.totalorder %s17947_s25, 0 }
  0x16   : > { %22195 = sst [smem:[#allocation22_spill]] %s22194_s14  ;;  %s17851_s16 = smov [#allocation7]  }
  0x17   : > { %p17975_p10 = pnand %p13532_p7, %p324_p8  ;;  %s368_s17 = sshll.u32 %s17851_s16, 4  ;;  %s369_s17 = int_to_ptr.vmem [resolvable:$true] %s368_s17 }
  0x18   : > { %s17852_s18 = smov [#allocation4]   ;;  %s17853_s26 = smov [#allocation9]  }
  0x19   : > { %s22196_s15 = scalar_select %p17975_p10, 1, 0 }
  0x1a   : > { %p17210_p11 = pneg %p17975_p10  ;;  %s348_s19 = sshll.u32 %s17852_s18, 4  ;;  %s17987_s19 = int_to_ptr.vmem [resolvable:$true] %s348_s19 }
  0x1b   : > { %s17989_s28 = sshll.u32 %s17853_s26, 4  ;;  %s22198_s8 = sld [smem:[#allocation73_spill]]  ;;  %s379_s28 = int_to_ptr.vmem [resolvable:$true] %s17989_s28 }
  0x1c   : > { %p17983_p12 = pnand %p22034_p9, %p17210_p11 }
  0x1e   : > { %p17999_p0 = pneg %p17983_p12 }
  0x21   : > { %s17663_s16 = scalar_lea.hbm %s22198_s8, 16 }
  0x22   : > { %p17664_p13 = scmp.ne.s32.totalorder %s22198_s8, %s17663_s16  ;;  %p17670_p3 = scmp.lt.u32.totalorder %s17663_s16, %s22198_s8 }
  0x24   : > { %p17666_p1 = pnand %p17999_p0, %p17664_p13 }
  0x26   : > { %p17667_p2 = pneg %p17666_p1 }
  0x28   : > { %p17672_p4 = pnand %p17670_p3, %p17667_p2 }
  0x2a   : > { %17675 = shalt.err (!%p17672_p4)
}
  0x2b   : > { %s17676_s30 = scalar_lea.vmem %s369_s17, 16  ;;  %s17683_s23 = scalar_lea.vmem %s369_s17, 32 }
  0x2c   : > { %p17677_p7 = scmp.ne.s32.totalorder %s369_s17, %s17676_s30  ;;  %p17684_p9 = scmp.lt.s32.totalorder %s369_s17, %s369_s17 }
  0x2d   : > { %p17685_p6 = scmp.lt.s32.totalorder %s17683_s23, %s17676_s30 }
  0x2e   : > { %p17679_p8 = pnand %p17677_p7, %p17999_p0 }
  0x2f   : > { %p17686_p5 = por %p17685_p6, %p17684_p9 }
  0x30   : > { %p17680_p11 = pneg %p17679_p8 }
  0x32   : > { %p17687_p10 = pnand %p17686_p5, %p17680_p11 }
  0x34   : > { %17690 = shalt.err (!%p17687_p10)
}
  0x35   : > { %17216 = dma.hbm_to_vmem [thread:$0]  (!%p17983_p12), %s22198_s8, 16, %s369_s17, [#allocation8]  }
  0x36   : > { %s17691_s26 = scalar_lea.hbm %s22022_s5, 9216 }
  0x37   : > { %p17692_p13 = scmp.ne.s32.totalorder %s22022_s5, %s17691_s26  ;;  %p17698_p5 = scmp.lt.u32.totalorder %s17691_s26, %s22022_s5 }
  0x39   : > { %p17694_p1 = pnand %p17692_p13, %p17999_p0 }
  0x3b   : > { %p17695_p6 = pneg %p17694_p1 }
  0x3d   : > { %p17700_p9 = pnand %p17698_p5, %p17695_p6 }
  0x3f   : > { %17703 = shalt.err (!%p17700_p9)
}
  0x40   : > { %s17704_s17 = scalar_lea.vmem %s17987_s19, 9216  ;;  %p17712_p4 = scmp.lt.s32.totalorder %s17987_s19, %s17987_s19 }
  0x41   : > { %p17705_p10 = scmp.ne.s32.totalorder %s17987_s19, %s17704_s17  ;;  %p17713_p7 = scmp.lt.s32.totalorder %s17704_s17, %s17704_s17 }
  0x43   : > { %p17707_p2 = pnand %p17705_p10, %p17999_p0  ;;  %p17714_p8 = por %p17713_p7, %p17712_p4 }
  0x45   : > { %p17708_p3 = pneg %p17707_p2 }
  0x47   : > { %p17715_p11 = pnand %p17714_p8, %p17708_p3 }
  0x49   : > { %17718 = shalt.err (!%p17715_p11)
}
  0x4a   : > { %s17854_s21 = smov 64   ;;  %s17855_s24 = smov 4  }
  0x4b   : > { %17213 = dma.hbm_to_vmem [thread:$0]  (!%p17983_p12), %s22022_s5, 9216, %s17987_s19, [#allocation5], %s17854_s21, %s17854_s21, %s17855_s24  }
  0x4c   : > { %s17719_s26 = scalar_lea.hbm %s22026_s9, 1024 }
  0x4d   : > { %p17720_p13 = scmp.ne.s32.totalorder %s22026_s9, %s17719_s26  ;;  %p17726_p5 = scmp.lt.u32.totalorder %s17719_s26, %s22026_s9 }
  0x4f   : > { %p17722_p1 = pnand %p17720_p13, %p17999_p0 }
  0x51   : > { %p17723_p6 = pneg %p17722_p1 }
  0x53   : > { %p17728_p9 = pnand %p17726_p5, %p17723_p6 }
  0x55   : > { %17731 = shalt.err (!%p17728_p9)
}
  0x56   : > { %s17732_s27 = scalar_lea.vmem %s379_s28, 1024  ;;  %p17740_p4 = scmp.lt.s32.totalorder %s379_s28, %s379_s28 }
  0x57   : > { %p17733_p10 = scmp.ne.s32.totalorder %s379_s28, %s17732_s27  ;;  %p17741_p7 = scmp.lt.s32.totalorder %s17732_s27, %s17732_s27 }
  0x59   : > { %p17735_p2 = pnand %p17733_p10, %p17999_p0  ;;  %p17742_p8 = por %p17741_p7, %p17740_p4 }
  0x5b   : > { %p17736_p3 = pneg %p17735_p2 }
  0x5d   : > { %p17743_p11 = pnand %p17742_p8, %p17736_p3 }
  0x5f   : > { %17746 = shalt.err (!%p17743_p11)
}
  0x60   : > { %17219 = dma.hbm_to_vmem [thread:$0]  (!%p17983_p12), %s22026_s9, 1024, %s379_s28, [#allocation8], %s17854_s21, %s17854_s21, %s17855_s24  }
  0x61   : > { %p22200_p13 = scmp.ne.s32.totalorder %s22196_s15, 0 }
  0x63   : > { %405 = sbr.rel (%p22200_p13) target bundleno = 2677 (0xa75), region = 64 }
  0x6a   : > { %p22201_p1 = scmp.eq.s32.totalorder %s17947_s25, 0 }
  0x6c   : > { %17820 = dma.done.wait (%p22201_p1), [#allocation5], 9216   ;;  %p22202_p0 = pmov %p22201_p1 }
  0x6e   : > { %17822 = vsyncadd (%p22202_p0), [#allocation5], 4294958080  ;;  %p22203_p6 = pmov %p22202_p0 }
  0x6f   : > { %p22204_p5 = pmov %p22202_p0 }
  0x70   : > { %17824 = dma.done.wait (%p22203_p6), [#allocation8], 1040  }
  0x71   : > { %17826 = vsyncadd (%p22204_p5), [#allocation8], 4294966256  ;;  %v17274_v0 = vld [vmem:[%s22018_s1 + $0x40] sm:$0xff]   ;;  %p458_p12 = scmp.lt.s32.totalorder %s17947_s25, 1  ;;  %v17276_v2 = vld [vmem:[%s22018_s1 + $0x48] sm:$0xff]   ;;  %vm1666_vm3 = vcmask 1042432  }
  0x72   : > { %v17275_v1 = vld [vmem:[%s22018_s1 + $0x100] sm:$0xff]   ;;  %15089 = vmatprep.subr.bf16.mxu1 %v17274_v0  ;;  %v17277_v3 = vld [vmem:[%s22018_s1 + $0x108] sm:$0xff]   ;;  %v17278_v4 = vld [vmem:[%s22018_s1 + $0x50] sm:$0xff]   ;;  %vm636_vm0 = vsmask.f32 3328  ;;  %vm1667_vm4 = vcmask 1046532  }
  0x73   : > { %15281 = vmatprep.subr.bf16.mxu0 %v17275_v1  ;;  %15090 = vmatpush3.bf16.msra.mxu1 %v17274_v0  ;;  %v17279_v5 = vld [vmem:[%s22018_s1 + $0x110] sm:$0xff]   ;;  %s459_s17 = scalar_select %p458_p12, %s17947_s25, 1  ;;  %v17280_v6 = vld [vmem:[%s22018_s1 + $0x58] sm:$0xff]   ;;  %vm637_vm1 = vsmask.f32 7440  ;;  %v17282_v8 = vld [vmem:[%s22018_s1 + $0x60] sm:$0xff]  }
  0x74   : > { %15282 = vmatpush3.bf16.msra.mxu0 %v17275_v1  ;;  %15091 = vmatprep.subr.bf16.mxu1 %v17276_v2  ;;  %v17281_v7 = vld [vmem:[%s22018_s1 + $0x118] sm:$0xff]   ;;  %v17283_v9 = vld [vmem:[%s22018_s1 + $0x120] sm:$0xff]   ;;  %v17284_v10 = vld [vmem:[%s22018_s1 + $0x68] sm:$0xff]   ;;  %vm5517_vm6 = vsmask.f32 256  ;;  %vm17858_vm8 = vmmov 0  }
  0x75   : > { %15283 = vmatprep.subr.bf16.mxu0 %v17277_v3  ;;  %s17193_s20 = smul.u32 216, %s459_s17  ;;  %v17285_v11 = vld [vmem:[%s22018_s1 + $0x128] sm:$0xff]   ;;  %v17286_v27 = vld [vmem:[%s22018_s1 + $0x70] sm:$0xff]   ;;  %vm18129_vm2 = vmor %vm636_vm0, %vm637_vm1  ;;  %vm6209_vm7 = vsmask.f32 7424  ;;  %s21923_s24 = sand.u32 1, %s17841_s22  }
  0x76   : > { %v17287_v28 = vld [vmem:[%s22018_s1 + $0x130] sm:$0xff]   ;;  %v17288_v48 = vld [vmem:[%s22018_s1 + $0x78] sm:$0xff]   ;;  %vm18507_vm5 = vmor %vm1666_vm3, %vm1667_vm4  ;;  %s451_s14 = scalar_lea.vmem [#allocation10], %s21923_s24  ;;  %s14419_s26 = sshll.u32 %s17947_s25, 4 }
  0x77   : > { %15092 = vmatpush3.bf16.msra.mxu1 %v17276_v2  ;;  %s18102_s16 = scalar_lea.vmem %s22017_s0, %s17193_s20  ;;  %v17289_v53 = vld [vmem:[%s22018_s1 + $0x138] sm:$0xff]   ;;  %s21943_s17 = scalar_lea.hbm %s22028_s11, %s14419_s26 }
  0x78   : > { %15284 = vmatpush3.bf16.msra.mxu0 %v17277_v3  ;;  %15093 = vmatprep.subr.bf16.mxu1 %v17278_v4  ;;  %v572_v12 = vld [vmem:[%s18102_s16] sm:$0xf]  ;;  %v573_v13 = vld [vmem:[%s18102_s16 + $0x4] sm:$0xf]  ;;  %v620_v14 = vld [vmem:[%s18102_s16 + $0x8] sm:$0x1] }
  0x79   : > { %15285 = vmatprep.subr.bf16.mxu0 %v17279_v5  ;;  %v640_v15 = vshrl.u32 %v572_v12, 16  ;;  %v643_v16 = vshll.u32 %v572_v12, 16  ;;  %v649_v17 = vshll.u32 %v573_v13, 16  ;;  %v653_v18 = vshrl.u32 %v573_v13, 16  ;;  %v13734_v19 = vld [vmem:[%s18102_s16 + $0xc] sm:$0xf] }
  0x7a   : > { %v659_v20 = vshll.u32 %v620_v14, 16  ;;  %v13735_v21 = vld [vmem:[%s18102_s16 + $0x10] sm:$0xf]  ;;  %v18116_v22 = vld [vmem:[%s18102_s16 + $0x14] sm:$0x1]  ;;  %v2539_v30 = vshrl.u32 %v13734_v19, 16 }
  0x7b   : > { %15094 = vmatpush3.bf16.msra.mxu1 %v17278_v4  ;;  %v642_v23 = vrot.slane %v640_v15, 4  ;;  %v645_v24 = vrot.slane %v643_v16, 5  ;;  %v651_v25 = vrot.slane %v649_v17, 5  ;;  %v655_v26 = vrot.slane %v653_v18, 4  ;;  %v574_v37 = vld [vmem:[%s18102_s16 + $0xc] sm:$0xf] }
  0x7c   : > { %15286 = vmatpush3.bf16.msra.mxu0 %v17279_v5  ;;  %15095 = vmatprep.subr.bf16.mxu1 %v17280_v6  ;;  %v661_v29 = vrot.slane %v659_v20, 5  ;;  %v2542_v31 = vshll.u32 %v13734_v19, 16  ;;  %v2548_v32 = vshll.u32 %v13735_v21, 16  ;;  %v2552_v35 = vshrl.u32 %v13735_v21, 16  ;;  %v575_v38 = vld [vmem:[%s18102_s16 + $0x10] sm:$0xf] }
  0x7d   : > { %15287 = vmatprep.subr.bf16.mxu0 %v17281_v7  ;;  %v646_v33 = vor.u32 %v645_v24, %v642_v23  ;;  %v656_v34 = vor.u32 %v655_v26, %v651_v25  ;;  %v2558_v36 = vshll.u32 %v18116_v22, 16  ;;  %v2541_v40 = vrot.slane %v2539_v30, 4  ;;  %v621_v47 = vld [vmem:[%s18102_s16 + $0x14] sm:$0x1]  ;;  %v13737_v58 = vld [vmem:[%s18102_s16 + $0x18] sm:$0xf] }
  0x7e   : > { %v2544_v41 = vrot.slane %v2542_v31, 5  ;;  %v2550_v42 = vrot.slane %v2548_v32, 5  ;;  %v2554_v45 = vrot.slane %v2552_v35, 4  ;;  %v664_v50 = vshrl.u32 %v574_v37, 16  ;;  %v18146_v3 = vld [vmem:[%s18102_s16 + $0x1c] sm:$0xf] }
  0x7f   : > { %15096 = vmatpush3.bf16.msra.mxu1 %v17280_v6  ;;  %v647_v43 = vrot.slane %v646_v33, 4  ;;  %v657_v44 = vrot.slane %v656_v34, 4  ;;  %v2560_v46 = vrot.slane %v2558_v36, 5  ;;  %v667_v51 = vshll.u32 %v574_v37, 16  ;;  %v18159_v13 = vld [vmem:[%s22018_s1 + $0x140] sm:$0xff]   ;;  %s13404_s27 = sshll.u32 %s451_s14, 4  ;;  %s13405_s27 = int_to_ptr.vmem [resolvable:$true] %s13404_s27 }
  0x80   : > { %15288 = vmatpush3.bf16.msra.mxu0 %v17281_v7  ;;  %15097 = vmatprep.subr.bf16.mxu1 %v17282_v8  ;;  %v2545_v49 = vor.u32 %v2544_v41, %v2541_v40  ;;  %v673_v52 = vshll.u32 %v575_v38, 16  ;;  %v2555_v56 = vor.u32 %v2554_v45, %v2550_v42  ;;  %v677_v57 = vshrl.u32 %v575_v38, 16  ;;  %v18152_v7 = vld [vmem:[%s18102_s16 + $0x20] sm:$0x1]  ;;  %v576_v23 = vld [vmem:[%s18102_s16 + $0x18] sm:$0xf] }
  0x81   : > { %15289 = vmatprep.subr.bf16.mxu0 %v17283_v9  ;;  %v652_v54 = vsel %vm18129_vm2, %v647_v43, %v651_v25  ;;  %v662_v55 = vsel %vm18129_vm2, %v657_v44, %v661_v29  ;;  %v666_v61 = vrot.slane %v664_v50, 4  ;;  %v669_v62 = vrot.slane %v667_v51, 5  ;;  %v17294_v29 = vld [vmem:[%s22018_s1] sm:$0xff]   ;;  %v17296_v45 = vld [vmem:[%s22018_s1 + $0x8] sm:$0xff]   ;;  %s13388_s19 = scalar_lea.sflag [#allocation6], %s21923_s24  ;;  %s17747_s29 = scalar_lea.vmem %s13405_s27, 16 }
  0x82   : > { %v13558_v59 = vcombine.low %v652_v54, %v662_v55  ;;  %v2546_v60 = vrot.slane %v2545_v49, 4  ;;  %v2556_v63 = vrot.slane %v2555_v56, 4  ;;  %v675_v0 = vrot.slane %v673_v52, 5  ;;  %v622_v34 = vld [vmem:[%s18102_s16 + $0x20] sm:$0x1]  ;;  %p17748_p9 = scmp.ne.s32.totalorder %s13405_s27, %s17747_s29  ;;  %p22532_p10 = scmp.ne.s32.totalorder %s22193_s13, 0 }
  0x83   : > { %15098 = vmatpush3.bf16.msra.mxu1 %v17282_v8  ;;  %v679_v1 = vrot.slane %v677_v57, 4  ;;  %v683_v2 = vshll.u32 %v621_v47, 16  ;;  %v3313_v5 = vrot.slane %v18116_v22, 5  ;;  %v670_v6 = vor.u32 %v669_v62, %v666_v61  ;;  %v13740_v35 = vld [vmem:[%s18102_s16 + $0x24] sm:$0xf]  ;;  %v17297_v61 = vld [vmem:[%s22018_s1 + $0x10] sm:$0xff]  }
  0x84   : > { %15290 = vmatpush3.bf16.msra.mxu0 %v17283_v9  ;;  %15099 = vmatprep.subr.bf16.mxu1 %v17284_v10  ;;  %v2551_v4 = vsel %vm18129_vm2, %v2546_v60, %v2550_v42  ;;  %v2563_v8 = vshrl.u32 %v13737_v58, 16  ;;  %v2561_v9 = vsel %vm18129_vm2, %v2556_v63, %v2560_v46  ;;  %v2566_v12 = vshll.u32 %v13737_v58, 16  ;;  %v13741_v49 = vld [vmem:[%s18102_s16 + $0x28] sm:$0xf]  ;;  %v13742_v55 = vld [vmem:[%s18102_s16 + $0x2c] sm:$0x1]  ;;  %p17749_p2 = pnand %p17748_p9, %p22532_p10 }
  0x85   : > { %15291 = vmatprep.subr.bf16.mxu0 %v17285_v11  ;;  %15105 = vmatprep.mubr.bf16.mxu1 %v13558_v59  ;;  %v13798_v14 = vcombine.low %v2551_v4, %v2561_v9  ;;  %v671_v15 = vrot.slane %v670_v6, 4  ;;  %v2572_v17 = vshll.u32 %v18146_v3, 16  ;;  %v2576_v20 = vshrl.u32 %v18146_v3, 16  ;;  %v578_v60 = vld [vmem:[%s18102_s16 + $0x24] sm:$0xf]  ;;  %s17859_s8 = smov [#allocation10]  }
  0x86   : > { %v2565_v16 = vrot.slane %v2563_v8, 4  ;;  %v2568_v19 = vrot.slane %v2566_v12, 5  ;;  %v2582_v21 = vshll.u32 %v18152_v7, 16  ;;  %v3317_v26 = vrot.slane %v18146_v3, 5  ;;  %v579_v9 = vld [vmem:[%s18102_s16 + $0x28] sm:$0xf]  ;;  %p17750_p3 = pneg %p17749_p2 }
  0x87   : > { %15100 = vmatpush3.bf16.msra.mxu1 %v17284_v10  ;;  %v680_v10 = vor.u32 %v679_v1, %v675_v0  ;;  %15297 = vmatprep.mubr.bf16.mxu0 %v13798_v14  ;;  %v676_v24 = vsel %vm18129_vm2, %v671_v15, %v675_v0  ;;  %v2574_v25 = vrot.slane %v2572_v17, 5  ;;  %v2578_v32 = vrot.slane %v2576_v20, 4  ;;  %v623_v15 = vld [vmem:[%s18102_s16 + $0x2c] sm:$0x1] }
  0x88   : > { %15292 = vmatpush3.bf16.msra.mxu0 %v17285_v11  ;;  %15101 = vmatprep.subr.bf16.mxu1 %v17286_v27  ;;  %v685_v11 = vrot.slane %v683_v2, 5  ;;  %v2569_v31 = vor.u32 %v2568_v19, %v2565_v16  ;;  %v2584_v33 = vrot.slane %v2582_v21, 5  ;;  %v18180_v37 = vrot.slane %v3317_v26, 4  ;;  %v13743_v21 = vld [vmem:[%s18102_s16 + $0x30] sm:$0xf] }
  0x89   : > { %15293 = vmatprep.subr.bf16.mxu0 %v17287_v28  ;;  %v681_v18 = vrot.slane %v680_v10, 4  ;;  %v688_v38 = vshrl.u32 %v576_v23, 16  ;;  %v691_v40 = vshll.u32 %v576_v23, 16  ;;  %v2579_v42 = vor.u32 %v2578_v32, %v2574_v25  ;;  %v17291_v10 = vld [vmem:[%s22018_s1 + $0x148] sm:$0xff]   ;;  %v17299_v23 = vld [vmem:[%s22018_s1 + $0x18] sm:$0xff]  }
  0x8a   : > { %v2570_v41 = vrot.slane %v2569_v31, 4  ;;  %v2587_v50 = vshrl.u32 %v13740_v35, 16  ;;  %v2590_v59 = vshll.u32 %v13740_v35, 16  ;;  %v2596_v0 = vshll.u32 %v13741_v49, 16  ;;  %v13745_v35 = vld [vmem:[%s18102_s16 + $0x38] sm:$0x1] }
  0x8b   : > { %15102 = vmatpush3.bf16.msra.mxu1 %v17286_v27  ;;  %v3320_v27 = vrot.slane %v18152_v7, 5  ;;  %v686_v30 = vsel %vm18129_vm2, %v681_v18, %v685_v11  ;;  %v690_v46 = vrot.slane %v688_v38, 4  ;;  %v693_v47 = vrot.slane %v691_v40, 5  ;;  %v17292_v38 = vld [vmem:[%s22018_s1 + $0x150] sm:$0xff]  }
  0x8c   : > { %15294 = vmatpush3.bf16.msra.mxu0 %v17287_v28  ;;  %15103 = vmatprep.subr.bf16.mxu1 %v17288_v48  ;;  %v577_v28 = vld [vmem:[%s18102_s16 + $0x1c] sm:$0xf]  ;;  %v13559_v36 = vcombine.low %v676_v24, %v686_v30  ;;  %v2575_v51 = vsel %vm18129_vm2, %v2570_v41, %v2574_v25  ;;  %v2580_v52 = vrot.slane %v2579_v42, 4  ;;  %v2589_v58 = vrot.slane %v2587_v50, 4  ;;  %v13744_v30 = vld [vmem:[%s18102_s16 + $0x34] sm:$0xf] }
  0x8d   : > { %15295 = vmatprep.subr.bf16.mxu0 %v17289_v53  ;;  %v697_v43 = vshll.u32 %v577_v28, 16  ;;  %v701_v44 = vshrl.u32 %v577_v28, 16  ;;  %v694_v56 = vor.u32 %v693_v47, %v690_v46  ;;  %v2600_v1 = vshrl.u32 %v13741_v49, 16  ;;  %v17300_v47 = vld [vmem:[%s22018_s1 + $0x20] sm:$0xff]  }
  0x8e   : > { %v2585_v62 = vsel %vm18129_vm2, %v2580_v52, %v2584_v33  ;;  %v2592_v6 = vrot.slane %v2590_v59, 5  ;;  %v2606_v8 = vshll.u32 %v13742_v55, 16  ;;  %v2598_v12 = vrot.slane %v2596_v0, 5 }
  0x8f   : > { %15104 = vmatpush3.bf16.msra.mxu1 %v17288_v48  ;;  %v707_v48 = vshll.u32 %v622_v34, 16  ;;  %v703_v54 = vrot.slane %v701_v44, 4  ;;  %v13799_v2 = vcombine.low %v2575_v51, %v2585_v62  ;;  %v695_v4 = vrot.slane %v694_v56, 4  ;;  %v581_v56 = vld [vmem:[%s18102_s16 + $0x34] sm:$0xf] }
  0x90   : > { %15296 = vmatpush3.bf16.msra.mxu0 %v17289_v53  ;;  %15137 = vmatprep.subr.bf16.mxu1 %v17294_v29  ;;  %v699_v53 = vrot.slane %v697_v43, 5  ;;  %v2602_v14 = vrot.slane %v2600_v1, 4  ;;  %v712_v16 = vshrl.u32 %v578_v60, 16  ;;  %v2593_v18 = vor.u32 %v2592_v6, %v2589_v58  ;;  %v624_v1 = vld [vmem:[%s18102_s16 + $0x38] sm:$0x1] }
  0x91   : > { %15329 = vmatprep.subr.bf16.mxu0 %v18159_v13  ;;  %v709_v57 = vrot.slane %v707_v48, 5  ;;  %v2608_v19 = vrot.slane %v2606_v8, 5  ;;  %v715_v20 = vshll.u32 %v578_v60, 16  ;;  %v725_v34 = vshrl.u32 %v579_v9, 16 }
  0x92   : > { %15106 = vmatmul.mubr.bf16.vlgmr.msra.gmra.mrb[0].mxu1 %v13559_v36  ;;  %v704_v63 = vor.u32 %v703_v54, %v699_v53  ;;  %v700_v17 = vsel %vm18129_vm2, %v695_v4, %v699_v53  ;;  %v2603_v25 = vor.u32 %v2602_v14, %v2598_v12  ;;  %v714_v28 = vrot.slane %v712_v16, 4  ;;  %v580_v36 = vld [vmem:[%s18102_s16 + $0x30] sm:$0xf]  ;;  %v17295_v4 = vld [vmem:[%s22018_s1 + $0x160] sm:$0xff]  }
  0x93   : > { %15138 = vmatpush3.bf16.msra.mxu1 %v17294_v29  ;;  %15298 = vmatmul.mubr.bf16.vlgmr.msra.gmra.mrb[0].mxu0 %v13799_v2  ;;  %v721_v29 = vshll.u32 %v579_v9, 16  ;;  %v2594_v32 = vrot.slane %v2593_v18, 4  ;;  %v717_v33 = vrot.slane %v715_v20, 5  ;;  %v731_v41 = vshll.u32 %v623_v15, 16  ;;  %v17302_v18 = vld [vmem:[%s22018_s1 + $0x28] sm:$0xff]  }
  0x94   : > { %15139 = vmatprep.subr.bf16.mxu1 %v17296_v45  ;;  %v705_v11 = vrot.slane %v704_v63, 4  ;;  %15330 = vmatpush3.bf16.msra.mxu0 %v18159_v13  ;;  %v2604_v40 = vrot.slane %v2603_v25, 4  ;;  %v2611_v42 = vshrl.u32 %v13743_v21, 16  ;;  %v2614_v46 = vshll.u32 %v13743_v21, 16 }
  0x95   : > { %15331 = vmatprep.subr.bf16.mxu0 %v17291_v10  ;;  %v723_v13 = vrot.slane %v721_v29, 5  ;;  %v2599_v43 = vsel %vm18129_vm2, %v2594_v32, %v2598_v12  ;;  %v718_v44 = vor.u32 %v717_v33, %v714_v28  ;;  %v733_v49 = vrot.slane %v731_v41, 5  ;;  %v13748_v29 = vld [vmem:[%s18102_s16 + $0x44] sm:$0x1]  ;;  %v582_v41 = vld [vmem:[%s18102_s16 + $0x3c] sm:$0xf] }
  0x96   : > { %v710_v24 = vsel %vm18129_vm2, %v705_v11, %v709_v57  ;;  %v2609_v48 = vsel %vm18129_vm2, %v2604_v40, %v2608_v19  ;;  %v2613_v50 = vrot.slane %v2611_v42, 4  ;;  %v2620_v51 = vshll.u32 %v13744_v30, 16  ;;  %v17293_v57 = vld [vmem:[%s22018_s1 + $0x158] sm:$0xff]   ;;  %v17303_v42 = vld [vmem:[%s22018_s1 + $0x30] sm:$0xff]  }
  0x97   : > { %15140 = vmatpush3.bf16.msra.mxu1 %v17296_v45  ;;  %v13560_v31 = vcombine.low %v700_v17, %v710_v24  ;;  %v727_v45 = vrot.slane %v725_v34, 4  ;;  %v13800_v52 = vcombine.low %v2599_v43, %v2609_v48  ;;  %v719_v53 = vrot.slane %v718_v44, 4  ;;  %v13746_v11 = vld [vmem:[%s18102_s16 + $0x3c] sm:$0xf]  ;;  %v13747_v17 = vld [vmem:[%s18102_s16 + $0x40] sm:$0xf] }
  0x98   : > { %15141 = vmatprep.subr.bf16.mxu1 %v17297_v61  ;;  %15332 = vmatpush3.bf16.msra.mxu0 %v17291_v10  ;;  %v2616_v55 = vrot.slane %v2614_v46, 5  ;;  %v2622_v58 = vrot.slane %v2620_v51, 5  ;;  %v2624_v59 = vshrl.u32 %v13744_v30, 16  ;;  %v2630_v60 = vshll.u32 %v13745_v35, 16 }
  0x99   : > { %15109 = vmatprep.mubr.bf16.mxu1 %v13560_v31  ;;  %v728_v54 = vor.u32 %v727_v45, %v723_v13  ;;  %15333 = vmatprep.subr.bf16.mxu0 %v17292_v38  ;;  %v724_v62 = vsel %vm18129_vm2, %v719_v53, %v723_v13  ;;  %v739_v2 = vshll.u32 %v580_v36, 16  ;;  %v745_v10 = vshll.u32 %v581_v56, 16  ;;  %v17298_v31 = vld [vmem:[%s22018_s1 + $0x168] sm:$0xff]  }
  0x9a   : > { %15301 = vmatprep.mubr.bf16.mxu0 %v13800_v52  ;;  %v2617_v0 = vor.u32 %v2616_v55, %v2613_v50  ;;  %v2626_v6 = vrot.slane %v2624_v59, 4  ;;  %v2632_v8 = vrot.slane %v2630_v60, 5  ;;  %v749_v16 = vshrl.u32 %v581_v56, 16  ;;  %v625_v52 = vld [vmem:[%s18102_s16 + $0x44] sm:$0x1] }
  0x9b   : > { %15142 = vmatpush3.bf16.msra.mxu1 %v17297_v61  ;;  %v736_v61 = vshrl.u32 %v580_v36, 16  ;;  %v729_v63 = vrot.slane %v728_v54, 4  ;;  %v741_v15 = vrot.slane %v739_v2, 5  ;;  %v747_v21 = vrot.slane %v745_v10, 5 }
  0x9c   : > { %15143 = vmatprep.subr.bf16.mxu1 %v17299_v23  ;;  %15334 = vmatpush3.bf16.msra.mxu0 %v17292_v38  ;;  %v2618_v14 = vrot.slane %v2617_v0, 4  ;;  %v2627_v20 = vor.u32 %v2626_v6, %v2622_v58  ;;  %v751_v28 = vrot.slane %v749_v16, 4  ;;  %v2635_v30 = vshrl.u32 %v13746_v11, 16  ;;  %v17301_v0 = vld [vmem:[%s22018_s1 + $0x170] sm:$0xff]  }
  0x9d   : > { %v738_v9 = vrot.slane %v736_v61, 4  ;;  %v734_v12 = vsel %vm18129_vm2, %v729_v63, %v733_v49  ;;  %15335 = vmatprep.subr.bf16.mxu0 %v17293_v57  ;;  %v2638_v34 = vshll.u32 %v13746_v11, 16  ;;  %v2644_v35 = vshll.u32 %v13747_v17, 16  ;;  %v13750_v63 = vld [vmem:[%s18102_s16 + $0x4c] sm:$0xf] }
  0x9e   : > { %v13561_v19 = vcombine.low %v724_v62, %v734_v12  ;;  %v2623_v24 = vsel %vm18129_vm2, %v2618_v14, %v2622_v58  ;;  %v2628_v32 = vrot.slane %v2627_v20, 4  ;;  %v752_v38 = vor.u32 %v751_v28, %v747_v21  ;;  %v17305_v58 = vld [vmem:[%s22018_s1 + $0x38] sm:$0xff]   ;;  %v584_v14 = vld [vmem:[%s18102_s16 + $0x48] sm:$0xf] }
  0x9f   : > { %15144 = vmatpush3.bf16.msra.mxu1 %v17299_v23  ;;  %v755_v23 = vshll.u32 %v624_v1, 16  ;;  %v742_v25 = vor.u32 %v741_v15, %v738_v9  ;;  %v2637_v40 = vrot.slane %v2635_v30, 4  ;;  %v2648_v13 = vshrl.u32 %v13747_v17, 16 }
  0xa0   : > { %15145 = vmatprep.subr.bf16.mxu1 %v17300_v47  ;;  %15110 = vmatmul.mubr.bf16.gmra.mrb[4].mxu1 %v13561_v19  ;;  %v2633_v43 = vsel %vm18129_vm2, %v2628_v32, %v2632_v8  ;;  %v2640_v44 = vrot.slane %v2638_v34, 5  ;;  %v2646_v45 = vrot.slane %v2644_v35, 5  ;;  %v2654_v46 = vshll.u32 %v13748_v29, 16  ;;  %v13751_v8 = vld [vmem:[%s18102_s16 + $0x50] sm:$0x1] }
  0xa1   : > { %v757_v33 = vrot.slane %v755_v23, 5  ;;  %15336 = vmatpush3.bf16.msra.mxu0 %v17293_v57  ;;  %v743_v36 = vrot.slane %v742_v25, 4  ;;  %v13801_v48 = vcombine.low %v2623_v24, %v2633_v43  ;;  %v753_v50 = vrot.slane %v752_v38, 4  ;;  %v13749_v57 = vld [vmem:[%s18102_s16 + $0x48] sm:$0xf]  ;;  %v17304_v25 = vld [vmem:[%s22018_s1 + $0x178] sm:$0xff]  }
  0xa2   : > { %15337 = vmatprep.subr.bf16.mxu0 %v17295_v4  ;;  %v2650_v51 = vrot.slane %v2648_v13, 4  ;;  %v2641_v53 = vor.u32 %v2640_v44, %v2637_v40  ;;  %v2656_v54 = vrot.slane %v2654_v46, 5  ;;  %v760_v55 = vshrl.u32 %v582_v41, 16  ;;  %v585_v24 = vld [vmem:[%s18102_s16 + $0x4c] sm:$0xf] }
  0xa3   : > { %15146 = vmatpush3.bf16.msra.mxu1 %v17300_v47  ;;  %v583_v47 = vld [vmem:[%s18102_s16 + $0x40] sm:$0xf]  ;;  %v748_v49 = vsel %vm18129_vm2, %v743_v36, %v747_v21  ;;  %v763_v56 = vshll.u32 %v582_v41, 16  ;;  %15302 = vmatmul.mubr.bf16.gmra.mrb[4].mxu0 %v13801_v48  ;;  %v758_v59 = vsel %vm18129_vm2, %v753_v50, %v757_v33  ;;  %v779_v12 = vshll.u32 %v625_v52, 16  ;;  %v626_v33 = vld [vmem:[%s18102_s16 + $0x50] sm:$0x1] }
  0xa4   : > { %15147 = vmatprep.subr.bf16.mxu1 %v17302_v18  ;;  %v2651_v60 = vor.u32 %v2650_v51, %v2646_v45  ;;  %v769_v61 = vshll.u32 %v583_v47, 16  ;;  %v773_v62 = vshrl.u32 %v583_v47, 16  ;;  %v13562_v1 = vcombine.low %v748_v49, %v758_v59  ;;  %v13752_v38 = vld [vmem:[%s18102_s16 + $0x54] sm:$0xf]  ;;  %v17308_v47 = vld [vmem:[%s22018_s1 + $0x180] sm:$0xff]  }
  0xa5   : > { %15338 = vmatpush3.bf16.msra.mxu0 %v17295_v4  ;;  %v2642_v2 = vrot.slane %v2641_v53, 4  ;;  %v762_v4 = vrot.slane %v760_v55, 4  ;;  %v765_v6 = vrot.slane %v763_v56, 5  ;;  %v2659_v17 = vshrl.u32 %v13749_v57, 16  ;;  %v13753_v52 = vld [vmem:[%s18102_s16 + $0x58] sm:$0xf] }
  0xa6   : > { %15339 = vmatprep.subr.bf16.mxu0 %v17298_v31  ;;  %v2652_v9 = vrot.slane %v2651_v60, 4  ;;  %v771_v10 = vrot.slane %v769_v61, 5  ;;  %v775_v11 = vrot.slane %v773_v62, 4  ;;  %15113 = vmatprep.mubr.bf16.mxu1 %v13562_v1  ;;  %v781_v21 = vrot.slane %v779_v12, 5  ;;  %v13754_v60 = vld [vmem:[%s18102_s16 + $0x5c] sm:$0x1] }
  0xa7   : > { %15148 = vmatpush3.bf16.msra.mxu1 %v17302_v18  ;;  %v2647_v15 = vsel %vm18129_vm2, %v2642_v2, %v2646_v45  ;;  %v766_v16 = vor.u32 %v765_v6, %v762_v4  ;;  %v2662_v18 = vshll.u32 %v13749_v57, 16  ;;  %v2668_v23 = vshll.u32 %v13750_v63, 16  ;;  %v17320_v57 = vld [vmem:[%s22018_s1 + $0x80] sm:$0xff]  }
  0xa8   : > { %15149 = vmatprep.subr.bf16.mxu1 %v17303_v42  ;;  %v2657_v19 = vsel %vm18129_vm2, %v2652_v9, %v2656_v54  ;;  %v776_v20 = vor.u32 %v775_v11, %v771_v10  ;;  %v2661_v30 = vrot.slane %v2659_v17, 4  ;;  %v2672_v35 = vshrl.u32 %v13750_v63, 16  ;;  %v627_v17 = vld [vmem:[%s18102_s16 + $0x5c] sm:$0x1] }
  0xa9   : > { %15340 = vmatpush3.bf16.msra.mxu0 %v17298_v31  ;;  %v13802_v28 = vcombine.low %v2647_v15, %v2657_v19  ;;  %v767_v29 = vrot.slane %v766_v16, 4  ;;  %v2664_v32 = vrot.slane %v2662_v18, 5  ;;  %v2670_v34 = vrot.slane %v2668_v23, 5  ;;  %v587_v16 = vld [vmem:[%s18102_s16 + $0x58] sm:$0xf] }
  0xaa   : > { %15341 = vmatprep.subr.bf16.mxu0 %v17301_v0  ;;  %v777_v31 = vrot.slane %v776_v20, 4  ;;  %v2678_v36 = vshll.u32 %v13751_v8, 16  ;;  %v784_v41 = vshrl.u32 %v584_v14, 16  ;;  %v2674_v44 = vrot.slane %v2672_v35, 4  ;;  %v13755_v23 = vld [vmem:[%s18102_s16 + $0x60] sm:$0xf] }
  0xab   : > { %15150 = vmatpush3.bf16.msra.mxu1 %v17303_v42  ;;  %15305 = vmatprep.mubr.bf16.mxu0 %v13802_v28  ;;  %v772_v40 = vsel %vm18129_vm2, %v767_v29, %v771_v10  ;;  %v2665_v13 = vor.u32 %v2664_v32, %v2661_v30  ;;  %v787_v42 = vshll.u32 %v584_v14, 16  ;;  %v793_v46 = vshll.u32 %v585_v24, 16  ;;  %v586_v10 = vld [vmem:[%s18102_s16 + $0x54] sm:$0xf] }
  0xac   : > { %15151 = vmatprep.subr.bf16.mxu1 %v17305_v58  ;;  %v782_v43 = vsel %vm18129_vm2, %v777_v31, %v781_v21  ;;  %v2680_v45 = vrot.slane %v2678_v36, 5  ;;  %v786_v50 = vrot.slane %v784_v41, 4  ;;  %v2675_v53 = vor.u32 %v2674_v44, %v2670_v34 }
  0xad   : > { %15342 = vmatpush3.bf16.msra.mxu0 %v17301_v0  ;;  %v13563_v48 = vcombine.low %v772_v40, %v782_v43  ;;  %v2666_v49 = vrot.slane %v2665_v13, 4  ;;  %v789_v51 = vrot.slane %v787_v42, 5  ;;  %v795_v54 = vrot.slane %v793_v46, 5  ;;  %v13757_v13 = vld [vmem:[%s18102_s16 + $0x68] sm:$0x1] }
  0xae   : > { %15343 = vmatprep.subr.bf16.mxu0 %v17304_v25  ;;  %v797_v55 = vshrl.u32 %v585_v24, 16  ;;  %v803_v56 = vshll.u32 %v626_v33, 16  ;;  %v2683_v61 = vshrl.u32 %v13752_v38, 16  ;;  %v2686_v62 = vshll.u32 %v13752_v38, 16 }
  0xaf   : > { %15152 = vmatpush3.bf16.msra.mxu1 %v17305_v58  ;;  %v2671_v58 = vsel %vm18129_vm2, %v2666_v49, %v2670_v34  ;;  %v790_v59 = vor.u32 %v789_v51, %v786_v50  ;;  %v2676_v63 = vrot.slane %v2675_v53, 4  ;;  %v2692_v2 = vshll.u32 %v13753_v52, 16  ;;  %v13756_v34 = vld [vmem:[%s18102_s16 + $0x64] sm:$0xf] }
  0xb0   : > { %15114 = vmatmul.mubr.bf16.gmra.mrb[8].mxu1 %v13563_v48  ;;  %v799_v0 = vrot.slane %v797_v55, 4  ;;  %v805_v1 = vrot.slane %v803_v56, 5  ;;  %15185 = vmatprep.subr.bf16.mxu1 %v17320_v57  ;;  %v2685_v6 = vrot.slane %v2683_v61, 4  ;;  %v2688_v8 = vrot.slane %v2686_v62, 5 }
  0xb1   : > { %15344 = vmatpush3.bf16.msra.mxu0 %v17304_v25  ;;  %v791_v4 = vrot.slane %v790_v59, 4  ;;  %v2696_v9 = vshrl.u32 %v13753_v52, 16  ;;  %v2681_v11 = vsel %vm18129_vm2, %v2676_v63, %v2680_v45  ;;  %v2694_v14 = vrot.slane %v2692_v2, 5  ;;  %v588_v45 = vld [vmem:[%s18102_s16 + $0x60] sm:$0xf] }
  0xb2   : > { %15377 = vmatprep.subr.bf16.mxu0 %v17308_v47  ;;  %v800_v12 = vor.u32 %v799_v0, %v795_v54  ;;  %v2702_v15 = vshll.u32 %v13754_v60, 16  ;;  %v13803_v18 = vcombine.low %v2671_v58, %v2681_v11  ;;  %v2689_v20 = vor.u32 %v2688_v8, %v2685_v6  ;;  %v589_v58 = vld [vmem:[%s18102_s16 + $0x64] sm:$0xf]  ;;  %v13758_v11 = vld [vmem:[%s18102_s16 + $0x6c] sm:$0xf] }
  0xb3   : > { %v796_v19 = vsel %vm18129_vm2, %v791_v4, %v795_v54  ;;  %v2698_v21 = vrot.slane %v2696_v9, 4  ;;  %v808_v28 = vshrl.u32 %v586_v10, 16  ;;  %v811_v29 = vshll.u32 %v586_v10, 16  ;;  %v628_v9 = vld [vmem:[%s18102_s16 + $0x68] sm:$0x1] }
  0xb4   : > { %v801_v24 = vrot.slane %v800_v12, 4  ;;  %v2704_v25 = vrot.slane %v2702_v15, 5  ;;  %15306 = vmatmul.mubr.bf16.gmra.mrb[8].mxu0 %v13803_v18  ;;  %v2690_v30 = vrot.slane %v2689_v20, 4  ;;  %v817_v33 = vshll.u32 %v587_v16, 16 }
  0xb5   : > { %v2699_v32 = vor.u32 %v2698_v21, %v2694_v14  ;;  %v821_v31 = vshrl.u32 %v587_v16, 16  ;;  %v810_v36 = vrot.slane %v808_v28, 4  ;;  %v813_v38 = vrot.slane %v811_v29, 5  ;;  %v18319_v28 = vld [vmem:[%s18102_s16 + $0x74] sm:$0x1] }
  0xb6   : > { %v806_v35 = vsel %vm18129_vm2, %v801_v24, %v805_v1  ;;  %v827_v40 = vshll.u32 %v627_v17, 16  ;;  %v2695_v42 = vsel %vm18129_vm2, %v2690_v30, %v2694_v14  ;;  %v819_v44 = vrot.slane %v817_v33, 5  ;;  %v18316_v17 = vld [vmem:[%s18102_s16 + $0x70] sm:$0xf] }
  0xb7   : > { %v13564_v41 = vcombine.low %v796_v19, %v806_v35  ;;  %v2700_v43 = vrot.slane %v2699_v32, 4  ;;  %v814_v46 = vor.u32 %v813_v38, %v810_v36  ;;  %v823_v47 = vrot.slane %v821_v31, 4 }
  0xb8   : > { %v829_v48 = vrot.slane %v827_v40, 5  ;;  %v2707_v49 = vshrl.u32 %v13755_v23, 16  ;;  %v2710_v51 = vshll.u32 %v13755_v23, 16  ;;  %v2716_v52 = vshll.u32 %v13756_v34, 16 }
  0xb9   : > { %15117 = vmatprep.mubr.bf16.mxu1 %v13564_v41  ;;  %v2705_v50 = vsel %vm18129_vm2, %v2700_v43, %v2704_v25  ;;  %v2720_v53 = vshrl.u32 %v13756_v34, 16  ;;  %v815_v55 = vrot.slane %v814_v46, 4  ;;  %v824_v56 = vor.u32 %v823_v47, %v819_v44  ;;  %v590_v34 = vld [vmem:[%s18102_s16 + $0x6c] sm:$0xf] }
  0xba   : > { %v13804_v54 = vcombine.low %v2695_v42, %v2705_v50  ;;  %v2709_v57 = vrot.slane %v2707_v49, 4  ;;  %v2712_v59 = vrot.slane %v2710_v51, 5  ;;  %v2718_v60 = vrot.slane %v2716_v52, 5  ;;  %v13761_v50 = vld [vmem:[%s18102_s16 + $0x78] sm:$0xf] }
  0xbb   : > { %v2722_v61 = vrot.slane %v2720_v53, 4  ;;  %v2726_v62 = vshll.u32 %v13757_v13, 16  ;;  %v820_v63 = vsel %vm18129_vm2, %v815_v55, %v819_v44  ;;  %v825_v0 = vrot.slane %v824_v56, 4  ;;  %v591_v13 = vld [vmem:[%s18102_s16 + $0x70] sm:$0xf] }
  0xbc   : > { %15309 = vmatprep.mubr.bf16.mxu0 %v13804_v54  ;;  %v832_v1 = vshrl.u32 %v588_v45, 16  ;;  %v835_v2 = vshll.u32 %v588_v45, 16  ;;  %v2713_v4 = vor.u32 %v2712_v59, %v2709_v57  ;;  %v841_v10 = vshll.u32 %v589_v58, 16  ;;  %v629_v45 = vld [vmem:[%s18102_s16 + $0x74] sm:$0x1] }
  0xbd   : > { %v2723_v6 = vor.u32 %v2722_v61, %v2718_v60  ;;  %v2728_v8 = vrot.slane %v2726_v62, 5  ;;  %v830_v12 = vsel %vm18129_vm2, %v825_v0, %v829_v48  ;;  %v845_v16 = vshrl.u32 %v589_v58, 16  ;;  %v18335_v55 = vld [vmem:[%s18102_s16 + $0x7c] sm:$0xf] }
  0xbe   : > { %v834_v14 = vrot.slane %v832_v1, 4  ;;  %v837_v15 = vrot.slane %v835_v2, 5  ;;  %v13565_v18 = vcombine.low %v820_v63, %v830_v12  ;;  %v2714_v19 = vrot.slane %v2713_v4, 4 }
  0xbf   : > { %v2724_v20 = vrot.slane %v2723_v6, 4  ;;  %v843_v21 = vrot.slane %v841_v10, 5  ;;  %v847_v24 = vrot.slane %v845_v16, 4  ;;  %v851_v25 = vshll.u32 %v628_v9, 16  ;;  %v13763_v10 = vld [vmem:[%s18102_s16 + $0x80] sm:$0x1] }
  0xc0   : > { %v838_v23 = vor.u32 %v837_v15, %v834_v14  ;;  %v2731_v29 = vshrl.u32 %v13758_v11, 16  ;;  %15118 = vmatmul.mubr.bf16.gmra.mrb[12].mxu1 %v13565_v18  ;;  %v2719_v30 = vsel %vm18129_vm2, %v2714_v19, %v2718_v60  ;;  %v2734_v33 = vshll.u32 %v13758_v11, 16  ;;  %v592_v18 = vld [vmem:[%s18102_s16 + $0x78] sm:$0xf] }
  0xc1   : > { %v2729_v32 = vsel %vm18129_vm2, %v2724_v20, %v2728_v8  ;;  %v2740_v31 = vshll.u32 %v18316_v17, 16  ;;  %v848_v38 = vor.u32 %v847_v24, %v843_v21  ;;  %v853_v40 = vrot.slane %v851_v25, 5  ;;  %v593_v24 = vld [vmem:[%s18102_s16 + $0x7c] sm:$0xf] }
  0xc2   : > { %v13805_v35 = vcombine.low %v2719_v30, %v2729_v32  ;;  %v839_v36 = vrot.slane %v838_v23, 4  ;;  %v2733_v41 = vrot.slane %v2731_v29, 4  ;;  %v2736_v42 = vrot.slane %v2734_v33, 5 }
  0xc3   : > { %v2742_v43 = vrot.slane %v2740_v31, 5  ;;  %v2744_v44 = vshrl.u32 %v18316_v17, 16  ;;  %v849_v47 = vrot.slane %v848_v38, 4  ;;  %v2750_v48 = vshll.u32 %v18319_v28, 16  ;;  %v13764_v38 = vld [vmem:[%s18102_s16 + $0x84] sm:$0xf] }
  0xc4   : > { %15310 = vmatmul.mubr.bf16.gmra.mrb[12].mxu0 %v13805_v35  ;;  %v844_v46 = vsel %vm18129_vm2, %v839_v36, %v843_v21  ;;  %v856_v49 = vshrl.u32 %v590_v34, 16  ;;  %v2737_v51 = vor.u32 %v2736_v42, %v2733_v41  ;;  %v859_v53 = vshll.u32 %v590_v34, 16  ;;  %v630_v35 = vld [vmem:[%s18102_s16 + $0x80] sm:$0x1] }
  0xc5   : > { %v2746_v52 = vrot.slane %v2744_v44, 4  ;;  %v865_v54 = vshll.u32 %v591_v13, 16  ;;  %v854_v56 = vsel %vm18129_vm2, %v849_v47, %v853_v40  ;;  %v2752_v57 = vrot.slane %v2750_v48, 5 }
  0xc6   : > { %v858_v58 = vrot.slane %v856_v49, 4  ;;  %v869_v59 = vshrl.u32 %v591_v13, 16  ;;  %v13566_v60 = vcombine.low %v844_v46, %v854_v56  ;;  %v2738_v61 = vrot.slane %v2737_v51, 4 }
  0xc7   : > { %v2747_v62 = vor.u32 %v2746_v52, %v2742_v43  ;;  %v861_v63 = vrot.slane %v859_v53, 5  ;;  %v867_v0 = vrot.slane %v865_v54, 5  ;;  %v875_v2 = vshll.u32 %v629_v45, 16  ;;  %v18358_v52 = vld [vmem:[%s18102_s16 + $0x8c] sm:$0x1] }
  0xc8   : > { %v871_v1 = vrot.slane %v869_v59, 4  ;;  %v2755_v4 = vshrl.u32 %v13761_v50, 16  ;;  %15121 = vmatprep.mubr.bf16.mxu1 %v13566_v60  ;;  %v2743_v6 = vsel %vm18129_vm2, %v2738_v61, %v2742_v43  ;;  %v2758_v11 = vshll.u32 %v13761_v50, 16  ;;  %v18355_v43 = vld [vmem:[%s18102_s16 + $0x88] sm:$0xf] }
  0xc9   : > { %v2748_v8 = vrot.slane %v2747_v62, 4  ;;  %v862_v9 = vor.u32 %v861_v63, %v858_v58  ;;  %v877_v14 = vrot.slane %v875_v2, 5  ;;  %v2764_v16 = vshll.u32 %v18335_v55, 16  ;;  %v594_v58 = vld [vmem:[%s18102_s16 + $0x84] sm:$0xf] }
  0xca   : > { %v872_v12 = vor.u32 %v871_v1, %v867_v0  ;;  %v2757_v15 = vrot.slane %v2755_v4, 4  ;;  %v2760_v21 = vrot.slane %v2758_v11, 5  ;;  %v2768_v23 = vshrl.u32 %v18335_v55, 16  ;;  %v595_v63 = vld [vmem:[%s18102_s16 + $0x88] sm:$0xf] }
  0xcb   : > { %v2753_v19 = vsel %vm18129_vm2, %v2748_v8, %v2752_v57  ;;  %v863_v20 = vrot.slane %v862_v9, 4  ;;  %v2766_v30 = vrot.slane %v2764_v16, 5  ;;  %v2774_v32 = vshll.u32 %v13763_v10, 16  ;;  %v631_v11 = vld [vmem:[%s18102_s16 + $0x8c] sm:$0x1] }
  0xcc   : > { %v13806_v25 = vcombine.low %v2743_v6, %v2753_v19  ;;  %v873_v29 = vrot.slane %v872_v12, 4  ;;  %v2761_v31 = vor.u32 %v2760_v21, %v2757_v15  ;;  %v2770_v34 = vrot.slane %v2768_v23, 4  ;;  %v13767_v23 = vld [vmem:[%s18102_s16 + $0x90] sm:$0xf] }
  0xcd   : > { %v868_v33 = vsel %vm18129_vm2, %v863_v20, %v867_v0  ;;  %v880_v36 = vshrl.u32 %v592_v18, 16  ;;  %v2776_v13 = vrot.slane %v2774_v32, 5  ;;  %v883_v41 = vshll.u32 %v592_v18, 16  ;;  %v18374_v32 = vld [vmem:[%s18102_s16 + $0x94] sm:$0xf] }
  0xce   : > { %15313 = vmatprep.mubr.bf16.mxu0 %v13806_v25  ;;  %v878_v40 = vsel %vm18129_vm2, %v873_v29, %v877_v14  ;;  %v889_v42 = vshll.u32 %v593_v24, 16  ;;  %v2762_v45 = vrot.slane %v2761_v31, 4  ;;  %v2771_v46 = vor.u32 %v2770_v34, %v2766_v30 }
  0xcf   : > { %v13567_v44 = vcombine.low %v868_v33, %v878_v40  ;;  %v882_v47 = vrot.slane %v880_v36, 4  ;;  %v885_v48 = vrot.slane %v883_v41, 5  ;;  %v893_v50 = vshrl.u32 %v593_v24, 16  ;;  %v18381_v41 = vld [vmem:[%s18102_s16 + $0x98] sm:$0x1] }
  0xd0   : > { %v891_v49 = vrot.slane %v889_v42, 5  ;;  %v899_v51 = vshll.u32 %v630_v35, 16  ;;  %v2767_v53 = vsel %vm18129_vm2, %v2762_v45, %v2766_v30  ;;  %v2772_v54 = vrot.slane %v2771_v46, 4 }
  0xd1   : > { %15122 = vmatmul.mubr.bf16.gmra.mrb[16].mxu1 %v13567_v44  ;;  %v2779_v56 = vshrl.u32 %v13764_v38, 16  ;;  %v2782_v57 = vshll.u32 %v13764_v38, 16  ;;  %v886_v59 = vor.u32 %v885_v48, %v882_v47  ;;  %v895_v60 = vrot.slane %v893_v50, 4  ;;  %v596_v47 = vld [vmem:[%s18102_s16 + $0x90] sm:$0xf] }
  0xd2   : > { %v901_v61 = vrot.slane %v899_v51, 5  ;;  %v2788_v62 = vshll.u32 %v18355_v43, 16  ;;  %v2777_v0 = vsel %vm18129_vm2, %v2772_v54, %v2776_v13  ;;  %v2792_v4 = vshrl.u32 %v18355_v43, 16 }
  0xd3   : > { %v2781_v1 = vrot.slane %v2779_v56, 4  ;;  %v2784_v2 = vrot.slane %v2782_v57, 5  ;;  %v13807_v6 = vcombine.low %v2767_v53, %v2777_v0  ;;  %v887_v8 = vrot.slane %v886_v59, 4 }
  0xd4   : > { %v896_v9 = vor.u32 %v895_v60, %v891_v49  ;;  %v2790_v10 = vrot.slane %v2788_v62, 5  ;;  %v2794_v14 = vrot.slane %v2792_v4, 4  ;;  %v2798_v15 = vshll.u32 %v18358_v52, 16 }
  0xd5   : > { %v2785_v12 = vor.u32 %v2784_v2, %v2781_v1  ;;  %v904_v16 = vshrl.u32 %v594_v58, 16  ;;  %15314 = vmatmul.mubr.bf16.gmra.mrb[16].mxu0 %v13807_v6  ;;  %v892_v18 = vsel %vm18129_vm2, %v887_v8, %v891_v49  ;;  %v907_v20 = vshll.u32 %v594_v58, 16  ;;  %v597_v58 = vld [vmem:[%s18102_s16 + $0x94] sm:$0xf] }
  0xd6   : > { %v897_v19 = vrot.slane %v896_v9, 4  ;;  %v913_v21 = vshll.u32 %v595_v63, 16  ;;  %v2795_v25 = vor.u32 %v2794_v14, %v2790_v10  ;;  %v2800_v29 = vrot.slane %v2798_v15, 5 }
  0xd7   : > { %v2786_v24 = vrot.slane %v2785_v12, 4  ;;  %v906_v30 = vrot.slane %v904_v16, 4  ;;  %v909_v31 = vrot.slane %v907_v20, 5  ;;  %v917_v35 = vshrl.u32 %v595_v63, 16  ;;  %v632_v63 = vld [vmem:[%s18102_s16 + $0x98] sm:$0x1] }
  0xd8   : > { %v902_v33 = vsel %vm18129_vm2, %v897_v19, %v901_v61  ;;  %v915_v34 = vrot.slane %v913_v21, 5  ;;  %v2796_v40 = vrot.slane %v2795_v25, 4  ;;  %v923_v13 = vshll.u32 %v631_v11, 16  ;;  %v13770_v11 = vld [vmem:[%s18102_s16 + $0x9c] sm:$0xf] }
  0xd9   : > { %v13568_v36 = vcombine.low %v892_v18, %v902_v33  ;;  %v2791_v38 = vsel %vm18129_vm2, %v2786_v24, %v2790_v10  ;;  %v910_v42 = vor.u32 %v909_v31, %v906_v30  ;;  %v919_v44 = vrot.slane %v917_v35, 4  ;;  %v18397_v18 = vld [vmem:[%s18102_s16 + $0xa0] sm:$0xf]  ;;  %v18400_v24 = vld [vmem:[%s18102_s16 + $0xa4] sm:$0x1] }
  0xda   : > { %v2803_v45 = vshrl.u32 %v13767_v23, 16  ;;  %v2806_v46 = vshll.u32 %v13767_v23, 16  ;;  %v2801_v48 = vsel %vm18129_vm2, %v2796_v40, %v2800_v29  ;;  %v925_v49 = vrot.slane %v923_v13, 5 }
  0xdb   : > { %15125 = vmatprep.mubr.bf16.mxu1 %v13568_v36  ;;  %v2812_v50 = vshll.u32 %v18374_v32, 16  ;;  %v2816_v51 = vshrl.u32 %v18374_v32, 16  ;;  %v13808_v53 = vcombine.low %v2791_v38, %v2801_v48  ;;  %v911_v54 = vrot.slane %v910_v42, 4  ;;  %v18408_v38 = vld [vmem:[%s18102_s16 + $0x9c] sm:$0xf] }
  0xdc   : > { %v920_v56 = vor.u32 %v919_v44, %v915_v34  ;;  %v2805_v57 = vrot.slane %v2803_v45, 4  ;;  %v2808_v59 = vrot.slane %v2806_v46, 5  ;;  %v2822_v62 = vshll.u32 %v18381_v41, 16  ;;  %v18411_v45 = vld [vmem:[%s18102_s16 + $0xa0] sm:$0xf] }
  0xdd   : > { %v2814_v60 = vrot.slane %v2812_v50, 5  ;;  %v2818_v61 = vrot.slane %v2816_v51, 4  ;;  %15317 = vmatprep.mubr.bf16.mxu0 %v13808_v53  ;;  %v916_v0 = vsel %vm18129_vm2, %v911_v54, %v915_v34  ;;  %v928_v2 = vshrl.u32 %v596_v47, 16  ;;  %v633_v50 = vld [vmem:[%s18102_s16 + $0xa4] sm:$0x1] }
  0xde   : > { %v921_v1 = vrot.slane %v920_v56, 4  ;;  %v931_v4 = vshll.u32 %v596_v47, 16  ;;  %v2809_v6 = vor.u32 %v2808_v59, %v2805_v57  ;;  %v2824_v9 = vrot.slane %v2822_v62, 5  ;;  %v13773_v51 = vld [vmem:[%s18102_s16 + $0xa8] sm:$0xf] }
  0xdf   : > { %v2819_v8 = vor.u32 %v2818_v61, %v2814_v60  ;;  %v937_v10 = vshll.u32 %v597_v58, 16  ;;  %v930_v14 = vrot.slane %v928_v2, 4  ;;  %v941_v16 = vshrl.u32 %v597_v58, 16  ;;  %v18423_v62 = vld [vmem:[%s18102_s16 + $0xac] sm:$0xf] }
  0xe0   : > { %v926_v12 = vsel %vm18129_vm2, %v921_v1, %v925_v49  ;;  %v933_v15 = vrot.slane %v931_v4, 5  ;;  %v2810_v20 = vrot.slane %v2809_v6, 4  ;;  %v947_v30 = vshll.u32 %v632_v63, 16 }
  0xe1   : > { %v13569_v19 = vcombine.low %v916_v0, %v926_v12  ;;  %v2820_v21 = vrot.slane %v2819_v8, 4  ;;  %v939_v23 = vrot.slane %v937_v10, 5  ;;  %v943_v29 = vrot.slane %v941_v16, 4  ;;  %v18429_v10 = vld [vmem:[%s18102_s16 + $0xb0] sm:$0x1] }
  0xe2   : > { %v934_v25 = vor.u32 %v933_v15, %v930_v14  ;;  %v2827_v33 = vshrl.u32 %v13770_v11, 16  ;;  %v2815_v31 = vsel %vm18129_vm2, %v2810_v20, %v2814_v60  ;;  %v2830_v35 = vshll.u32 %v13770_v11, 16  ;;  %v18432_v16 = vld [vmem:[%s18102_s16 + $0xa8] sm:$0xf] }
  0xe3   : > { %15126 = vmatmul.mubr.bf16.gmra.mrb[20].mxu1 %v13569_v19  ;;  %v2825_v34 = vsel %vm18129_vm2, %v2820_v21, %v2824_v9  ;;  %v2836_v36 = vshll.u32 %v18397_v18, 16  ;;  %v944_v42 = vor.u32 %v943_v29, %v939_v23  ;;  %v949_v44 = vrot.slane %v947_v30, 5 }
  0xe4   : > { %v13809_v40 = vcombine.low %v2815_v31, %v2825_v34  ;;  %v935_v13 = vrot.slane %v934_v25, 4  ;;  %v2829_v46 = vrot.slane %v2827_v33, 4  ;;  %v2832_v47 = vrot.slane %v2830_v35, 5  ;;  %v18437_v25 = vld [vmem:[%s18102_s16 + $0xac] sm:$0xf] }
  0xe5   : > { %v2838_v48 = vrot.slane %v2836_v36, 5  ;;  %v2840_v49 = vshrl.u32 %v18397_v18, 16  ;;  %v945_v54 = vrot.slane %v944_v42, 4  ;;  %v2846_v56 = vshll.u32 %v18400_v24, 16 }
  0xe6   : > { %15318 = vmatmul.mubr.bf16.gmra.mrb[20].mxu0 %v13809_v40  ;;  %v940_v53 = vsel %vm18129_vm2, %v935_v13, %v939_v23  ;;  %v952_v57 = vshrl.u32 %v18408_v38, 16  ;;  %v2833_v58 = vor.u32 %v2832_v47, %v2829_v46  ;;  %v955_v60 = vshll.u32 %v18408_v38, 16  ;;  %v634_v13 = vld [vmem:[%s18102_s16 + $0xb0] sm:$0x1] }
  0xe7   : > { %v2842_v59 = vrot.slane %v2840_v49, 4  ;;  %v961_v61 = vshll.u32 %v18411_v45, 16  ;;  %v950_v63 = vsel %vm18129_vm2, %v945_v54, %v949_v44  ;;  %v2848_v0 = vrot.slane %v2846_v56, 5 }
  0xe8   : > { %v954_v1 = vrot.slane %v952_v57, 4  ;;  %v965_v2 = vshrl.u32 %v18411_v45, 16  ;;  %v13570_v4 = vcombine.low %v940_v53, %v950_v63  ;;  %v2834_v6 = vrot.slane %v2833_v58, 4  ;;  %v13776_v53 = vld [vmem:[%s18102_s16 + $0xb4] sm:$0xf] }
  0xe9   : > { %v2843_v8 = vor.u32 %v2842_v59, %v2838_v48  ;;  %v957_v9 = vrot.slane %v955_v60, 5  ;;  %v963_v11 = vrot.slane %v961_v61, 5  ;;  %v971_v14 = vshll.u32 %v633_v50, 16 }
  0xea   : > { %v967_v12 = vrot.slane %v965_v2, 4  ;;  %v2851_v15 = vshrl.u32 %v13773_v51, 16  ;;  %15129 = vmatprep.mubr.bf16.mxu1 %v13570_v4  ;;  %v2839_v19 = vsel %vm18129_vm2, %v2834_v6, %v2838_v48  ;;  %v2854_v23 = vshll.u32 %v13773_v51, 16 }
  0xeb   : > { %v2844_v20 = vrot.slane %v2843_v8, 4  ;;  %v958_v21 = vor.u32 %v957_v9, %v954_v1  ;;  %v973_v30 = vrot.slane %v971_v14, 5  ;;  %v2860_v31 = vshll.u32 %v18423_v62, 16  ;;  %v18458_v8 = vld [vmem:[%s18102_s16 + $0xbc] sm:$0x1] }
  0xec   : > { %v968_v29 = vor.u32 %v967_v12, %v963_v11  ;;  %v2853_v33 = vrot.slane %v2851_v15, 4  ;;  %v2856_v36 = vrot.slane %v2854_v23, 5  ;;  %v2864_v40 = vshrl.u32 %v18423_v62, 16  ;;  %v18461_v9 = vld [vmem:[%s18102_s16 + $0xb4] sm:$0xf] }
  0xed   : > { %v2849_v34 = vsel %vm18129_vm2, %v2844_v20, %v2848_v0  ;;  %v959_v35 = vrot.slane %v958_v21, 4  ;;  %v2862_v46 = vrot.slane %v2860_v31, 5  ;;  %v2870_v47 = vshll.u32 %v18429_v10, 16  ;;  %v18454_v0 = vld [vmem:[%s18102_s16 + $0xb8] sm:$0xf] }
  0xee   : > { %v13810_v42 = vcombine.low %v2839_v19, %v2849_v34  ;;  %v969_v44 = vrot.slane %v968_v29, 4  ;;  %v2857_v49 = vor.u32 %v2856_v36, %v2853_v33  ;;  %v2866_v50 = vrot.slane %v2864_v40, 4  ;;  %v18470_v34 = vld [vmem:[%s18102_s16 + $0xb8] sm:$0xf] }
  0xef   : > { %v964_v48 = vsel %vm18129_vm2, %v959_v35, %v963_v11  ;;  %v976_v51 = vshrl.u32 %v18432_v16, 16  ;;  %v2872_v56 = vrot.slane %v2870_v47, 5  ;;  %v979_v57 = vshll.u32 %v18432_v16, 16 }
  0xf0   : > { %15321 = vmatprep.mubr.bf16.mxu0 %v13810_v42  ;;  %v974_v54 = vsel %vm18129_vm2, %v969_v44, %v973_v30  ;;  %v985_v58 = vshll.u32 %v18437_v25, 16  ;;  %v2858_v60 = vrot.slane %v2857_v49, 4  ;;  %v2867_v61 = vor.u32 %v2866_v50, %v2862_v46  ;;  %v635_v42 = vld [vmem:[%s18102_s16 + $0xbc] sm:$0x1]  ;;  %v13779_v49 = vld [vmem:[%s18102_s16 + $0xc0] sm:$0xf] }
  0xf1   : > { %v13571_v59 = vcombine.low %v964_v48, %v974_v54  ;;  %v978_v63 = vrot.slane %v976_v51, 4  ;;  %v981_v1 = vrot.slane %v979_v57, 5  ;;  %v989_v4 = vshrl.u32 %v18437_v25, 16 }
  0xf2   : > { %v987_v2 = vrot.slane %v985_v58, 5  ;;  %v995_v6 = vshll.u32 %v634_v13, 16  ;;  %v2863_v11 = vsel %vm18129_vm2, %v2858_v60, %v2862_v46  ;;  %v2868_v12 = vrot.slane %v2867_v61, 4 }
  0xf3   : > { %15130 = vmatmul.mubr.bf16.gmra.mrb[24].mxu1 %v13571_v59  ;;  %v2875_v14 = vshrl.u32 %v13776_v53, 16  ;;  %v2878_v15 = vshll.u32 %v13776_v53, 16  ;;  %v982_v19 = vor.u32 %v981_v1, %v978_v63  ;;  %v991_v20 = vrot.slane %v989_v4, 4 }
  0xf4   : > { %v997_v21 = vrot.slane %v995_v6, 5  ;;  %v2884_v23 = vshll.u32 %v18454_v0, 16  ;;  %v2873_v29 = vsel %vm18129_vm2, %v2868_v12, %v2872_v56  ;;  %v2888_v31 = vshrl.u32 %v18454_v0, 16  ;;  %v18481_v56 = vld [vmem:[%s18102_s16 + $0xc4] sm:$0xf] }
  0xf5   : > { %v2877_v30 = vrot.slane %v2875_v14, 4  ;;  %v2880_v33 = vrot.slane %v2878_v15, 5  ;;  %v13811_v35 = vcombine.low %v2863_v11, %v2873_v29  ;;  %v983_v36 = vrot.slane %v982_v19, 4  ;;  %v18489_v14 = vld [vmem:[%s18102_s16 + $0xc8] sm:$0x1] }
  0xf6   : > { %v992_v40 = vor.u32 %v991_v20, %v987_v2  ;;  %v2886_v13 = vrot.slane %v2884_v23, 5  ;;  %v2890_v46 = vrot.slane %v2888_v31, 4  ;;  %v2894_v47 = vshll.u32 %v18458_v8, 16  ;;  %v13822_v31 = vld [vmem:[%s18102_s16 + $0xc] sm:$0xe] }
  0xf7   : > { %v2881_v44 = vor.u32 %v2880_v33, %v2877_v30  ;;  %v1000_v48 = vshrl.u32 %v18461_v9, 16  ;;  %15322 = vmatmul.mubr.bf16.gmra.mrb[24].mxu0 %v13811_v35  ;;  %v988_v50 = vsel %vm18129_vm2, %v983_v36, %v987_v2  ;;  %v1003_v53 = vshll.u32 %v18461_v9, 16 }
  0xf8   : > { %v993_v51 = vrot.slane %v992_v40, 4  ;;  %v1009_v54 = vshll.u32 %v18470_v34, 16  ;;  %v2891_v58 = vor.u32 %v2890_v46, %v2886_v13  ;;  %v2896_v59 = vrot.slane %v2894_v47, 5 }
  0xf9   : > { %v2882_v57 = vrot.slane %v2881_v44, 4  ;;  %v1002_v60 = vrot.slane %v1000_v48, 4  ;;  %v1005_v63 = vrot.slane %v1003_v53, 5  ;;  %v1013_v2 = vshrl.u32 %v18470_v34, 16 }
  0xfa   : > { %v998_v61 = vsel %vm18129_vm2, %v993_v51, %v997_v21  ;;  %v1011_v1 = vrot.slane %v1009_v54, 5  ;;  %v2892_v11 = vrot.slane %v2891_v58, 4  ;;  %v1019_v12 = vshll.u32 %v635_v42, 16  ;;  %v13823_v42 = vld [vmem:[%s18102_s16 + $0x18] sm:$0xe] }
  0xfb   : > { %v13572_v4 = vcombine.low %v988_v50, %v998_v61  ;;  %v2887_v6 = vsel %vm18129_vm2, %v2882_v57, %v2886_v13  ;;  %v1006_v15 = vor.u32 %v1005_v63, %v1002_v60  ;;  %v1015_v19 = vrot.slane %v1013_v2, 4  ;;  %v17554_v58 = vld [vmem:[%s18102_s16] sm:$0xf] }
  0xfc   : > { %v2899_v20 = vshrl.u32 %v13779_v49, 16  ;;  %v2902_v23 = vshll.u32 %v13779_v49, 16  ;;  %v2897_v21 = vsel %vm18129_vm2, %v2892_v11, %v2896_v59  ;;  %v1021_v29 = vrot.slane %v1019_v12, 5  ;;  %v18504_v59 = vld [vmem:[%s18102_s16 + $0x4] sm:$0xf] }
  0xfd   : > { %15133 = vmatprep.mubr.bf16.mxu1 %v13572_v4  ;;  %v2908_v30 = vshll.u32 %v18481_v56, 16  ;;  %v2912_v33 = vshrl.u32 %v18481_v56, 16  ;;  %v13812_v35 = vcombine.low %v2887_v6, %v2897_v21  ;;  %v1007_v36 = vrot.slane %v1006_v15, 4  ;;  %v13824_v4 = vld [vmem:[%s18102_s16 + $0x24] sm:$0xe] }
  0xfe   : > { %v1016_v40 = vor.u32 %v1015_v19, %v1011_v1  ;;  %v2901_v13 = vrot.slane %v2899_v20, 4  ;;  %v2904_v44 = vrot.slane %v2902_v23, 5  ;;  %v2918_v48 = vshll.u32 %v18489_v14, 16 }
  0xff   : > { %v2910_v46 = vrot.slane %v2908_v30, 5  ;;  %v2914_v47 = vrot.slane %v2912_v33, 4  ;;  %15325 = vmatprep.mubr.bf16.mxu0 %v13812_v35  ;;  %v1012_v49 = vsel %vm18129_vm2, %v1007_v36, %v1011_v1  ;;  %v13582_v60 = vcombine.low %v17554_v58, %v18504_v59  ;;  %v17556_v1 = vld [vmem:[%s18102_s16 + $0x10] sm:$0xf]  ;;  %v17558_v36 = vld [vmem:[%s18102_s16 + $0x2c] sm:$0x1] }
 0x100   : > { %v1017_v50 = vrot.slane %v1016_v40, 4  ;;  %v2905_v51 = vor.u32 %v2904_v44, %v2901_v13  ;;  %v2920_v54 = vrot.slane %v2918_v48, 5  ;;  %v22207_v61 = vmov 0  ;;  %v13825_v13 = vld [vmem:[%s18102_s16 + $0x30] sm:$0xe] }
 0x101   : > { %v2915_v53 = vor.u32 %v2914_v47, %v2910_v46  ;;  %v22208_v61 = vsel %vm18507_vm5, 4294967295, %v22207_v61  ;;  %v13838_v63 = vrot.slane %v13822_v31, 9  ;;  %v3310_v2 = vrot.slane %v17556_v1, 5  ;;  %v17557_v31 = vld [vmem:[%s18102_s16 + $0x28] sm:$0xf] }
 0x102   : > { %v1022_v57 = vsel %vm18129_vm2, %v1017_v50, %v1021_v29  ;;  %22209 = vst [vmem:[#allocation23_spill] sm:$0xff] %v22208_v61  ;;  %v2906_v11 = vrot.slane %v2905_v51, 4  ;;  %v13839_v15 = vrot.slane %v13823_v42, 9  ;;  %v3321_v23 = vsel %vm18507_vm5, %v18180_v37, %v3320_v27  ;;  %v17559_v42 = vld [vmem:[%s18102_s16 + $0x34] sm:$0xf]  ;;  %v17322_v1 = vld [vmem:[%s22018_s1 + $0x88] sm:$0xff]  }
 0x103   : > { %v13573_v6 = vcombine.low %v1012_v49, %v1022_v57  ;;  %v2916_v12 = vrot.slane %v2915_v53, 4  ;;  %v3311_v19 = vsel %vm18507_vm5, %v13838_v63, %v3310_v2  ;;  %v3312_v20 = vrot.slane %v3310_v2, 4  ;;  %v17560_v44 = vld [vmem:[%s18102_s16 + $0xc] sm:$0xf]  ;;  %v13826_v47 = vld [vmem:[%s18102_s16 + $0x3c] sm:$0xe] }
 0x104   : > { %v2911_v21 = vsel %vm18129_vm2, %v2906_v11, %v2910_v46  ;;  %v3318_v30 = vsel %vm18507_vm5, %v13839_v15, %v3317_v26  ;;  %v13840_v33 = vrot.slane %v13824_v4, 9  ;;  %v3324_v35 = vrot.slane %v17557_v31, 5  ;;  %v17562_v48 = vld [vmem:[%s18102_s16 + $0x40] sm:$0xf]  ;;  %v17563_v50 = vld [vmem:[%s18102_s16 + $0x18] sm:$0xf] }
 0x105   : > { %15134 = vmatmul.mubr.bf16.gmra.mrb[28].mxu1 %v13573_v6  ;;  %v2921_v29 = vsel %vm18129_vm2, %v2916_v12, %v2920_v54  ;;  %v3314_v27 = vsel %vm18507_vm5, %v3312_v20, %v3313_v5  ;;  %v13871_v37 = vcombine.low %v3318_v30, %v3321_v23  ;;  %v3327_v26 = vrot.slane %v17558_v36, 5  ;;  %v18538_v5 = vld [vmem:[%s18102_s16 + $0x10] sm:$0xf]  ;;  %v18545_v51 = vld [vmem:[%s18102_s16 + $0x1c] sm:$0xf] }
 0x106   : > { %v13813_v7 = vcombine.low %v2911_v21, %v2921_v29  ;;  %15153 = vmatprep.mubr.bf16.mxu1 %v13582_v60  ;;  %v13870_v3 = vcombine.low %v3311_v19, %v3314_v27  ;;  %v3326_v40 = vrot.slane %v3324_v35, 4  ;;  %v3331_v22 = vrot.slane %v17559_v42, 5  ;;  %v13827_v60 = vld [vmem:[%s18102_s16 + $0x48] sm:$0xe]  ;;  %v18554_v63 = vld [vmem:[%s18102_s16 + $0x54] sm:$0xe] }
 0x107   : > { %v13583_v46 = vcombine.low %v17560_v44, %v18538_v5  ;;  %v3338_v49 = vrot.slane %v17562_v48, 5  ;;  %v13584_v53 = vcombine.low %v17563_v50, %v18545_v51  ;;  %v3325_v54 = vsel %vm18507_vm5, %v13840_v33, %v3324_v35  ;;  %v17565_v4 = vld [vmem:[%s18102_s16 + $0x38] sm:$0x1]  ;;  %v17566_v12 = vld [vmem:[%s18102_s16 + $0x44] sm:$0x1]  ;;  %v17311_v29 = vld [vmem:[%s22018_s1 + $0x188] sm:$0xff]  }
 0x108   : > { %15326 = vmatmul.mubr.bf16.gmra.mrb[28].mxu0 %v13813_v7  ;;  %v3328_v57 = vsel %vm18507_vm5, %v3326_v40, %v3327_v26  ;;  %v13841_v58 = vrot.slane %v13825_v13, 9  ;;  %v3333_v2 = vrot.slane %v3331_v22, 4  ;;  %v3334_v6 = vrot.slane %v17565_v4, 5  ;;  %v17567_v23 = vld [vmem:[%s18102_s16 + $0x4c] sm:$0xf]  ;;  %v17569_v7 = vld [vmem:[%s22018_s1 + $0x80] sm:$0xff]  }
 0x109   : > { %15345 = vmatprep.mubr.bf16.mxu0 %v13870_v3  ;;  %v13842_v11 = vrot.slane %v13826_v47, 9  ;;  %v3341_v15 = vrot.slane %v17566_v12, 5  ;;  %v13872_v19 = vcombine.low %v3325_v54, %v3328_v57  ;;  %v3340_v20 = vrot.slane %v3338_v49, 4  ;;  %v17568_v30 = vld [vmem:[%s18102_s16 + $0x58] sm:$0xf]  ;;  %v17325_v36 = vld [vmem:[%s22018_s1 + $0x90] sm:$0xff]  }
 0x10a   : > { %v3345_v21 = vrot.slane %v17567_v23, 5  ;;  %v3352_v33 = vrot.slane %v17568_v30, 5  ;;  %v17570_v27 = vld [vmem:[%s18102_s16 + $0x24] sm:$0xf]  ;;  %v18571_v31 = vld [vmem:[%s18102_s16 + $0x28] sm:$0xf]  ;;  %v3332_v3 = vsel %vm18507_vm5, %v13841_v58, %v3331_v22  ;;  %v3335_v47 = vsel %vm18507_vm5, %v3333_v2, %v3334_v6 }
 0x10b   : > { %v13585_v35 = vcombine.low %v17570_v27, %v18571_v31  ;;  %v18581_v26 = vsel %vm18507_vm5, %v13842_v11, %v3338_v49  ;;  %v13843_v40 = vrot.slane %v13827_v60, 9  ;;  %v17572_v13 = vld [vmem:[%s18102_s16 + $0x50] sm:$0x1]  ;;  %v13844_v44 = vrot.slane %v18554_v63, 9  ;;  %v17574_v50 = vld [vmem:[%s18102_s16 + $0x5c] sm:$0x1] }
 0x10c   : > { %v3348_v42 = vrot.slane %v17572_v13, 5  ;;  %v18587_v22 = vld [vmem:[%s22018_s1 + $0x190] sm:$0xff]   ;;  %v3342_v48 = vsel %vm18507_vm5, %v3340_v20, %v3341_v15  ;;  %v3347_v49 = vrot.slane %v3345_v21, 4  ;;  %v3354_v60 = vrot.slane %v3352_v33, 4  ;;  %v17577_v63 = vld [vmem:[%s18102_s16 + $0x64] sm:$0xf] }
 0x10d   : > { %15154 = vmatmul.mubr.bf16.vlgmr.msra.gmra.mrb[0].mxu1 %v13583_v46  ;;  %v18591_v46 = vld [vmem:[%s18102_s16 + $0x60] sm:$0xe]  ;;  %v17575_v54 = vld [vmem:[%s18102_s16 + $0x30] sm:$0xf]  ;;  %v18603_v57 = vld [vmem:[%s18102_s16 + $0x34] sm:$0xf]  ;;  %v13873_v11 = vcombine.low %v3332_v3, %v3335_v47  ;;  %v13874_v12 = vcombine.low %v18581_v26, %v3342_v48  ;;  %v18616_v15 = vsel %vm18507_vm5, %v13843_v40, %v3345_v21  ;;  %v18631_v21 = vsel %vm18507_vm5, %v13844_v44, %v3352_v33 }
 0x10e   : > { %15157 = vmatprep.mubr.bf16.mxu1 %v13584_v53  ;;  %15186 = vmatpush3.bf16.msra.mxu1 %v17569_v7  ;;  %v3355_v53 = vrot.slane %v17574_v50, 5  ;;  %v13586_v58 = vcombine.low %v17575_v54, %v18603_v57  ;;  %v3359_v4 = vrot.slane %v17577_v63, 5  ;;  %v17327_v2 = vld [vmem:[%s22018_s1 + $0x98] sm:$0xff]   ;;  %v18611_v6 = vld [vmem:[%s18102_s16 + $0x6c] sm:$0xe]  ;;  %v18627_v23 = vsel %vm18507_vm5, %v3347_v49, %v3348_v42  ;;  %v18650_v26 = vld [vmem:[%s22018_s1 + $0xa0] sm:$0xff]  }
 0x10f   : > { %15187 = vmatprep.subr.bf16.mxu1 %v17322_v1  ;;  %v13834_v20 = vld [vmem:[%s18102_s16 + $0x9c] sm:$0xe]  ;;  %v13845_v30 = vrot.slane %v18591_v46, 9  ;;  %v18635_v7 = vld [vmem:[%s18102_s16 + $0x68] sm:$0x1]  ;;  %v13846_v33 = vrot.slane %v18611_v6, 9 }
 0x110   : > { %15346 = vmatmul.mubr.bf16.vlgmr.msra.gmra.mrb[0].mxu0 %v13871_v37  ;;  %v17573_v37 = vld [vmem:[%s22018_s1 + $0x180] sm:$0xff]   ;;  %v3362_v27 = vrot.slane %v18635_v7, 5  ;;  %v3366_v3 = vrot.slane %v18316_v17, 5  ;;  %v13835_v40 = vld [vmem:[%s18102_s16 + $0xa8] sm:$0xe]  ;;  %v13850_v54 = vrot.slane %v13834_v20, 9 }
 0x111   : > { %15378 = vmatpush3.bf16.msra.mxu0 %v17573_v37  ;;  %15349 = vmatprep.mubr.bf16.mxu0 %v13872_v19  ;;  %v18621_v19 = vld [vmem:[%s22018_s1 + $0x198] sm:$0xff]   ;;  %v18655_v42 = vld [vmem:[%s18102_s16 + $0x40] sm:$0xf]  ;;  %v17581_v46 = vld [vmem:[%s18102_s16 + $0x48] sm:$0xf]  ;;  %v3394_v63 = vrot.slane %v18397_v18, 5  ;;  %v18703_v18 = vsel %vm18507_vm5, %v13845_v30, %v3359_v4 }
 0x112   : > { %15379 = vmatprep.subr.bf16.mxu0 %v17311_v29  ;;  %15188 = vmatpush3.bf16.msra.mxu1 %v17322_v1  ;;  %v13833_v1 = vld [vmem:[%s18102_s16 + $0x90] sm:$0xe]  ;;  %v17579_v13 = vld [vmem:[%s18102_s16 + $0x3c] sm:$0xf]  ;;  %v18660_v37 = vld [vmem:[%s18102_s16 + $0x4c] sm:$0xf] }
 0x113   : > { %15189 = vmatprep.subr.bf16.mxu1 %v17325_v36  ;;  %v13587_v44 = vcombine.low %v17579_v13, %v18655_v42  ;;  %v13588_v47 = vcombine.low %v17581_v46, %v18660_v37  ;;  %v13849_v49 = vrot.slane %v13833_v1, 9  ;;  %v18665_v50 = vld [vmem:[%s18102_s16 + $0x54] sm:$0xf]  ;;  %v3387_v13 = vrot.slane %v18374_v32, 5  ;;  %v18710_v48 = vld [vmem:[%s18102_s16 + $0x78] sm:$0xe] }
 0x114   : > { %v13875_v1 = vcombine.low %v18616_v15, %v18627_v23  ;;  %v3368_v32 = vrot.slane %v3366_v3, 4  ;;  %v3397_v15 = vrot.slane %v18400_v24, 5  ;;  %v13837_v23 = vld [vmem:[%s18102_s16 + $0xc0] sm:$0xe]  ;;  %v18707_v20 = vsel %vm18507_vm5, %v13850_v54, %v3394_v63  ;;  %v17335_v17 = vld [vmem:[%s22018_s1 + $0xb0] sm:$0xff]  }
 0x115   : > { %15158 = vmatmul.mubr.bf16.gmra.mrb[4].mxu1 %v13585_v35  ;;  %15380 = vmatpush3.bf16.msra.mxu0 %v17311_v29  ;;  %v18641_v29 = vsel %vm18507_vm5, %v3354_v60, %v3355_v53  ;;  %v18643_v35 = vrot.slane %v3359_v4, 4  ;;  %v18668_v53 = vld [vmem:[%s18102_s16 + $0x58] sm:$0xf]  ;;  %v18676_v60 = vld [vmem:[%s18102_s16 + $0x64] sm:$0xf]  ;;  %v17326_v4 = vld [vmem:[%s22018_s1 + $0x1a8] sm:$0xff]  }
 0x116   : > { %15161 = vmatprep.mubr.bf16.mxu1 %v13586_v58  ;;  %15381 = vmatprep.subr.bf16.mxu0 %v18587_v22  ;;  %v18673_v58 = vld [vmem:[%s18102_s16 + $0x60] sm:$0xf]  ;;  %v13876_v46 = vcombine.low %v18631_v21, %v18641_v29  ;;  %v3396_v21 = vrot.slane %v3394_v63, 4  ;;  %v13851_v29 = vrot.slane %v13835_v40, 9  ;;  %v3404_v30 = vrot.slane %v18429_v10, 5  ;;  %v17332_v40 = vld [vmem:[%s22018_s1 + $0xa8] sm:$0xff]  }
 0x117   : > { %15190 = vmatpush3.bf16.msra.mxu1 %v17325_v36  ;;  %v3390_v36 = vrot.slane %v18381_v41, 5  ;;  %v17321_v41 = vld [vmem:[%s22018_s1 + $0x1a0] sm:$0xff]   ;;  %v3415_v6 = vrot.slane %v18481_v56, 5  ;;  %v17331_v56 = vld [vmem:[%s22018_s1 + $0x1b0] sm:$0xff]   ;;  %v22210_v7 = vrot.slane %v18319_v28, 5 }
 0x118   : > { %15350 = vmatmul.mubr.bf16.gmra.mrb[4].mxu0 %v13873_v11  ;;  %15191 = vmatprep.subr.bf16.mxu1 %v17327_v2  ;;  %v13836_v11 = vld [vmem:[%s18102_s16 + $0xb4] sm:$0xe]  ;;  %v18731_v63 = vsel %vm18507_vm5, %v3396_v21, %v3397_v15  ;;  %v13853_v15 = vrot.slane %v13837_v23, 9  ;;  %v3380_v21 = vrot.slane %v18355_v43, 5  ;;  %v3363_v43 = vsel %vm18507_vm5, %v18643_v35, %v3362_v27  ;;  %v17587_v23 = vld [vmem:[%s18102_s16 + $0x80] sm:$0x1] }
 0x119   : > { %15353 = vmatprep.mubr.bf16.mxu0 %v13874_v12  ;;  %15382 = vmatpush3.bf16.msra.mxu0 %v18587_v22  ;;  %v18697_v12 = vsel %vm18507_vm5, %v13849_v49, %v3387_v13  ;;  %v3389_v22 = vrot.slane %v3387_v13, 4  ;;  %v3373_v49 = vrot.slane %v18335_v55, 5  ;;  %v13852_v13 = vrot.slane %v13836_v11, 9 }
 0x11a   : > { %15383 = vmatprep.subr.bf16.mxu0 %v18621_v19  ;;  %v13882_v10 = vcombine.low %v18707_v20, %v18731_v63  ;;  %v18786_v35 = vsel %vm18507_vm5, %v13853_v15, %v3415_v6 }
 0x11b   : > { %15192 = vmatpush3.bf16.msra.mxu1 %v17327_v2  ;;  %v18715_v24 = vsel %vm18507_vm5, %v3389_v22, %v3390_v36  ;;  %v3401_v2 = vrot.slane %v18423_v62, 5  ;;  %v3408_v36 = vrot.slane %v18454_v0, 5  ;;  %v13832_v62 = vld [vmem:[%s18102_s16 + $0x84] sm:$0xe]  ;;  %v3411_v22 = vrot.slane %v18458_v8, 5 }
 0x11c   : > { %15193 = vmatprep.subr.bf16.mxu1 %v18650_v26  ;;  %v13881_v54 = vcombine.low %v18697_v12, %v18715_v24  ;;  %v3367_v0 = vsel %vm18507_vm5, %v13846_v33, %v3366_v3  ;;  %v3418_v33 = vrot.slane %v18489_v14, 5  ;;  %v13847_v3 = vrot.slane %v18710_v48, 9  ;;  %v17606_v24 = vld [vmem:[%s18102_s16 + $0x80] sm:$0x1] }
 0x11d   : > { %15162 = vmatmul.mubr.bf16.gmra.mrb[8].mxu1 %v13587_v44  ;;  %15384 = vmatpush3.bf16.msra.mxu0 %v18621_v19  ;;  %v18739_v44 = vsel %vm18507_vm5, %v13851_v29, %v3401_v2  ;;  %v3403_v19 = vrot.slane %v3401_v2, 4  ;;  %v3410_v11 = vrot.slane %v3408_v36, 4  ;;  %v3417_v48 = vrot.slane %v3415_v6, 4 }
 0x11e   : > { %15165 = vmatprep.mubr.bf16.mxu1 %v13588_v47  ;;  %15385 = vmatprep.subr.bf16.mxu0 %v17321_v41  ;;  %v18751_v47 = vsel %vm18507_vm5, %v13852_v13, %v3408_v36  ;;  %v3375_v28 = vrot.slane %v3373_v49, 4  ;;  %v13848_v29 = vrot.slane %v13832_v62, 9  ;;  %v3383_v2 = vrot.slane %v18358_v52, 5 }
 0x11f   : > { %15194 = vmatpush3.bf16.msra.mxu1 %v18650_v26  ;;  %v18756_v8 = vsel %vm18507_vm5, %v3403_v19, %v3404_v30  ;;  %v18776_v14 = vsel %vm18507_vm5, %v3410_v11, %v3411_v22  ;;  %v13877_v30 = vcombine.low %v18703_v18, %v3363_v43  ;;  %v3382_v13 = vrot.slane %v3380_v21, 4  ;;  %v17607_v26 = vld [vmem:[%s18102_s16 + $0x8c] sm:$0x1] }
 0x120   : > { %15354 = vmatmul.mubr.bf16.gmra.mrb[8].mxu0 %v13875_v1  ;;  %15195 = vmatprep.subr.bf16.mxu1 %v17332_v40  ;;  %v3370_v1 = vsel %vm18507_vm5, %v3368_v32, %v22210_v7  ;;  %v3376_v32 = vrot.slane %v17587_v23, 5  ;;  %v18799_v36 = vsel %vm18507_vm5, %v3417_v48, %v3418_v33  ;;  %v1671_v19 = vrot.slane %v18504_v59, 5  ;;  %v17336_v59 = vld [vmem:[%s22018_s1 + $0x1b8] sm:$0xff]   ;;  %v17589_v33 = vld [vmem:[%s18102_s16 + $0x14] sm:$0x1] }
 0x121   : > { %15357 = vmatprep.mubr.bf16.mxu0 %v13876_v46  ;;  %15386 = vmatpush3.bf16.msra.mxu0 %v17321_v41  ;;  %v17337_v46 = vld [vmem:[%s22018_s1 + $0xb8] sm:$0xff]   ;;  %v1618_v41 = vld [vmem:[%s18102_s16] sm:$0xe]  ;;  %v22211_v22 = vcombine.low %v18665_v50, %v18668_v53  ;;  %v13878_v11 = vcombine.low %v3367_v0, %v3370_v1  ;;  %v22212_v62 = vcombine.low %v18673_v58, %v18676_v60  ;;  %v1678_v6 = vrot.slane %v18538_v5, 5  ;;  %v18842_v7 = vld [vmem:[%s18102_s16 + $0x70] sm:$0xf] }
 0x122   : > { %15387 = vmatprep.subr.bf16.mxu0 %v17326_v4  ;;  %v18818_v50 = vsel %vm18507_vm5, %v13847_v3, %v3373_v49  ;;  %v13606_v58 = vrot.slane %v1618_v41, 9  ;;  %v18827_v0 = vld [vmem:[%s22018_s1 + $0xc0] sm:$0xff]   ;;  %v18831_v55 = vsel %vm18507_vm5, %v13848_v29, %v3380_v21  ;;  %v18835_v49 = vsel %vm18507_vm5, %v3382_v13, %v3383_v2  ;;  %v17590_v3 = vld [vmem:[%s18102_s16 + $0x6c] sm:$0xf]  ;;  %v1620_v1 = vld [vmem:[%s18102_s16 + $0x18] sm:$0xe] }
 0x123   : > { %15196 = vmatpush3.bf16.msra.mxu1 %v17332_v40  ;;  %v17588_v40 = vld [vmem:[%s18102_s16 + $0x8] sm:$0x1]  ;;  %v1673_v15 = vrot.slane %v1671_v19, 4  ;;  %v1681_v43 = vrot.slane %v17589_v33, 5  ;;  %v13591_v21 = vcombine.low %v17590_v3, %v18842_v7  ;;  %v1685_v48 = vrot.slane %v18545_v51, 5  ;;  %v18858_v29 = vld [vmem:[%s22018_s1 + $0x1c0] sm:$0xff]  }
 0x124   : > { %15197 = vmatprep.subr.bf16.mxu1 %v17335_v17  ;;  %v1674_v18 = vrot.slane %v17588_v40, 5  ;;  %v1621_v41 = vld [vmem:[%s18102_s16 + $0x24] sm:$0xe]  ;;  %v17592_v23 = vld [vmem:[%s18102_s16 + $0x78] sm:$0xf]  ;;  %v13880_v2 = vcombine.low %v18831_v55, %v18835_v49  ;;  %v13608_v40 = vrot.slane %v1620_v1, 9  ;;  %v13595_v1 = vcombine.low %v18408_v38, %v18411_v45 }
 0x125   : > { %15166 = vmatmul.mubr.bf16.gmra.mrb[12].mxu1 %v22211_v22  ;;  %15388 = vmatpush3.bf16.msra.mxu0 %v17326_v4  ;;  %v18822_v4 = vsel %vm18507_vm5, %v3375_v28, %v3376_v32  ;;  %v18852_v5 = vld [vmem:[%s18102_s16 + $0x7c] sm:$0xf]  ;;  %v1622_v51 = vld [vmem:[%s18102_s16 + $0x30] sm:$0xe]  ;;  %v1699_v22 = vrot.slane %v18603_v57, 5  ;;  %v1727_v52 = vrot.slane %v18676_v60, 5  ;;  %v22214_v38 = vcombine.low %v18432_v16, %v18437_v25 }
 0x126   : > { %15169 = vmatprep.mubr.bf16.mxu1 %v22212_v62  ;;  %15389 = vmatprep.subr.bf16.mxu0 %v17331_v56  ;;  %v13879_v28 = vcombine.low %v18818_v50, %v18822_v4  ;;  %v13592_v32 = vcombine.low %v17592_v23, %v18852_v5  ;;  %v17594_v62 = vld [vmem:[%s18102_s16 + $0x20] sm:$0x1]  ;;  %v13609_v4 = vrot.slane %v1621_v41, 9  ;;  %v17595_v57 = vld [vmem:[%s18102_s16 + $0x2c] sm:$0x1]  ;;  %v13610_v55 = vrot.slane %v1622_v51, 9 }
 0x127   : > { %15198 = vmatpush3.bf16.msra.mxu1 %v17335_v17  ;;  %v1619_v17 = vld [vmem:[%s18102_s16 + $0xc] sm:$0xe]  ;;  %v1688_v50 = vrot.slane %v17594_v62, 5  ;;  %v18879_v49 = vld [vmem:[%s18102_s16 + $0x88] sm:$0xf]  ;;  %v1701_v23 = vrot.slane %v1699_v22, 4 }
 0x128   : > { %15358 = vmatmul.mubr.bf16.gmra.mrb[12].mxu0 %v13877_v30  ;;  %15199 = vmatprep.subr.bf16.mxu1 %v17337_v46  ;;  %v18866_v30 = vsel %vm18507_vm5, %v13606_v58, %v1671_v19  ;;  %v13607_v13 = vrot.slane %v1619_v17, 9  ;;  %v1687_v19 = vrot.slane %v1685_v48, 4  ;;  %v1695_v58 = vrot.slane %v17595_v57, 5  ;;  %v17598_v17 = vld [vmem:[%s18102_s16 + $0x90] sm:$0xf] }
 0x129   : > { %15361 = vmatprep.mubr.bf16.mxu0 %v13878_v11  ;;  %15390 = vmatpush3.bf16.msra.mxu0 %v17331_v56  ;;  %v1692_v56 = vrot.slane %v18571_v31, 5  ;;  %v18871_v11 = vsel %vm18507_vm5, %v1673_v15, %v1674_v18  ;;  %v1680_v31 = vrot.slane %v1678_v6, 4  ;;  %v17596_v18 = vld [vmem:[%s18102_s16 + $0x84] sm:$0xf]  ;;  %v18884_v33 = vld [vmem:[%s18102_s16 + $0x94] sm:$0xf] }
 0x12a   : > { %15391 = vmatprep.subr.bf16.mxu0 %v17336_v59  ;;  %v13593_v15 = vcombine.low %v17596_v18, %v18879_v49  ;;  %v13594_v3 = vcombine.low %v17598_v17, %v18884_v33  ;;  %v18904_v18 = vsel %vm18507_vm5, %v13608_v40, %v1685_v48  ;;  %v1624_v17 = vld [vmem:[%s18102_s16 + $0x48] sm:$0xe]  ;;  %v1627_v57 = vld [vmem:[%s18102_s16 + $0x6c] sm:$0xe]  ;;  %v1751_v41 = vrot.slane %v17607_v26, 5 }
 0x12b   : > { %15200 = vmatpush3.bf16.msra.mxu1 %v17337_v46  ;;  %v1623_v46 = vld [vmem:[%s18102_s16 + $0x3c] sm:$0xe]  ;;  %v17609_v25 = vld [vmem:[%s18102_s16 + $0x98] sm:$0x1] }
 0x12c   : > { %15233 = vmatprep.subr.bf16.mxu1 %v18827_v0 }
 0x12d   : > { %15170 = vmatmul.mubr.bf16.gmra.mrb[16].mxu1 %v13591_v21  ;;  %15392 = vmatpush3.bf16.msra.mxu0 %v17336_v59  ;;  %v1694_v59 = vrot.slane %v1692_v56, 4  ;;  %v1706_v21 = vrot.slane %v18655_v42, 5  ;;  %v18900_v42 = vsel %vm18507_vm5, %v13607_v13, %v1678_v6  ;;  %v18917_v6 = vsel %vm18507_vm5, %v13609_v4, %v1692_v56 }
 0x12e   : > { %15173 = vmatprep.mubr.bf16.mxu1 %v13592_v32  ;;  %15425 = vmatprep.subr.bf16.mxu0 %v18858_v29  ;;  %v17600_v32 = vld [vmem:[%s18102_s16 + $0x38] sm:$0x1]  ;;  %v13611_v13 = vrot.slane %v1623_v46, 9  ;;  %v13612_v56 = vrot.slane %v1624_v17, 9  ;;  %v1713_v46 = vrot.slane %v18660_v37, 5  ;;  %v1720_v4 = vrot.slane %v18668_v53, 5 }
 0x12f   : > { %v1702_v51 = vrot.slane %v17600_v32, 5  ;;  %v18913_v32 = vsel %vm18507_vm5, %v1687_v19, %v1688_v50  ;;  %v18921_v48 = vsel %vm18507_vm5, %v1694_v59, %v1695_v58  ;;  %v1625_v50 = vld [vmem:[%s18102_s16 + $0x54] sm:$0xe]  ;;  %v1626_v58 = vld [vmem:[%s18102_s16 + $0x60] sm:$0xe]  ;;  %v1734_v17 = vrot.slane %v18842_v7, 5 }
 0x130   : > { %15362 = vmatmul.mubr.bf16.gmra.mrb[16].mxu0 %v13879_v28  ;;  %v18909_v28 = vsel %vm18507_vm5, %v1680_v31, %v1681_v43  ;;  %v1708_v43 = vrot.slane %v1706_v21, 4  ;;  %v17601_v31 = vld [vmem:[%s18102_s16 + $0x44] sm:$0x1]  ;;  %v18948_v53 = vsel %vm18507_vm5, %v13611_v13, %v1706_v21  ;;  %v1629_v37 = vld [vmem:[%s18102_s16 + $0x84] sm:$0xe]  ;;  %v1748_v21 = vrot.slane %v18879_v49, 5 }
 0x131   : > { %15365 = vmatprep.mubr.bf16.mxu0 %v13880_v2  ;;  %v18925_v2 = vsel %vm18507_vm5, %v13610_v55, %v1699_v22  ;;  %v1709_v40 = vrot.slane %v17601_v31, 5  ;;  %v18931_v19 = vsel %vm18507_vm5, %v1701_v23, %v1702_v51  ;;  %v17602_v55 = vld [vmem:[%s18102_s16 + $0x50] sm:$0x1]  ;;  %v1628_v23 = vld [vmem:[%s18102_s16 + $0x78] sm:$0xe]  ;;  %v13613_v51 = vrot.slane %v1625_v50, 9 }
 0x132   : > { %v1716_v31 = vrot.slane %v17602_v55, 5  ;;  %v18962_v13 = vsel %vm18507_vm5, %v13612_v56, %v1713_v46  ;;  %v1715_v7 = vrot.slane %v1713_v46, 4  ;;  %v17603_v50 = vld [vmem:[%s18102_s16 + $0x5c] sm:$0x1]  ;;  %v13615_v59 = vrot.slane %v1627_v57, 9 }
 0x133   : > { %v18955_v60 = vsel %vm18507_vm5, %v1708_v43, %v1709_v40  ;;  %v1723_v55 = vrot.slane %v17603_v50, 5  ;;  %v13614_v43 = vrot.slane %v1626_v58, 9  ;;  %v17604_v40 = vld [vmem:[%s18102_s16 + $0x68] sm:$0x1]  ;;  %v1630_v49 = vld [vmem:[%s18102_s16 + $0x90] sm:$0xe]  ;;  %v18984_v63 = vsel %vm18507_vm5, %v13613_v51, %v1720_v4 }
 0x134   : > { %v1730_v22 = vrot.slane %v17604_v40, 5  ;;  %v1736_v56 = vrot.slane %v1734_v17, 4  ;;  %v17605_v46 = vld [vmem:[%s18102_s16 + $0x74] sm:$0x1]  ;;  %v13616_v50 = vrot.slane %v1628_v23, 9  ;;  %v13617_v27 = vrot.slane %v1629_v37, 9 }
 0x135   : > { %15174 = vmatmul.mubr.bf16.gmra.mrb[20].mxu1 %v13593_v15  ;;  %v1741_v15 = vrot.slane %v18852_v5, 5  ;;  %v1729_v5 = vrot.slane %v1727_v52, 4  ;;  %v1737_v62 = vrot.slane %v17605_v46, 5  ;;  %v1750_v58 = vrot.slane %v1748_v21, 4  ;;  %v1631_v23 = vld [vmem:[%s18102_s16 + $0x9c] sm:$0xe] }
 0x136   : > { %15177 = vmatprep.mubr.bf16.mxu1 %v13594_v3  ;;  %v1722_v3 = vrot.slane %v1720_v4, 4  ;;  %v18980_v20 = vsel %vm18507_vm5, %v1715_v7, %v1716_v31  ;;  %v18994_v26 = vsel %vm18507_vm5, %v13614_v43, %v1727_v52  ;;  %v19002_v4 = vsel %vm18507_vm5, %v13615_v59, %v1734_v17  ;;  %v13966_v51 = vld [vmem:[%s18102_s16 + $0x18] sm:$0xf]  ;;  %v19021_v17 = vld [vmem:[%s18102_s16 + $0x1c] sm:$0xf] }
 0x137   : > { %v1743_v12 = vrot.slane %v1741_v15, 4  ;;  %v18998_v31 = vsel %vm18507_vm5, %v1729_v5, %v1730_v22  ;;  %v19014_v52 = vsel %vm18507_vm5, %v13616_v50, %v1741_v15  ;;  %v19018_v22 = vsel %vm18507_vm5, %v13617_v27, %v1748_v21  ;;  %22213 = vst [vmem:[#allocation24_spill] sm:$0xff] %v19021_v17  ;;  %v1632_v5 = vld [vmem:[%s18102_s16 + $0xa8] sm:$0xe]  ;;  %v1633_v46 = vld [vmem:[%s18102_s16 + $0xb4] sm:$0xe] }
 0x138   : > { %15366 = vmatmul.mubr.bf16.gmra.mrb[20].mxu0 %v13881_v54  ;;  %v1744_v54 = vrot.slane %v17606_v24, 5  ;;  %v18990_v37 = vsel %vm18507_vm5, %v1722_v3, %v1723_v55  ;;  %v13618_v59 = vrot.slane %v1630_v49, 9  ;;  %v17608_v55 = vld [vmem:[%s18102_s16 + $0xa0] sm:$0xf]  ;;  %v1758_v7 = vrot.slane %v17609_v25, 5 }
 0x139   : > { %15369 = vmatprep.mubr.bf16.mxu0 %v13882_v10  ;;  %v1755_v10 = vrot.slane %v18884_v33, 5  ;;  %v19010_v33 = vsel %vm18507_vm5, %v1736_v56, %v1737_v62  ;;  %v13619_v62 = vrot.slane %v1631_v23, 9  ;;  %v1762_v27 = vrot.slane %v17608_v55, 5  ;;  %v13969_v24 = vld [vmem:[%s18102_s16 + $0x24] sm:$0xf]  ;;  %v17338_v55 = vld [vmem:[%s18102_s16 + $0x18] sm:$0xff]  }
 0x13a   : > { %v19028_v45 = vsel %vm18507_vm5, %v1743_v12, %v1744_v54  ;;  %v22215_v3 = vcombine.low %v18739_v44, %v18756_v8  ;;  %v4178_v40 = vshrl.u32 %v13966_v51, 16  ;;  %v4181_v49 = vshll.u32 %v13966_v51, 16  ;;  %v19069_v51 = vld [vmem:[%s18102_s16 + $0x20] sm:$0x1]  ;;  %v13972_v44 = vld [vmem:[%s18102_s16 + $0x30] sm:$0xf] }
 0x13b   : > { %v1757_v16 = vrot.slane %v1755_v10, 4  ;;  %v22216_v56 = vcombine.low %v18751_v47, %v18776_v14  ;;  %v4187_v50 = vshll.u32 %v19021_v17, 16  ;;  %v4191_v12 = vshrl.u32 %v19021_v17, 16  ;;  %22217 = vst [vmem:[#allocation25_spill] sm:$0xff] %v19069_v51  ;;  %v17613_v15 = vld [vmem:[%s18102_s16 + $0xbc] sm:$0x1] }
 0x13c   : > { %v19061_v54 = vsel %vm18507_vm5, %v13618_v59, %v1755_v10  ;;  %v19065_v47 = vsel %vm18507_vm5, %v13619_v62, %v1762_v27  ;;  %v1764_v14 = vrot.slane %v1762_v27, 4  ;;  %v13620_v10 = vrot.slane %v1632_v5, 9  ;;  %v17611_v59 = vld [vmem:[%s18102_s16 + $0xac] sm:$0xf] }
 0x13d   : > { %15178 = vmatmul.mubr.bf16.gmra.mrb[24].mxu1 %v13595_v1  ;;  %v19032_v1 = vsel %vm18507_vm5, %v1750_v58, %v1751_v41  ;;  %v17610_v58 = vld [vmem:[%s18102_s16 + $0xa4] sm:$0x1]  ;;  %v19077_v25 = vsel %vm18507_vm5, %v1757_v16, %v1758_v7  ;;  %v1776_v62 = vrot.slane %v18470_v34, 5  ;;  %v4183_v27 = vrot.slane %v4181_v49, 5  ;;  %v19114_v49 = vld [vmem:[%s18102_s16 + $0x2c] sm:$0x1] }
 0x13e   : > { %15181 = vmatprep.mubr.bf16.mxu1 %v22214_v38  ;;  %v1765_v23 = vrot.slane %v17610_v58, 5  ;;  %v19072_v38 = vld [vmem:[%s18102_s16 + $0x28] sm:$0xf]  ;;  %v4202_v58 = vshrl.u32 %v13969_v24, 16  ;;  %v4205_v8 = vshll.u32 %v13969_v24, 16  ;;  %v22219_v43 = vcombine.low %v18461_v9, %v18470_v34  ;;  %22223 = vst [vmem:[#allocation28_spill] sm:$0xff] %v19114_v49 }
 0x13f   : > { %22218 = vst [vmem:[#allocation26_spill] sm:$0xff] %v19072_v38  ;;  %v19085_v41 = vrot.slane %v4187_v50, 5  ;;  %v4193_v16 = vrot.slane %v4191_v12, 4  ;;  %v4211_v7 = vshll.u32 %v19072_v38, 16  ;;  %v4215_v5 = vshrl.u32 %v19072_v38, 16 }
 0x140   : > { %15370 = vmatmul.mubr.bf16.gmra.mrb[24].mxu0 %v22215_v3  ;;  %v1769_v3 = vrot.slane %v17611_v59, 5  ;;  %v19090_v59 = vld [vmem:[%s18102_s16 + $0x34] sm:$0xf]  ;;  %v19099_v9 = vsel %vm18507_vm5, %v1764_v14, %v1765_v23  ;;  %v17612_v34 = vld [vmem:[%s18102_s16 + $0xb0] sm:$0x1]  ;;  %v13621_v50 = vrot.slane %v1633_v46, 9 }
 0x141   : > { %15373 = vmatprep.mubr.bf16.mxu0 %v22216_v56  ;;  %v4180_v56 = vrot.slane %v4178_v40, 4  ;;  %22220 = vst [vmem:[#allocation27_spill] sm:$0xff] %v19090_v59  ;;  %v22221_v40 = vcombine.low %v18866_v30, %v18871_v11  ;;  %v13975_v12 = vld [vmem:[%s18102_s16 + $0x3c] sm:$0xf]  ;;  %v1778_v21 = vrot.slane %v1776_v62, 4  ;;  %v1779_v57 = vrot.slane %v17613_v15, 5 }
 0x142   : > { %v1771_v24 = vrot.slane %v1769_v3, 4  ;;  %v4197_v30 = vshll.u32 %v19069_v51, 16  ;;  %v22222_v11 = vcombine.low %v18786_v35, %v18799_v36  ;;  %v19110_v14 = vsel %vm18507_vm5, %v13620_v10, %v1769_v3  ;;  %v17339_v35 = vld [vmem:[%s18102_s16 + $0x24] sm:$0xff]  }
 0x143   : > { %v4184_v23 = vor.u32 %v4183_v27, %v4180_v56  ;;  %v4207_v46 = vrot.slane %v4205_v8, 5  ;;  %v19116_v15 = vrot.slane %v4211_v7, 5  ;;  %v4217_v38 = vrot.slane %v4215_v5, 4  ;;  %v17354_v36 = vld [vmem:[%s22018_s1 + $0xc8] sm:$0xff]   ;;  %v17341_v56 = vld [vmem:[%s18102_s16 + $0x30] sm:$0xff]  }
 0x144   : > { %v4226_v51 = vshrl.u32 %v13972_v44, 16  ;;  %v4229_v8 = vshll.u32 %v13972_v44, 16  ;;  %v4239_v3 = vshrl.u32 %v19090_v59, 16  ;;  %v4250_v7 = vshrl.u32 %v13975_v12, 16  ;;  %v17343_v44 = vld [vmem:[%s22018_s1 + $0x1c8] sm:$0xff]  }
 0x145   : > { %15182 = vmatmul.mubr.bf16.gmra.mrb[28].mxu1 %v22219_v43  ;;  %v1772_v43 = vrot.slane %v17612_v34, 5  ;;  %v4194_v34 = vor.u32 %v4193_v16, %v19085_v41  ;;  %v19136_v16 = vld [vmem:[%s18102_s16 + $0x40] sm:$0xf]  ;;  %v4253_v5 = vshll.u32 %v13975_v12, 16  ;;  %v4199_v10 = vrot.slane %v4197_v30, 5 }
 0x146   : > { %15201 = vmatprep.mubr.bf16.mxu1 %v22221_v40  ;;  %v4204_v40 = vrot.slane %v4202_v58, 4  ;;  %v19133_v58 = vsel %vm18507_vm5, %v13621_v50, %v1776_v62  ;;  %22225 = vst [vmem:[#allocation30_spill] sm:$0xff] %v19136_v16  ;;  %v22227_v62 = vcombine.low %v18900_v42, %v18909_v28  ;;  %v19153_v50 = vld [vmem:[%s22018_s1 + $0xd0] sm:$0xff]   ;;  %v4185_v12 = vrot.slane %v4184_v23, 4  ;;  %v22357_v39 = vld [vmem:[#allocation26_spill] sm:$0xff] }
 0x147   : > { %v19129_v27 = vsel %vm18507_vm5, %v1771_v24, %v1772_v43  ;;  %22224 = vst [vmem:[#allocation29_spill] sm:$0xff] %v19133_v58  ;;  %v4221_v24 = vshll.u32 %v19114_v49, 16  ;;  %v4195_v17 = vrot.slane %v4194_v34, 4  ;;  %v4218_v61 = vor.u32 %v4217_v38, %v19116_v15  ;;  %v19364_v58 = vld [vmem:[%s18102_s16 + $0x94] sm:$0xf] }
 0x148   : > { %15374 = vmatmul.mubr.bf16.gmra.mrb[28].mxu0 %v22222_v11  ;;  %v19143_v11 = vsel %vm18507_vm5, %v1778_v21, %v1779_v57  ;;  %v4208_v43 = vor.u32 %v4207_v46, %v4204_v40  ;;  %v19157_v57 = vld [vmem:[%s18102_s16 + $0x38] sm:$0x1]  ;;  %v4228_v21 = vrot.slane %v4226_v51, 4  ;;  %v22229_v30 = vcombine.low %v18904_v18, %v18913_v32  ;;  %22249 = vst [vmem:[#allocation48_spill] sm:$0xff] %v19364_v58 }
 0x149   : > { %15393 = vmatprep.mubr.bf16.mxu0 %v17338_v55  ;;  %v4235_v55 = vshll.u32 %v19090_v59, 16  ;;  %22226 = vst [vmem:[#allocation31_spill] sm:$0xff] %v19143_v11  ;;  %v13978_v59 = vld [vmem:[%s18102_s16 + $0x48] sm:$0xf]  ;;  %22228 = vst [vmem:[#allocation32_spill] sm:$0xff] %v19157_v57  ;;  %v4231_v42 = vrot.slane %v4229_v8, 5 }
 0x14a   : > { %v4241_v40 = vrot.slane %v4239_v3, 4  ;;  %v4259_v46 = vshll.u32 %v19136_v16, 16  ;;  %v4252_v23 = vrot.slane %v4250_v7, 4  ;;  %v4255_v34 = vrot.slane %v4253_v5, 5  ;;  %v19174_v8 = vld [vmem:[%s18102_s16 + $0x4c] sm:$0xf] }
 0x14b   : > { %v19163_v28 = vrot.slane %v4235_v55, 5  ;;  %v4263_v38 = vshrl.u32 %v19136_v16, 16  ;;  %v4274_v51 = vshrl.u32 %v13978_v59, 16  ;;  %v19171_v32 = vrot.slane %v4208_v43, 4  ;;  %22230 = vst [vmem:[#allocation33_spill] sm:$0xff] %v19174_v8  ;;  %v17342_v43 = vld [vmem:[%s18102_s16 + $0x3c] sm:$0xff]  }
 0x14c   : > { %v4277_v55 = vshll.u32 %v13978_v59, 16  ;;  %v4190_v3 = vsel %vm18129_vm2, %v4185_v12, %v19085_v41  ;;  %v4200_v7 = vsel %vm18129_vm2, %v4195_v17, %v4199_v10  ;;  %v19185_v5 = vrot.slane %v4221_v24, 5  ;;  %v13981_v41 = vld [vmem:[%s18102_s16 + $0x54] sm:$0xf]  ;;  %v19199_v17 = vld [vmem:[%s18102_s16 + $0x58] sm:$0xf] }
 0x14d   : > { %15202 = vmatmul.mubr.bf16.vlgmr.msra.gmra.mrb[0].mxu1 %v22227_v62  ;;  %v4245_v59 = vshll.u32 %v19157_v57, 16  ;;  %v4242_v62 = vor.u32 %v4241_v40, %v19163_v28  ;;  %22232 = vst [vmem:[#allocation35_spill] sm:$0xff] %v19199_v17  ;;  %v17359_v10 = vld [vmem:[%s22018_s1 + $0xd8] sm:$0xff]   ;;  %v4276_v24 = vrot.slane %v4274_v51, 4  ;;  %v4283_v12 = vshll.u32 %v19174_v8, 16 }
 0x14e   : > { %15205 = vmatprep.mubr.bf16.mxu1 %v22229_v30  ;;  %15234 = vmatpush3.bf16.msra.mxu1 %v18827_v0  ;;  %v19193_v30 = vld [vmem:[%s18102_s16 + $0x44] sm:$0x1]  ;;  %v19195_v0 = vrot.slane %v4259_v46, 5  ;;  %v4214_v40 = vsel %vm18129_vm2, %v19171_v32, %v19116_v15  ;;  %v4279_v46 = vrot.slane %v4277_v55, 5  ;;  %v4287_v18 = vshrl.u32 %v19174_v8, 16 }
 0x14f   : > { %15235 = vmatprep.subr.bf16.mxu1 %v17354_v36  ;;  %22231 = vst [vmem:[#allocation34_spill] sm:$0xff] %v19193_v30  ;;  %v4298_v51 = vshrl.u32 %v13981_v41, 16  ;;  %v4311_v15 = vshrl.u32 %v19199_v17, 16  ;;  %v22235_v32 = vcombine.low %v18925_v2, %v18931_v19  ;;  %v19240_v2 = vrot.slane %v4242_v62, 4  ;;  %v19263_v16 = vld [vmem:[%s18102_s16 + $0x68] sm:$0x1] }
 0x150   : > { %15394 = vmatmul.mubr.bf16.vlgmr.msra.gmra.mrb[0].mxu0 %v17339_v35  ;;  %v17346_v35 = vld [vmem:[%s22018_s1 + $0x1d0] sm:$0xff]   ;;  %v4280_v62 = vor.u32 %v4279_v46, %v4276_v24  ;;  %22239 = vst [vmem:[#allocation40_spill] sm:$0xff] %v19263_v16 }
 0x151   : > { %15426 = vmatpush3.bf16.msra.mxu0 %v18858_v29  ;;  %15397 = vmatprep.mubr.bf16.mxu0 %v17341_v56  ;;  %v19189_v29 = vrot.slane %v4218_v61, 4  ;;  %v4232_v56 = vor.u32 %v4231_v42, %v4228_v21  ;;  %v4265_v61 = vrot.slane %v4263_v38, 4  ;;  %v13984_v21 = vld [vmem:[%s18102_s16 + $0x60] sm:$0xf]  ;;  %v19207_v42 = vcombine.low %v4190_v3, %v4200_v7  ;;  %v17349_v38 = vld [vmem:[%s22018_s1 + $0x1d8] sm:$0xff]  }
 0x152   : > { %15427 = vmatprep.subr.bf16.mxu0 %v17343_v44  ;;  %15236 = vmatpush3.bf16.msra.mxu1 %v17354_v36  ;;  %v4256_v36 = vor.u32 %v4255_v34, %v4252_v23  ;;  %v22234_v23 = vcombine.low %v18917_v6, %v18921_v48  ;;  %v17344_v34 = vld [vmem:[%s18102_s16 + $0x48] sm:$0xff]   ;;  %v4301_v3 = vshll.u32 %v13981_v41, 16  ;;  %v4307_v7 = vshll.u32 %v19199_v17, 16  ;;  %v19231_v48 = vld [vmem:[%s18102_s16 + $0x50] sm:$0x1]  ;;  %v17361_v17 = vld [vmem:[%s22018_s1 + $0xe0] sm:$0xff]  }
 0x153   : > { %15237 = vmatprep.subr.bf16.mxu1 %v19153_v50  ;;  %22233 = vst [vmem:[#allocation36_spill] sm:$0xff] %v19207_v42  ;;  %v19226_v55 = vrot.slane %v4232_v56, 4  ;;  %v19228_v6 = vrot.slane %v4245_v59, 5  ;;  %22236 = vst [vmem:[#allocation37_spill] sm:$0xff] %v19231_v48  ;;  %v4325_v41 = vshll.u32 %v13984_v21, 16  ;;  %v4266_v59 = vor.u32 %v4265_v61, %v19195_v0  ;;  %v17345_v24 = vld [vmem:[%s18102_s16 + $0x54] sm:$0xff]  }
 0x154   : > { %v19242_v19 = vrot.slane %v4256_v36, 4  ;;  %v4269_v56 = vshll.u32 %v19193_v30, 16  ;;  %v19255_v36 = vrot.slane %v4283_v12, 5  ;;  %v4289_v61 = vrot.slane %v4287_v18, 4 }
 0x155   : > { %15206 = vmatmul.mubr.bf16.gmra.mrb[4].mxu1 %v22234_v23  ;;  %15428 = vmatpush3.bf16.msra.mxu0 %v17343_v44  ;;  %v19234_v44 = vld [vmem:[%s18102_s16 + $0x64] sm:$0xf]  ;;  %v4322_v23 = vshrl.u32 %v13984_v21, 16  ;;  %v4303_v42 = vrot.slane %v4301_v3, 5  ;;  %v19260_v8 = vrot.slane %v4307_v7, 5  ;;  %v4313_v30 = vrot.slane %v4311_v15, 4 }
 0x156   : > { %15209 = vmatprep.mubr.bf16.mxu1 %v22235_v32  ;;  %15429 = vmatprep.subr.bf16.mxu0 %v17346_v35  ;;  %22237 = vst [vmem:[#allocation38_spill] sm:$0xff] %v19234_v44  ;;  %v19249_v21 = vld [vmem:[%s22018_s1 + $0x1e0] sm:$0xff]   ;;  %v19258_v32 = vld [vmem:[%s18102_s16 + $0x5c] sm:$0x1]  ;;  %v4335_v18 = vshrl.u32 %v19234_v44, 16  ;;  %v19270_v12 = vrot.slane %v4266_v59, 4  ;;  %v22242_v59 = vcombine.low %v18948_v53, %v18955_v60 }
 0x157   : > { %15238 = vmatpush3.bf16.msra.mxu1 %v19153_v50  ;;  %v4224_v50 = vsel %vm18129_vm2, %v19189_v29, %v19185_v5  ;;  %22238 = vst [vmem:[#allocation39_spill] sm:$0xff] %v19258_v32  ;;  %v4324_v57 = vrot.slane %v4322_v23, 4  ;;  %v4327_v5 = vrot.slane %v4325_v41, 5  ;;  %v4331_v29 = vshll.u32 %v19234_v44, 16  ;;  %v17364_v3 = vld [vmem:[%s22018_s1 + $0xe8] sm:$0xff]  }
 0x158   : > { %15398 = vmatmul.mubr.bf16.gmra.mrb[4].mxu0 %v17342_v43  ;;  %15239 = vmatprep.subr.bf16.mxu1 %v17359_v10  ;;  %v4300_v43 = vrot.slane %v4298_v51, 4  ;;  %v19272_v46 = vrot.slane %v4269_v56, 5  ;;  %v13987_v51 = vld [vmem:[%s18102_s16 + $0x6c] sm:$0xf]  ;;  %v19291_v15 = vrot.slane %v4280_v62, 4  ;;  %v17347_v56 = vld [vmem:[%s18102_s16 + $0x60] sm:$0xff]   ;;  %v22243_v62 = vcombine.low %v18962_v13, %v18980_v20 }
 0x159   : > { %15401 = vmatprep.mubr.bf16.mxu0 %v17344_v34  ;;  %15430 = vmatpush3.bf16.msra.mxu0 %v17346_v35  ;;  %v19268_v35 = vcombine.low %v4214_v40, %v4224_v50  ;;  %v4293_v34 = vshll.u32 %v19231_v48, 16  ;;  %v19294_v23 = vld [vmem:[%s18102_s16 + $0x70] sm:$0xf]  ;;  %v13990_v41 = vld [vmem:[%s18102_s16 + $0x78] sm:$0xf]  ;;  %v4290_v50 = vor.u32 %v4289_v61, %v19255_v36  ;;  %v17358_v53 = vld [vmem:[%s22018_s1 + $0x1e8] sm:$0xff]   ;;  %v4328_v60 = vor.u32 %v4327_v5, %v4324_v57 }
 0x15a   : > { %15431 = vmatprep.subr.bf16.mxu0 %v17349_v38  ;;  %22241 = vst [vmem:[#allocation42_spill] sm:$0xff] %v19294_v23  ;;  %v4304_v7 = vor.u32 %v4303_v42, %v4300_v43  ;;  %v4337_v61 = vrot.slane %v4335_v18, 4  ;;  %v4341_v42 = vshll.u32 %v19263_v16, 16  ;;  %v17366_v13 = vld [vmem:[%s22018_s1 + $0xf0] sm:$0xff]   ;;  %v4346_v57 = vshrl.u32 %v13987_v51, 16 }
 0x15b   : > { %15240 = vmatpush3.bf16.msra.mxu1 %v17359_v10  ;;  %22240 = vst [vmem:[#allocation41_spill] sm:$0xff] %v19268_v35  ;;  %v4314_v10 = vor.u32 %v4313_v30, %v19260_v8  ;;  %v4317_v35 = vshll.u32 %v19258_v32, 16  ;;  %v19321_v30 = vrot.slane %v4293_v34, 5  ;;  %v4349_v43 = vshll.u32 %v13987_v51, 16  ;;  %v19324_v5 = vld [vmem:[%s18102_s16 + $0x7c] sm:$0xf] }
 0x15c   : > { %15241 = vmatprep.subr.bf16.mxu1 %v17361_v17  ;;  %22245 = vst [vmem:[#allocation44_spill] sm:$0xff] %v19324_v5  ;;  %v4359_v18 = vshrl.u32 %v19294_v23, 16  ;;  %v4373_v34 = vshll.u32 %v13990_v41, 16  ;;  %v19335_v51 = vld [vmem:[%s18102_s16 + $0x88] sm:$0xf]  ;;  %v19340_v40 = vrot.slane %v4304_v7, 4 }
 0x15d   : > { %15210 = vmatmul.mubr.bf16.gmra.mrb[8].mxu1 %v22242_v59  ;;  %15432 = vmatpush3.bf16.msra.mxu0 %v17349_v38  ;;  %v19311_v38 = vrot.slane %v4331_v29, 5  ;;  %v4355_v29 = vshll.u32 %v19294_v23, 16  ;;  %v4370_v59 = vshrl.u32 %v13990_v41, 16  ;;  %22246 = vst [vmem:[#allocation45_spill] sm:$0xff] %v19335_v51  ;;  %v19342_v20 = vrot.slane %v4314_v10, 4  ;;  %v17348_v23 = vld [vmem:[%s18102_s16 + $0x6c] sm:$0xff]  }
 0x15e   : > { %15213 = vmatprep.mubr.bf16.mxu1 %v22243_v62  ;;  %15433 = vmatprep.subr.bf16.mxu0 %v19249_v21  ;;  %v13993_v62 = vld [vmem:[%s18102_s16 + $0x84] sm:$0xf]  ;;  %v19344_v16 = vrot.slane %v4317_v35, 5  ;;  %v13996_v44 = vld [vmem:[%s18102_s16 + $0x90] sm:$0xf]  ;;  %v17369_v41 = vld [vmem:[%s22018_s1 + $0xf8] sm:$0xff]  }
 0x15f   : > { %22244 = vst [vmem:[#allocation43_spill] sm:$0xff] %v19311_v38  ;;  %15242 = vmatpush3.bf16.msra.mxu1 %v17361_v17  ;;  %v19329_v17 = vld [vmem:[%s22018_s1 + $0x1f0] sm:$0xff]   ;;  %v19355_v7 = vrot.slane %v4328_v60, 4  ;;  %v4338_v10 = vor.u32 %v4337_v61, %v19311_v38  ;;  %v17350_v35 = vld [vmem:[%s18102_s16 + $0x78] sm:$0xff]   ;;  %v4351_v32 = vrot.slane %v4349_v43, 5  ;;  %v4379_v48 = vshll.u32 %v19324_v5, 16 }
 0x160   : > { %15402 = vmatmul.mubr.bf16.gmra.mrb[8].mxu0 %v17345_v24  ;;  %15243 = vmatprep.subr.bf16.mxu1 %v17364_v3  ;;  %v19338_v24 = vrot.slane %v4290_v50, 4  ;;  %v4348_v50 = vrot.slane %v4346_v57, 4  ;;  %v4383_v11 = vshrl.u32 %v19324_v5, 16  ;;  %v17368_v60 = vld [vmem:[%s22018_s1 + $0x1f8] sm:$0xff]   ;;  %v19372_v61 = vrot.slane %v4355_v29, 5 }
 0x161   : > { %15405 = vmatprep.mubr.bf16.mxu0 %v17347_v56  ;;  %15434 = vmatpush3.bf16.msra.mxu0 %v19249_v21  ;;  %22247 = vst [vmem:[#allocation46_spill] sm:$0xff] %v19355_v7  ;;  %v19358_v56 = vrot.slane %v4341_v42, 5  ;;  %v19370_v21 = vld [vmem:[%s18102_s16 + $0x74] sm:$0x1]  ;;  %v4361_v42 = vrot.slane %v4359_v18, 4  ;;  %v22251_v57 = vcombine.low %v18984_v63, %v18990_v37  ;;  %v4394_v5 = vshrl.u32 %v13993_v62, 16 }
 0x162   : > { %15435 = vmatprep.subr.bf16.mxu0 %v17358_v53  ;;  %22250 = vst [vmem:[#allocation49_spill] sm:$0xff] %v19372_v61  ;;  %v19380_v43 = vld [vmem:[%s18102_s16 + $0x80] sm:$0x1]  ;;  %v4397_v7 = vshll.u32 %v13993_v62, 16  ;;  %v4403_v38 = vshll.u32 %v19335_v51, 16  ;;  %v4407_v49 = vshrl.u32 %v19335_v51, 16  ;;  %v22253_v29 = vcombine.low %v18994_v26, %v18998_v31 }
 0x163   : > { %22248 = vst [vmem:[#allocation47_spill] sm:$0xff] %v19358_v56  ;;  %15244 = vmatpush3.bf16.msra.mxu1 %v17364_v3  ;;  %v19374_v56 = vrot.slane %v4370_v59, 4  ;;  %v4375_v3 = vrot.slane %v4373_v34, 5  ;;  %22252 = vst [vmem:[#allocation50_spill] sm:$0xff] %v19380_v43  ;;  %v19388_v18 = vrot.slane %v4338_v10, 4  ;;  %v4418_v63 = vshrl.u32 %v13996_v44, 16 }
 0x164   : > { %15245 = vmatprep.subr.bf16.mxu1 %v17366_v13  ;;  %v4421_v37 = vshll.u32 %v13996_v44, 16  ;;  %v4352_v59 = vor.u32 %v4351_v32, %v4348_v50  ;;  %v4365_v34 = vshll.u32 %v19370_v21, 16  ;;  %v19392_v62 = vrot.slane %v4379_v48, 5  ;;  %v19397_v26 = vld [vmem:[%s22018_s1 + $0x200] sm:$0xff]   ;;  %v19403_v32 = vld [vmem:[%s18102_s16 + $0x8c] sm:$0x1] }
 0x165   : > { %15214 = vmatmul.mubr.bf16.gmra.mrb[12].mxu1 %v22251_v57  ;;  %15436 = vmatpush3.bf16.msra.mxu0 %v17358_v53  ;;  %v4427_v53 = vshll.u32 %v19364_v58, 16  ;;  %v4385_v57 = vrot.slane %v4383_v11, 4  ;;  %v4362_v31 = vor.u32 %v4361_v42, %v19372_v61  ;;  %v4376_v44 = vor.u32 %v4375_v3, %v19374_v56  ;;  %v19408_v11 = vld [vmem:[%s18102_s16 + $0xa0] sm:$0xf]  ;;  %v17352_v51 = vld [vmem:[%s18102_s16 + $0x84] sm:$0xff]  }
 0x166   : > { %15217 = vmatprep.mubr.bf16.mxu1 %v22253_v29  ;;  %15437 = vmatprep.subr.bf16.mxu0 %v19329_v17  ;;  %22254 = vst [vmem:[#allocation51_spill] sm:$0xff] %v19392_v62  ;;  %v4389_v10 = vshll.u32 %v19380_v43, 16  ;;  %v4431_v48 = vshrl.u32 %v19364_v58, 16  ;;  %v4399_v50 = vrot.slane %v4397_v7, 5  ;;  %v19411_v29 = vrot.slane %v4403_v38, 5 }
 0x167   : > { %15246 = vmatpush3.bf16.msra.mxu1 %v17366_v13  ;;  %v13999_v13 = vld [vmem:[%s18102_s16 + $0x9c] sm:$0xf]  ;;  %v4409_v42 = vrot.slane %v4407_v49, 4  ;;  %v4420_v56 = vrot.slane %v4418_v63, 4  ;;  %v4423_v3 = vrot.slane %v4421_v37, 5  ;;  %v19413_v61 = vrot.slane %v4427_v53, 5 }
 0x168   : > { %15406 = vmatmul.mubr.bf16.gmra.mrb[12].mxu0 %v17348_v23  ;;  %15247 = vmatprep.subr.bf16.mxu1 %v17369_v41  ;;  %v4396_v23 = vrot.slane %v4394_v5, 4  ;;  %22255 = vst [vmem:[#allocation52_spill] sm:$0xff] %v19411_v29  ;;  %v4433_v58 = vrot.slane %v4431_v48, 4  ;;  %v19416_v43 = vrot.slane %v4352_v59, 4  ;;  %v19420_v5 = vld [vmem:[%s18102_s16 + $0x98] sm:$0x1] }
 0x169   : > { %15409 = vmatprep.mubr.bf16.mxu0 %v17350_v35  ;;  %15438 = vmatpush3.bf16.msra.mxu0 %v19329_v17  ;;  %22256 = vst [vmem:[#allocation53_spill] sm:$0xff] %v19413_v61  ;;  %v4386_v35 = vor.u32 %v4385_v57, %v19392_v62  ;;  %v4442_v38 = vshrl.u32 %v13999_v13, 16  ;;  %v4445_v17 = vshll.u32 %v13999_v13, 16  ;;  %v19422_v49 = vrot.slane %v4362_v31, 4  ;;  %v14002_v53 = vld [vmem:[%s18102_s16 + $0xa8] sm:$0xf] }
 0x16a   : > { %15439 = vmatprep.subr.bf16.mxu0 %v17368_v60  ;;  %v19424_v7 = vrot.slane %v4365_v34, 5  ;;  %v4451_v63 = vshll.u32 %v19408_v11, 16  ;;  %v4455_v37 = vshrl.u32 %v19408_v11, 16  ;;  %v17355_v59 = vld [vmem:[%s18102_s16 + $0x90] sm:$0xff]   ;;  %v19433_v57 = vrot.slane %v4389_v10, 5 }
 0x16b   : > { %15248 = vmatpush3.bf16.msra.mxu1 %v17369_v41  ;;  %22257 = vst [vmem:[#allocation54_spill] sm:$0xff] %v19422_v49  ;;  %v22258_v41 = vcombine.low %v19002_v4, %v19010_v33  ;;  %v4400_v48 = vor.u32 %v4399_v50, %v4396_v23  ;;  %v4410_v31 = vor.u32 %v4409_v42, %v19411_v29  ;;  %v4413_v34 = vshll.u32 %v19403_v32, 16  ;;  %v19438_v13 = vld [vmem:[%s18102_s16 + $0xac] sm:$0xf]  ;;  %v19449_v23 = vld [vmem:[%s18102_s16 + $0xa4] sm:$0x1] }
 0x16c   : > { %22259 = vst [vmem:[#allocation55_spill] sm:$0xff] %v19433_v57  ;;  %v22260_v62 = vcombine.low %v19014_v52, %v19028_v45  ;;  %v19444_v4 = vrot.slane %v4376_v44, 4  ;;  %v4424_v33 = vor.u32 %v4423_v3, %v4420_v56  ;;  %v4437_v10 = vshll.u32 %v19420_v5, 16  ;;  %v14005_v45 = vld [vmem:[%s18102_s16 + $0xb4] sm:$0xf] }
 0x16d   : > { %15218 = vmatmul.mubr.bf16.gmra.mrb[16].mxu1 %v22258_v41  ;;  %15440 = vmatpush3.bf16.msra.mxu0 %v17368_v60  ;;  %v4434_v60 = vor.u32 %v4433_v58, %v19413_v61  ;;  %v19451_v50 = vrot.slane %v4386_v35, 4  ;;  %v4444_v42 = vrot.slane %v4442_v38, 4  ;;  %v4447_v41 = vrot.slane %v4445_v17, 5  ;;  %v19458_v3 = vld [vmem:[%s18102_s16 + $0xb8] sm:$0xf] }
 0x16e   : > { %15221 = vmatprep.mubr.bf16.mxu1 %v22260_v62  ;;  %15473 = vmatprep.subr.bf16.mxu0 %v19397_v26  ;;  %22261 = vst [vmem:[#allocation56_spill] sm:$0xff] %v19444_v4  ;;  %v4466_v52 = vshrl.u32 %v14002_v53, 16  ;;  %v19454_v62 = vrot.slane %v4451_v63, 5  ;;  %v4457_v44 = vrot.slane %v4455_v37, 4  ;;  %v4469_v56 = vshll.u32 %v14002_v53, 16  ;;  %v17357_v63 = vld [vmem:[%s18102_s16 + $0x9c] sm:$0xff]  }
 0x16f   : > { %22262 = vst [vmem:[#allocation57_spill] sm:$0xff] %v19451_v50  ;;  %v4475_v58 = vshll.u32 %v19438_v13, 16  ;;  %v19460_v61 = vrot.slane %v4400_v48, 4  ;;  %v19462_v35 = vrot.slane %v4410_v31, 4  ;;  %v19464_v38 = vrot.slane %v4413_v34, 5 }
 0x170   : > { %15410 = vmatmul.mubr.bf16.gmra.mrb[16].mxu0 %v17352_v51  ;;  %v19467_v17 = vld [vmem:[%s18102_s16 + $0xb0] sm:$0x1]  ;;  %v4479_v51 = vshrl.u32 %v19438_v13, 16  ;;  %v19471_v37 = vrot.slane %v4424_v33, 4  ;;  %v19473_v53 = vrot.slane %v4434_v60, 4  ;;  %v19475_v29 = vrot.slane %v4437_v10, 5 }
 0x171   : > { %15413 = vmatprep.mubr.bf16.mxu0 %v17355_v59  ;;  %22263 = vst [vmem:[#allocation58_spill] sm:$0xff] %v19460_v61  ;;  %22264 = vst [vmem:[#allocation59_spill] sm:$0xff] %v19462_v35  ;;  %v4490_v59 = vshrl.u32 %v14005_v45, 16  ;;  %v14008_v48 = vld [vmem:[%s18102_s16 + $0xc0] sm:$0xf]  ;;  %v17360_v61 = vld [vmem:[%s18102_s16 + $0xa8] sm:$0xff]   ;;  %v4448_v57 = vor.u32 %v4447_v41, %v4444_v42  ;;  %v4458_v33 = vor.u32 %v4457_v44, %v19454_v62 }
 0x172   : > { %22265 = vst [vmem:[#allocation60_spill] sm:$0xff] %v19464_v38  ;;  %22266 = vst [vmem:[#allocation61_spill] sm:$0xff] %v19471_v37  ;;  %v4461_v31 = vshll.u32 %v19449_v23, 16  ;;  %v4468_v34 = vrot.slane %v4466_v52, 4  ;;  %v4493_v35 = vshll.u32 %v14005_v45, 16  ;;  %v4499_v38 = vshll.u32 %v19458_v3, 16 }
 0x173   : > { %22267 = vst [vmem:[#allocation62_spill] sm:$0xff] %v19473_v53  ;;  %22268 = vst [vmem:[#allocation63_spill] sm:$0xff] %v19475_v29  ;;  %v19482_v50 = vld [vmem:[%s18102_s16 + $0xc4] sm:$0xf]  ;;  %v4471_v60 = vrot.slane %v4469_v56, 5  ;;  %v19485_v53 = vrot.slane %v4475_v58, 5  ;;  %v22270_v10 = vcombine.low %v19018_v22, %v19032_v1  ;;  %v22271_v42 = vcombine.low %v19061_v54, %v19077_v25 }
 0x174   : > { %v4481_v29 = vrot.slane %v4479_v51, 4  ;;  %v4485_v37 = vshll.u32 %v19467_v17, 16  ;;  %v19492_v4 = vld [vmem:[%s18102_s16 + $0xbc] sm:$0x1]  ;;  %v4492_v52 = vrot.slane %v4490_v59, 4  ;;  %v4503_v45 = vshrl.u32 %v19458_v3, 16 }
 0x175   : > { %22269 = vst [vmem:[#allocation64_spill] sm:$0xff] %v19485_v53  ;;  %15222 = vmatmul.mubr.bf16.gmra.mrb[20].mxu1 %v22270_v10  ;;  %v14011_v49 = vld [vmem:[%s18102_s16 + $0xcc] sm:$0xf]  ;;  %v4495_v41 = vrot.slane %v4493_v35, 5  ;;  %v19499_v44 = vrot.slane %v4499_v38, 5  ;;  %v4514_v56 = vshrl.u32 %v14008_v48, 16 }
 0x176   : > { %15225 = vmatprep.mubr.bf16.mxu1 %v22271_v42  ;;  %v4517_v22 = vshll.u32 %v14008_v48, 16  ;;  %v4505_v51 = vrot.slane %v4503_v45, 4  ;;  %v4523_v54 = vshll.u32 %v19482_v50, 16  ;;  %v19510_v25 = vrot.slane %v4448_v57, 4  ;;  %v19515_v48 = vld [vmem:[%s18102_s16 + $0xd0] sm:$0xf] }
 0x177   : > { %22272 = vst [vmem:[#allocation65_spill] sm:$0xff] %v19499_v44  ;;  %v19512_v35 = vrot.slane %v4461_v31, 5  ;;  %v4516_v38 = vrot.slane %v4514_v56, 4  ;;  %v19517_v10 = vrot.slane %v4458_v33, 4  ;;  %v4472_v42 = vor.u32 %v4471_v60, %v4468_v34  ;;  %v19523_v1 = vld [vmem:[%s18102_s16 + $0xc8] sm:$0x1] }
 0x178   : > { %15414 = vmatmul.mubr.bf16.gmra.mrb[20].mxu0 %v17357_v63  ;;  %22273 = vst [vmem:[#allocation66_spill] sm:$0xff] %v19510_v25  ;;  %v4519_v59 = vrot.slane %v4517_v22, 5  ;;  %v4482_v58 = vor.u32 %v4481_v29, %v19485_v53  ;;  %v19520_v45 = vrot.slane %v4485_v37, 5  ;;  %v17362_v57 = vld [vmem:[%s18102_s16 + $0xb4] sm:$0xff]   ;;  %v4509_v63 = vshll.u32 %v19492_v4, 16  ;;  %v17365_v60 = vld [vmem:[%s18102_s16 + $0xc0] sm:$0xff]  }
 0x179   : > { %22274 = vst [vmem:[#allocation67_spill] sm:$0xff] %v19512_v35  ;;  %15417 = vmatprep.mubr.bf16.mxu0 %v17360_v61  ;;  %22275 = vst [vmem:[#allocation68_spill] sm:$0xff] %v19517_v10  ;;  %v19527_v31 = vrot.slane %v4523_v54, 5  ;;  %v4527_v56 = vshrl.u32 %v19482_v50, 16  ;;  %v4538_v22 = vshrl.u32 %v14011_v49, 16  ;;  %v4496_v61 = vor.u32 %v4495_v41, %v4492_v52 }
 0x17a   : > { %22276 = vst [vmem:[#allocation69_spill] sm:$0xff] %v19520_v45  ;;  %v4506_v33 = vor.u32 %v4505_v51, %v19499_v44  ;;  %v19532_v34 = vld [vmem:[%s18102_s16 + $0xd4] sm:$0x1]  ;;  %v4541_v29 = vshll.u32 %v14011_v49, 16  ;;  %v4547_v37 = vshll.u32 %v19515_v48, 16  ;;  %v4520_v45 = vor.u32 %v4519_v59, %v4516_v38 }
 0x17b   : > { %v4529_v53 = vrot.slane %v4527_v56, 4  ;;  %v4533_v10 = vshll.u32 %v19523_v1, 16  ;;  %v4540_v54 = vrot.slane %v4538_v22, 4  ;;  %v19538_v35 = vld [vmem:[%s18102_s16 + $0x18] sm:$0xe]  ;;  %v22278_v52 = vcombine.low %v19065_v47, %v19099_v9 }
 0x17c   : > { %22277 = vst [vmem:[#allocation70_spill] sm:$0xff] %v19538_v35  ;;  %v19543_v41 = vrot.slane %v4472_v42, 4  ;;  %v4543_v51 = vrot.slane %v4541_v29, 5  ;;  %v19545_v44 = vrot.slane %v4547_v37, 5  ;;  %v4551_v49 = vshrl.u32 %v19515_v48, 16 }
 0x17d   : > { %15226 = vmatmul.mubr.bf16.gmra.mrb[24].mxu1 %v22278_v52  ;;  %v19549_v25 = vld [vmem:[%s18102_s16 + $0x24] sm:$0xe]  ;;  %v14056_v38 = vld [vmem:[%s18102_s16 + $0x30] sm:$0xe]  ;;  %v22281_v59 = vcombine.low %v19110_v14, %v19129_v27  ;;  %v4320_v47 = vsel %vm18129_vm2, %v19342_v20, %v19344_v16  ;;  %v19559_v9 = vrot.slane %v4482_v58, 4  ;;  %v4530_v42 = vor.u32 %v4529_v53, %v19527_v31 }
 0x17e   : > { %22279 = vst [vmem:[#allocation71_spill] sm:$0xff] %v19543_v41  ;;  %22280 = vst [vmem:[#allocation72_spill] sm:$0xff] %v19549_v25  ;;  %v4557_v56 = vshll.u32 %v19532_v34, 16  ;;  %v19563_v22 = vrot.slane %v4509_v63, 5  ;;  %v4544_v29 = vor.u32 %v4543_v51, %v4540_v54  ;;  %v4553_v37 = vrot.slane %v4551_v49, 4  ;;  %v22282_v52 = vld [vmem:[#allocation24_spill] sm:$0xff] }
 0x17f   : > { %15229 = vmatprep.mubr.bf16.mxu1 %v22281_v59  ;;  %v19566_v27 = vrot.slane %v4496_v61, 4  ;;  %v19568_v59 = vrot.slane %v4506_v33, 4  ;;  %v19570_v41 = vrot.slane %v4520_v45, 4  ;;  %v19572_v16 = vrot.slane %v4533_v10, 5  ;;  %v14057_v20 = vld [vmem:[%s18102_s16 + $0x3c] sm:$0xe] }
 0x180   : > { %15418 = vmatmul.mubr.bf16.gmra.mrb[24].mxu0 %v17362_v57  ;;  %v17370_v53 = vld [vmem:[%s18102_s16 + $0xc] sm:$0xff]   ;;  %v19576_v58 = vrot.slane %v4530_v42, 4  ;;  %v4554_v63 = vor.u32 %v4553_v37, %v19545_v44  ;;  %v19579_v54 = vrot.slane %v4557_v56, 5  ;;  %v22284_v10 = vld [vmem:[#allocation26_spill] sm:$0xff]  ;;  %v14072_v14 = vrot.slane %v14056_v38, 9  ;;  %v22309_v25 = vld [vmem:[#allocation33_spill] sm:$0xff] }
 0x181   : > { %15421 = vmatprep.mubr.bf16.mxu0 %v17365_v60  ;;  %v17367_v61 = vld [vmem:[%s18102_s16 + $0xcc] sm:$0xff]   ;;  %v22076_v49 = vrot.slane %v22284_v10, 5  ;;  %v22285_v60 = vsel %vm18129_vm2, %v19240_v2, %v19228_v6  ;;  %v22286_v42 = vsel %vm18129_vm2, %v19226_v55, %v19163_v28  ;;  %v22287_v37 = vsel %vm18129_vm2, %v19270_v12, %v19272_v46  ;;  %v14058_v28 = vld [vmem:[%s18102_s16 + $0x48] sm:$0xe] }
 0x182   : > { %v19596_v56 = vcombine.low %v22286_v42, %v22285_v60  ;;  %v22288_v38 = vsel %vm18129_vm2, %v19242_v19, %v19195_v0  ;;  %v19610_v6 = vrot.slane %v4544_v29, 4  ;;  %v22289_v2 = vrot.slane %v22282_v52, 5  ;;  %v22295_v42 = vld [vmem:[#allocation27_spill] sm:$0xff]  ;;  %v22311_v33 = vld [vmem:[#allocation36_spill] sm:$0xff] }
 0x183   : > { %v19608_v45 = vcombine.low %v22288_v38, %v22287_v37  ;;  %v22291_v55 = vsel %vm18129_vm2, %v19338_v24, %v19321_v30  ;;  %v22292_v12 = vsel %vm18129_vm2, %v19291_v15, %v19255_v36  ;;  %v22293_v19 = vsel %vm18129_vm2, %v19340_v40, %v19260_v8  ;;  %v14059_v24 = vld [vmem:[%s18102_s16 + $0x54] sm:$0xe]  ;;  %v22297_v38 = vld [vmem:[#allocation31_spill] sm:$0xff]  ;;  %v22300_v8 = vld [vmem:[#allocation30_spill] sm:$0xff] }
 0x184   : > { %v19614_v51 = vrot.slane %v22289_v2, 4  ;;  %v19627_v0 = vcombine.low %v22292_v12, %v22291_v55  ;;  %v19634_v46 = vcombine.low %v22293_v19, %v4320_v47  ;;  %v4963_v30 = vrot.slane %v22295_v42, 5  ;;  %v22296_v37 = vld [vmem:[#allocation29_spill] sm:$0xff]  ;;  %v22299_v15 = vld [vmem:[#allocation32_spill] sm:$0xff]  ;;  %v22301_v47 = vld [vmem:[#allocation43_spill] sm:$0xff] }
 0x185   : > { %v22298_v2 = vcombine.low %v22296_v37, %v22297_v38  ;;  %v19642_v36 = vrot.slane %v4554_v63, 4  ;;  %v4966_v55 = vrot.slane %v22299_v15, 5  ;;  %v14073_v12 = vrot.slane %v14057_v20, 9  ;;  %v22302_v19 = vld [vmem:[#allocation46_spill] sm:$0xff]  ;;  %v22305_v20 = vld [vmem:[#allocation47_spill] sm:$0xff] }
 0x186   : > { %22290 = vst [vmem:[#allocation24_spill] sm:$0xff] %v19614_v51  ;;  %v4970_v40 = vrot.slane %v22300_v8, 5  ;;  %v19652_v60 = vrot.slane %v22076_v49, 4  ;;  %v19656_v63 = vsel %vm18507_vm5, %v14072_v14, %v4963_v30  ;;  %v4965_v38 = vrot.slane %v4963_v30, 4  ;;  %v17371_v15 = vld [vmem:[%s18102_s16 + $0x18] sm:$0xff]   ;;  %v17373_v14 = vld [vmem:[%s18102_s16 + $0x24] sm:$0xff]  }
 0x187   : > { %15230 = vmatmul.mubr.bf16.gmra.mrb[28].mxu1 %v22298_v2  ;;  %v14060_v2 = vld [vmem:[%s18102_s16 + $0x60] sm:$0xe]  ;;  %v14074_v29 = vrot.slane %v14058_v28, 9  ;;  %v4977_v10 = vrot.slane %v22309_v25, 5  ;;  %v22310_v51 = vld [vmem:[#allocation37_spill] sm:$0xff] }
 0x188   : > { %15249 = vmatprep.mubr.bf16.mxu1 %v17370_v53  ;;  %22303 = vst [vmem:[#allocation27_spill] sm:$0xff] %v19652_v60  ;;  %v19666_v8 = vsel %vm18507_vm5, %v14073_v12, %v4970_v40  ;;  %v4972_v57 = vrot.slane %v4970_v40, 4  ;;  %v22307_v42 = vld [vmem:[#allocation34_spill] sm:$0xff]  ;;  %v14061_v60 = vld [vmem:[%s18102_s16 + $0x6c] sm:$0xe]  ;;  %15422 = vmatmul.mubr.bf16.gmra.mrb[28].mxu0 %v17367_v61  ;;  %v19673_v30 = vsel %vm18507_vm5, %v4965_v38, %v4966_v55  ;;  %v4980_v53 = vrot.slane %v22310_v51, 5 }
 0x189   : > { %22306 = vst [vmem:[#allocation29_spill] sm:$0xff] %v19666_v8  ;;  %v4973_v49 = vrot.slane %v22307_v42, 5  ;;  %22308 = vst [vmem:[#allocation31_spill] sm:$0xff] %v19673_v30  ;;  %15441 = vmatprep.mubr.bf16.mxu0 %v22311_v33  ;;  %v14075_v61 = vrot.slane %v14059_v24, 9  ;;  %v22313_v42 = vld [vmem:[#allocation35_spill] sm:$0xff]  ;;  %v19689_v25 = vsel %vm18507_vm5, %v14074_v29, %v4977_v10  ;;  %v4979_v51 = vrot.slane %v4977_v10, 4 }
 0x18a   : > { %v4984_v35 = vrot.slane %v22313_v42, 5  ;;  %22314 = vst [vmem:[#allocation30_spill] sm:$0xff] %v19689_v25  ;;  %v22315_v55 = vld [vmem:[#allocation39_spill] sm:$0xff]  ;;  %v14062_v38 = vld [vmem:[%s18102_s16 + $0x78] sm:$0xe]  ;;  %v22316_v24 = vld [vmem:[#allocation38_spill] sm:$0xff] }
 0x18b   : > { %v19682_v40 = vsel %vm18507_vm5, %v4972_v57, %v4973_v49  ;;  %v4987_v33 = vrot.slane %v22315_v55, 5  ;;  %v14076_v49 = vrot.slane %v14060_v2, 9  ;;  %v4991_v42 = vrot.slane %v22316_v24, 5  ;;  %v14063_v30 = vld [vmem:[%s18102_s16 + $0x84] sm:$0xe]  ;;  %v22318_v29 = vld [vmem:[#allocation40_spill] sm:$0xff] }
 0x18c   : > { %22312 = vst [vmem:[#allocation32_spill] sm:$0xff] %v19682_v40  ;;  %v19695_v12 = vsel %vm18507_vm5, %v14075_v61, %v4984_v35  ;;  %v4986_v57 = vrot.slane %v4984_v35, 4  ;;  %v19701_v28 = vsel %vm18507_vm5, %v4979_v51, %v4980_v53  ;;  %v4994_v10 = vrot.slane %v22318_v29, 5  ;;  %v22319_v40 = vld [vmem:[#allocation42_spill] sm:$0xff]  ;;  %v17375_v35 = vld [vmem:[%s22018_s1 + $0x208] sm:$0xff]  }
 0x18d   : > { %22317 = vst [vmem:[#allocation43_spill] sm:$0xff] %v19701_v28  ;;  %v14077_v55 = vrot.slane %v14061_v60, 9  ;;  %v4998_v8 = vrot.slane %v22319_v40, 5  ;;  %v19716_v53 = vsel %vm18507_vm5, %v14076_v49, %v4991_v42  ;;  %v4993_v60 = vrot.slane %v4991_v42, 4  ;;  %v14064_v51 = vld [vmem:[%s18102_s16 + $0x90] sm:$0xe] }
 0x18e   : > { %v19712_v61 = vsel %vm18507_vm5, %v4986_v57, %v4987_v33  ;;  %v5001_v29 = vrot.slane %v19370_v21, 5  ;;  %v14065_v33 = vld [vmem:[%s18102_s16 + $0x9c] sm:$0xe]  ;;  %v17374_v57 = vld [vmem:[%s18102_s16 + $0x30] sm:$0xff]   ;;  %v14078_v49 = vrot.slane %v14062_v38, 9 }
 0x18f   : > { %15250 = vmatmul.mubr.bf16.vlgmr.msra.gmra.mrb[0].mxu1 %v17371_v15  ;;  %22320 = vst [vmem:[#allocation46_spill] sm:$0xff] %v19712_v61  ;;  %v19723_v40 = vsel %vm18507_vm5, %v14077_v55, %v4998_v8  ;;  %v5000_v24 = vrot.slane %v4998_v8, 4  ;;  %v19730_v2 = vsel %vm18507_vm5, %v4993_v60, %v4994_v10  ;;  %v22322_v42 = vld [vmem:[#allocation44_spill] sm:$0xff]  ;;  %v22323_v28 = vld [vmem:[#allocation50_spill] sm:$0xff]  ;;  %v22324_v15 = vld [vmem:[#allocation41_spill] sm:$0xff]  ;;  %v14079_v55 = vrot.slane %v14063_v30, 9 }
 0x190   : > { %15253 = vmatprep.mubr.bf16.mxu1 %v17373_v14  ;;  %22321 = vst [vmem:[#allocation23_spill] sm:$0xff] %v19723_v40  ;;  %v5005_v14 = vrot.slane %v22322_v42, 5  ;;  %v5008_v25 = vrot.slane %v22323_v28, 5  ;;  %15442 = vmatmul.mubr.bf16.vlgmr.msra.gmra.mrb[0].mxu0 %v22324_v15  ;;  %v17376_v61 = vld [vmem:[%s18102_s16 + $0x3c] sm:$0xff]   ;;  %v5015_v42 = vrot.slane %v19403_v32, 5  ;;  %v17378_v30 = vld [vmem:[%s22018_s1 + $0x210] sm:$0xff]   ;;  %v22374_v37 = vcombine.low %v19716_v53, %v19730_v2 }
 0x191   : > { %v19740_v21 = vsel %vm18507_vm5, %v5000_v24, %v5001_v29  ;;  %v22326_v10 = vld [vmem:[#allocation45_spill] sm:$0xff]  ;;  %15474 = vmatpush3.bf16.msra.mxu0 %v19397_v26  ;;  %15445 = vmatprep.mubr.bf16.mxu0 %v19596_v56  ;;  %v14066_v24 = vld [vmem:[%s18102_s16 + $0xa8] sm:$0xe]  ;;  %v14080_v29 = vrot.slane %v14064_v51, 9  ;;  %v14081_v8 = vrot.slane %v14065_v33, 9 }
 0x192   : > { %22325 = vst [vmem:[#allocation47_spill] sm:$0xff] %v19740_v21  ;;  %v5012_v60 = vrot.slane %v22326_v10, 5  ;;  %v19749_v38 = vsel %vm18507_vm5, %v14078_v49, %v5005_v14  ;;  %v5007_v15 = vrot.slane %v5005_v14, 4  ;;  %15475 = vmatprep.subr.bf16.mxu0 %v17375_v35  ;;  %v22327_v10 = vld [vmem:[#allocation48_spill] sm:$0xff]  ;;  %v5022_v14 = vrot.slane %v19420_v5, 5 }
 0x193   : > { %v5019_v28 = vrot.slane %v22327_v10, 5  ;;  %v14067_v49 = vld [vmem:[%s18102_s16 + $0xb4] sm:$0xe]  ;;  %v5026_v21 = vrot.slane %v19408_v11, 5  ;;  %v5040_v10 = vrot.slane %v19458_v3, 5  ;;  %v17395_v2 = vld [vmem:[%s22020_s3 + $0x48] sm:$0xff]  }
 0x194   : > { %v19758_v26 = vsel %vm18507_vm5, %v14079_v55, %v5012_v60  ;;  %v5014_v56 = vrot.slane %v5012_v60, 4  ;;  %v19764_v32 = vsel %vm18507_vm5, %v5007_v15, %v5008_v25  ;;  %v14068_v25 = vld [vmem:[%s18102_s16 + $0xc0] sm:$0xe]  ;;  %v5029_v15 = vrot.slane %v19449_v23, 5  ;;  %v17396_v53 = vld [vmem:[%s22020_s3 + $0x50] sm:$0xff]  }
 0x195   : > { %v14110_v40 = vcombine.low %v19749_v38, %v19764_v32  ;;  %v19776_v51 = vsel %vm18507_vm5, %v14080_v29, %v5019_v28  ;;  %v5021_v60 = vrot.slane %v5019_v28, 4  ;;  %15476 = vmatpush3.bf16.msra.mxu0 %v17375_v35  ;;  %v19783_v11 = vsel %vm18507_vm5, %v14081_v8, %v5026_v21  ;;  %v17381_v28 = vld [vmem:[%s22018_s1 + $0x218] sm:$0xff]   ;;  %v17398_v38 = vld [vmem:[%s22020_s3 + $0x60] sm:$0xff]   ;;  %v20043_v32 = vld [vmem:[%s22020_s3 + $0x70] sm:$0xff]  }
 0x196   : > { %v19772_v55 = vsel %vm18507_vm5, %v5014_v56, %v5015_v42  ;;  %v5028_v33 = vrot.slane %v5026_v21, 4  ;;  %v14069_v42 = vld [vmem:[%s18102_s16 + $0xcc] sm:$0xe]  ;;  %15477 = vmatprep.subr.bf16.mxu0 %v17378_v30  ;;  %v5033_v56 = vrot.slane %v19438_v13, 5  ;;  %v5036_v8 = vrot.slane %v19467_v17, 5 }
 0x197   : > { %15254 = vmatmul.mubr.bf16.gmra.mrb[4].mxu1 %v17374_v57  ;;  %v14111_v5 = vcombine.low %v19758_v26, %v19772_v55  ;;  %v19792_v35 = vsel %vm18507_vm5, %v5021_v60, %v5022_v14  ;;  %v14082_v57 = vrot.slane %v14066_v24, 9  ;;  %v17377_v21 = vld [vmem:[%s18102_s16 + $0x48] sm:$0xff]   ;;  %v14083_v29 = vrot.slane %v14067_v49, 9  ;;  %v17379_v60 = vld [vmem:[%s18102_s16 + $0x54] sm:$0xff]  }
 0x198   : > { %15257 = vmatprep.mubr.bf16.mxu1 %v17376_v61  ;;  %v14112_v23 = vcombine.low %v19776_v51, %v19792_v35  ;;  %v19801_v61 = vsel %vm18507_vm5, %v5028_v33, %v5029_v15  ;;  %15446 = vmatmul.mubr.bf16.gmra.mrb[4].mxu0 %v19608_v45  ;;  %v5035_v17 = vrot.slane %v5033_v56, 4  ;;  %v5043_v14 = vrot.slane %v19492_v4, 5  ;;  %v17384_v15 = vld [vmem:[%s22018_s1 + $0x220] sm:$0xff]   ;;  %v17399_v26 = vld [vmem:[%s22020_s3 + $0x68] sm:$0xff]   ;;  %v17401_v51 = vld [vmem:[%s22020_s3 + $0x78] sm:$0xff]  }
 0x199   : > { %v14113_v24 = vcombine.low %v19783_v11, %v19801_v61  ;;  %v19809_v13 = vsel %vm18507_vm5, %v14082_v57, %v5033_v56  ;;  %15449 = vmatprep.mubr.bf16.mxu0 %v19627_v0  ;;  %15478 = vmatpush3.bf16.msra.mxu0 %v17378_v30  ;;  %v19816_v49 = vsel %vm18507_vm5, %v14083_v29, %v5040_v10  ;;  %v5042_v3 = vrot.slane %v5040_v10, 4 }
 0x19a   : > { %v14084_v45 = vrot.slane %v14068_v25, 9  ;;  %v5047_v33 = vrot.slane %v19482_v50, 5  ;;  %15479 = vmatprep.subr.bf16.mxu0 %v17381_v28  ;;  %v19824_v4 = vsel %vm18507_vm5, %v5035_v17, %v5036_v8  ;;  %v5050_v0 = vrot.slane %v19523_v1, 5  ;;  %v17387_v1 = vld [vmem:[%s22018_s1 + $0x228] sm:$0xff]  }
 0x19b   : > { %v14085_v30 = vrot.slane %v14069_v42, 9  ;;  %v5054_v57 = vrot.slane %v19515_v48, 5  ;;  %v14114_v56 = vcombine.low %v19809_v13, %v19824_v4  ;;  %v19832_v50 = vsel %vm18507_vm5, %v5042_v3, %v5043_v14 }
 0x19c   : > { %v19836_v25 = vsel %vm18507_vm5, %v14084_v45, %v5047_v33  ;;  %v5049_v29 = vrot.slane %v5047_v33, 4  ;;  %v14115_v48 = vcombine.low %v19816_v49, %v19832_v50  ;;  %v5057_v10 = vrot.slane %v19532_v34, 5  ;;  %v22331_v33 = vld [vmem:[#allocation54_spill] sm:$0xff] }
 0x19d   : > { %v19845_v42 = vsel %vm18507_vm5, %v14085_v30, %v5054_v57  ;;  %v5056_v8 = vrot.slane %v5054_v57, 4  ;;  %v22328_v17 = vsel %vm18129_vm2, %v19388_v18, %v22305_v20  ;;  %v22329_v14 = vsel %vm18129_vm2, %v22302_v19, %v22301_v47  ;;  %15480 = vmatpush3.bf16.msra.mxu0 %v17381_v28  ;;  %v17380_v18 = vld [vmem:[%s18102_s16 + $0x60] sm:$0xff]   ;;  %v17382_v47 = vld [vmem:[%s18102_s16 + $0x6c] sm:$0xff]   ;;  %v22330_v28 = vld [vmem:[#allocation49_spill] sm:$0xff] }
 0x19e   : > { %v14036_v3 = vcombine.low %v22329_v14, %v22328_v17  ;;  %v19860_v45 = vsel %vm18507_vm5, %v5049_v29, %v5050_v0  ;;  %15481 = vmatprep.subr.bf16.mxu0 %v17384_v15  ;;  %v17390_v19 = vld [vmem:[%s22018_s1 + $0x230] sm:$0xff]   ;;  %v4368_v0 = vsel %vm18129_vm2, %v22331_v33, %v19424_v7  ;;  %v22334_v29 = vld [vmem:[#allocation55_spill] sm:$0xff]  ;;  %v17383_v7 = vld [vmem:[%s18102_s16 + $0x78] sm:$0xff]   ;;  %v22106_v55 = vmov 0  }
 0x19f   : > { %15258 = vmatmul.mubr.bf16.gmra.mrb[8].mxu1 %v17377_v21  ;;  %v14116_v34 = vcombine.low %v19836_v25, %v19860_v45  ;;  %v19866_v21 = vsel %vm18507_vm5, %v5056_v8, %v5057_v10  ;;  %v22333_v30 = vld [vmem:[#allocation56_spill] sm:$0xff]  ;;  %v22335_v8 = vld [vmem:[#allocation57_spill] sm:$0xff]  ;;  %464 = vst [vmem:[#allocation2] sm:$0xff] %v22106_v55  ;;  %466 = vst [vmem:[#allocation2 + $0x10] sm:$0xff] %v22106_v55 }
 0x1a0   : > { %15261 = vmatprep.mubr.bf16.mxu1 %v17379_v60  ;;  %v14117_v20 = vcombine.low %v19845_v42, %v19866_v21  ;;  %15450 = vmatmul.mubr.bf16.gmra.mrb[8].mxu0 %v19634_v46  ;;  %v4358_v60 = vsel %vm18129_vm2, %v19416_v43, %v22330_v28  ;;  %v22332_v46 = vld [vmem:[#allocation51_spill] sm:$0xff]  ;;  %v4392_v10 = vsel %vm18129_vm2, %v22335_v8, %v22334_v29  ;;  %v17393_v43 = vld [vmem:[%s22018_s1 + $0x238] sm:$0xff]   ;;  %v22338_v33 = vld [vmem:[#allocation60_spill] sm:$0xff] }
 0x1a1   : > { %15453 = vmatprep.mubr.bf16.mxu0 %v14036_v3  ;;  %15482 = vmatpush3.bf16.msra.mxu0 %v17384_v15  ;;  %v4382_v57 = vsel %vm18129_vm2, %v22333_v30, %v22332_v46  ;;  %v14037_v17 = vcombine.low %v4358_v60, %v4368_v0  ;;  %v17385_v15 = vld [vmem:[%s18102_s16 + $0x84] sm:$0xff]   ;;  %v22336_v3 = vld [vmem:[#allocation52_spill] sm:$0xff]  ;;  %467 = vst [vmem:[#allocation2 + $0x18] sm:$0xff] %v22106_v55  ;;  %469 = vst [vmem:[#allocation2 + $0x28] sm:$0xff] %v22106_v55 }
 0x1a2   : > { %15483 = vmatprep.subr.bf16.mxu0 %v17387_v1  ;;  %v14038_v14 = vcombine.low %v4382_v57, %v4392_v10  ;;  %v22337_v28 = vld [vmem:[#allocation58_spill] sm:$0xff]  ;;  %v22339_v0 = vld [vmem:[#allocation59_spill] sm:$0xff]  ;;  %470 = vst [vmem:[#allocation2 + $0x30] sm:$0xff] %v22106_v55  ;;  %472 = vst [vmem:[#allocation2 + $0x40] sm:$0xff] %v22106_v55 }
 0x1a3   : > { %v4406_v60 = vsel %vm18129_vm2, %v22337_v28, %v22336_v3  ;;  %v22342_v30 = vld [vmem:[#allocation63_spill] sm:$0xff]  ;;  %v22343_v57 = vld [vmem:[#allocation62_spill] sm:$0xff]  ;;  %473 = vst [vmem:[#allocation2 + $0x48] sm:$0xff] %v22106_v55  ;;  %475 = vst [vmem:[#allocation2 + $0x58] sm:$0xff] %v22106_v55 }
 0x1a4   : > { %v4440_v29 = vsel %vm18129_vm2, %v22343_v57, %v22342_v30  ;;  %v22345_v28 = vld [vmem:[#allocation67_spill] sm:$0xff]  ;;  %v22350_v30 = vld [vmem:[#allocation65_spill] sm:$0xff]  ;;  %476 = vst [vmem:[#allocation2 + $0x60] sm:$0xff] %v22106_v55  ;;  %478 = vst [vmem:[#allocation2 + $0x70] sm:$0xff] %v22106_v55 }
 0x1a5   : > { %15484 = vmatpush3.bf16.msra.mxu0 %v17387_v1  ;;  %v22340_v1 = vld [vmem:[#allocation53_spill] sm:$0xff]  ;;  %v4502_v57 = vsel %vm18129_vm2, %v19566_v27, %v22350_v30  ;;  %v17392_v27 = vld [vmem:[%s18102_s16 + $0xc0] sm:$0xff]   ;;  %479 = vst [vmem:[#allocation2 + $0x78] sm:$0xff] %v22106_v55  ;;  %481 = vst [vmem:[#allocation2 + $0x88] sm:$0xff] %v22106_v55 }
 0x1a6   : > { %15485 = vmatprep.subr.bf16.mxu0 %v17390_v19  ;;  %v22369_v30 = vld [vmem:[#allocation30_spill] sm:$0xff]  ;;  %482 = vst [vmem:[#allocation2 + $0x90] sm:$0xff] %v22106_v55  ;;  %484 = vst [vmem:[#allocation2 + $0xa0] sm:$0xff] %v22106_v55 }
 0x1a7   : > { %15262 = vmatmul.mubr.bf16.gmra.mrb[12].mxu1 %v17380_v18  ;;  %v4416_v18 = vsel %vm18129_vm2, %v22339_v0, %v22338_v33  ;;  %v22346_v33 = vld [vmem:[#allocation68_spill] sm:$0xff]  ;;  %v22348_v0 = vld [vmem:[#allocation71_spill] sm:$0xff]  ;;  %485 = vst [vmem:[#allocation2 + $0xa8] sm:$0xff] %v22106_v55  ;;  %487 = vst [vmem:[#allocation2 + $0xb8] sm:$0xff] %v22106_v55 }
 0x1a8   : > { %15265 = vmatprep.mubr.bf16.mxu1 %v17382_v47  ;;  %15454 = vmatmul.mubr.bf16.gmra.mrb[12].mxu0 %v14037_v17  ;;  %v22341_v47 = vld [vmem:[#allocation61_spill] sm:$0xff]  ;;  %v14039_v8 = vcombine.low %v4406_v60, %v4416_v18  ;;  %v4464_v60 = vsel %vm18129_vm2, %v22346_v33, %v22345_v28  ;;  %488 = vst [vmem:[#allocation2 + $0xc0] sm:$0xff] %v22106_v55  ;;  %490 = vst [vmem:[#allocation2 + $0xd0] sm:$0xff] %v22106_v55 }
 0x1a9   : > { %15457 = vmatprep.mubr.bf16.mxu0 %v14038_v14  ;;  %15486 = vmatpush3.bf16.msra.mxu0 %v17390_v19  ;;  %v4430_v46 = vsel %vm18129_vm2, %v22341_v47, %v22340_v1  ;;  %v17386_v17 = vld [vmem:[%s18102_s16 + $0x90] sm:$0xff]   ;;  %v17388_v19 = vld [vmem:[%s18102_s16 + $0x9c] sm:$0xff]   ;;  %491 = vst [vmem:[#allocation2 + $0xd8] sm:$0xff] %v22106_v55  ;;  %493 = vst [vmem:[#allocation2 + $0xe8] sm:$0xff] %v22106_v55 }
 0x1aa   : > { %15487 = vmatprep.subr.bf16.mxu0 %v17393_v43  ;;  %v14040_v10 = vcombine.low %v4430_v46, %v4440_v29  ;;  %v22344_v14 = vld [vmem:[#allocation66_spill] sm:$0xff]  ;;  %v17391_v46 = vld [vmem:[%s18102_s16 + $0xb4] sm:$0xff]   ;;  %v4512_v29 = vsel %vm18129_vm2, %v19568_v59, %v19563_v22  ;;  %v4550_v22 = vsel %vm18129_vm2, %v19610_v6, %v19545_v44  ;;  %494 = vst [vmem:[#allocation2 + $0xf0] sm:$0xff] %v22106_v55  ;;  %496 = vst [vmem:[#allocation2 + $0x100] sm:$0xff] %v22106_v55 }
 0x1ab   : > { %v4454_v3 = vsel %vm18129_vm2, %v22344_v14, %v19454_v62  ;;  %v17389_v62 = vld [vmem:[%s18102_s16 + $0xa8] sm:$0xff]   ;;  %v22352_v59 = vld [vmem:[#allocation70_spill] sm:$0xff]  ;;  %497 = vst [vmem:[#allocation2 + $0x108] sm:$0xff] %v22106_v55  ;;  %499 = vst [vmem:[#allocation2 + $0x118] sm:$0xff] %v22106_v55  ;;  %s17751_s16 = sshll.u32 %s17859_s8, 4  ;;  %s17752_s16 = int_to_ptr.vmem [resolvable:$false] %s17751_s16 }
 0x1ac   : > { %v14041_v1 = vcombine.low %v4454_v3, %v4464_v60  ;;  %v22356_v3 = vld [vmem:[#allocation24_spill] sm:$0xff]  ;;  %500 = vst [vmem:[#allocation2 + $0x120] sm:$0xff] %v22106_v55  ;;  %502 = vst [vmem:[#allocation2 + $0x130] sm:$0xff] %v22106_v55  ;;  %s17753_s20 = scalar_lea.vmem %s17752_s16, 32  ;;  %p17754_p4 = scmp.lt.s32.totalorder %s13405_s27, %s17752_s16 }
 0x1ad   : > { %15488 = vmatpush3.bf16.msra.mxu0 %v17393_v43  ;;  %v22359_v6 = vld [vmem:[#allocation72_spill] sm:$0xff]  ;;  %503 = vst [vmem:[#allocation2 + $0x138] sm:$0xff] %v22106_v55  ;;  %505 = vst [vmem:[#allocation2 + $0x148] sm:$0xff] %v22106_v55  ;;  %p17755_p7 = scmp.lt.s32.totalorder %s17753_s20, %s17747_s29 }
 0x1ae   : > { %v22361_v60 = vld [vmem:[#allocation28_spill] sm:$0xff]  ;;  %506 = vst [vmem:[#allocation2 + $0x150] sm:$0xff] %v22106_v55  ;;  %508 = vst [vmem:[#allocation2 + $0x160] sm:$0xff] %v22106_v55 }
 0x1af   : > { %15266 = vmatmul.mubr.bf16.gmra.mrb[16].mxu1 %v17383_v7  ;;  %v22347_v7 = vld [vmem:[#allocation64_spill] sm:$0xff]  ;;  %509 = vst [vmem:[#allocation2 + $0x168] sm:$0xff] %v22106_v55  ;;  %511 = vst [vmem:[#allocation2 + $0x178] sm:$0xff] %v22106_v55  ;;  %p17756_p8 = por %p17755_p7, %p17754_p4 }
 0x1b0   : > { %15269 = vmatprep.mubr.bf16.mxu1 %v17385_v15  ;;  %15458 = vmatmul.mubr.bf16.gmra.mrb[16].mxu0 %v14039_v8  ;;  %v4478_v43 = vsel %vm18129_vm2, %v22348_v0, %v22347_v7  ;;  %v22349_v15 = vld [vmem:[#allocation69_spill] sm:$0xff]  ;;  %v4536_v8 = vsel %vm18129_vm2, %v19576_v58, %v19572_v16  ;;  %v22353_v16 = vrot.slane %v22352_v59, 9  ;;  %v22362_v7 = vrot.slane %v22361_v60, 5  ;;  %v22363_v0 = vld [vmem:[#allocation27_spill] sm:$0xff]  ;;  %512 = vst [vmem:[#allocation2 + $0x180] sm:$0xff] %v22106_v55 }
 0x1b1   : > { %15461 = vmatprep.mubr.bf16.mxu0 %v14040_v10  ;;  %v4488_v18 = vsel %vm18129_vm2, %v19559_v9, %v22349_v15  ;;  %v4526_v9 = vsel %vm18129_vm2, %v19570_v41, %v19527_v31  ;;  %v14043_v10 = vcombine.low %v4502_v57, %v4512_v29  ;;  %v4560_v31 = vsel %vm18129_vm2, %v19642_v36, %v19579_v54  ;;  %v22370_v57 = vld [vmem:[#allocation43_spill] sm:$0xff]  ;;  %p17757_p11 = pnand %p17756_p8, %p17750_p3 }
 0x1b2   : > { %v14042_v47 = vcombine.low %v4478_v43, %v4488_v18  ;;  %v22351_v41 = vrot.slane %v22282_v52, 5  ;;  %v14045_v33 = vcombine.low %v4550_v22, %v4560_v31  ;;  %v22358_v54 = vrot.slane %v22357_v39, 5  ;;  %v22364_v18 = vld [vmem:[#allocation31_spill] sm:$0xff]  ;;  %514 = vst [vmem:[#allocation2 + $0x190] sm:$0xff] %v22106_v55  ;;  %515 = vst [vmem:[#allocation2 + $0x198] sm:$0xff] %v22106_v55 }
 0x1b3   : > { %v22360_v52 = vrot.slane %v22359_v6, 9  ;;  %v4960_v43 = vsel %vm18507_vm5, %v22363_v0, %v22362_v7  ;;  %v22371_v29 = vcombine.low %v22369_v30, %v22370_v57  ;;  %517 = vst [vmem:[#allocation2 + $0x1a8] sm:$0xff] %v22106_v55  ;;  %518 = vst [vmem:[#allocation3] sm:$0xff] %v22106_v55 }
 0x1b4   : > { %v4950_v58 = vsel %vm18507_vm5, %v22353_v16, %v22351_v41  ;;  %520 = vst [vmem:[#allocation3 + $0x10] sm:$0xff] %v22106_v55  ;;  %521 = vst [vmem:[#allocation3 + $0x18] sm:$0xff] %v22106_v55 }
 0x1b5   : > { %v4957_v36 = vsel %vm18507_vm5, %v22360_v52, %v22358_v54  ;;  %523 = vst [vmem:[#allocation3 + $0x28] sm:$0xff] %v22106_v55  ;;  %524 = vst [vmem:[#allocation3 + $0x30] sm:$0xff] %v22106_v55  ;;  %v20181_v52 = vld [vmem:[%s22019_s2] ss:$0 sm:$0xff] }
 0x1b6   : > { %v14103_v15 = vcombine.low %v4957_v36, %v4960_v43  ;;  %526 = vst [vmem:[#allocation3 + $0x40] sm:$0xff] %v22106_v55  ;;  %527 = vst [vmem:[#allocation3 + $0x48] sm:$0xff] %v22106_v55 }
 0x1b7   : > { %15270 = vmatmul.mubr.bf16.gmra.mrb[20].mxu1 %v17386_v17  ;;  %v14044_v17 = vcombine.low %v4526_v9, %v4536_v8  ;;  %v22372_v9 = vld [vmem:[#allocation46_spill] sm:$0xff]  ;;  %529 = vst [vmem:[#allocation3 + $0x58] sm:$0xff] %v22106_v55  ;;  %530 = vst [vmem:[#allocation3 + $0x60] sm:$0xff] %v22106_v55 }
 0x1b8   : > { %15273 = vmatprep.mubr.bf16.mxu1 %v17388_v19  ;;  %15462 = vmatmul.mubr.bf16.gmra.mrb[20].mxu0 %v14041_v1  ;;  %v22354_v19 = vld [vmem:[#allocation25_spill] sm:$0xff]  ;;  %v22365_v1 = vcombine.low %v19656_v63, %v22364_v18  ;;  %v22373_v8 = vcombine.low %v19695_v12, %v22372_v9  ;;  %v17394_v12 = vld [vmem:[%s22020_s3 + $0x40] sm:$0xff]   ;;  %532 = vst [vmem:[#allocation3 + $0x70] sm:$0xff] %v22106_v55  ;;  %533 = vst [vmem:[#allocation3 + $0x78] sm:$0xff] %v22106_v55 }
 0x1b9   : > { %15465 = vmatprep.mubr.bf16.mxu0 %v14042_v47  ;;  %v22355_v14 = vrot.slane %v22354_v19, 5  ;;  %v22366_v47 = vld [vmem:[#allocation29_spill] sm:$0xff]  ;;  %15521 = vmatprep.subr.bf16.mxu1 %v17394_v12  ;;  %535 = vst [vmem:[#allocation3 + $0x88] sm:$0xff] %v22106_v55  ;;  %536 = vst [vmem:[#allocation3 + $0x90] sm:$0xff] %v22106_v55 }
 0x1ba   : > { %15522 = vmatpush3.bf16.msra.mxu1 %v17394_v12  ;;  %538 = vst [vmem:[#allocation3 + $0xa0] sm:$0xff] %v22106_v55  ;;  %539 = vst [vmem:[#allocation3 + $0xa8] sm:$0xff] %v22106_v55 }
 0x1bb   : > { %v4953_v28 = vsel %vm18507_vm5, %v22356_v3, %v22355_v14  ;;  %15523 = vmatprep.subr.bf16.mxu1 %v17395_v2  ;;  %541 = vst [vmem:[#allocation3 + $0xb8] sm:$0xff] %v22106_v55  ;;  %542 = vst [vmem:[#allocation3 + $0xc0] sm:$0xff] %v22106_v55 }
 0x1bc   : > { %v14102_v44 = vcombine.low %v4950_v58, %v4953_v28  ;;  %544 = vst [vmem:[#allocation3 + $0xd0] sm:$0xff] %v22106_v55  ;;  %545 = vst [vmem:[#allocation3 + $0xd8] sm:$0xff] %v22106_v55 }
 0x1bd   : > { %547 = vst [vmem:[#allocation3 + $0xe8] sm:$0xff] %v22106_v55  ;;  %548 = vst [vmem:[#allocation3 + $0xf0] sm:$0xff] %v22106_v55 }
 0x1be   : > { %15524 = vmatpush3.bf16.msra.mxu1 %v17395_v2  ;;  %550 = vst [vmem:[#allocation3 + $0x100] sm:$0xff] %v22106_v55  ;;  %551 = vst [vmem:[#allocation3 + $0x108] sm:$0xff] %v22106_v55 }
 0x1bf   : > { %15274 = vmatmul.mubr.bf16.gmra.mrb[24].mxu1 %v17389_v62  ;;  %v22367_v62 = vld [vmem:[#allocation32_spill] sm:$0xff]  ;;  %15525 = vmatprep.subr.bf16.mxu1 %v17396_v53  ;;  %553 = vst [vmem:[#allocation3 + $0x118] sm:$0xff] %v22106_v55  ;;  %554 = vst [vmem:[#allocation3 + $0x120] sm:$0xff] %v22106_v55 }
 0x1c0   : > { %15277 = vmatprep.mubr.bf16.mxu1 %v17391_v46  ;;  %15466 = vmatmul.mubr.bf16.gmra.mrb[24].mxu0 %v14043_v10  ;;  %v22368_v46 = vcombine.low %v22366_v47, %v22367_v62  ;;  %v22375_v10 = vld [vmem:[#allocation23_spill] sm:$0xff]  ;;  %556 = vst [vmem:[#allocation3 + $0x130] sm:$0xff] %v22106_v55  ;;  %557 = vst [vmem:[#allocation3 + $0x138] sm:$0xff] %v22106_v55 }
 0x1c1   : > { %15469 = vmatprep.mubr.bf16.mxu0 %v14044_v17  ;;  %v22376_v17 = vld [vmem:[#allocation47_spill] sm:$0xff]  ;;  %559 = vst [vmem:[#allocation3 + $0x148] sm:$0xff] %v22106_v55  ;;  %560 = vst [vmem:[#allocation3 + $0x150] sm:$0xff] %v22106_v55 }
 0x1c2   : > { %v22377_v63 = vcombine.low %v22375_v10, %v22376_v17  ;;  %15526 = vmatpush3.bf16.msra.mxu1 %v17396_v53  ;;  %562 = vst [vmem:[#allocation3 + $0x160] sm:$0xff] %v22106_v55  ;;  %563 = vst [vmem:[#allocation3 + $0x168] sm:$0xff] %v22106_v55  ;;  %v17403_v53 = vld [vmem:[%s22020_s3 + $0x8] sm:$0xff]  }
 0x1c3   : > { %565 = vst [vmem:[#allocation3 + $0x178] sm:$0xff] %v22106_v55  ;;  %566 = vst [vmem:[#allocation3 + $0x180] sm:$0xff] %v22106_v55 }
 0x1c4   : > { %568 = vst [vmem:[#allocation3 + $0x190] sm:$0xff] %v22106_v55  ;;  %569 = vst [vmem:[#allocation3 + $0x198] sm:$0xff] %v22106_v55 }
 0x1c5   : > { %571 = vst [vmem:[#allocation3 + $0x1a8] sm:$0xff] %v22106_v55 }
 0x1c7   : > { %15278 = vmatmul.mubr.bf16.gmra.mrb[28].mxu1 %v17392_v27 }
 0x1c8   : > { %15470 = vmatmul.mubr.bf16.gmra.mrb[28].mxu0 %v14045_v33  ;;  %15537 = vmatprep.mubr.bf16.mxu1 %v22106_v55 }
 0x1c9   : > { %15489 = vmatprep.mubr.bf16.mxu0 %v14102_v44 }
 0x1d0   : > { %15490 = vmatmul.mubr.bf16.vlgmr.msra.gmra.mrb[0].mxu0 %v14103_v15 }
 0x1d1   : > { %15493 = vmatprep.mubr.bf16.mxu0 %v22365_v1 }
 0x1d8   : > { %15494 = vmatmul.mubr.bf16.gmra.mrb[4].mxu0 %v22368_v46 }
 0x1d9   : > { %15497 = vmatprep.mubr.bf16.mxu0 %v22371_v29 }
 0x1e0   : > { %15498 = vmatmul.mubr.bf16.gmra.mrb[8].mxu0 %v22373_v8 }
 0x1e1   : > { %15501 = vmatprep.mubr.bf16.mxu0 %v22374_v37 }
 0x1e8   : > { %15502 = vmatmul.mubr.bf16.gmra.mrb[12].mxu0 %v22377_v63 }
 0x1e9   : > { %15505 = vmatprep.mubr.bf16.mxu0 %v14110_v40  ;;  %v17397_v40 = vld [vmem:[%s22020_s3 + $0x58] sm:$0xff]  }
 0x1ea   : > { %15527 = vmatprep.subr.bf16.mxu1 %v17397_v40 }
 0x1eb   : > { %15528 = vmatpush3.bf16.msra.mxu1 %v17397_v40 }
 0x1ec   : > { %15529 = vmatprep.subr.bf16.mxu1 %v17398_v38 }
 0x1ef   : > { %15530 = vmatpush3.bf16.msra.mxu1 %v17398_v38 }
 0x1f0   : > { %15506 = vmatmul.mubr.bf16.gmra.mrb[16].mxu0 %v14111_v5  ;;  %15531 = vmatprep.subr.bf16.mxu1 %v17399_v26  ;;  %v20127_v5 = vld [vmem:[%s22020_s3] sm:$0xff]  }
 0x1f1   : > { %15509 = vmatprep.mubr.bf16.mxu0 %v14112_v23 }
 0x1f3   : > { %15532 = vmatpush3.bf16.msra.mxu1 %v17399_v26 }
 0x1f4   : > { %15533 = vmatprep.subr.bf16.mxu1 %v20043_v32 }
 0x1f7   : > { %15534 = vmatpush3.bf16.msra.mxu1 %v20043_v32 }
 0x1f8   : > { %15510 = vmatmul.mubr.bf16.gmra.mrb[20].mxu0 %v14113_v24  ;;  %15535 = vmatprep.subr.bf16.mxu1 %v17401_v51 }
 0x1f9   : > { %15513 = vmatprep.mubr.bf16.mxu0 %v14114_v56 }
 0x1fb   : > { %15536 = vmatpush3.bf16.msra.mxu1 %v17401_v51 }
 0x1fc   : > { %15569 = vmatprep.subr.bf16.mxu1 %v20127_v5 }
 0x200   : > { %15514 = vmatmul.mubr.bf16.gmra.mrb[24].mxu0 %v14115_v48 }
 0x201   : > { %15517 = vmatprep.mubr.bf16.mxu0 %v14116_v34 }
 0x208   : > { %15518 = vmatmul.mubr.bf16.gmra.mrb[28].mxu0 %v14117_v20 }
 0x209   : > { %15969 = vmatprep.mubr.bf16.mxu0 %v22106_v55 }
 0x262   : > { %v15251_v11 = vpop.f32.mrb[0].mxu1 }
 0x263   : > { %v2331_v35 = vpop.f32.mrb[1].mxu1 }
 0x264   : > { %v15252_v23 = vpop.f32.mrb[2].mxu1 }
 0x265   : > { %v2334_v61 = vpop.f32.mrb[3].mxu1 }
 0x26a   : > { %v15255_v24 = vpop.f32.mrb[4].mxu1 }
 0x26b   : > { %v2347_v13 = vpop.f32.mrb[5].mxu1 }
 0x26c   : > { %v15256_v49 = vpop.f32.mrb[6].mxu1 }
 0x26d   : > { %v2350_v4 = vpop.f32.mrb[7].mxu1 }
 0x272   : > { %v20130_v56 = vpop.f32.mrb[8].mxu1 }
 0x273   : > { %v20132_v50 = vpop.f32.mrb[9].mxu1 }
 0x274   : > { %v20134_v25 = vpop.f32.mrb[10].mxu1 }
 0x275   : > { %v20136_v48 = vpop.f32.mrb[11].mxu1 }
 0x27a   : > { %v20138_v42 = vpop.f32.mrb[12].mxu1 }
 0x27b   : > { %v20140_v45 = vpop.f32.mrb[13].mxu1 }
 0x27c   : > { %v20142_v34 = vpop.f32.mrb[14].mxu1 }
 0x27d   : > { %v20144_v21 = vpop.f32.mrb[15].mxu1 }
 0x282   : > { %v20146_v20 = vpop.f32.mrb[16].mxu1 }
 0x283   : > { %v20148_v27 = vpop.f32.mrb[17].mxu1 }
 0x284   : > { %v20150_v22 = vpop.f32.mrb[18].mxu1 }
 0x285   : > { %v20152_v31 = vpop.f32.mrb[19].mxu1 }
 0x28a   : > { %v20154_v41 = vpop.f32.mrb[20].mxu1 }
 0x28b   : > { %v20156_v59 = vpop.f32.mrb[21].mxu1 }
 0x28c   : > { %v20158_v16 = vpop.f32.mrb[22].mxu1 }
 0x28d   : > { %v20160_v58 = vpop.f32.mrb[23].mxu1 }
 0x292   : > { %v20162_v19 = vpop.f32.mrb[24].mxu1 }
 0x293   : > { %v20164_v14 = vpop.f32.mrb[25].mxu1 }
 0x294   : > { %v20166_v3 = vpop.f32.mrb[26].mxu1 }
 0x295   : > { %v20168_v28 = vpop.f32.mrb[27].mxu1 }
 0x29a   : > { %v20170_v33 = vpop.f32.mrb[28].mxu1 }
 0x29b   : > { %v20172_v44 = vpop.f32.mrb[29].mxu1 }
 0x29c   : > { %v20174_v39 = vpop.f32.mrb[30].mxu1 }
 0x29d   : > { %v20176_v54 = vpop.f32.mrb[31].mxu1 }
 0x2a3   : > { %v15491_v6 = vpop.f32.mrb[0].mxu0 }
 0x2a4   : > { %v16425_v36 = vadd.f32 %v15491_v6, %v15251_v11  ;;  %v5222_v60 = vpop.f32.mrb[1].mxu0 }
 0x2a5   : > { %v16426_v7 = vadd.f32 %v5222_v60, %v2331_v35  ;;  %v15492_v0 = vpop.f32.mrb[2].mxu0 }
 0x2a6   : > { %v5390_v43 = vadd.f32 %v16425_v36, %v20181_v52  ;;  %v16427_v15 = vadd.f32 %v15492_v0, %v15252_v23  ;;  %v5225_v18 = vpop.f32.mrb[3].mxu0  ;;  %v17404_v23 = vld [vmem:[%s22020_s3 + $0x10] sm:$0xff]  }
 0x2a7   : > { %v5388_v1 = vadd.f32 %v16426_v7, %v20181_v52  ;;  %v16428_v47 = vadd.f32 %v5225_v18, %v2334_v61 }
 0x2a8   : > { %v5391_v62 = vadd.f32 %v16427_v15, %v20181_v52  ;;  %v5422_v30 = vmax.f32 %v5390_v43, 0.0  ;;  %v17405_v43 = vld [vmem:[%s22020_s3 + $0x18] sm:$0xff]  }
 0x2a9   : > { %v5389_v46 = vadd.f32 %v16428_v47, %v20181_v52  ;;  %v5420_v29 = vmax.f32 %v5388_v1, 0.0 }
 0x2aa   : > { %v5423_v57 = vmax.f32 %v5391_v62, 0.0 }
 0x2ab   : > { %v5421_v9 = vmax.f32 %v5389_v46, 0.0  ;;  %v15495_v8 = vpop.f32.mrb[4].mxu0 }
 0x2ac   : > { %v20187_v37 = vpack.c.bf16 %v5423_v57, %v5422_v30  ;;  %v16429_v10 = vadd.f32 %v15495_v8, %v15255_v24  ;;  %v5238_v17 = vpop.f32.mrb[5].mxu0 }
 0x2ad   : > { %v20189_v63 = vpack.c.bf16 %v5421_v9, %v5420_v29  ;;  %v16430_v12 = vadd.f32 %v5238_v17, %v2347_v13  ;;  %v15496_v2 = vpop.f32.mrb[6].mxu0 }
 0x2ae   : > { %5470 = vst [vmem:[#allocation2 + $0x38] sm:$0xff] %v20187_v37  ;;  %v5394_v40 = vadd.f32 %v16429_v10, %v20181_v52  ;;  %v16431_v38 = vadd.f32 %v15496_v2, %v15256_v49  ;;  %v5241_v26 = vpop.f32.mrb[7].mxu0 }
 0x2af   : > { %5469 = vst [vmem:[#allocation2 + $0x20] sm:$0xff] %v20189_v63  ;;  %v5392_v32 = vadd.f32 %v16430_v12, %v20181_v52  ;;  %v16432_v51 = vadd.f32 %v5241_v26, %v2350_v4  ;;  %15538 = vmatmul.mubr.bf16.vlgmr.msra.gmra.mrb[32].mxu1 %v20189_v63 }
 0x2b0   : > { %v5395_v11 = vadd.f32 %v16431_v38, %v20181_v52  ;;  %15541 = vmatprep.mubr.bf16.mxu1 %v20187_v37  ;;  %15570 = vmatpush3.bf16.msra.mxu1 %v20127_v5  ;;  %v5426_v61 = vmax.f32 %v5394_v40, 0.0 }
 0x2b1   : > { %v5393_v35 = vadd.f32 %v16432_v51, %v20181_v52  ;;  %15571 = vmatprep.subr.bf16.mxu1 %v17403_v53  ;;  %v5424_v13 = vmax.f32 %v5392_v32, 0.0 }
 0x2b2   : > { %v5427_v24 = vmax.f32 %v5395_v11, 0.0 }
 0x2b3   : > { %v5425_v49 = vmax.f32 %v5393_v35, 0.0  ;;  %v15499_v4 = vpop.f32.mrb[8].mxu0 }
 0x2b4   : > { %v20206_v6 = vpack.c.bf16 %v5427_v24, %v5426_v61  ;;  %v16433_v36 = vadd.f32 %v15499_v4, %v20130_v56  ;;  %v5254_v60 = vpop.f32.mrb[9].mxu0  ;;  %15572 = vmatpush3.bf16.msra.mxu1 %v17403_v53  ;;  %v17407_v53 = vld [vmem:[%s22020_s3 + $0x28] sm:$0xff]  }
 0x2b5   : > { %v20209_v7 = vpack.c.bf16 %v5425_v49, %v5424_v13  ;;  %v16434_v5 = vadd.f32 %v5254_v60, %v20132_v50  ;;  %v15500_v0 = vpop.f32.mrb[10].mxu0  ;;  %15573 = vmatprep.subr.bf16.mxu1 %v17404_v23 }
 0x2b6   : > { %5472 = vst [vmem:[#allocation2 + $0x68] sm:$0xff] %v20206_v6  ;;  %v5398_v15 = vadd.f32 %v16433_v36, %v20181_v52  ;;  %v16435_v18 = vadd.f32 %v15500_v0, %v20134_v25  ;;  %v5257_v1 = vpop.f32.mrb[11].mxu0  ;;  %v17406_v25 = vld [vmem:[%s22020_s3 + $0x20] sm:$0xff]  }
 0x2b7   : > { %5471 = vst [vmem:[#allocation2 + $0x50] sm:$0xff] %v20209_v7  ;;  %v5396_v56 = vadd.f32 %v16434_v5, %v20181_v52  ;;  %v16436_v47 = vadd.f32 %v5257_v1, %v20136_v48  ;;  %15542 = vmatmul.mubr.bf16.gmra.mrb[36].mxu1 %v20209_v7  ;;  %v17409_v5 = vld [vmem:[%s22020_s3 + $0x38] sm:$0xff]  }
 0x2b8   : > { %v5399_v50 = vadd.f32 %v16435_v18, %v20181_v52  ;;  %15545 = vmatprep.mubr.bf16.mxu1 %v20206_v6  ;;  %15574 = vmatpush3.bf16.msra.mxu1 %v17404_v23  ;;  %v5430_v46 = vmax.f32 %v5398_v15, 0.0 }
 0x2b9   : > { %v5397_v62 = vadd.f32 %v16436_v47, %v20181_v52  ;;  %15575 = vmatprep.subr.bf16.mxu1 %v17405_v43  ;;  %v5428_v57 = vmax.f32 %v5396_v56, 0.0 }
 0x2ba   : > { %v5431_v30 = vmax.f32 %v5399_v50, 0.0 }
 0x2bb   : > { %v5429_v29 = vmax.f32 %v5397_v62, 0.0  ;;  %v15503_v9 = vpop.f32.mrb[12].mxu0 }
 0x2bc   : > { %v20228_v48 = vpack.c.bf16 %v5431_v30, %v5430_v46  ;;  %v16437_v8 = vadd.f32 %v15503_v9, %v20138_v42  ;;  %v5270_v10 = vpop.f32.mrb[13].mxu0  ;;  %15576 = vmatpush3.bf16.msra.mxu1 %v17405_v43 }
 0x2bd   : > { %v20231_v17 = vpack.c.bf16 %v5429_v29, %v5428_v57  ;;  %v16438_v12 = vadd.f32 %v5270_v10, %v20140_v45  ;;  %v15504_v2 = vpop.f32.mrb[14].mxu0  ;;  %15577 = vmatprep.subr.bf16.mxu1 %v17406_v25 }
 0x2be   : > { %5474 = vst [vmem:[#allocation2 + $0x98] sm:$0xff] %v20228_v48  ;;  %v5402_v40 = vadd.f32 %v16437_v8, %v20181_v52  ;;  %v16439_v38 = vadd.f32 %v15504_v2, %v20142_v34  ;;  %v5273_v26 = vpop.f32.mrb[15].mxu0  ;;  %v17408_v34 = vld [vmem:[%s22020_s3 + $0x30] sm:$0xff]  }
 0x2bf   : > { %5473 = vst [vmem:[#allocation2 + $0x80] sm:$0xff] %v20231_v17  ;;  %v5400_v42 = vadd.f32 %v16438_v12, %v20181_v52  ;;  %v16440_v32 = vadd.f32 %v5273_v26, %v20144_v21  ;;  %15546 = vmatmul.mubr.bf16.gmra.mrb[40].mxu1 %v20231_v17 }
 0x2c0   : > { %v5403_v45 = vadd.f32 %v16439_v38, %v20181_v52  ;;  %15549 = vmatprep.mubr.bf16.mxu1 %v20228_v48  ;;  %15578 = vmatpush3.bf16.msra.mxu1 %v17406_v25  ;;  %v5434_v11 = vmax.f32 %v5402_v40, 0.0 }
 0x2c1   : > { %v5401_v51 = vadd.f32 %v16440_v32, %v20181_v52  ;;  %15579 = vmatprep.subr.bf16.mxu1 %v17407_v53  ;;  %v5432_v23 = vmax.f32 %v5400_v42, 0.0 }
 0x2c2   : > { %v5435_v35 = vmax.f32 %v5403_v45, 0.0 }
 0x2c3   : > { %v5433_v61 = vmax.f32 %v5401_v51, 0.0  ;;  %v15507_v24 = vpop.f32.mrb[16].mxu0 }
 0x2c4   : > { %v20250_v21 = vpack.c.bf16 %v5435_v35, %v5434_v11  ;;  %v16441_v13 = vadd.f32 %v15507_v24, %v20146_v20  ;;  %v5286_v49 = vpop.f32.mrb[17].mxu0  ;;  %15580 = vmatpush3.bf16.msra.mxu1 %v17407_v53 }
 0x2c5   : > { %v20253_v4 = vpack.c.bf16 %v5433_v61, %v5432_v23  ;;  %v16442_v36 = vadd.f32 %v5286_v49, %v20148_v27  ;;  %v15508_v60 = vpop.f32.mrb[18].mxu0  ;;  %15581 = vmatprep.subr.bf16.mxu1 %v17408_v34 }
 0x2c6   : > { %5476 = vst [vmem:[#allocation2 + $0xc8] sm:$0xff] %v20250_v21  ;;  %v5406_v0 = vadd.f32 %v16441_v13, %v20181_v52  ;;  %v16443_v43 = vadd.f32 %v15508_v60, %v20150_v22  ;;  %v5289_v15 = vpop.f32.mrb[19].mxu0  ;;  %v20272_v22 = vld [vmem:[%s22020_s3 + $0x80] sm:$0xff]  }
 0x2c7   : > { %5475 = vst [vmem:[#allocation2 + $0xb0] sm:$0xff] %v20253_v4  ;;  %v5404_v20 = vadd.f32 %v16442_v36, %v20181_v52  ;;  %v16444_v18 = vadd.f32 %v5289_v15, %v20152_v31  ;;  %15550 = vmatmul.mubr.bf16.gmra.mrb[44].mxu1 %v20253_v4  ;;  %v5485_v60 = vld [vmem:[#allocation2] sm:$0x80] }
 0x2c8   : > { %v5407_v27 = vadd.f32 %v16443_v43, %v20181_v52  ;;  %15553 = vmatprep.mubr.bf16.mxu1 %v20250_v21  ;;  %15582 = vmatpush3.bf16.msra.mxu1 %v17408_v34  ;;  %v5438_v56 = vmax.f32 %v5406_v0, 0.0 }
 0x2c9   : > { %v5405_v1 = vadd.f32 %v16444_v18, %v20181_v52  ;;  %15583 = vmatprep.subr.bf16.mxu1 %v17409_v5  ;;  %v5436_v50 = vmax.f32 %v5404_v20, 0.0 }
 0x2ca   : > { %v5439_v47 = vmax.f32 %v5407_v27, 0.0 }
 0x2cb   : > { %v5437_v62 = vmax.f32 %v5405_v1, 0.0  ;;  %v15511_v31 = vpop.f32.mrb[20].mxu0 }
 0x2cc   : > { %v20274_v25 = vpack.c.bf16 %v5439_v47, %v5438_v56  ;;  %v16445_v46 = vadd.f32 %v15511_v31, %v20154_v41  ;;  %v5302_v30 = vpop.f32.mrb[21].mxu0  ;;  %15584 = vmatpush3.bf16.msra.mxu1 %v17409_v5  ;;  %v5519_v56 = vshrl.u32 %v5485_v60, 16 }
 0x2cd   : > { %v20277_v57 = vpack.c.bf16 %v5437_v62, %v5436_v50  ;;  %v16446_v29 = vadd.f32 %v5302_v30, %v20156_v59  ;;  %v15512_v9 = vpop.f32.mrb[22].mxu0  ;;  %15617 = vmatprep.subr.bf16.mxu1 %v20272_v22 }
 0x2ce   : > { %5478 = vst [vmem:[#allocation2 + $0xf8] sm:$0xff] %v20274_v25  ;;  %v5410_v8 = vadd.f32 %v16445_v46, %v20181_v52  ;;  %v16447_v10 = vadd.f32 %v15512_v9, %v20158_v16  ;;  %v5305_v12 = vpop.f32.mrb[23].mxu0  ;;  %v5521_v30 = vrot.slane %v5519_v56, 7 }
 0x2cf   : > { %5477 = vst [vmem:[#allocation2 + $0xe0] sm:$0xff] %v20277_v57  ;;  %v5408_v41 = vadd.f32 %v16446_v29, %v20181_v52  ;;  %v16448_v2 = vadd.f32 %v5305_v12, %v20160_v58  ;;  %15554 = vmatmul.mubr.bf16.gmra.mrb[48].mxu1 %v20277_v57  ;;  %v22101_v29 = vshrl.u32 %v20189_v63, 16 }
 0x2d0   : > { %v5411_v59 = vadd.f32 %v16447_v10, %v20181_v52  ;;  %15557 = vmatprep.mubr.bf16.mxu1 %v20274_v25  ;;  %v5442_v40 = vmax.f32 %v5410_v8, 0.0  ;;  %v5489_v8 = vld [vmem:[#allocation2 + $0x30] sm:$0x80]  ;;  %v5547_v10 = vshrl.u32 %v20187_v37, 16 }
 0x2d1   : > { %v5409_v53 = vadd.f32 %v16448_v2, %v20181_v52  ;;  %v5440_v26 = vmax.f32 %v5408_v41, 0.0  ;;  %v5487_v2 = vld [vmem:[#allocation2 + $0x18] sm:$0x80] }
 0x2d2   : > { %v5443_v38 = vmax.f32 %v5411_v59, 0.0 }
 0x2d3   : > { %v5441_v42 = vmax.f32 %v5409_v53, 0.0  ;;  %v15515_v16 = vpop.f32.mrb[24].mxu0 }
 0x2d4   : > { %v20291_v32 = vpack.c.bf16 %v5443_v38, %v5442_v40  ;;  %v16449_v45 = vadd.f32 %v15515_v16, %v20162_v19  ;;  %v5318_v51 = vpop.f32.mrb[25].mxu0  ;;  %v5543_v40 = vshrl.u32 %v5489_v8, 16  ;;  %v5491_v38 = vld [vmem:[#allocation2 + $0x48] sm:$0x80]  ;;  %v5531_v16 = vshrl.u32 %v5487_v2, 16 }
 0x2d5   : > { %v20294_v34 = vpack.c.bf16 %v5441_v42, %v5440_v26  ;;  %v16450_v58 = vadd.f32 %v5318_v51, %v20164_v14  ;;  %v15516_v11 = vpop.f32.mrb[26].mxu0  ;;  %v5537_v26 = vrot.slane %v22101_v29, 7  ;;  %v22096_v42 = vshrl.u32 %v20206_v6, 16  ;;  %v20360_v8 = vld [vmem:[#allocation2 + $0xc0] sm:$0x80] }
 0x2d6   : > { %5480 = vst [vmem:[#allocation2 + $0x128] sm:$0xff] %v20291_v32  ;;  %v5414_v35 = vadd.f32 %v16449_v45, %v20181_v52  ;;  %v16451_v23 = vadd.f32 %v15516_v11, %v20166_v3  ;;  %v5321_v61 = vpop.f32.mrb[27].mxu0  ;;  %v5497_v45 = vld [vmem:[#allocation2 + $0x90] sm:$0x80]  ;;  %v5549_v51 = vrot.slane %v5547_v10, 7  ;;  %v22092_v11 = vshrl.u32 %v20231_v17, 16 }
 0x2d7   : > { %5479 = vst [vmem:[#allocation2 + $0x110] sm:$0xff] %v20294_v34  ;;  %v5412_v24 = vadd.f32 %v16450_v58, %v20181_v52  ;;  %v16452_v13 = vadd.f32 %v5321_v61, %v20168_v28  ;;  %15558 = vmatmul.mubr.bf16.gmra.mrb[52].mxu1 %v20294_v34  ;;  %v5525_v28 = vrot.slane %v22106_v55, 7  ;;  %v22097_v58 = vshrl.u32 %v20209_v7, 16 }
 0x2d8   : > { %v5415_v19 = vadd.f32 %v16451_v23, %v20181_v52  ;;  %15561 = vmatprep.mubr.bf16.mxu1 %v20291_v32  ;;  %v5446_v49 = vmax.f32 %v5414_v35, 0.0  ;;  %v22091_v35 = vshrl.u32 %v20228_v48, 16  ;;  %v5495_v23 = vld [vmem:[#allocation2 + $0x78] sm:$0x80]  ;;  %v22103_v61 = vshll.u32 %v20189_v63, 16 }
 0x2d9   : > { %v5413_v14 = vadd.f32 %v16452_v13, %v20181_v52  ;;  %v5444_v5 = vmax.f32 %v5412_v24, 0.0  ;;  %v5529_v53 = vsel %vm5517_vm6, %v5521_v30, %v5525_v28  ;;  %v5555_v24 = vshrl.u32 %v5491_v38, 16  ;;  %v5499_v28 = vld [vmem:[#allocation2 + $0xa8] sm:$0x80]  ;;  %v17412_v38 = vld [vmem:[%s22020_s3 + $0x90] sm:$0xff]  }
 0x2da   : > { %v5447_v36 = vmax.f32 %v5415_v19, 0.0  ;;  %v5550_v19 = vshll.u32 %v20187_v37, 16  ;;  %v5573_v60 = vrot.slane %v22096_v42, 7  ;;  %v5597_v37 = vrot.slane %v22091_v35, 7 }
 0x2db   : > { %v5445_v3 = vmax.f32 %v5413_v14, 0.0  ;;  %v15519_v0 = vpop.f32.mrb[28].mxu0  ;;  %v5545_v14 = vrot.slane %v5543_v40, 7  ;;  %v5557_v56 = vrot.slane %v5555_v24, 7  ;;  %v22088_v40 = vshrl.u32 %v20250_v21, 16  ;;  %v20386_v24 = vld [vmem:[#allocation2 + $0x68] sm:$0xff] }
 0x2dc   : > { %v20307_v43 = vpack.c.bf16 %v5447_v36, %v5446_v49  ;;  %v16453_v15 = vadd.f32 %v15519_v0, %v20170_v33  ;;  %v5334_v20 = vpop.f32.mrb[29].mxu0  ;;  %v5591_v49 = vshrl.u32 %v5497_v45, 16  ;;  %v5540_v36 = vor.u32 %v22103_v61, %v5537_v26  ;;  %v20379_v26 = vld [vmem:[#allocation2 + $0x50] sm:$0xff] }
 0x2dd   : > { %v20311_v18 = vpack.c.bf16 %v5445_v3, %v5444_v5  ;;  %v16454_v27 = vadd.f32 %v5334_v20, %v20172_v44  ;;  %v15520_v1 = vpop.f32.mrb[30].mxu0  ;;  %v5533_v5 = vrot.slane %v5531_v16, 7  ;;  %v5579_v3 = vshrl.u32 %v5495_v23, 16 }
 0x2de   : > { %5482 = vst [vmem:[#allocation2 + $0x158] sm:$0xff] %v20307_v43  ;;  %v5418_v47 = vadd.f32 %v16453_v15, %v20181_v52  ;;  %v16455_v50 = vadd.f32 %v15520_v1, %v20174_v39  ;;  %v5337_v62 = vpop.f32.mrb[31].mxu0  ;;  %v5552_v0 = vor.u32 %v5550_v19, %v5549_v51  ;;  %v5561_v15 = vrot.slane %v22097_v58, 7 }
 0x2df   : > { %5481 = vst [vmem:[#allocation2 + $0x140] sm:$0xff] %v20311_v18  ;;  %v5416_v33 = vadd.f32 %v16454_v27, %v20181_v52  ;;  %v16456_v31 = vadd.f32 %v5337_v62, %v20176_v54  ;;  %15562 = vmatmul.mubr.bf16.gmra.mrb[56].mxu1 %v20311_v18  ;;  %v5585_v20 = vrot.slane %v22092_v11, 7  ;;  %v22099_v27 = vshll.u32 %v20206_v6, 16 }
 0x2e0   : > { %v5419_v46 = vadd.f32 %v16455_v50, %v20181_v52  ;;  %15565 = vmatprep.mubr.bf16.mxu1 %v20307_v43  ;;  %v5450_v9 = vmax.f32 %v5418_v47, 0.0  ;;  %v22089_v1 = vshrl.u32 %v20253_v4, 16  ;;  %v22100_v50 = vshll.u32 %v20209_v7, 16 }
 0x2e1   : > { %v5417_v44 = vadd.f32 %v16456_v31, %v20181_v52  ;;  %v5448_v12 = vmax.f32 %v5416_v33, 0.0  ;;  %v5493_v52 = vld [vmem:[#allocation2 + $0x60] sm:$0x80]  ;;  %v22094_v62 = vshll.u32 %v20231_v17, 16  ;;  %v22093_v33 = vshll.u32 %v20228_v48, 16  ;;  %v17411_v31 = vld [vmem:[%s22020_s3 + $0x88] sm:$0xff]  }
 0x2e2   : > { %v5451_v39 = vmax.f32 %v5419_v46, 0.0  ;;  %v5567_v13 = vshrl.u32 %v5493_v52, 16  ;;  %v5593_v46 = vrot.slane %v5591_v49, 7  ;;  %v5541_v30 = vsel %vm5517_vm6, %v5533_v5, %v5540_v36  ;;  %v20398_v36 = vld [vmem:[#allocation2 + $0x98] sm:$0xff] }
 0x2e3   : > { %v5449_v41 = vmax.f32 %v5417_v44, 0.0  ;;  %v5576_v44 = vor.u32 %v22099_v27, %v5573_v60  ;;  %v5564_v10 = vor.u32 %v22100_v50, %v5561_v15  ;;  %v5553_v2 = vsel %vm5517_vm6, %v5545_v14, %v5552_v0  ;;  %v20400_v60 = vld [vmem:[#allocation2 + $0xb0] sm:$0xff]  ;;  %v17413_v15 = vld [vmem:[%s22020_s3 + $0x98] sm:$0xff]  }
 0x2e4   : > { %v5467_v54 = vpack.c.bf16 %v5451_v39, %v5450_v9  ;;  %v5569_v47 = vrot.slane %v5567_v13, 7  ;;  %v5581_v9 = vrot.slane %v5579_v3, 7  ;;  %v5603_v39 = vshrl.u32 %v5499_v28, 16 }
 0x2e5   : > { %v20326_v59 = vpack.c.bf16 %v5449_v41, %v5448_v12  ;;  %v5588_v12 = vor.u32 %v22094_v62, %v5585_v20  ;;  %v5600_v41 = vor.u32 %v22093_v33, %v5597_v37  ;;  %v22090_v16 = vshll.u32 %v20253_v4, 16  ;;  %v20415_v37 = vld [vmem:[#allocation2 + $0xc8] sm:$0xff]  ;;  %v17414_v62 = vld [vmem:[%s22020_s3 + $0xa0] sm:$0xff]  }
 0x2e6   : > { %5484 = vst [vmem:[#allocation2 + $0x188] sm:$0xff] %v5467_v54  ;;  %v20369_v54 = vld [vmem:[#allocation2 + $0x20] sm:$0xff]  ;;  %v5577_v45 = vsel %vm5517_vm6, %v5569_v47, %v5576_v44  ;;  %v20383_v51 = vrot.slane %v5603_v39, 7  ;;  %v5565_v13 = vsel %vm5517_vm6, %v5557_v56, %v5564_v10  ;;  %v20408_v3 = vrot.slane %v22088_v40, 7  ;;  %v20434_v40 = vld [vmem:[#allocation2 + $0x128] sm:$0xff] }
 0x2e7   : > { %5483 = vst [vmem:[#allocation2 + $0x170] sm:$0xff] %v20326_v59  ;;  %15566 = vmatmul.mubr.bf16.gmra.mrb[60].mxu1 %v20326_v59  ;;  %v22102_v23 = vshrl.u32 %v20369_v54, 16  ;;  %v20392_v19 = vsel %vm5517_vm6, %v5581_v9, %v5588_v12  ;;  %v20395_v14 = vsel %vm5517_vm6, %v5593_v46, %v5600_v41  ;;  %v22095_v49 = vshll.u32 %v20369_v54, 16  ;;  %v20421_v44 = vld [vmem:[#allocation2 + $0xe0] sm:$0xff] }
 0x2e8   : > { %15585 = vmatprep.mubr.bf16.mxu1 %v5529_v53  ;;  %v5609_v53 = vrot.slane %v22089_v1, 7  ;;  %v22132_v0 = vshll.u32 %v20250_v21, 16  ;;  %v22098_v20 = vshll.u32 %v20379_v26, 16  ;;  %v22108_v28 = vshrl.u32 %v20379_v26, 16  ;;  %v20441_v11 = vld [vmem:[#allocation2 + $0x140] sm:$0xff] }
 0x2e9   : > { %v22113_v56 = vshrl.u32 %v20386_v24, 16  ;;  %v22105_v47 = vshll.u32 %v20386_v24, 16  ;;  %v22111_v9 = vshrl.u32 %v20398_v36, 16  ;;  %v22107_v39 = vshll.u32 %v20398_v36, 16 }
 0x2ea   : > { %v20404_v5 = vor.u32 %v22090_v16, %v5609_v53  ;;  %v22114_v10 = vshrl.u32 %v20400_v60, 16  ;;  %v22110_v12 = vshll.u32 %v20400_v60, 16  ;;  %v22127_v41 = vshrl.u32 %v20415_v37, 16  ;;  %v20432_v53 = vld [vmem:[#allocation2 + $0x110] sm:$0xff] }
 0x2eb   : > { %v7469_v1 = vrot.slane %v22095_v49, 1  ;;  %v22126_v16 = vshrl.u32 %v20421_v44, 16  ;;  %v22115_v35 = vshll.u32 %v20421_v44, 16  ;;  %v7493_v33 = vrot.slane %v22098_v20, 1 }
 0x2ec   : > { %v7505_v42 = vrot.slane %v22105_v47, 1  ;;  %v22117_v20 = vshll.u32 %v20432_v53, 16  ;;  %v22120_v27 = vshll.u32 %v20434_v40, 16  ;;  %v7541_v55 = vrot.slane %v22110_v12, 1 }
 0x2ed   : > { %v20465_v29 = vor.u32 %v7493_v33, %v22108_v28  ;;  %v20470_v61 = vld [vmem:[#allocation2 + $0x188] sm:$0xff]  ;;  %v22121_v33 = vshrl.u32 %v20432_v53, 16 }
 0x2ee   : > { %v20461_v50 = vld [vmem:[#allocation2 + $0x170] sm:$0xff]  ;;  %v20497_v12 = vor.u32 %v7541_v55, %v22114_v10  ;;  %v7589_v52 = vrot.slane %v22117_v20, 1  ;;  %v22123_v55 = vshrl.u32 %v20441_v11, 16 }
 0x2ef   : > { %15586 = vmatmul.mubr.bf16.vlgmr.msra.gmra.mrb[32].mxu1 %v5541_v30 }
 0x2f0   : > { %15589 = vmatprep.mubr.bf16.mxu1 %v5553_v2  ;;  %15618 = vmatpush3.bf16.msra.mxu1 %v20272_v22  ;;  %v20388_v22 = vld [vmem:[#allocation2 + $0x80] sm:$0xff]  ;;  %v22112_v2 = vshll.u32 %v20415_v37, 16  ;;  %v20528_v20 = vor.u32 %v7589_v52, %v22121_v33 }
 0x2f1   : > { %15619 = vmatprep.subr.bf16.mxu1 %v17411_v31  ;;  %v22104_v46 = vshll.u32 %v20388_v22, 16  ;;  %v22109_v30 = vshrl.u32 %v20388_v22, 16 }
 0x2f3   : > { %v7517_v58 = vrot.slane %v22104_v46, 1  ;;  %v20474_v46 = vor.u32 %v7505_v42, %v22113_v56  ;;  %v7553_v42 = vrot.slane %v22112_v2, 1 }
 0x2f4   : > { %15620 = vmatpush3.bf16.msra.mxu1 %v17411_v31  ;;  %v20423_v31 = vld [vmem:[#allocation2 + $0xf8] sm:$0xff] }
 0x2f5   : > { %15621 = vmatprep.subr.bf16.mxu1 %v17412_v38  ;;  %v22116_v49 = vshll.u32 %v20423_v31, 16  ;;  %v20478_v47 = vor.u32 %v7517_v58, %v22109_v30  ;;  %v17415_v58 = vld [vmem:[%s22020_s3 + $0xa8] sm:$0xff]   ;;  %v22125_v30 = vshrl.u32 %v20434_v40, 16  ;;  %v20504_v2 = vor.u32 %v7553_v42, %v22127_v41 }
 0x2f7   : > { %15590 = vmatmul.mubr.bf16.gmra.mrb[36].mxu1 %v5565_v13  ;;  %v22122_v13 = vshrl.u32 %v20423_v31, 16  ;;  %v7577_v56 = vrot.slane %v22116_v49, 1 }
 0x2f8   : > { %15593 = vmatprep.mubr.bf16.mxu1 %v5577_v45  ;;  %15622 = vmatpush3.bf16.msra.mxu1 %v17412_v38  ;;  %v20449_v45 = vld [vmem:[#allocation2 + $0x158] sm:$0xff]  ;;  %v20453_v38 = vor.u32 %v7469_v1, %v22102_v23  ;;  %v7529_v1 = vrot.slane %v22107_v39, 1  ;;  %v22118_v23 = vshll.u32 %v20441_v11, 16 }
 0x2f9   : > { %15623 = vmatprep.subr.bf16.mxu1 %v17413_v15  ;;  %v22119_v39 = vshll.u32 %v20449_v45, 16  ;;  %v22129_v49 = vshrl.u32 %v20449_v45, 16 }
 0x2fa   : > { %v20486_v28 = vor.u32 %v7529_v1, %v22111_v9  ;;  %v7565_v1 = vrot.slane %v22115_v35, 1  ;;  %v22128_v9 = vshll.u32 %v20470_v61, 16  ;;  %v7601_v35 = vrot.slane %v22120_v27, 1 }
 0x2fb   : > { %v7613_v42 = vrot.slane %v22118_v23, 1  ;;  %v17416_v23 = vld [vmem:[%s22020_s3 + $0xb0] sm:$0xff]   ;;  %v22130_v27 = vshrl.u32 %v20470_v61, 16 }
 0x2fc   : > { %15624 = vmatpush3.bf16.msra.mxu1 %v17413_v15  ;;  %v22124_v15 = vshll.u32 %v20461_v50, 16  ;;  %v20514_v10 = vor.u32 %v7565_v1, %v22126_v16  ;;  %v7625_v1 = vrot.slane %v22119_v39, 1  ;;  %v22133_v39 = vshrl.u32 %v20277_v57, 16  ;;  %v5503_v16 = vld [vmem:[#allocation2 + $0xd8] sm:$0x80] }
 0x2fd   : > { %15625 = vmatprep.subr.bf16.mxu1 %v17414_v62 }
 0x2fe   : > { %v7637_v52 = vrot.slane %v22124_v15, 1  ;;  %v20550_v33 = vor.u32 %v7625_v1, %v22129_v49  ;;  %v22378_v15 = vshrl.u32 %v20360_v8, 16  ;;  %v5505_v1 = vld [vmem:[#allocation2 + $0xf0] sm:$0x80]  ;;  %v5633_v8 = vrot.slane %v22133_v39, 7  ;;  %v20587_v39 = vld [vmem:[%s22020_s3 + $0xc0] sm:$0xff]  }
 0x2ff   : > { %15594 = vmatmul.mubr.bf16.gmra.mrb[40].mxu1 %v20392_v19  ;;  %v20524_v19 = vor.u32 %v7577_v56, %v22122_v13  ;;  %v20542_v56 = vor.u32 %v7613_v42, %v22123_v55  ;;  %v7649_v13 = vrot.slane %v22128_v9, 1  ;;  %v5624_v42 = vor.u32 %v22132_v0, %v20408_v3  ;;  %v17417_v3 = vld [vmem:[%s22020_s3 + $0xb8] sm:$0xff]  }
 0x300   : > { %15597 = vmatprep.mubr.bf16.mxu1 %v20395_v14  ;;  %15626 = vmatpush3.bf16.msra.mxu1 %v17414_v62  ;;  %v22131_v62 = vshrl.u32 %v20461_v50, 16  ;;  %v20538_v14 = vor.u32 %v7601_v35, %v22125_v30  ;;  %v20554_v35 = vld [vmem:[#allocation2 + $0x38] sm:$0xff]  ;;  %v22134_v55 = vshrl.u32 %v20274_v25, 16  ;;  %v5617_v30 = vrot.slane %v22378_v15, 7 }
 0x301   : > { %15627 = vmatprep.subr.bf16.mxu1 %v17415_v58  ;;  %v20568_v9 = vor.u32 %v7649_v13, %v22130_v27  ;;  %v22135_v49 = vshll.u32 %v20554_v35, 16  ;;  %v5613_v15 = vsel %vm5517_vm6, %v20383_v51, %v20404_v5  ;;  %v5639_v27 = vshrl.u32 %v5505_v1, 16 }
 0x302   : > { %v20564_v41 = vor.u32 %v7637_v52, %v22131_v62  ;;  %v5627_v52 = vshrl.u32 %v5503_v16, 16  ;;  %v5625_v13 = vsel %vm5517_vm6, %v5617_v30, %v5624_v42  ;;  %v22139_v62 = vshll.u32 %v20277_v57, 16 }
 0x303   : > { %22379 = vst [vmem:[#allocation34_spill] sm:$0xff] %v20568_v9  ;;  %v22136_v0 = vshll.u32 %v20274_v25, 16  ;;  %v22137_v16 = vshrl.u32 %v20554_v35, 16  ;;  %v8724_v51 = vrot.slane %v22135_v49, 1  ;;  %v22138_v30 = vshrl.u32 %v20294_v34, 16 }
 0x304   : > { %15628 = vmatpush3.bf16.msra.mxu1 %v17415_v58  ;;  %v5645_v58 = vrot.slane %v22134_v55, 7  ;;  %v5636_v5 = vor.u32 %v22139_v62, %v5633_v8  ;;  %v5629_v42 = vrot.slane %v5627_v52, 7  ;;  %v22140_v1 = vshrl.u32 %v20291_v32, 16  ;;  %v5509_v9 = vld [vmem:[#allocation2 + $0x120] sm:$0x80] }
 0x305   : > { %15629 = vmatprep.subr.bf16.mxu1 %v17416_v23  ;;  %v20600_v55 = vor.u32 %v8724_v51, %v22137_v16  ;;  %v5657_v8 = vrot.slane %v22138_v30, 7  ;;  %v22143_v51 = vshll.u32 %v20294_v34, 16  ;;  %v22142_v30 = vshrl.u32 %v20311_v18, 16 }
 0x306   : > { %v5637_v52 = vsel %vm5517_vm6, %v5629_v42, %v5636_v5  ;;  %v22144_v42 = vshrl.u32 %v20307_v43, 16 }
 0x307   : > { %15598 = vmatmul.mubr.bf16.gmra.mrb[44].mxu1 %v5613_v15  ;;  %v5641_v15 = vrot.slane %v5639_v27, 7  ;;  %22380 = vst [vmem:[#allocation33_spill] sm:$0xff] %v20600_v55  ;;  %v5660_v16 = vor.u32 %v22143_v51, %v5657_v8 }
 0x308   : > { %15601 = vmatprep.mubr.bf16.mxu1 %v5625_v13  ;;  %15630 = vmatpush3.bf16.msra.mxu1 %v17416_v23  ;;  %v5648_v23 = vor.u32 %v22136_v0, %v5645_v58  ;;  %v5507_v13 = vld [vmem:[#allocation2 + $0x108] sm:$0x80]  ;;  %v5669_v58 = vrot.slane %v22140_v1, 7  ;;  %v5663_v0 = vshrl.u32 %v5509_v9, 16  ;;  %v5681_v9 = vrot.slane %v22142_v30, 7 }
 0x309   : > { %15631 = vmatprep.subr.bf16.mxu1 %v17417_v3  ;;  %v5651_v49 = vshrl.u32 %v5507_v13, 16  ;;  %v5693_v8 = vrot.slane %v22144_v42, 7  ;;  %v22147_v30 = vshrl.u32 %v20326_v59, 16  ;;  %v22381_v42 = vmov 0  }
 0x30a   : > { %v5649_v27 = vsel %vm5517_vm6, %v5641_v15, %v5648_v23  ;;  %v5665_v13 = vrot.slane %v5663_v0, 7  ;;  %v5513_v23 = vld [vmem:[#allocation2 + $0x150] sm:$0x80]  ;;  %v22146_v0 = vshll.u32 %v20307_v43, 16 }
 0x30b   : > { %v5653_v62 = vrot.slane %v5651_v49, 7  ;;  %v5687_v1 = vshrl.u32 %v5513_v23, 16  ;;  %v5705_v23 = vrot.slane %v22147_v30, 7  ;;  %v6182_v30 = vld [vmem:[#allocation2 + $0x40] sm:$0x1] }
 0x30c   : > { %15632 = vmatpush3.bf16.msra.mxu1 %v17417_v3  ;;  %v22141_v3 = vshll.u32 %v20291_v32, 16 }
 0x30d   : > { %15665 = vmatprep.subr.bf16.mxu1 %v20587_v39  ;;  %v5661_v15 = vsel %vm5517_vm6, %v5653_v62, %v5660_v16  ;;  %v6178_v62 = vld [vmem:[#allocation2 + $0x10] sm:$0x1]  ;;  %v5696_v16 = vor.u32 %v22146_v0, %v5693_v8 }
 0x30e   : > { %v5672_v5 = vor.u32 %v22141_v3, %v5669_v58  ;;  %v22145_v58 = vshll.u32 %v20311_v18, 16 }
 0x30f   : > { %15602 = vmatmul.mubr.bf16.gmra.mrb[48].mxu1 %v5637_v52  ;;  %v5511_v52 = vld [vmem:[#allocation2 + $0x138] sm:$0x80] }
 0x310   : > { %15605 = vmatprep.mubr.bf16.mxu1 %v5649_v27  ;;  %v5675_v27 = vshrl.u32 %v5511_v52, 16  ;;  %v5673_v49 = vsel %vm5517_vm6, %v5665_v13, %v5672_v5  ;;  %v5684_v3 = vor.u32 %v22145_v58, %v5681_v9  ;;  %v5689_v52 = vrot.slane %v5687_v1, 7  ;;  %v20636_v58 = vld [vmem:[#allocation2 + $0x38] sm:$0xff] }
 0x311   : > { %v6215_v5 = vrot.slane %v22381_v42, 1  ;;  %v6218_v13 = vshll.u32 %v6178_v62, 16  ;;  %v6180_v62 = vld [vmem:[#allocation2 + $0x28] sm:$0x1]  ;;  %v22149_v0 = vshll.u32 %v20636_v58, 16 }
 0x312   : > { %v5677_v51 = vrot.slane %v5675_v27, 7  ;;  %v5697_v9 = vsel %vm5517_vm6, %v5689_v52, %v5696_v16  ;;  %v22148_v27 = vshll.u32 %v20326_v59, 16  ;;  %v22382_v16 = vshll.u32 %v20189_v63, 16 }
 0x313   : > { %v6220_v8 = vrot.slane %v6218_v13, 1  ;;  %v6239_v13 = vrot.slane %v22149_v0, 1 }
 0x314   : > { %v5708_v1 = vor.u32 %v22148_v27, %v5705_v23  ;;  %v6227_v52 = vrot.slane %v22382_v16, 1  ;;  %v22383_v23 = vshrl.u32 %v20189_v63, 16 }
 0x317   : > { %15606 = vmatmul.mubr.bf16.gmra.mrb[52].mxu1 %v5661_v15  ;;  %v5515_v15 = vld [vmem:[#allocation2 + $0x168] sm:$0x80] }
 0x318   : > { %15609 = vmatprep.mubr.bf16.mxu1 %v5673_v49  ;;  %v5685_v49 = vsel %vm5517_vm6, %v5677_v51, %v5684_v3  ;;  %v5699_v55 = vshrl.u32 %v5515_v15, 16  ;;  %v6221_v51 = vsel %vm6209_vm7, %v6215_v5, %v6220_v8  ;;  %v6230_v15 = vshll.u32 %v6180_v62, 16  ;;  %v17419_v62 = vld [vmem:[%s22020_s3 + $0xc8] sm:$0xff]  }
 0x31a   : > { %v5701_v42 = vrot.slane %v5699_v55, 7  ;;  %v6235_v55 = vshrl.u32 %v20636_v58, 16  ;;  %v6232_v27 = vrot.slane %v6230_v15, 1 }
 0x31c   : > { %v5709_v3 = vsel %vm5517_vm6, %v5701_v42, %v5708_v1  ;;  %v20652_v5 = vor.u32 %v6239_v13, %v6235_v55  ;;  %v6184_v1 = vld [vmem:[#allocation2 + $0x58] sm:$0x1]  ;;  %v6186_v42 = vld [vmem:[#allocation2 + $0x70] sm:$0x1] }
 0x31d   : > { %v6254_v16 = vshll.u32 %v6184_v1, 16  ;;  %v6266_v13 = vshll.u32 %v6186_v42, 16  ;;  %v22387_v1 = vshrl.u32 %v20206_v6, 16 }
 0x31f   : > { %15610 = vmatmul.mubr.bf16.gmra.mrb[56].mxu1 %v5685_v49  ;;  %v6242_v49 = vshll.u32 %v6182_v30, 16 }
 0x320   : > { %15613 = vmatprep.mubr.bf16.mxu1 %v5697_v9  ;;  %v6228_v9 = vor.u32 %v6227_v52, %v22383_v23  ;;  %v22385_v52 = vshll.u32 %v20206_v6, 16  ;;  %v22389_v6 = vshll.u32 %v20228_v48, 16 }
 0x321   : > { %v6244_v8 = vrot.slane %v6242_v49, 1  ;;  %v22386_v49 = vshrl.u32 %v20209_v7, 16 }
 0x322   : > { %v6233_v30 = vsel %vm6209_vm7, %v6228_v9, %v6232_v27  ;;  %v6263_v15 = vrot.slane %v22385_v52, 1  ;;  %v17420_v27 = vld [vmem:[%s22020_s3 + $0xd0] sm:$0xff]   ;;  %v6256_v9 = vrot.slane %v6254_v16, 1  ;;  %v6190_v52 = vld [vmem:[#allocation2 + $0xa0] sm:$0x1]  ;;  %v6287_v16 = vrot.slane %v22389_v6, 1 }
 0x323   : > { %v6245_v63 = vsel %vm6209_vm7, %v20652_v5, %v6244_v8  ;;  %v6268_v8 = vrot.slane %v6266_v13, 1  ;;  %v22390_v13 = vshrl.u32 %v20231_v17, 16  ;;  %v22394_v6 = vshrl.u32 %v20253_v4, 16 }
 0x327   : > { %15614 = vmatmul.mubr.bf16.gmra.mrb[60].mxu1 %v5709_v3 }
 0x328   : > { %15633 = vmatprep.mubr.bf16.mxu1 %v6221_v51  ;;  %v22384_v51 = vshll.u32 %v20209_v7, 16 }
 0x32a   : > { %v6251_v3 = vrot.slane %v22384_v51, 1  ;;  %v6188_v51 = vld [vmem:[#allocation2 + $0x88] sm:$0x1] }
 0x32b   : > { %v6278_v7 = vshll.u32 %v6188_v51, 16 }
 0x32c   : > { %v6252_v23 = vor.u32 %v6251_v3, %v22386_v49 }
 0x32e   : > { %v6257_v42 = vsel %vm6209_vm7, %v6252_v23, %v6256_v9  ;;  %v6280_v23 = vrot.slane %v6278_v7, 1  ;;  %v22391_v9 = vshrl.u32 %v20228_v48, 16  ;;  %v22393_v48 = vshll.u32 %v20250_v21, 16 }
 0x32f   : > { %15634 = vmatmul.mubr.bf16.vlgmr.msra.gmra.mrb[32].mxu1 %v6233_v30  ;;  %v6264_v30 = vor.u32 %v6263_v15, %v22387_v1  ;;  %v6290_v15 = vshll.u32 %v6190_v52, 16 }
 0x330   : > { %15637 = vmatprep.mubr.bf16.mxu1 %v6245_v63  ;;  %15666 = vmatpush3.bf16.msra.mxu1 %v20587_v39  ;;  %v17421_v39 = vld [vmem:[%s22020_s3 + $0xd8] sm:$0xff]   ;;  %v22388_v63 = vshll.u32 %v20231_v17, 16  ;;  %v6288_v1 = vor.u32 %v6287_v16, %v22391_v9  ;;  %v6311_v7 = vrot.slane %v22393_v48, 1  ;;  %v6196_v9 = vld [vmem:[#allocation2 + $0xe8] sm:$0x1] }
 0x331   : > { %15667 = vmatprep.subr.bf16.mxu1 %v17419_v62  ;;  %v6269_v3 = vsel %vm6209_vm7, %v6264_v30, %v6268_v8  ;;  %v6292_v51 = vrot.slane %v6290_v15, 1  ;;  %v6192_v30 = vld [vmem:[#allocation2 + $0xb8] sm:$0x1]  ;;  %v6194_v8 = vld [vmem:[#allocation2 + $0xd0] sm:$0x1] }
 0x332   : > { %v6275_v0 = vrot.slane %v22388_v63, 1  ;;  %v6302_v17 = vshll.u32 %v6192_v30, 16  ;;  %v22396_v30 = vshll.u32 %v20277_v57, 16 }
 0x334   : > { %15668 = vmatpush3.bf16.msra.mxu1 %v17419_v62  ;;  %v17422_v62 = vld [vmem:[%s22020_s3 + $0xe0] sm:$0xff]   ;;  %v6276_v49 = vor.u32 %v6275_v0, %v22390_v13  ;;  %v6293_v0 = vsel %vm6209_vm7, %v6288_v1, %v6292_v51  ;;  %v6304_v15 = vrot.slane %v6302_v17, 1  ;;  %v22395_v13 = vshrl.u32 %v20250_v21, 16 }
 0x335   : > { %15669 = vmatprep.subr.bf16.mxu1 %v17420_v27  ;;  %v6198_v1 = vld [vmem:[#allocation2 + $0x100] sm:$0x1]  ;;  %v22397_v21 = vshll.u32 %v20274_v25, 16  ;;  %v22398_v17 = vshrl.u32 %v20277_v57, 16 }
 0x336   : > { %v6281_v52 = vsel %vm6209_vm7, %v6276_v49, %v6280_v23  ;;  %v6312_v49 = vor.u32 %v6311_v7, %v22395_v13  ;;  %v22399_v7 = vshrl.u32 %v20274_v25, 16  ;;  %v22400_v13 = vshll.u32 %v20294_v34, 16 }
 0x337   : > { %15638 = vmatmul.mubr.bf16.gmra.mrb[36].mxu1 %v6257_v42  ;;  %v22392_v42 = vshll.u32 %v20253_v4, 16  ;;  %v6326_v4 = vshll.u32 %v6196_v9, 16  ;;  %v22401_v9 = vshll.u32 %v20291_v32, 16 }
 0x338   : > { %15641 = vmatprep.mubr.bf16.mxu1 %v6269_v3  ;;  %15670 = vmatpush3.bf16.msra.mxu1 %v17420_v27  ;;  %v17423_v27 = vld [vmem:[%s22020_s3 + $0xe8] sm:$0xff]   ;;  %v6314_v3 = vshll.u32 %v6194_v8, 16  ;;  %v6323_v8 = vrot.slane %v22396_v30, 1 }
 0x339   : > { %15671 = vmatprep.subr.bf16.mxu1 %v17421_v39  ;;  %v6299_v63 = vrot.slane %v22392_v42, 1  ;;  %v6335_v42 = vrot.slane %v22397_v21, 1  ;;  %v6328_v48 = vrot.slane %v6326_v4, 1  ;;  %v6204_v21 = vld [vmem:[#allocation2 + $0x148] sm:$0x1] }
 0x33a   : > { %v6316_v23 = vrot.slane %v6314_v3, 1 }
 0x33b   : > { %v6300_v16 = vor.u32 %v6299_v63, %v22394_v6  ;;  %v6338_v63 = vshll.u32 %v6198_v1, 16  ;;  %v6336_v3 = vor.u32 %v6335_v42, %v22399_v7  ;;  %v6359_v1 = vrot.slane %v22401_v9, 1  ;;  %v6206_v42 = vld [vmem:[#allocation2 + $0x160] sm:$0x1] }
 0x33c   : > { %15672 = vmatpush3.bf16.msra.mxu1 %v17421_v39  ;;  %v17424_v39 = vld [vmem:[%s22020_s3 + $0xf0] sm:$0xff]  }
 0x33d   : > { %15673 = vmatprep.subr.bf16.mxu1 %v17422_v62  ;;  %v6305_v51 = vsel %vm6209_vm7, %v6300_v16, %v6304_v15  ;;  %v6340_v6 = vrot.slane %v6338_v63, 1  ;;  %v6200_v16 = vld [vmem:[#allocation2 + $0x118] sm:$0x1]  ;;  %v6202_v15 = vld [vmem:[#allocation2 + $0x130] sm:$0x1] }
 0x33e   : > { %v6362_v25 = vshll.u32 %v6202_v15, 16 }
 0x33f   : > { %15642 = vmatmul.mubr.bf16.gmra.mrb[40].mxu1 %v6281_v52  ;;  %v6317_v52 = vsel %vm6209_vm7, %v6312_v49, %v6316_v23  ;;  %v6347_v49 = vrot.slane %v22400_v13, 1  ;;  %v6350_v23 = vshll.u32 %v6200_v16, 16  ;;  %v6341_v57 = vsel %vm6209_vm7, %v6336_v3, %v6340_v6 }
 0x340   : > { %15645 = vmatprep.mubr.bf16.mxu1 %v6293_v0  ;;  %15674 = vmatpush3.bf16.msra.mxu1 %v17422_v62  ;;  %v17425_v62 = vld [vmem:[%s22020_s3 + $0xf8] sm:$0xff]   ;;  %v6324_v0 = vor.u32 %v6323_v8, %v22398_v17  ;;  %v22403_v8 = vshrl.u32 %v20291_v32, 16  ;;  %v22404_v17 = vshll.u32 %v20311_v18, 16  ;;  %v22405_v3 = vshll.u32 %v20307_v43, 16 }
 0x341   : > { %15675 = vmatprep.subr.bf16.mxu1 %v17423_v27  ;;  %v6386_v6 = vshll.u32 %v6206_v42, 16  ;;  %v22406_v32 = vshrl.u32 %v20311_v18, 16  ;;  %v22409_v18 = vshrl.u32 %v20369_v54, 16  ;;  %v22411_v42 = vshll.u32 %v20369_v54, 16 }
 0x342   : > { %v6360_v4 = vor.u32 %v6359_v1, %v22403_v8  ;;  %v22408_v1 = vshll.u32 %v20326_v59, 16 }
 0x343   : > { %v6715_v8 = vrot.slane %v22409_v18, 7 }
 0x344   : > { %15676 = vmatpush3.bf16.msra.mxu1 %v17423_v27  ;;  %v20716_v27 = vld [vmem:[%s22020_s3 + $0x100] sm:$0xff]  }
 0x345   : > { %15677 = vmatprep.subr.bf16.mxu1 %v17424_v39 }
 0x347   : > { %15646 = vmatmul.mubr.bf16.gmra.mrb[44].mxu1 %v6305_v51  ;;  %v22402_v51 = vshrl.u32 %v20294_v34, 16  ;;  %v6383_v34 = vrot.slane %v22405_v3, 1  ;;  %v6727_v3 = vrot.slane %v6235_v55, 7  ;;  %v17427_v55 = vld [vmem:[%s22020_s3 + $0x108] sm:$0xff]  }
 0x348   : > { %15649 = vmatprep.mubr.bf16.mxu1 %v6317_v52  ;;  %15678 = vmatpush3.bf16.msra.mxu1 %v17424_v39  ;;  %v6329_v39 = vsel %vm6209_vm7, %v6324_v0, %v6328_v48  ;;  %v6364_v52 = vrot.slane %v6362_v25, 1  ;;  %v6371_v0 = vrot.slane %v22404_v17, 1  ;;  %v6374_v48 = vshll.u32 %v6204_v21, 16  ;;  %v6678_v17 = vld [vmem:[#allocation2 + $0x30] sm:$0x80] }
 0x349   : > { %15679 = vmatprep.subr.bf16.mxu1 %v17425_v62  ;;  %v6348_v30 = vor.u32 %v6347_v49, %v22402_v51  ;;  %v6388_v49 = vrot.slane %v6386_v6, 1  ;;  %v6395_v25 = vrot.slane %v22408_v1, 1 }
 0x34a   : > { %v6365_v7 = vsel %vm6209_vm7, %v6360_v4, %v6364_v52  ;;  %v6372_v16 = vor.u32 %v6371_v0, %v22406_v32  ;;  %v6376_v15 = vrot.slane %v6374_v48, 1  ;;  %v6680_v0 = vld [vmem:[#allocation2 + $0x48] sm:$0x80] }
 0x34b   : > { %v6733_v6 = vshrl.u32 %v6680_v0, 16 }
 0x34c   : > { %15680 = vmatpush3.bf16.msra.mxu1 %v17425_v62  ;;  %v6352_v62 = vrot.slane %v6350_v23, 1  ;;  %v6208_v23 = vld [vmem:[#allocation2 + $0x178] sm:$0x1]  ;;  %v6377_v9 = vsel %vm6209_vm7, %v6372_v16, %v6376_v15  ;;  %v22413_v15 = vshll.u32 %v20636_v58, 16 }
 0x34d   : > { %15713 = vmatprep.subr.bf16.mxu1 %v20716_v27  ;;  %v6398_v51 = vshll.u32 %v6208_v23, 16 }
 0x34e   : > { %v6353_v63 = vsel %vm6209_vm7, %v6348_v30, %v6352_v62 }
 0x34f   : > { %15650 = vmatmul.mubr.bf16.gmra.mrb[48].mxu1 %v6329_v39  ;;  %v22407_v39 = vshrl.u32 %v20307_v43, 16  ;;  %v22410_v43 = vshrl.u32 %v20326_v59, 16  ;;  %v6400_v52 = vrot.slane %v6398_v51, 1  ;;  %v22412_v59 = vshrl.u32 %v20379_v26, 16 }
 0x350   : > { %15653 = vmatprep.mubr.bf16.mxu1 %v6341_v57  ;;  %v6676_v57 = vld [vmem:[#allocation2 + $0x18] sm:$0x80]  ;;  %v22415_v51 = vshrl.u32 %v20386_v24, 16 }
 0x351   : > { %v6384_v13 = vor.u32 %v6383_v34, %v22407_v39  ;;  %v6709_v62 = vshrl.u32 %v6676_v57, 16  ;;  %v6396_v4 = vor.u32 %v6395_v25, %v22410_v43  ;;  %v6739_v32 = vrot.slane %v22412_v59, 7  ;;  %v6682_v57 = vld [vmem:[#allocation2 + $0x60] sm:$0x80] }
 0x352   : > { %v6730_v39 = vor.u32 %v6727_v3, %v22413_v15  ;;  %v6745_v25 = vshrl.u32 %v6682_v57, 16  ;;  %v22420_v15 = vshrl.u32 %v20400_v60, 16  ;;  %v22421_v57 = vshll.u32 %v20398_v36, 16 }
 0x353   : > { %v6389_v30 = vsel %vm6209_vm7, %v6384_v13, %v6388_v49  ;;  %v6711_v21 = vrot.slane %v6709_v62, 7  ;;  %v6401_v48 = vsel %vm6209_vm7, %v6396_v4, %v6400_v52  ;;  %v6735_v13 = vrot.slane %v6733_v6, 7  ;;  %v17428_v4 = vld [vmem:[%s22020_s3 + $0x110] sm:$0xff]  }
 0x354   : > { %v22414_v49 = vshll.u32 %v20379_v26, 16  ;;  %v6747_v52 = vrot.slane %v6745_v25, 7  ;;  %v22419_v6 = vshrl.u32 %v20398_v36, 16 }
 0x356   : > { %v20763_v23 = vor.u32 %v22414_v49, %v6739_v32  ;;  %v6775_v59 = vrot.slane %v22419_v6, 7  ;;  %v22426_v6 = vshll.u32 %v20421_v44, 16 }
 0x357   : > { %15654 = vmatmul.mubr.bf16.gmra.mrb[52].mxu1 %v6353_v63  ;;  %v6718_v63 = vor.u32 %v22411_v42, %v6715_v8  ;;  %v22416_v8 = vshrl.u32 %v20388_v22, 16 }
 0x358   : > { %15657 = vmatprep.mubr.bf16.mxu1 %v6365_v7  ;;  %v6721_v7 = vshrl.u32 %v6678_v17, 16  ;;  %v6743_v62 = vsel %vm5517_vm6, %v6735_v13, %v20763_v23  ;;  %v22418_v17 = vshll.u32 %v20388_v22, 16  ;;  %v17430_v13 = vld [vmem:[%s22020_s3 + $0x120] sm:$0xff]  }
 0x359   : > { %v6719_v34 = vsel %vm5517_vm6, %v6711_v21, %v6718_v63  ;;  %v6763_v43 = vrot.slane %v22416_v8, 7  ;;  %v22417_v21 = vshll.u32 %v20386_v24, 16 }
 0x35a   : > { %v6723_v16 = vrot.slane %v6721_v7, 7  ;;  %v6688_v7 = vld [vmem:[#allocation2 + $0xa8] sm:$0x80] }
 0x35b   : > { %v20785_v0 = vor.u32 %v22418_v17, %v6763_v43  ;;  %v22423_v43 = vshrl.u32 %v20415_v37, 16 }
 0x35c   : > { %v6731_v1 = vsel %vm5517_vm6, %v6723_v16, %v6730_v39  ;;  %v6781_v16 = vshrl.u32 %v6688_v7, 16  ;;  %v6787_v39 = vrot.slane %v22420_v15, 7  ;;  %v17433_v15 = vld [vmem:[%s22020_s3 + $0x138] sm:$0xff]  }
 0x35f   : > { %15658 = vmatmul.mubr.bf16.gmra.mrb[56].mxu1 %v6377_v9  ;;  %v6684_v9 = vld [vmem:[#allocation2 + $0x78] sm:$0x80] }
 0x360   : > { %15661 = vmatprep.mubr.bf16.mxu1 %v6389_v30  ;;  %v6751_v30 = vrot.slane %v22415_v51, 7  ;;  %v6757_v18 = vshrl.u32 %v6684_v9, 16  ;;  %v20803_v9 = vor.u32 %v22421_v57, %v6775_v59  ;;  %v6690_v51 = vld [vmem:[#allocation2 + $0xc0] sm:$0x80] }
 0x361   : > { %v6793_v8 = vshrl.u32 %v6690_v51, 16  ;;  %v22428_v51 = vshrl.u32 %v20432_v53, 16 }
 0x362   : > { %v20781_v42 = vor.u32 %v22417_v21, %v6751_v30  ;;  %v6759_v63 = vrot.slane %v6757_v18, 7  ;;  %v6692_v30 = vld [vmem:[#allocation2 + $0xd8] sm:$0x80] }
 0x363   : > { %v6805_v21 = vshrl.u32 %v6692_v30, 16  ;;  %v6795_v7 = vrot.slane %v6793_v8, 7  ;;  %v6835_v30 = vrot.slane %v22428_v51, 7  ;;  %v22429_v8 = vshll.u32 %v20423_v31, 16  ;;  %v6702_v51 = vld [vmem:[#allocation2 + $0x150] sm:$0x80] }
 0x364   : > { %v6755_v3 = vsel %vm5517_vm6, %v6747_v52, %v20781_v42  ;;  %v6767_v32 = vsel %vm5517_vm6, %v6759_v63, %v20785_v0  ;;  %v22424_v63 = vshrl.u32 %v20421_v44, 16 }
 0x366   : > { %v6811_v17 = vrot.slane %v22424_v63, 7  ;;  %v6698_v63 = vld [vmem:[#allocation2 + $0x120] sm:$0x80] }
 0x367   : > { %15662 = vmatmul.mubr.bf16.gmra.mrb[60].mxu1 %v6401_v48  ;;  %v6686_v48 = vld [vmem:[#allocation2 + $0x90] sm:$0x80] }
 0x368   : > { %15681 = vmatprep.mubr.bf16.mxu1 %v6719_v34  ;;  %v6769_v34 = vshrl.u32 %v6686_v48, 16  ;;  %v17432_v48 = vld [vmem:[%s22020_s3 + $0x130] sm:$0xff]   ;;  %v20829_v59 = vor.u32 %v22426_v6, %v6811_v17  ;;  %v6700_v17 = vld [vmem:[#allocation2 + $0x138] sm:$0x80] }
 0x36a   : > { %v6771_v49 = vrot.slane %v6769_v34, 7  ;;  %v6807_v34 = vrot.slane %v6805_v21, 7 }
 0x36c   : > { %v6779_v18 = vsel %vm5517_vm6, %v6771_v49, %v20803_v9  ;;  %v22427_v49 = vshrl.u32 %v20423_v31, 16 }
 0x36e   : > { %v6823_v57 = vrot.slane %v22427_v49, 7 }
 0x36f   : > { %15682 = vmatmul.mubr.bf16.vlgmr.msra.gmra.mrb[32].mxu1 %v6731_v1  ;;  %v22422_v1 = vshll.u32 %v20400_v60, 16 }
 0x370   : > { %15685 = vmatprep.mubr.bf16.mxu1 %v6743_v62  ;;  %15714 = vmatpush3.bf16.msra.mxu1 %v20716_v27  ;;  %v17429_v27 = vld [vmem:[%s22020_s3 + $0x118] sm:$0xff]   ;;  %v17431_v62 = vld [vmem:[%s22020_s3 + $0x128] sm:$0xff]  }
 0x371   : > { %15715 = vmatprep.subr.bf16.mxu1 %v17427_v55  ;;  %v20807_v25 = vor.u32 %v22422_v1, %v6787_v39 }
 0x374   : > { %15716 = vmatpush3.bf16.msra.mxu1 %v17427_v55  ;;  %v6783_v55 = vrot.slane %v6781_v16, 7  ;;  %v6696_v16 = vld [vmem:[#allocation2 + $0x108] sm:$0x80] }
 0x375   : > { %15717 = vmatprep.subr.bf16.mxu1 %v17428_v4  ;;  %v6829_v1 = vshrl.u32 %v6696_v16, 16  ;;  %v22432_v16 = vshrl.u32 %v20441_v11, 16 }
 0x376   : > { %v6791_v52 = vsel %vm5517_vm6, %v6783_v55, %v20807_v25  ;;  %v6815_v55 = vsel %vm5517_vm6, %v6807_v34, %v20829_v59 }
 0x377   : > { %15686 = vmatmul.mubr.bf16.gmra.mrb[36].mxu1 %v6755_v3 }
 0x378   : > { %15689 = vmatprep.mubr.bf16.mxu1 %v6767_v32  ;;  %15718 = vmatpush3.bf16.msra.mxu1 %v17428_v4  ;;  %v6799_v4 = vrot.slane %v22423_v43, 7  ;;  %v6694_v32 = vld [vmem:[#allocation2 + $0xf0] sm:$0x80]  ;;  %v20847_v43 = vor.u32 %v22429_v8, %v6823_v57  ;;  %v6865_v8 = vshrl.u32 %v6702_v51, 16 }
 0x379   : > { %15719 = vmatprep.subr.bf16.mxu1 %v17429_v27 }
 0x37c   : > { %15720 = vmatpush3.bf16.msra.mxu1 %v17429_v27  ;;  %v22425_v27 = vshll.u32 %v20415_v37, 16 }
 0x37d   : > { %15721 = vmatprep.subr.bf16.mxu1 %v17430_v13 }
 0x37e   : > { %v20825_v3 = vor.u32 %v22425_v27, %v6799_v4  ;;  %v6831_v4 = vrot.slane %v6829_v1, 7  ;;  %v22431_v27 = vshrl.u32 %v20434_v40, 16 }
 0x37f   : > { %15690 = vmatmul.mubr.bf16.gmra.mrb[40].mxu1 %v6779_v18 }
 0x380   : > { %15693 = vmatprep.mubr.bf16.mxu1 %v6791_v52  ;;  %15722 = vmatpush3.bf16.msra.mxu1 %v17430_v13  ;;  %v6803_v39 = vsel %vm5517_vm6, %v6795_v7, %v20825_v3  ;;  %v6817_v13 = vshrl.u32 %v6694_v32, 16  ;;  %v22430_v52 = vshll.u32 %v20432_v53, 16  ;;  %v6841_v7 = vshrl.u32 %v6698_v63, 16 }
 0x381   : > { %15723 = vmatprep.subr.bf16.mxu1 %v17431_v62  ;;  %v6847_v34 = vrot.slane %v22431_v27, 7  ;;  %v6853_v32 = vshrl.u32 %v6700_v17, 16  ;;  %v6867_v27 = vrot.slane %v6865_v8, 7  ;;  %v22440_v8 = vshll.u32 %v20470_v61, 16 }
 0x382   : > { %v6819_v18 = vrot.slane %v6817_v13, 7  ;;  %v20851_v21 = vor.u32 %v22430_v52, %v6835_v30  ;;  %v6843_v13 = vrot.slane %v6841_v7, 7  ;;  %v6704_v30 = vld [vmem:[#allocation2 + $0x168] sm:$0x80] }
 0x383   : > { %v6855_v57 = vrot.slane %v6853_v32, 7  ;;  %v6877_v17 = vshrl.u32 %v6704_v30, 16 }
 0x384   : > { %15724 = vmatpush3.bf16.msra.mxu1 %v17431_v62  ;;  %v17434_v62 = vld [vmem:[%s22020_s3 + $0x140] sm:$0xff]   ;;  %v6839_v6 = vsel %vm5517_vm6, %v6831_v4, %v20851_v21  ;;  %v22435_v4 = vshrl.u32 %v20449_v45, 16 }
 0x385   : > { %15725 = vmatprep.subr.bf16.mxu1 %v17432_v48  ;;  %v6879_v32 = vrot.slane %v6877_v17, 7  ;;  %v17436_v17 = vld [vmem:[%s22020_s3 + $0x150] sm:$0xff]  }
 0x386   : > { %v6871_v52 = vrot.slane %v22435_v4, 7 }
 0x387   : > { %15694 = vmatmul.mubr.bf16.gmra.mrb[44].mxu1 %v6803_v39  ;;  %v6859_v39 = vrot.slane %v22432_v16, 7  ;;  %v22438_v16 = vshll.u32 %v20461_v50, 16 }
 0x388   : > { %15697 = vmatprep.mubr.bf16.mxu1 %v6815_v55  ;;  %15726 = vmatpush3.bf16.msra.mxu1 %v17432_v48  ;;  %v6827_v48 = vsel %vm5517_vm6, %v6819_v18, %v20847_v43  ;;  %v22434_v55 = vshll.u32 %v20441_v11, 16 }
 0x389   : > { %15727 = vmatprep.subr.bf16.mxu1 %v17433_v15 }
 0x38a   : > { %v20867_v1 = vor.u32 %v22434_v55, %v6859_v39  ;;  %v22439_v55 = vshrl.u32 %v20470_v61, 16 }
 0x38c   : > { %15728 = vmatpush3.bf16.msra.mxu1 %v17433_v15  ;;  %v22433_v15 = vshll.u32 %v20434_v40, 16  ;;  %v6863_v63 = vsel %vm5517_vm6, %v6855_v57, %v20867_v1  ;;  %v6895_v51 = vrot.slane %v22439_v55, 7  ;;  %v7445_v55 = vld [vmem:[#allocation2 + $0xb8] sm:$0x1] }
 0x38d   : > { %15761 = vmatprep.subr.bf16.mxu1 %v17434_v62 }
 0x38e   : > { %v20863_v49 = vor.u32 %v22433_v15, %v6847_v34  ;;  %v22437_v34 = vshll.u32 %v20449_v45, 16  ;;  %v20893_v4 = vor.u32 %v22440_v8, %v6895_v51  ;;  %v17446_v8 = vld [vmem:[%s22020_s3 + $0x1a0] sm:$0xff]  }
 0x38f   : > { %15698 = vmatmul.mubr.bf16.gmra.mrb[48].mxu1 %v6827_v48  ;;  %v22436_v48 = vshrl.u32 %v20461_v50, 16 }
 0x390   : > { %15701 = vmatprep.mubr.bf16.mxu1 %v6839_v6  ;;  %v6851_v18 = vsel %vm5517_vm6, %v6843_v13, %v20863_v49  ;;  %v20879_v6 = vor.u32 %v22437_v34, %v6871_v52  ;;  %v6706_v13 = vld [vmem:[#allocation2 + $0x180] sm:$0x80]  ;;  %v7441_v34 = vld [vmem:[#allocation2 + $0x88] sm:$0x1] }
 0x391   : > { %v6883_v7 = vrot.slane %v22436_v48, 7  ;;  %v6889_v57 = vshrl.u32 %v6706_v13, 16  ;;  %v7437_v48 = vld [vmem:[#allocation2 + $0x58] sm:$0x1] }
 0x392   : > { %v6875_v15 = vsel %vm5517_vm6, %v6867_v27, %v20879_v6 }
 0x393   : > { %v20883_v39 = vor.u32 %v22438_v16, %v6883_v7  ;;  %v7520_v16 = vshll.u32 %v7441_v34, 16 }
 0x395   : > { %v6887_v30 = vsel %vm5517_vm6, %v6879_v32, %v20883_v39 }
 0x397   : > { %15702 = vmatmul.mubr.bf16.gmra.mrb[52].mxu1 %v6851_v18  ;;  %v6891_v18 = vrot.slane %v6889_v57, 7  ;;  %v7443_v57 = vld [vmem:[#allocation2 + $0xa0] sm:$0x1] }
 0x398   : > { %15705 = vmatprep.mubr.bf16.mxu1 %v6863_v63  ;;  %v17435_v63 = vld [vmem:[%s22020_s3 + $0x148] sm:$0xff]   ;;  %v7532_v51 = vshll.u32 %v7443_v57, 16 }
 0x399   : > { %v6899_v52 = vsel %vm5517_vm6, %v6891_v18, %v20893_v4  ;;  %v7544_v18 = vshll.u32 %v7445_v55, 16 }
 0x39f   : > { %15706 = vmatmul.mubr.bf16.gmra.mrb[56].mxu1 %v6875_v15  ;;  %v7522_v15 = vrot.slane %v7520_v16, 1  ;;  %v7461_v16 = vld [vmem:[#allocation2 + $0x178] sm:$0x1] }
 0x3a0   : > { %15709 = vmatprep.mubr.bf16.mxu1 %v6887_v30 }
 0x3a1   : > { %v7523_v30 = vsel %vm6209_vm7, %v20478_v47, %v7522_v15 }
 0x3a7   : > { %15710 = vmatmul.mubr.bf16.gmra.mrb[60].mxu1 %v6899_v52  ;;  %v7534_v52 = vrot.slane %v7532_v51, 1 }
 0x3a8   : > { %15729 = vmatprep.mubr.bf16.mxu1 %v20369_v54  ;;  %v17437_v54 = vld [vmem:[%s22020_s3 + $0x158] sm:$0xff]  }
 0x3a9   : > { %v7535_v47 = vsel %vm6209_vm7, %v20486_v28, %v7534_v52  ;;  %v17449_v28 = vld [vmem:[%s22020_s3 + $0x1b8] sm:$0xff]  }
 0x3af   : > { %15730 = vmatmul.mubr.bf16.vlgmr.msra.gmra.mrb[32].mxu1 %v20636_v58  ;;  %v17439_v58 = vld [vmem:[%s22020_s3 + $0x168] sm:$0xff]  }
 0x3b0   : > { %15733 = vmatprep.mubr.bf16.mxu1 %v20379_v26  ;;  %15762 = vmatpush3.bf16.msra.mxu1 %v17434_v62  ;;  %v17438_v26 = vld [vmem:[%s22020_s3 + $0x160] sm:$0xff]  }
 0x3b1   : > { %15763 = vmatprep.subr.bf16.mxu1 %v17435_v63  ;;  %v7435_v62 = vld [vmem:[#allocation2 + $0x40] sm:$0x1] }
 0x3b2   : > { %v7484_v7 = vshll.u32 %v7435_v62, 16 }
 0x3b4   : > { %15764 = vmatpush3.bf16.msra.mxu1 %v17435_v63  ;;  %v7546_v63 = vrot.slane %v7544_v18, 1  ;;  %v22441_v18 = vshrl.u32 %v20554_v35, 16 }
 0x3b5   : > { %15765 = vmatprep.subr.bf16.mxu1 %v17436_v17 }
 0x3b7   : > { %15734 = vmatmul.mubr.bf16.gmra.mrb[36].mxu1 %v20386_v24  ;;  %v17440_v24 = vld [vmem:[%s22020_s3 + $0x170] sm:$0xff]  }
 0x3b8   : > { %15737 = vmatprep.mubr.bf16.mxu1 %v20388_v22  ;;  %15766 = vmatpush3.bf16.msra.mxu1 %v17436_v17  ;;  %v17441_v22 = vld [vmem:[%s22020_s3 + $0x178] sm:$0xff]   ;;  %v7447_v17 = vld [vmem:[#allocation2 + $0xd0] sm:$0x1] }
 0x3b9   : > { %15767 = vmatprep.subr.bf16.mxu1 %v17437_v54 }
 0x3bc   : > { %15768 = vmatpush3.bf16.msra.mxu1 %v17437_v54  ;;  %v7449_v54 = vld [vmem:[#allocation2 + $0xe8] sm:$0x1] }
 0x3bd   : > { %15769 = vmatprep.subr.bf16.mxu1 %v17438_v26 }
 0x3bf   : > { %15738 = vmatmul.mubr.bf16.gmra.mrb[40].mxu1 %v20398_v36  ;;  %v17442_v36 = vld [vmem:[%s22020_s3 + $0x180] sm:$0xff]  }
 0x3c0   : > { %15741 = vmatprep.mubr.bf16.mxu1 %v20400_v60  ;;  %15770 = vmatpush3.bf16.msra.mxu1 %v17438_v26  ;;  %v7433_v60 = vld [vmem:[#allocation2 + $0x28] sm:$0x1]  ;;  %v7556_v26 = vshll.u32 %v7447_v17, 16 }
 0x3c1   : > { %15771 = vmatprep.subr.bf16.mxu1 %v17439_v58 }
 0x3c4   : > { %15772 = vmatpush3.bf16.msra.mxu1 %v17439_v58  ;;  %v7547_v58 = vsel %vm6209_vm7, %v20497_v12, %v7546_v63  ;;  %v22442_v63 = vshll.u32 %v20554_v35, 16  ;;  %v17451_v35 = vld [vmem:[%s22020_s3 + $0x1c8] sm:$0xff]  }
 0x3c5   : > { %15773 = vmatprep.subr.bf16.mxu1 %v17440_v24 }
 0x3c7   : > { %15742 = vmatmul.mubr.bf16.gmra.mrb[44].mxu1 %v20415_v37  ;;  %v7472_v37 = vshll.u32 %v7433_v60, 16 }
 0x3c8   : > { %15745 = vmatprep.mubr.bf16.mxu1 %v20421_v44  ;;  %15774 = vmatpush3.bf16.msra.mxu1 %v17440_v24  ;;  %v7568_v24 = vshll.u32 %v7449_v54, 16  ;;  %v7933_v54 = vld [vmem:[#allocation2 + $0x48] sm:$0x80] }
 0x3c9   : > { %15775 = vmatprep.subr.bf16.mxu1 %v17441_v22  ;;  %v7474_v44 = vrot.slane %v7472_v37, 1  ;;  %v7451_v37 = vld [vmem:[#allocation2 + $0x100] sm:$0x1] }
 0x3ca   : > { %v7570_v60 = vrot.slane %v7568_v24, 1  ;;  %v7580_v62 = vshll.u32 %v7451_v37, 16 }
 0x3cc   : > { %15776 = vmatpush3.bf16.msra.mxu1 %v17441_v22  ;;  %v17448_v22 = vld [vmem:[%s22020_s3 + $0x1b0] sm:$0xff]  }
 0x3cd   : > { %15809 = vmatprep.subr.bf16.mxu1 %v17442_v36 }
 0x3cf   : > { %15746 = vmatmul.mubr.bf16.gmra.mrb[48].mxu1 %v20423_v31  ;;  %v7475_v31 = vsel %vm6209_vm7, %v20453_v38, %v7474_v44  ;;  %v17444_v38 = vld [vmem:[%s22020_s3 + $0x190] sm:$0xff]   ;;  %v7453_v44 = vld [vmem:[#allocation2 + $0x118] sm:$0x1] }
 0x3d0   : > { %15749 = vmatprep.mubr.bf16.mxu1 %v20432_v53  ;;  %v7496_v53 = vshll.u32 %v7437_v48, 16  ;;  %v7571_v48 = vsel %vm6209_vm7, %v20514_v10, %v7570_v60  ;;  %v7939_v60 = vld [vmem:[#allocation2 + $0x90] sm:$0x80] }
 0x3d2   : > { %v7498_v27 = vrot.slane %v7496_v53, 1  ;;  %v7582_v53 = vrot.slane %v7580_v62, 1  ;;  %v17452_v62 = vld [vmem:[%s22020_s3 + $0x1d0] sm:$0xff]  }
 0x3d7   : > { %15750 = vmatmul.mubr.bf16.gmra.mrb[52].mxu1 %v20434_v40  ;;  %v7486_v40 = vrot.slane %v7484_v7, 1  ;;  %v7592_v7 = vshll.u32 %v7453_v44, 16 }
 0x3d8   : > { %15753 = vmatprep.mubr.bf16.mxu1 %v20441_v11  ;;  %v7439_v11 = vld [vmem:[#allocation2 + $0x70] sm:$0x1] }
 0x3d9   : > { %v7508_v32 = vshll.u32 %v7439_v11, 16  ;;  %v7457_v11 = vld [vmem:[#allocation2 + $0x148] sm:$0x1] }
 0x3db   : > { %v7510_v13 = vrot.slane %v7508_v32, 1 }
 0x3df   : > { %15754 = vmatmul.mubr.bf16.gmra.mrb[56].mxu1 %v20449_v45  ;;  %v17443_v45 = vld [vmem:[%s22020_s3 + $0x188] sm:$0xff]  }
 0x3e0   : > { %15757 = vmatprep.mubr.bf16.mxu1 %v20461_v50  ;;  %v7487_v50 = vsel %vm6209_vm7, %v20652_v5, %v7486_v40  ;;  %v17445_v5 = vld [vmem:[%s22020_s3 + $0x198] sm:$0xff]   ;;  %v7594_v40 = vrot.slane %v7592_v7, 1 }
 0x3e2   : > { %v7595_v10 = vsel %vm6209_vm7, %v20528_v20, %v7594_v40  ;;  %v7931_v20 = vld [vmem:[#allocation2 + $0x30] sm:$0x80]  ;;  %v7943_v40 = vld [vmem:[#allocation2 + $0xc0] sm:$0x80] }
 0x3e7   : > { %15758 = vmatmul.mubr.bf16.gmra.mrb[60].mxu1 %v20470_v61  ;;  %v7499_v61 = vsel %vm6209_vm7, %v20465_v29, %v7498_v27  ;;  %v7511_v29 = vsel %vm6209_vm7, %v20474_v46, %v7510_v13  ;;  %v17447_v46 = vld [vmem:[%s22020_s3 + $0x1a8] sm:$0xff]   ;;  %v7455_v27 = vld [vmem:[#allocation2 + $0x130] sm:$0x1] }
 0x3e8   : > { %15777 = vmatprep.mubr.bf16.mxu1 %v7475_v31  ;;  %v17450_v31 = vld [vmem:[%s22020_s3 + $0x1c0] sm:$0xff]   ;;  %v7604_v34 = vshll.u32 %v7455_v27, 16 }
 0x3ef   : > { %15778 = vmatmul.mubr.bf16.vlgmr.msra.gmra.mrb[32].mxu1 %v7487_v50  ;;  %v7606_v50 = vrot.slane %v7604_v34, 1 }
 0x3f0   : > { %15781 = vmatprep.mubr.bf16.mxu1 %v7499_v61  ;;  %15810 = vmatpush3.bf16.msra.mxu1 %v17442_v36  ;;  %v7558_v36 = vrot.slane %v7556_v26, 1  ;;  %v7459_v61 = vld [vmem:[#allocation2 + $0x160] sm:$0x1]  ;;  %v7976_v26 = vshrl.u32 %v7933_v54, 16  ;;  %v7959_v54 = vld [vmem:[#allocation2 + $0x180] sm:$0x80] }
 0x3f1   : > { %15811 = vmatprep.subr.bf16.mxu1 %v17443_v45  ;;  %v7628_v13 = vshll.u32 %v7459_v61, 16 }
 0x3f2   : > { %v7559_v12 = vsel %vm6209_vm7, %v20504_v2, %v7558_v36  ;;  %v7583_v2 = vsel %vm6209_vm7, %v20524_v19, %v7582_v53  ;;  %v7640_v19 = vshll.u32 %v7461_v16, 16  ;;  %v7978_v24 = vrot.slane %v7976_v26, 7  ;;  %v7937_v36 = vld [vmem:[#allocation2 + $0x78] sm:$0x80]  ;;  %v7941_v53 = vld [vmem:[#allocation2 + $0xa8] sm:$0x80] }
 0x3f3   : > { %v7630_v57 = vrot.slane %v7628_v13, 1  ;;  %v8000_v44 = vshrl.u32 %v7937_v36, 16  ;;  %v8024_v27 = vshrl.u32 %v7941_v53, 16  ;;  %v21046_v26 = vld [vmem:[#allocation2] sm:$0xff]  ;;  %v17617_v53 = vld [vmem:[#allocation2 + $0x68] sm:$0xff] }
 0x3f4   : > { %15812 = vmatpush3.bf16.msra.mxu1 %v17443_v45  ;;  %v7616_v45 = vshll.u32 %v7457_v11, 16  ;;  %v7642_v55 = vrot.slane %v7640_v19, 1  ;;  %v7986_v37 = vsel %vm5517_vm6, %v7978_v24, %v20763_v23  ;;  %v17453_v23 = vld [vmem:[%s22020_s3 + $0x1d8] sm:$0xff]   ;;  %v8036_v11 = vshrl.u32 %v7943_v40, 16  ;;  %v7949_v19 = vld [vmem:[#allocation2 + $0x108] sm:$0x80] }
 0x3f5   : > { %15813 = vmatprep.subr.bf16.mxu1 %v17444_v38  ;;  %v8026_v34 = vrot.slane %v8024_v27, 7  ;;  %v17460_v40 = vld [vmem:[%s22020_s3 + $0x210] sm:$0xff]   ;;  %v17618_v27 = vld [vmem:[#allocation2 + $0x80] sm:$0xff] }
 0x3f6   : > { %v7618_v32 = vrot.slane %v7616_v45, 1  ;;  %v7945_v45 = vld [vmem:[#allocation2 + $0xd8] sm:$0x80] }
 0x3f7   : > { %15782 = vmatmul.mubr.bf16.gmra.mrb[36].mxu1 %v7511_v29  ;;  %v7631_v29 = vsel %vm6209_vm7, %v20550_v33, %v7630_v57  ;;  %v7951_v57 = vld [vmem:[#allocation2 + $0x120] sm:$0x80] }
 0x3f8   : > { %15785 = vmatprep.mubr.bf16.mxu1 %v7523_v30  ;;  %15814 = vmatpush3.bf16.msra.mxu1 %v17444_v38  ;;  %v7607_v38 = vsel %vm6209_vm7, %v20538_v14, %v7606_v50  ;;  %v7619_v15 = vsel %vm6209_vm7, %v20542_v56, %v7618_v32  ;;  %v7643_v30 = vsel %vm6209_vm7, %v20564_v41, %v7642_v55  ;;  %v7964_v14 = vshrl.u32 %v7931_v20, 16  ;;  %v7947_v50 = vld [vmem:[#allocation2 + $0xf0] sm:$0x80] }
 0x3f9   : > { %15815 = vmatprep.subr.bf16.mxu1 %v17445_v5  ;;  %v8048_v32 = vshrl.u32 %v7945_v45, 16  ;;  %v8060_v16 = vshrl.u32 %v7947_v50, 16  ;;  %v8072_v55 = vshrl.u32 %v7949_v19, 16  ;;  %v8084_v20 = vshrl.u32 %v7951_v57, 16  ;;  %v17621_v45 = vld [vmem:[#allocation2 + $0xc8] sm:$0xff]  ;;  %v17464_v50 = vld [vmem:[%s22020_s3 + $0x230] sm:$0xff]  }
 0x3fa   : > { %v7966_v52 = vrot.slane %v7964_v14, 7  ;;  %v7953_v14 = vld [vmem:[#allocation2 + $0x138] sm:$0x80]  ;;  %v17628_v19 = vld [vmem:[#allocation2 + $0x170] sm:$0xff] }
 0x3fb   : > { %v8050_v13 = vrot.slane %v8048_v32, 7  ;;  %v17623_v32 = vld [vmem:[#allocation2 + $0xf8] sm:$0xff] }
 0x3fc   : > { %15816 = vmatpush3.bf16.msra.mxu1 %v17445_v5  ;;  %v7463_v5 = vld [vmem:[#allocation2 + $0x190] sm:$0x1] }
 0x3fd   : > { %15817 = vmatprep.subr.bf16.mxu1 %v17446_v8  ;;  %v7652_v51 = vshll.u32 %v7463_v5, 16 }
 0x3ff   : > { %15786 = vmatmul.mubr.bf16.gmra.mrb[40].mxu1 %v7535_v47  ;;  %v7654_v56 = vrot.slane %v7652_v51, 1  ;;  %v22443_v47 = vld [vmem:[#allocation34_spill] sm:$0xff]  ;;  %v8074_v51 = vrot.slane %v8072_v55, 7  ;;  %v8691_v55 = vld [vmem:[#allocation2 + $0x68] sm:$0xff] }
 0x400   : > { %15789 = vmatprep.mubr.bf16.mxu1 %v7547_v58  ;;  %15818 = vmatpush3.bf16.msra.mxu1 %v17446_v8  ;;  %v7970_v8 = vrot.slane %v22441_v18, 7  ;;  %v7955_v18 = vld [vmem:[#allocation2 + $0x150] sm:$0x80] }
 0x401   : > { %15819 = vmatprep.subr.bf16.mxu1 %v17447_v46  ;;  %v7655_v33 = vsel %vm6209_vm7, %v22443_v47, %v7654_v56  ;;  %v8108_v56 = vshrl.u32 %v7955_v18, 16 }
 0x402   : > { %v7973_v17 = vor.u32 %v22442_v63, %v7970_v8  ;;  %v8096_v8 = vshrl.u32 %v7953_v14, 16 }
 0x403   : > { %v8110_v63 = vrot.slane %v8108_v56, 7 }
 0x404   : > { %15820 = vmatpush3.bf16.msra.mxu1 %v17447_v46  ;;  %v7935_v46 = vld [vmem:[#allocation2 + $0x60] sm:$0x80]  ;;  %v7974_v58 = vsel %vm5517_vm6, %v7966_v52, %v7973_v17  ;;  %v8098_v52 = vrot.slane %v8096_v8, 7  ;;  %v7957_v17 = vld [vmem:[#allocation2 + $0x168] sm:$0x80] }
 0x405   : > { %15821 = vmatprep.subr.bf16.mxu1 %v17448_v22  ;;  %v7988_v41 = vshrl.u32 %v7935_v46, 16  ;;  %v8120_v47 = vshrl.u32 %v7957_v17, 16  ;;  %v8695_v17 = vld [vmem:[#allocation2 + $0x98] sm:$0xff] }
 0x406   : > { %v8106_v46 = vsel %vm5517_vm6, %v8098_v52, %v20867_v1  ;;  %v8151_v1 = vshll.u32 %v21046_v26, 16  ;;  %v8693_v52 = vld [vmem:[#allocation2 + $0x80] sm:$0xff] }
 0x407   : > { %15790 = vmatmul.mubr.bf16.gmra.mrb[44].mxu1 %v7559_v12  ;;  %v8012_v12 = vshrl.u32 %v7939_v60, 16 }
 0x408   : > { %15793 = vmatprep.mubr.bf16.mxu1 %v7571_v48  ;;  %15822 = vmatpush3.bf16.msra.mxu1 %v17448_v22  ;;  %v7990_v22 = vrot.slane %v7988_v41, 7  ;;  %v8002_v48 = vrot.slane %v8000_v44, 7  ;;  %v8122_v41 = vrot.slane %v8120_v47, 7 }
 0x409   : > { %15823 = vmatprep.subr.bf16.mxu1 %v17449_v28  ;;  %v8014_v7 = vrot.slane %v8012_v12, 7  ;;  %v17467_v12 = vld [vmem:[#allocation4 + $0x48] sm:$0xff]  }
 0x40a   : > { %v8130_v60 = vsel %vm5517_vm6, %v8122_v41, %v20883_v39  ;;  %v17468_v39 = vld [vmem:[#allocation4 + $0x50] sm:$0xff]   ;;  %v8694_v41 = vld [vmem:[#allocation2 + $0x88] sm:$0x1] }
 0x40c   : > { %15824 = vmatpush3.bf16.msra.mxu1 %v17449_v28  ;;  %v7998_v28 = vsel %vm5517_vm6, %v7990_v22, %v20781_v42  ;;  %v8010_v42 = vsel %vm5517_vm6, %v8002_v48, %v20785_v0  ;;  %v17455_v0 = vld [vmem:[%s22020_s3 + $0x1e8] sm:$0xff]   ;;  %v17616_v48 = vld [vmem:[#allocation2 + $0x50] sm:$0xff] }
 0x40d   : > { %15857 = vmatprep.subr.bf16.mxu1 %v17450_v31 }
 0x40f   : > { %15794 = vmatmul.mubr.bf16.gmra.mrb[48].mxu1 %v7583_v2  ;;  %v17454_v2 = vld [vmem:[%s22020_s3 + $0x1e0] sm:$0xff]  }
 0x410   : > { %15797 = vmatprep.mubr.bf16.mxu1 %v7595_v10  ;;  %v8038_v10 = vrot.slane %v8036_v11, 7  ;;  %v17619_v11 = vld [vmem:[#allocation2 + $0x98] sm:$0xff] }
 0x412   : > { %v8046_v61 = vsel %vm5517_vm6, %v8038_v10, %v20825_v3  ;;  %v8058_v3 = vsel %vm5517_vm6, %v8050_v13, %v20829_v59  ;;  %v8082_v59 = vsel %vm5517_vm6, %v8074_v51, %v20851_v21  ;;  %v8132_v21 = vshrl.u32 %v7959_v54, 16  ;;  %v17620_v10 = vld [vmem:[#allocation2 + $0xb0] sm:$0xff]  ;;  %v17627_v13 = vld [vmem:[#allocation2 + $0x158] sm:$0xff] }
 0x413   : > { %v8746_v51 = vshll.u32 %v8691_v55, 16  ;;  %v8744_v54 = vshrl.u32 %v8691_v55, 16 }
 0x414   : > { %v8134_v24 = vrot.slane %v8132_v21, 7 }
 0x417   : > { %15798 = vmatmul.mubr.bf16.gmra.mrb[52].mxu1 %v7607_v38  ;;  %v17456_v38 = vld [vmem:[%s22020_s3 + $0x1f0] sm:$0xff]  }
 0x418   : > { %15801 = vmatprep.mubr.bf16.mxu1 %v7619_v15  ;;  %v8062_v15 = vrot.slane %v8060_v16, 7  ;;  %v17625_v16 = vld [vmem:[#allocation2 + $0x128] sm:$0xff] }
 0x41a   : > { %v8070_v5 = vsel %vm5517_vm6, %v8062_v15, %v20847_v43  ;;  %v8688_v15 = vld [vmem:[#allocation2 + $0x40] sm:$0x1] }
 0x41b   : > { %v8727_v57 = vshll.u32 %v8688_v15, 16 }
 0x41f   : > { %15802 = vmatmul.mubr.bf16.gmra.mrb[56].mxu1 %v7631_v29  ;;  %v17458_v29 = vld [vmem:[%s22020_s3 + $0x200] sm:$0xff]  }
 0x420   : > { %15805 = vmatprep.mubr.bf16.mxu1 %v7643_v30  ;;  %v8086_v30 = vrot.slane %v8084_v20, 7  ;;  %v8729_v20 = vrot.slane %v8727_v57, 1  ;;  %v8702_v57 = vld [vmem:[#allocation2 + $0xe8] sm:$0x1] }
 0x422   : > { %v8094_v43 = vsel %vm5517_vm6, %v8086_v30, %v20863_v49  ;;  %v8148_v49 = vshrl.u32 %v21046_v26, 16  ;;  %v8692_v30 = vld [vmem:[#allocation2 + $0x70] sm:$0x1] }
 0x423   : > { %v8751_v56 = vshll.u32 %v8692_v30, 16 }
 0x424   : > { %v8150_v36 = vrot.slane %v8148_v49, 7 }
 0x427   : > { %15806 = vmatmul.mubr.bf16.gmra.mrb[60].mxu1 %v7655_v33  ;;  %v8118_v33 = vsel %vm5517_vm6, %v8110_v63, %v20879_v6  ;;  %v8142_v6 = vsel %vm5517_vm6, %v8134_v24, %v20893_v4  ;;  %v17459_v4 = vld [vmem:[%s22020_s3 + $0x208] sm:$0xff]   ;;  %v8770_v24 = vshll.u32 %v8695_v17, 16 }
 0x428   : > { %15825 = vmatprep.mubr.bf16.mxu1 %v7974_v58  ;;  %v7961_v58 = vld [vmem:[#allocation2 + $0x198] sm:$0x80] }
 0x429   : > { %v8144_v22 = vshrl.u32 %v7961_v58, 16  ;;  %v8753_v58 = vrot.slane %v8751_v56, 1 }
 0x42f   : > { %15826 = vmatmul.mubr.bf16.vlgmr.msra.gmra.mrb[32].mxu1 %v7986_v37  ;;  %v21058_v37 = vor.u32 %v8151_v1, %v8150_v36 }
 0x430   : > { %15829 = vmatprep.mubr.bf16.mxu1 %v7998_v28  ;;  %15858 = vmatpush3.bf16.msra.mxu1 %v17450_v31  ;;  %v8022_v31 = vsel %vm5517_vm6, %v8014_v7, %v20803_v9  ;;  %v8034_v9 = vsel %vm5517_vm6, %v8026_v34, %v20807_v25  ;;  %v17457_v25 = vld [vmem:[%s22020_s3 + $0x1f8] sm:$0xff]   ;;  %v17466_v28 = vld [vmem:[#allocation4 + $0x40] sm:$0xff]   ;;  %v17463_v34 = vld [vmem:[%s22020_s3 + $0x228] sm:$0xff]  }
 0x431   : > { %15859 = vmatprep.subr.bf16.mxu1 %v17451_v35  ;;  %15953 = vmatprep.subr.bf16.mxu0 %v17466_v28  ;;  %v17469_v7 = vld [vmem:[#allocation4 + $0x58] sm:$0xff]  }
 0x432   : > { %15954 = vmatpush3.bf16.msra.mxu0 %v17466_v28 }
 0x433   : > { %15955 = vmatprep.subr.bf16.mxu0 %v17467_v12 }
 0x434   : > { %15860 = vmatpush3.bf16.msra.mxu1 %v17451_v35  ;;  %v8146_v35 = vrot.slane %v8144_v22, 7  ;;  %v8696_v22 = vld [vmem:[#allocation2 + $0xa0] sm:$0x1] }
 0x435   : > { %15861 = vmatprep.subr.bf16.mxu1 %v17452_v62  ;;  %v8775_v28 = vshll.u32 %v8696_v22, 16 }
 0x436   : > { %v8154_v44 = vsel %vm5517_vm6, %v8146_v35, %v21058_v37  ;;  %15956 = vmatpush3.bf16.msra.mxu0 %v17467_v12  ;;  %v8697_v12 = vld [vmem:[#allocation2 + $0xb0] sm:$0xff] }
 0x437   : > { %15830 = vmatmul.mubr.bf16.gmra.mrb[36].mxu1 %v8010_v42  ;;  %15957 = vmatprep.subr.bf16.mxu0 %v17468_v39  ;;  %v17461_v42 = vld [vmem:[%s22020_s3 + $0x218] sm:$0xff]  }
 0x438   : > { %15833 = vmatprep.mubr.bf16.mxu1 %v8022_v31  ;;  %15862 = vmatpush3.bf16.msra.mxu1 %v17452_v62  ;;  %v17615_v62 = vld [vmem:[#allocation2 + $0x38] sm:$0xff]  ;;  %v17471_v31 = vld [vmem:[#allocation4 + $0x68] sm:$0xff]  }
 0x439   : > { %15863 = vmatprep.subr.bf16.mxu1 %v17453_v23 }
 0x43a   : > { %15958 = vmatpush3.bf16.msra.mxu0 %v17468_v39  ;;  %v8699_v39 = vld [vmem:[#allocation2 + $0xc8] sm:$0xff] }
 0x43b   : > { %15959 = vmatprep.subr.bf16.mxu0 %v17469_v7 }
 0x43c   : > { %15864 = vmatpush3.bf16.msra.mxu1 %v17453_v23  ;;  %v17470_v23 = vld [vmem:[#allocation4 + $0x60] sm:$0xff]  }
 0x43d   : > { %15865 = vmatprep.subr.bf16.mxu1 %v17454_v2 }
 0x43e   : > { %15960 = vmatpush3.bf16.msra.mxu0 %v17469_v7 }
 0x43f   : > { %15834 = vmatmul.mubr.bf16.gmra.mrb[40].mxu1 %v8034_v9  ;;  %15961 = vmatprep.subr.bf16.mxu0 %v17470_v23  ;;  %v17622_v9 = vld [vmem:[#allocation2 + $0xe0] sm:$0xff] }
 0x440   : > { %15837 = vmatprep.mubr.bf16.mxu1 %v8046_v61  ;;  %15866 = vmatpush3.bf16.msra.mxu1 %v17454_v2  ;;  %v17462_v2 = vld [vmem:[%s22020_s3 + $0x220] sm:$0xff]   ;;  %v17624_v61 = vld [vmem:[#allocation2 + $0x110] sm:$0xff] }
 0x441   : > { %15867 = vmatprep.subr.bf16.mxu1 %v17455_v0 }
 0x442   : > { %15962 = vmatpush3.bf16.msra.mxu0 %v17470_v23  ;;  %v8777_v23 = vrot.slane %v8775_v28, 1 }
 0x443   : > { %15963 = vmatprep.subr.bf16.mxu0 %v17471_v31 }
 0x444   : > { %15868 = vmatpush3.bf16.msra.mxu1 %v17455_v0  ;;  %v17465_v0 = vld [vmem:[%s22020_s3 + $0x238] sm:$0xff]  }
 0x445   : > { %15869 = vmatprep.subr.bf16.mxu1 %v17456_v38 }
 0x446   : > { %15964 = vmatpush3.bf16.msra.mxu0 %v17471_v31  ;;  %v8700_v31 = vld [vmem:[#allocation2 + $0xd0] sm:$0x1] }
 0x447   : > { %15838 = vmatmul.mubr.bf16.gmra.mrb[44].mxu1 %v8058_v3  ;;  %v17629_v3 = vld [vmem:[#allocation2 + $0x188] sm:$0xff] }
 0x448   : > { %15841 = vmatprep.mubr.bf16.mxu1 %v8070_v5  ;;  %15870 = vmatpush3.bf16.msra.mxu1 %v17456_v38  ;;  %v17626_v38 = vld [vmem:[#allocation2 + $0x140] sm:$0xff] }
 0x449   : > { %15871 = vmatprep.subr.bf16.mxu1 %v17457_v25 }
 0x44c   : > { %15872 = vmatpush3.bf16.msra.mxu1 %v17457_v25  ;;  %v8689_v25 = vld [vmem:[#allocation2 + $0x50] sm:$0xff] }
 0x44d   : > { %15905 = vmatprep.subr.bf16.mxu1 %v17458_v29  ;;  %v8734_v5 = vshll.u32 %v8689_v25, 16  ;;  %v8732_v63 = vshrl.u32 %v8689_v25, 16 }
 0x44f   : > { %15842 = vmatmul.mubr.bf16.gmra.mrb[48].mxu1 %v8082_v59  ;;  %v8736_v14 = vrot.slane %v8734_v5, 1  ;;  %v22444_v59 = vld [vmem:[#allocation33_spill] sm:$0xff] }
 0x450   : > { %15845 = vmatprep.mubr.bf16.mxu1 %v8094_v43  ;;  %v8730_v8 = vsel %vm6209_vm7, %v22444_v59, %v8729_v20  ;;  %v8748_v43 = vrot.slane %v8746_v51, 1  ;;  %v8811_v20 = vshll.u32 %v8702_v57, 16  ;;  %v8707_v59 = vld [vmem:[#allocation2 + $0x128] sm:$0xff] }
 0x452   : > { %v8749_v21 = vor.u32 %v8748_v43, %v8744_v54  ;;  %v8813_v56 = vrot.slane %v8811_v20, 1  ;;  %v8706_v54 = vld [vmem:[#allocation2 + $0x118] sm:$0x1]  ;;  %v8718_v20 = vld [vmem:[#allocation2 + $0x1a8] sm:$0x1] }
 0x454   : > { %v8754_v35 = vsel %vm6209_vm7, %v8749_v21, %v8753_v58  ;;  %v8835_v58 = vshll.u32 %v8706_v54, 16  ;;  %v17473_v54 = vld [vmem:[#allocation4 + $0x78] sm:$0xff]  }
 0x456   : > { %v8837_v28 = vrot.slane %v8835_v58, 1 }
 0x457   : > { %15846 = vmatmul.mubr.bf16.gmra.mrb[52].mxu1 %v8106_v46  ;;  %v8737_v46 = vor.u32 %v8736_v14, %v8732_v63  ;;  %v8705_v14 = vld [vmem:[#allocation2 + $0x110] sm:$0xff] }
 0x458   : > { %15849 = vmatprep.mubr.bf16.mxu1 %v8118_v33  ;;  %v8758_v33 = vshll.u32 %v8693_v52, 16 }
 0x45f   : > { %15850 = vmatmul.mubr.bf16.gmra.mrb[56].mxu1 %v8130_v60  ;;  %v8760_v60 = vrot.slane %v8758_v33, 1 }
 0x460   : > { %15853 = vmatprep.mubr.bf16.mxu1 %v8142_v6  ;;  %v8763_v6 = vshll.u32 %v8694_v41, 16 }
 0x462   : > { %v8765_v7 = vrot.slane %v8763_v6, 1  ;;  %v8711_v6 = vld [vmem:[#allocation2 + $0x158] sm:$0xff] }
 0x467   : > { %15854 = vmatmul.mubr.bf16.gmra.mrb[60].mxu1 %v8154_v44  ;;  %v8772_v44 = vrot.slane %v8770_v24, 1 }
 0x468   : > { %15873 = vmatprep.mubr.bf16.mxu1 %v17615_v62  ;;  %v8756_v62 = vshrl.u32 %v8693_v52, 16  ;;  %v8830_v52 = vshll.u32 %v8705_v14, 16 }
 0x46a   : > { %v8832_v21 = vrot.slane %v8830_v52, 1 }
 0x46f   : > { %15874 = vmatmul.mubr.bf16.vlgmr.msra.gmra.mrb[32].mxu1 %v17616_v48  ;;  %v8761_v48 = vor.u32 %v8760_v60, %v8756_v62  ;;  %v8828_v60 = vshrl.u32 %v8705_v14, 16 }
 0x470   : > { %15877 = vmatprep.mubr.bf16.mxu1 %v17617_v53  ;;  %15906 = vmatpush3.bf16.msra.mxu1 %v17458_v29  ;;  %v8690_v29 = vld [vmem:[#allocation2 + $0x58] sm:$0x1]  ;;  %v8782_v53 = vshll.u32 %v8697_v12, 16 }
 0x471   : > { %15907 = vmatprep.subr.bf16.mxu1 %v17459_v4  ;;  %v8739_v18 = vshll.u32 %v8690_v29, 16 }
 0x473   : > { %v8741_v47 = vrot.slane %v8739_v18, 1 }
 0x474   : > { %15908 = vmatpush3.bf16.msra.mxu1 %v17459_v4  ;;  %v8768_v4 = vshrl.u32 %v8695_v17, 16 }
 0x475   : > { %15909 = vmatprep.subr.bf16.mxu1 %v17460_v40  ;;  %v8742_v36 = vsel %vm6209_vm7, %v8737_v46, %v8741_v47  ;;  %v8842_v46 = vshll.u32 %v8707_v59, 16  ;;  %v8708_v47 = vld [vmem:[#allocation2 + $0x130] sm:$0x1] }
 0x476   : > { %v8847_v22 = vshll.u32 %v8708_v47, 16 }
 0x477   : > { %15878 = vmatmul.mubr.bf16.gmra.mrb[36].mxu1 %v17618_v27  ;;  %v8794_v27 = vshll.u32 %v8699_v39, 16  ;;  %v8844_v24 = vrot.slane %v8842_v46, 1  ;;  %v21108_v46 = vld [vmem:[%s22021_s4] ss:$0 sm:$0xff] }
 0x478   : > { %15881 = vmatprep.mubr.bf16.mxu1 %v17619_v11  ;;  %15910 = vmatpush3.bf16.msra.mxu1 %v17460_v40  ;;  %v8773_v40 = vor.u32 %v8772_v44, %v8768_v4  ;;  %v8766_v11 = vsel %vm6209_vm7, %v8761_v48, %v8765_v7  ;;  %v8833_v44 = vor.u32 %v8832_v21, %v8828_v60  ;;  %v8710_v4 = vld [vmem:[#allocation2 + $0x148] sm:$0x1]  ;;  %v8866_v48 = vshll.u32 %v8711_v6, 16  ;;  %v8712_v7 = vld [vmem:[#allocation2 + $0x160] sm:$0x1] }
 0x479   : > { %15911 = vmatprep.subr.bf16.mxu1 %v17461_v42 }
 0x47c   : > { %15912 = vmatpush3.bf16.msra.mxu1 %v17461_v42  ;;  %v8698_v42 = vld [vmem:[#allocation2 + $0xb8] sm:$0x1] }
 0x47d   : > { %15913 = vmatprep.subr.bf16.mxu1 %v17462_v2 }
 0x47f   : > { %15882 = vmatmul.mubr.bf16.gmra.mrb[40].mxu1 %v17620_v10  ;;  %v8778_v10 = vsel %vm6209_vm7, %v8773_v40, %v8777_v23  ;;  %v8859_v23 = vshll.u32 %v8710_v4, 16 }
 0x480   : > { %15885 = vmatprep.mubr.bf16.mxu1 %v17621_v45  ;;  %15914 = vmatpush3.bf16.msra.mxu1 %v17462_v2  ;;  %v8784_v2 = vrot.slane %v8782_v53, 1  ;;  %v8796_v45 = vrot.slane %v8794_v27, 1  ;;  %v8838_v53 = vsel %vm6209_vm7, %v8833_v44, %v8837_v28  ;;  %v8868_v27 = vrot.slane %v8866_v48, 1 }
 0x481   : > { %15915 = vmatprep.subr.bf16.mxu1 %v17463_v34 }
 0x484   : > { %15916 = vmatpush3.bf16.msra.mxu1 %v17463_v34  ;;  %v8787_v34 = vshll.u32 %v8698_v42, 16 }
 0x485   : > { %15917 = vmatprep.subr.bf16.mxu1 %v17464_v50 }
 0x487   : > { %15886 = vmatmul.mubr.bf16.gmra.mrb[44].mxu1 %v17622_v9  ;;  %v8780_v9 = vshrl.u32 %v8697_v12, 16 }
 0x488   : > { %15889 = vmatprep.mubr.bf16.mxu1 %v17623_v32  ;;  %15918 = vmatpush3.bf16.msra.mxu1 %v17464_v50  ;;  %v8799_v50 = vshll.u32 %v8700_v31, 16  ;;  %v8703_v32 = vld [vmem:[#allocation2 + $0xf8] sm:$0xff]  ;;  %v8871_v31 = vshll.u32 %v8712_v7, 16 }
 0x489   : > { %15919 = vmatprep.subr.bf16.mxu1 %v17465_v0  ;;  %v8818_v25 = vshll.u32 %v8703_v32, 16 }
 0x48b   : > { %v8820_v51 = vrot.slane %v8818_v25, 1 }
 0x48c   : > { %15920 = vmatpush3.bf16.msra.mxu1 %v17465_v0  ;;  %v8701_v0 = vld [vmem:[#allocation2 + $0xe0] sm:$0xff] }
 0x48d   : > { %v8804_v18 = vshrl.u32 %v8701_v0, 16 }
 0x48f   : > { %15890 = vmatmul.mubr.bf16.gmra.mrb[48].mxu1 %v17624_v61  ;;  %v8792_v61 = vshrl.u32 %v8699_v39, 16  ;;  %v8849_v39 = vrot.slane %v8847_v22, 1 }
 0x490   : > { %15893 = vmatprep.mubr.bf16.mxu1 %v17625_v16  ;;  %v8785_v16 = vor.u32 %v8784_v2, %v8780_v9 }
 0x491   : > { %v8797_v15 = vor.u32 %v8796_v45, %v8792_v61  ;;  %v8714_v61 = vld [vmem:[#allocation2 + $0x178] sm:$0x1] }
 0x497   : > { %15894 = vmatmul.mubr.bf16.gmra.mrb[52].mxu1 %v17626_v38  ;;  %v8789_v38 = vrot.slane %v8787_v34, 1  ;;  %v8715_v34 = vld [vmem:[#allocation2 + $0x188] sm:$0xff] }
 0x498   : > { %15897 = vmatprep.mubr.bf16.mxu1 %v17627_v13  ;;  %v8806_v13 = vshll.u32 %v8701_v0, 16 }
 0x499   : > { %v8790_v55 = vsel %vm6209_vm7, %v8785_v16, %v8789_v38  ;;  %v8890_v16 = vshll.u32 %v8715_v34, 16  ;;  %v8716_v38 = vld [vmem:[#allocation2 + $0x190] sm:$0x1] }
 0x49a   : > { %v8808_v5 = vrot.slane %v8806_v13, 1 }
 0x49b   : > { %v8892_v25 = vrot.slane %v8890_v16, 1 }
 0x49c   : > { %v8809_v43 = vor.u32 %v8808_v5, %v8804_v18  ;;  %v8888_v5 = vshrl.u32 %v8715_v34, 16  ;;  %v8904_v18 = vrot.slane %v8151_v1, 1  ;;  %v17474_v1 = vld [vmem:[#allocation4] sm:$0xff]  }
 0x49e   : > { %v8814_v33 = vsel %vm6209_vm7, %v8809_v43, %v8813_v56  ;;  %v8905_v56 = vor.u32 %v8904_v18, %v8148_v49  ;;  %v17478_v18 = vld [vmem:[#allocation4 + $0x20] sm:$0xff]  }
 0x49f   : > { %15898 = vmatmul.mubr.bf16.gmra.mrb[56].mxu1 %v17628_v19  ;;  %v8801_v19 = vrot.slane %v8799_v50, 1  ;;  %v8861_v50 = vrot.slane %v8859_v23, 1 }
 0x4a0   : > { %15901 = vmatprep.mubr.bf16.mxu1 %v17629_v3  ;;  %v8704_v3 = vld [vmem:[#allocation2 + $0x100] sm:$0x1] }
 0x4a1   : > { %v8802_v29 = vsel %vm6209_vm7, %v8797_v15, %v8801_v19  ;;  %v8823_v30 = vshll.u32 %v8704_v3, 16  ;;  %v8883_v19 = vshll.u32 %v8714_v61, 16  ;;  %v8895_v3 = vshll.u32 %v8716_v38, 16 }
 0x4a3   : > { %v8825_v17 = vrot.slane %v8823_v30, 1  ;;  %v8893_v30 = vor.u32 %v8892_v25, %v8888_v5  ;;  %v8897_v14 = vrot.slane %v8895_v3, 1 }
 0x4a5   : > { %v8898_v43 = vsel %vm6209_vm7, %v8893_v30, %v8897_v14 }
 0x4a7   : > { %15902 = vmatmul.mubr.bf16.gmra.mrb[60].mxu1 %v21046_v26 }
 0x4a8   : > { %15921 = vmatprep.mubr.bf16.mxu1 %v8730_v8  ;;  %v8816_v8 = vshrl.u32 %v8703_v32, 16  ;;  %v8873_v32 = vrot.slane %v8871_v31, 1 }
 0x4aa   : > { %v8821_v63 = vor.u32 %v8820_v51, %v8816_v8  ;;  %v8885_v51 = vrot.slane %v8883_v19, 1 }
 0x4ac   : > { %v8826_v41 = vsel %vm6209_vm7, %v8821_v63, %v8825_v17  ;;  %v17472_v17 = vld [vmem:[#allocation4 + $0x70] sm:$0xff]  }
 0x4ad   : > { %15965 = vmatprep.subr.bf16.mxu0 %v17472_v17 }
 0x4ae   : > { %15966 = vmatpush3.bf16.msra.mxu0 %v17472_v17 }
 0x4af   : > { %15922 = vmatmul.mubr.bf16.vlgmr.msra.gmra.mrb[32].mxu1 %v8742_v36  ;;  %v8709_v36 = vld [vmem:[#allocation2 + $0x140] sm:$0xff]  ;;  %15967 = vmatprep.subr.bf16.mxu0 %v17473_v54 }
 0x4b0   : > { %15925 = vmatprep.mubr.bf16.mxu1 %v8754_v35  ;;  %v8840_v35 = vshrl.u32 %v8707_v59, 16  ;;  %v8854_v12 = vshll.u32 %v8709_v36, 16  ;;  %v8852_v2 = vshrl.u32 %v8709_v36, 16  ;;  %v8907_v59 = vshll.u32 %v8718_v20, 16 }
 0x4b2   : > { %v8845_v62 = vor.u32 %v8844_v24, %v8840_v35  ;;  %v8856_v40 = vrot.slane %v8854_v12, 1  ;;  %v8909_v52 = vrot.slane %v8907_v59, 1  ;;  %15968 = vmatpush3.bf16.msra.mxu0 %v17473_v54  ;;  %v17475_v12 = vld [vmem:[#allocation4 + $0x8] sm:$0xff]  }
 0x4b3   : > { %16001 = vmatprep.subr.bf16.mxu0 %v17474_v1 }
 0x4b4   : > { %v8850_v42 = vsel %vm6209_vm7, %v8845_v62, %v8849_v39  ;;  %v8857_v45 = vor.u32 %v8856_v40, %v8852_v2  ;;  %v8910_v63 = vsel %vm6209_vm7, %v8905_v56, %v8909_v52  ;;  %v17476_v2 = vld [vmem:[#allocation4 + $0x10] sm:$0xff]  }
 0x4b6   : > { %v8862_v13 = vsel %vm6209_vm7, %v8857_v45, %v8861_v50 }
 0x4b7   : > { %15926 = vmatmul.mubr.bf16.gmra.mrb[36].mxu1 %v8766_v11  ;;  %v8713_v11 = vld [vmem:[#allocation2 + $0x170] sm:$0xff] }
 0x4b8   : > { %15929 = vmatprep.mubr.bf16.mxu1 %v8778_v10  ;;  %v8864_v10 = vshrl.u32 %v8711_v6, 16  ;;  %v8878_v0 = vshll.u32 %v8713_v11, 16 }
 0x4ba   : > { %v8869_v9 = vor.u32 %v8868_v27, %v8864_v10  ;;  %v8880_v15 = vrot.slane %v8878_v0, 1 }
 0x4bc   : > { %v8874_v57 = vsel %vm6209_vm7, %v8869_v9, %v8873_v32 }
 0x4bf   : > { %15930 = vmatmul.mubr.bf16.gmra.mrb[40].mxu1 %v8790_v55  ;;  %v8876_v55 = vshrl.u32 %v8713_v11, 16 }
 0x4c0   : > { %15933 = vmatprep.mubr.bf16.mxu1 %v8802_v29 }
 0x4c1   : > { %v8881_v29 = vor.u32 %v8880_v15, %v8876_v55 }
 0x4c3   : > { %v8886_v8 = vsel %vm6209_vm7, %v8881_v29, %v8885_v51 }
 0x4c7   : > { %15934 = vmatmul.mubr.bf16.gmra.mrb[44].mxu1 %v8814_v33 }
 0x4c8   : > { %15937 = vmatprep.mubr.bf16.mxu1 %v8826_v41 }
 0x4cf   : > { %15938 = vmatmul.mubr.bf16.gmra.mrb[48].mxu1 %v8838_v53 }
 0x4d0   : > { %15941 = vmatprep.mubr.bf16.mxu1 %v8850_v42 }
 0x4d7   : > { %15942 = vmatmul.mubr.bf16.gmra.mrb[52].mxu1 %v8862_v13  ;;  %v17477_v13 = vld [vmem:[#allocation4 + $0x18] sm:$0xff]  }
 0x4d8   : > { %15945 = vmatprep.mubr.bf16.mxu1 %v8874_v57 }
 0x4df   : > { %15946 = vmatmul.mubr.bf16.gmra.mrb[56].mxu1 %v8886_v8 }
 0x4e0   : > { %15949 = vmatprep.mubr.bf16.mxu1 %v8898_v43 }
 0x4e7   : > { %15950 = vmatmul.mubr.bf16.gmra.mrb[60].mxu1 %v8910_v63 }
 0x582   : > { %v15923_v47 = vpop.f32.mrb[32].mxu1 }
 0x583   : > { %v9194_v26 = vadd.f32 %v15923_v47, %v21108_v46  ;;  %v9026_v49 = vpop.f32.mrb[33].mxu1 }
 0x584   : > { %v9192_v33 = vadd.f32 %v21108_v46, %v9026_v49  ;;  %v15924_v21 = vpop.f32.mrb[34].mxu1 }
 0x585   : > { %v9195_v58 = vadd.f32 %v15924_v21, %v21108_v46  ;;  %v9029_v41 = vpop.f32.mrb[35].mxu1  ;;  %v9226_v22 = vmax.f32 %v9194_v26, 0.0  ;;  %v17479_v26 = vld [vmem:[#allocation4 + $0x28] sm:$0xff]  }
 0x586   : > { %v9193_v24 = vadd.f32 %v21108_v46, %v9029_v41  ;;  %v9224_v60 = vmax.f32 %v9192_v33, 0.0 }
 0x587   : > { %v9227_v36 = vmax.f32 %v9195_v58, 0.0 }
 0x588   : > { %v9225_v6 = vmax.f32 %v9193_v24, 0.0 }
 0x589   : > { %v21114_v35 = vpack.c.bf16 %v9227_v36, %v9226_v22 }
 0x58a   : > { %v21116_v44 = vpack.c.bf16 %v9225_v6, %v9224_v60  ;;  %v15927_v28 = vpop.f32.mrb[36].mxu1 }
 0x58b   : > { %9274 = vst [vmem:[#allocation3 + $0x38] sm:$0xff] %v21114_v35  ;;  %v9198_v62 = vadd.f32 %v15927_v28, %v21108_v46  ;;  %v9042_v39 = vpop.f32.mrb[37].mxu1  ;;  %v9353_v4 = vshll.u32 %v21114_v35, 16  ;;  %v9350_v42 = vshrl.u32 %v21114_v35, 16 }
 0x58c   : > { %9273 = vst [vmem:[#allocation3 + $0x20] sm:$0xff] %v21116_v44  ;;  %v9196_v48 = vadd.f32 %v21108_v46, %v9042_v39  ;;  %v15928_v7 = vpop.f32.mrb[38].mxu1  ;;  %v9341_v53 = vshll.u32 %v21116_v44, 16  ;;  %15970 = vmatmul.mubr.bf16.vlgmr.msra.gmra.mrb[32].mxu0 %v21116_v44  ;;  %v9338_v11 = vshrl.u32 %v21116_v44, 16 }
 0x58d   : > { %v9199_v40 = vadd.f32 %v15928_v7, %v21108_v46  ;;  %v9045_v23 = vpop.f32.mrb[39].mxu1  ;;  %15973 = vmatprep.mubr.bf16.mxu0 %v21114_v35  ;;  %16002 = vmatpush3.bf16.msra.mxu0 %v17474_v1  ;;  %v10041_v27 = vrot.slane %v9353_v4, 1  ;;  %v9230_v10 = vmax.f32 %v9198_v62, 0.0  ;;  %v17480_v62 = vld [vmem:[#allocation4 + $0x30] sm:$0xff]  }
 0x58e   : > { %v9197_v31 = vadd.f32 %v21108_v46, %v9045_v23  ;;  %16003 = vmatprep.subr.bf16.mxu0 %v17475_v12  ;;  %v10029_v34 = vrot.slane %v9341_v53, 1  ;;  %v9228_v0 = vmax.f32 %v9196_v48, 0.0 }
 0x58f   : > { %v9231_v45 = vmax.f32 %v9199_v40, 0.0  ;;  %v21136_v50 = vor.u32 %v10041_v27, %v9350_v42 }
 0x590   : > { %v9229_v9 = vmax.f32 %v9197_v31, 0.0  ;;  %v21140_v32 = vor.u32 %v10029_v34, %v9338_v11 }
 0x591   : > { %v21142_v61 = vpack.c.bf16 %v9231_v45, %v9230_v10  ;;  %16004 = vmatpush3.bf16.msra.mxu0 %v17475_v12  ;;  %v17481_v45 = vld [vmem:[#allocation4 + $0x38] sm:$0xff]  }
 0x592   : > { %v21144_v16 = vpack.c.bf16 %v9229_v9, %v9228_v0  ;;  %v15931_v38 = vpop.f32.mrb[40].mxu1  ;;  %16005 = vmatprep.subr.bf16.mxu0 %v17476_v2 }
 0x593   : > { %9276 = vst [vmem:[#allocation3 + $0x68] sm:$0xff] %v21142_v61  ;;  %v9202_v15 = vadd.f32 %v15931_v38, %v21108_v46  ;;  %v9058_v19 = vpop.f32.mrb[41].mxu1  ;;  %v9377_v57 = vshll.u32 %v21142_v61, 16  ;;  %v9374_v29 = vshrl.u32 %v21142_v61, 16 }
 0x594   : > { %9275 = vst [vmem:[#allocation3 + $0x50] sm:$0xff] %v21144_v16  ;;  %v9200_v25 = vadd.f32 %v21108_v46, %v9058_v19  ;;  %v15932_v3 = vpop.f32.mrb[42].mxu1  ;;  %v9365_v55 = vshll.u32 %v21144_v16, 16  ;;  %15974 = vmatmul.mubr.bf16.gmra.mrb[36].mxu0 %v21144_v16  ;;  %v9362_v14 = vshrl.u32 %v21144_v16, 16 }
 0x595   : > { %v9203_v5 = vadd.f32 %v15932_v3, %v21108_v46  ;;  %v9061_v20 = vpop.f32.mrb[43].mxu1  ;;  %15977 = vmatprep.mubr.bf16.mxu0 %v21142_v61  ;;  %16006 = vmatpush3.bf16.msra.mxu0 %v17476_v2  ;;  %v10065_v51 = vrot.slane %v9377_v57, 1  ;;  %v9234_v8 = vmax.f32 %v9202_v15, 0.0 }
 0x596   : > { %v9201_v30 = vadd.f32 %v21108_v46, %v9061_v20  ;;  %16007 = vmatprep.subr.bf16.mxu0 %v17477_v13  ;;  %v10053_v59 = vrot.slane %v9365_v55, 1  ;;  %v9232_v52 = vmax.f32 %v9200_v25, 0.0 }
 0x597   : > { %v9235_v43 = vmax.f32 %v9203_v5, 0.0  ;;  %v21164_v56 = vor.u32 %v10065_v51, %v9374_v29 }
 0x598   : > { %v9233_v63 = vmax.f32 %v9201_v30, 0.0  ;;  %v21168_v17 = vor.u32 %v10053_v59, %v9362_v14 }
 0x599   : > { %v21170_v54 = vpack.c.bf16 %v9235_v43, %v9234_v8  ;;  %16008 = vmatpush3.bf16.msra.mxu0 %v17477_v13 }
 0x59a   : > { %v21172_v1 = vpack.c.bf16 %v9233_v63, %v9232_v52  ;;  %v15935_v47 = vpop.f32.mrb[44].mxu1  ;;  %16009 = vmatprep.subr.bf16.mxu0 %v17478_v18  ;;  %v21361_v61 = vld [vmem:[#allocation3 + $0x68] sm:$0xff] }
 0x59b   : > { %9278 = vst [vmem:[#allocation3 + $0x98] sm:$0xff] %v21170_v54  ;;  %v9206_v49 = vadd.f32 %v15935_v47, %v21108_v46  ;;  %v9074_v33 = vpop.f32.mrb[45].mxu1  ;;  %v9401_v21 = vshll.u32 %v21170_v54, 16  ;;  %v9398_v60 = vshrl.u32 %v21170_v54, 16 }
 0x59c   : > { %9277 = vst [vmem:[#allocation3 + $0x80] sm:$0xff] %v21172_v1  ;;  %v9204_v58 = vadd.f32 %v21108_v46, %v9074_v33  ;;  %v15936_v41 = vpop.f32.mrb[46].mxu1  ;;  %v9389_v24 = vshll.u32 %v21172_v1, 16  ;;  %15978 = vmatmul.mubr.bf16.gmra.mrb[40].mxu0 %v21172_v1  ;;  %v9386_v12 = vshrl.u32 %v21172_v1, 16 }
 0x59d   : > { %v9207_v22 = vadd.f32 %v15936_v41, %v21108_v46  ;;  %v9077_v36 = vpop.f32.mrb[47].mxu1  ;;  %15981 = vmatprep.mubr.bf16.mxu0 %v21170_v54  ;;  %16010 = vmatpush3.bf16.msra.mxu0 %v17478_v18  ;;  %v10089_v6 = vrot.slane %v9401_v21, 1  ;;  %v9238_v48 = vmax.f32 %v9206_v49, 0.0  ;;  %v21216_v18 = vld [vmem:[#allocation4 + $0x80] sm:$0xff]  }
 0x59e   : > { %v9205_v28 = vadd.f32 %v21108_v46, %v9077_v36  ;;  %16011 = vmatprep.subr.bf16.mxu0 %v17479_v26  ;;  %v10077_v39 = vrot.slane %v9389_v24, 1  ;;  %v9236_v23 = vmax.f32 %v9204_v58, 0.0 }
 0x59f   : > { %v9239_v7 = vmax.f32 %v9207_v22, 0.0  ;;  %v21192_v40 = vor.u32 %v10089_v6, %v9398_v60 }
 0x5a0   : > { %v9237_v27 = vmax.f32 %v9205_v28, 0.0  ;;  %v21196_v31 = vor.u32 %v10077_v39, %v9386_v12 }
 0x5a1   : > { %v21198_v2 = vpack.c.bf16 %v9239_v7, %v9238_v48  ;;  %16012 = vmatpush3.bf16.msra.mxu0 %v17479_v26 }
 0x5a2   : > { %v21200_v34 = vpack.c.bf16 %v9237_v27, %v9236_v23  ;;  %v15939_v10 = vpop.f32.mrb[48].mxu1  ;;  %16013 = vmatprep.subr.bf16.mxu0 %v17480_v62  ;;  %v21370_v54 = vld [vmem:[#allocation3 + $0x98] sm:$0xff] }
 0x5a3   : > { %9280 = vst [vmem:[#allocation3 + $0xc8] sm:$0xff] %v21198_v2  ;;  %v9210_v0 = vadd.f32 %v15939_v10, %v21108_v46  ;;  %v9090_v9 = vpop.f32.mrb[49].mxu1  ;;  %v22158_v38 = vshll.u32 %v21198_v2, 16  ;;  %v22168_v5 = vshrl.u32 %v21198_v2, 16 }
 0x5a4   : > { %9279 = vst [vmem:[#allocation3 + $0xb0] sm:$0xff] %v21200_v34  ;;  %v9208_v13 = vadd.f32 %v21108_v46, %v9090_v9  ;;  %v15940_v15 = vpop.f32.mrb[50].mxu1  ;;  %v22165_v19 = vshll.u32 %v21200_v34, 16  ;;  %15982 = vmatmul.mubr.bf16.gmra.mrb[44].mxu0 %v21200_v34  ;;  %v22167_v30 = vshrl.u32 %v21200_v34, 16 }
 0x5a5   : > { %v9211_v25 = vadd.f32 %v15940_v15, %v21108_v46  ;;  %v9093_v3 = vpop.f32.mrb[51].mxu1  ;;  %15985 = vmatprep.mubr.bf16.mxu0 %v21198_v2  ;;  %16014 = vmatpush3.bf16.msra.mxu0 %v17480_v62  ;;  %v10113_v20 = vrot.slane %v22158_v38, 1  ;;  %v9242_v8 = vmax.f32 %v9210_v0, 0.0 }
 0x5a6   : > { %v9209_v51 = vadd.f32 %v21108_v46, %v9093_v3  ;;  %16015 = vmatprep.subr.bf16.mxu0 %v17481_v45  ;;  %v10101_v59 = vrot.slane %v22165_v19, 1  ;;  %v9240_v63 = vmax.f32 %v9208_v13, 0.0 }
 0x5a7   : > { %v9243_v43 = vmax.f32 %v9211_v25, 0.0  ;;  %v21222_v52 = vor.u32 %v10113_v20, %v22168_v5 }
 0x5a8   : > { %v9241_v47 = vmax.f32 %v9209_v51, 0.0  ;;  %v21226_v26 = vor.u32 %v10101_v59, %v22167_v30 }
 0x5a9   : > { %v21228_v49 = vpack.c.bf16 %v9243_v43, %v9242_v8  ;;  %16016 = vmatpush3.bf16.msra.mxu0 %v17481_v45 }
 0x5aa   : > { %v21230_v33 = vpack.c.bf16 %v9241_v47, %v9240_v63  ;;  %v15943_v58 = vpop.f32.mrb[52].mxu1  ;;  %16049 = vmatprep.subr.bf16.mxu0 %v21216_v18 }
 0x5ab   : > { %9282 = vst [vmem:[#allocation3 + $0xf8] sm:$0xff] %v21228_v49  ;;  %v9214_v41 = vadd.f32 %v15943_v58, %v21108_v46  ;;  %v9106_v22 = vpop.f32.mrb[53].mxu1  ;;  %v22151_v36 = vshll.u32 %v21228_v49, 16  ;;  %v22156_v7 = vshrl.u32 %v21228_v49, 16 }
 0x5ac   : > { %9281 = vst [vmem:[#allocation3 + $0xe0] sm:$0xff] %v21230_v33  ;;  %v9212_v6 = vadd.f32 %v21108_v46, %v9106_v22  ;;  %v15944_v28 = vpop.f32.mrb[54].mxu1  ;;  %v22155_v62 = vshll.u32 %v21230_v33, 16  ;;  %15986 = vmatmul.mubr.bf16.gmra.mrb[48].mxu0 %v21230_v33  ;;  %v22157_v10 = vshrl.u32 %v21230_v33, 16 }
 0x5ad   : > { %v9215_v39 = vadd.f32 %v15944_v28, %v21108_v46  ;;  %v9109_v48 = vpop.f32.mrb[55].mxu1  ;;  %15989 = vmatprep.mubr.bf16.mxu0 %v21228_v49  ;;  %v10137_v23 = vrot.slane %v22151_v36, 1  ;;  %v9246_v0 = vmax.f32 %v9214_v41, 0.0 }
 0x5ae   : > { %v9213_v27 = vadd.f32 %v21108_v46, %v9109_v48  ;;  %v10125_v45 = vrot.slane %v22155_v62, 1  ;;  %v9244_v15 = vmax.f32 %v9212_v6, 0.0 }
 0x5af   : > { %v9247_v9 = vmax.f32 %v9215_v39, 0.0  ;;  %v21251_v13 = vor.u32 %v10137_v23, %v22156_v7 }
 0x5b0   : > { %v9245_v25 = vmax.f32 %v9213_v27, 0.0  ;;  %v21255_v3 = vor.u32 %v10125_v45, %v22157_v10 }
 0x5b1   : > { %v21257_v20 = vpack.c.bf16 %v9247_v9, %v9246_v0  ;;  %v9289_v9 = vld [vmem:[#allocation3] sm:$0x80] }
 0x5b2   : > { %v21259_v51 = vpack.c.bf16 %v9245_v25, %v9244_v15  ;;  %v15947_v59 = vpop.f32.mrb[56].mxu1  ;;  %v9322_v36 = vshrl.u32 %v9289_v9, 16 }
 0x5b3   : > { %9284 = vst [vmem:[#allocation3 + $0x128] sm:$0xff] %v21257_v20  ;;  %v9218_v8 = vadd.f32 %v15947_v59, %v21108_v46  ;;  %v9122_v43 = vpop.f32.mrb[57].mxu1  ;;  %v22150_v63 = vshll.u32 %v21257_v20, 16  ;;  %v22153_v28 = vshrl.u32 %v21257_v20, 16 }
 0x5b4   : > { %9283 = vst [vmem:[#allocation3 + $0x110] sm:$0xff] %v21259_v51  ;;  %v9216_v47 = vadd.f32 %v21108_v46, %v9122_v43  ;;  %v15948_v58 = vpop.f32.mrb[58].mxu1  ;;  %v22152_v41 = vshll.u32 %v21259_v51, 16  ;;  %15990 = vmatmul.mubr.bf16.gmra.mrb[52].mxu0 %v21259_v51  ;;  %v22154_v23 = vshrl.u32 %v21259_v51, 16 }
 0x5b5   : > { %v9219_v22 = vadd.f32 %v15948_v58, %v21108_v46  ;;  %v9125_v6 = vpop.f32.mrb[59].mxu1  ;;  %15993 = vmatprep.mubr.bf16.mxu0 %v21257_v20  ;;  %v10161_v39 = vrot.slane %v22150_v63, 1  ;;  %v9250_v45 = vmax.f32 %v9218_v8, 0.0 }
 0x5b6   : > { %v9217_v48 = vadd.f32 %v21108_v46, %v9125_v6  ;;  %v10149_v27 = vrot.slane %v22152_v41, 1  ;;  %v9248_v25 = vmax.f32 %v9216_v47, 0.0  ;;  %v9291_v41 = vld [vmem:[#allocation3 + $0x18] sm:$0x80] }
 0x5b7   : > { %v9251_v0 = vmax.f32 %v9219_v22, 0.0  ;;  %v21279_v15 = vor.u32 %v10161_v39, %v22153_v28 }
 0x5b8   : > { %v9249_v59 = vmax.f32 %v9217_v48, 0.0  ;;  %v21283_v43 = vor.u32 %v10149_v27, %v22154_v23 }
 0x5b9   : > { %v21285_v58 = vpack.c.bf16 %v9251_v0, %v9250_v45 }
 0x5ba   : > { %v21287_v6 = vpack.c.bf16 %v9249_v59, %v9248_v25  ;;  %v15951_v63 = vpop.f32.mrb[60].mxu1 }
 0x5bb   : > { %9286 = vst [vmem:[#allocation3 + $0x158] sm:$0xff] %v21285_v58  ;;  %v9222_v8 = vadd.f32 %v15951_v63, %v21108_v46  ;;  %v9138_v22 = vpop.f32.mrb[61].mxu1  ;;  %v22159_v39 = vshll.u32 %v21285_v58, 16  ;;  %v22163_v9 = vshrl.u32 %v21285_v58, 16  ;;  %v21406_v19 = vld [vmem:[#allocation3 + $0x110] sm:$0xff] }
 0x5bc   : > { %9285 = vst [vmem:[#allocation3 + $0x140] sm:$0xff] %v21287_v6  ;;  %v9220_v47 = vadd.f32 %v21108_v46, %v9138_v22  ;;  %v15952_v48 = vpop.f32.mrb[62].mxu1  ;;  %v22160_v27 = vshll.u32 %v21287_v6, 16  ;;  %15994 = vmatmul.mubr.bf16.gmra.mrb[56].mxu0 %v21287_v6  ;;  %v22164_v59 = vshrl.u32 %v21287_v6, 16  ;;  %v9324_v22 = vrot.slane %v9322_v36, 7 }
 0x5bd   : > { %v9223_v45 = vadd.f32 %v15952_v48, %v21108_v46  ;;  %v9141_v0 = vpop.f32.mrb[63].mxu1  ;;  %15997 = vmatprep.mubr.bf16.mxu0 %v21285_v58  ;;  %v10185_v63 = vrot.slane %v22159_v39, 1  ;;  %v9254_v23 = vmax.f32 %v9222_v8, 0.0  ;;  %v9293_v48 = vld [vmem:[#allocation3 + $0x30] sm:$0x80] }
 0x5be   : > { %v9221_v25 = vadd.f32 %v21108_v46, %v9141_v0  ;;  %v10173_v28 = vrot.slane %v22160_v27, 1  ;;  %v9252_v10 = vmax.f32 %v9220_v47, 0.0  ;;  %v9334_v0 = vshrl.u32 %v9291_v41, 16 }
 0x5bf   : > { %v9255_v62 = vmax.f32 %v9223_v45, 0.0  ;;  %v21307_v7 = vor.u32 %v10185_v63, %v22163_v9  ;;  %v9332_v27 = vsel %vm5517_vm6, %v9324_v22, %v21058_v37  ;;  %v9346_v8 = vshrl.u32 %v9293_v48, 16  ;;  %v9295_v63 = vld [vmem:[#allocation3 + $0x48] sm:$0x80] }
 0x5c0   : > { %v9253_v38 = vmax.f32 %v9221_v25, 0.0  ;;  %v21311_v39 = vor.u32 %v10173_v28, %v22164_v59  ;;  %v9340_v45 = vrot.slane %v9338_v11, 7  ;;  %v9352_v47 = vrot.slane %v9350_v42, 7  ;;  %v9299_v11 = vld [vmem:[#allocation3 + $0x78] sm:$0x80]  ;;  %v21391_v59 = vld [vmem:[#allocation3 + $0xe0] sm:$0xff] }
 0x5c1   : > { %v9271_v46 = vpack.c.bf16 %v9255_v62, %v9254_v23  ;;  %v9336_v62 = vrot.slane %v9334_v0, 7  ;;  %v9348_v41 = vrot.slane %v9346_v8, 7  ;;  %v9358_v23 = vshrl.u32 %v9295_v63, 16 }
 0x5c2   : > { %v21313_v36 = vpack.c.bf16 %v9253_v38, %v9252_v10  ;;  %v9297_v38 = vld [vmem:[#allocation3 + $0x60] sm:$0x80]  ;;  %v9301_v10 = vld [vmem:[#allocation3 + $0x90] sm:$0x80]  ;;  %v9343_v42 = vor.u32 %v9341_v53, %v9340_v45  ;;  %v9364_v22 = vrot.slane %v9362_v14, 7  ;;  %v9376_v48 = vrot.slane %v9374_v29, 7 }
 0x5c3   : > { %9288 = vst [vmem:[#allocation3 + $0x188] sm:$0xff] %v9271_v46  ;;  %v9355_v46 = vor.u32 %v9353_v4, %v9352_v47  ;;  %v9400_v0 = vrot.slane %v9398_v60, 7  ;;  %v9394_v8 = vshrl.u32 %v9301_v10, 16  ;;  %v9382_v44 = vshrl.u32 %v9299_v11, 16  ;;  %v17483_v45 = vld [vmem:[#allocation4 + $0x88] sm:$0xff]   ;;  %v21343_v14 = vld [vmem:[#allocation3 + $0x20] sm:$0xff] }
 0x5c4   : > { %9287 = vst [vmem:[#allocation3 + $0x170] sm:$0xff] %v21313_v36  ;;  %v22161_v28 = vshll.u32 %v21313_v36, 16  ;;  %15998 = vmatmul.mubr.bf16.gmra.mrb[60].mxu0 %v21313_v36  ;;  %v22162_v37 = vshrl.u32 %v21313_v36, 16  ;;  %v9360_v53 = vrot.slane %v9358_v23, 7  ;;  %v9367_v29 = vor.u32 %v9365_v55, %v9364_v22  ;;  %v21350_v47 = vld [vmem:[#allocation3 + $0xc0] sm:$0x80] }
 0x5c5   : > { %16017 = vmatprep.mubr.bf16.mxu0 %v9332_v27  ;;  %v9370_v27 = vshrl.u32 %v9297_v38, 16  ;;  %v9379_v35 = vor.u32 %v9377_v57, %v9376_v48  ;;  %v9344_v4 = vsel %vm5517_vm6, %v9336_v62, %v9343_v42  ;;  %v21352_v38 = vld [vmem:[#allocation3 + $0x38] sm:$0xff]  ;;  %v9388_v10 = vrot.slane %v9386_v12, 7  ;;  %v21359_v11 = vld [vmem:[#allocation3 + $0x50] sm:$0xff] }
 0x5c6   : > { %v10197_v25 = vrot.slane %v22161_v28, 1  ;;  %v21341_v28 = vld [vmem:[#allocation3 + $0xa8] sm:$0x80]  ;;  %v9403_v23 = vor.u32 %v9401_v21, %v9400_v0  ;;  %v9356_v16 = vsel %vm5517_vm6, %v9348_v41, %v9355_v46  ;;  %v9396_v55 = vrot.slane %v9394_v8, 7  ;;  %v17484_v21 = vld [vmem:[#allocation4 + $0x90] sm:$0xff]   ;;  %v21376_v48 = vld [vmem:[#allocation3 + $0xb0] sm:$0xff] }
 0x5c7   : > { %v9372_v60 = vrot.slane %v9370_v27, 7  ;;  %v21364_v57 = vrot.slane %v9382_v44, 7  ;;  %v22166_v12 = vshll.u32 %v21343_v14, 16  ;;  %v22172_v42 = vshrl.u32 %v21343_v14, 16  ;;  %v21382_v44 = vld [vmem:[#allocation3 + $0xc8] sm:$0xff] }
 0x5c8   : > { %v21339_v63 = vor.u32 %v10197_v25, %v22162_v37  ;;  %v21368_v25 = vld [vmem:[#allocation3 + $0x80] sm:$0xff]  ;;  %v22174_v22 = vshrl.u32 %v21352_v38, 16  ;;  %v9368_v27 = vsel %vm5517_vm6, %v9360_v53, %v9367_v29  ;;  %v22170_v0 = vshll.u32 %v21359_v11, 16 }
 0x5c9   : > { %v9380_v46 = vsel %vm5517_vm6, %v9372_v60, %v9379_v35  ;;  %v22171_v8 = vshll.u32 %v21361_v61, 16  ;;  %v22173_v37 = vshll.u32 %v21368_v25, 16  ;;  %v22175_v9 = vshll.u32 %v21370_v54, 16  ;;  %v21396_v60 = vld [vmem:[#allocation3 + $0xf8] sm:$0xff] }
 0x5ca   : > { %v22176_v53 = vshrl.u32 %v21359_v11, 16  ;;  %v22178_v29 = vshrl.u32 %v21361_v61, 16  ;;  %v22177_v35 = vshll.u32 %v21376_v48, 16  ;;  %v11271_v1 = vrot.slane %v22166_v12, 1 }
 0x5cb   : > { %v11295_v12 = vrot.slane %v22170_v0, 1  ;;  %v11307_v30 = vrot.slane %v22171_v8, 1  ;;  %v22182_v5 = vshll.u32 %v21396_v60, 16  ;;  %v11319_v41 = vrot.slane %v22173_v37, 1  ;;  %v21429_v8 = vld [vmem:[#allocation3 + $0x140] sm:$0xff]  ;;  %v17486_v37 = vld [vmem:[#allocation4 + $0xa0] sm:$0xff]  }
 0x5cc   : > { %16018 = vmatmul.mubr.bf16.vlgmr.msra.gmra.mrb[32].mxu0 %v9344_v4  ;;  %v9391_v4 = vor.u32 %v9389_v24, %v9388_v10  ;;  %v17485_v24 = vld [vmem:[#allocation4 + $0x98] sm:$0xff]   ;;  %v22179_v10 = vshrl.u32 %v21368_v25, 16  ;;  %v21410_v62 = vor.u32 %v11271_v1, %v22172_v42  ;;  %v11331_v1 = vrot.slane %v22175_v9, 1 }
 0x5cd   : > { %16021 = vmatprep.mubr.bf16.mxu0 %v9356_v16  ;;  %16050 = vmatpush3.bf16.msra.mxu0 %v21216_v18  ;;  %v22169_v18 = vshll.u32 %v21352_v38, 16  ;;  %v21387_v16 = vsel %vm5517_vm6, %v9396_v55, %v9403_v23  ;;  %v22180_v23 = vshrl.u32 %v21370_v54, 16  ;;  %v21417_v55 = vld [vmem:[#allocation3 + $0x128] sm:$0xff]  ;;  %v22181_v0 = vshrl.u32 %v21376_v48, 16 }
 0x5ce   : > { %16051 = vmatprep.subr.bf16.mxu0 %v17483_v45  ;;  %v21433_v42 = vor.u32 %v11295_v12, %v22176_v53  ;;  %v21445_v9 = vor.u32 %v11319_v41, %v22179_v10  ;;  %v21448_v53 = vld [vmem:[#allocation3 + $0x158] sm:$0xff]  ;;  %v21462_v10 = vld [vmem:[#allocation3 + $0x170] sm:$0xff]  ;;  %v22450_v12 = vshll.u32 %v21391_v59, 16  ;;  %v22452_v41 = vshrl.u32 %v21382_v44, 16 }
 0x5d0   : > { %22446 = vst [vmem:[#allocation36_spill] sm:$0xff] %v21445_v9 }
 0x5d1   : > { %16052 = vmatpush3.bf16.msra.mxu0 %v17483_v45  ;;  %v11283_v45 = vrot.slane %v22169_v18, 1 }
 0x5d2   : > { %16053 = vmatprep.subr.bf16.mxu0 %v17484_v21 }
 0x5d3   : > { %v21421_v18 = vor.u32 %v11283_v45, %v22174_v22  ;;  %v11343_v45 = vrot.slane %v22177_v35, 1  ;;  %v21452_v35 = vor.u32 %v11331_v1, %v22180_v23  ;;  %v11379_v1 = vrot.slane %v22182_v5, 1 }
 0x5d4   : > { %16022 = vmatmul.mubr.bf16.gmra.mrb[36].mxu0 %v9368_v27  ;;  %v11367_v27 = vrot.slane %v22450_v12, 1  ;;  %v22451_v23 = vshrl.u32 %v21198_v2, 16  ;;  %v17487_v12 = vld [vmem:[#allocation4 + $0xa8] sm:$0xff]   ;;  %v22454_v5 = vshrl.u32 %v21391_v59, 16 }
 0x5d5   : > { %16025 = vmatprep.mubr.bf16.mxu0 %v9380_v46  ;;  %16054 = vmatpush3.bf16.msra.mxu0 %v17484_v21  ;;  %v21441_v21 = vor.u32 %v11307_v30, %v22178_v29  ;;  %22447 = vst [vmem:[#allocation35_spill] sm:$0xff] %v21452_v35  ;;  %v21456_v22 = vor.u32 %v11343_v45, %v22181_v0  ;;  %v22449_v46 = vshll.u32 %v21382_v44, 16  ;;  %v21473_v0 = vld [vmem:[#allocation3 + $0x188] sm:$0xff] }
 0x5d6   : > { %16055 = vmatprep.subr.bf16.mxu0 %v17485_v24  ;;  %v9424_v35 = vrot.slane %v22451_v23, 7  ;;  %v9392_v45 = vsel %vm5517_vm6, %v21364_v57, %v9391_v4  ;;  %v21482_v9 = vor.u32 %v11367_v27, %v22454_v5  ;;  %v22456_v23 = vshrl.u32 %v21396_v60, 16 }
 0x5d7   : > { %22445 = vst [vmem:[#allocation37_spill] sm:$0xff] %v21441_v21  ;;  %22448 = vst [vmem:[#allocation39_spill] sm:$0xff] %v21456_v22  ;;  %v11355_v30 = vrot.slane %v22449_v46, 1  ;;  %v22458_v4 = vshll.u32 %v21406_v19, 16  ;;  %v22459_v46 = vshrl.u32 %v21200_v34, 16  ;;  %v22460_v22 = vshll.u32 %v21417_v55, 16 }
 0x5d8   : > { %22455 = vst [vmem:[#allocation40_spill] sm:$0xff] %v21482_v9  ;;  %v21486_v57 = vor.u32 %v11379_v1, %v22456_v23  ;;  %v22184_v5 = vshrl.u32 %v21429_v8, 16  ;;  %v22461_v1 = vshrl.u32 %v21406_v19, 16  ;;  %v22470_v27 = vshll.u32 %v21198_v2, 16  ;;  %v9307_v9 = vld [vmem:[#allocation3 + $0xd8] sm:$0x80] }
 0x5d9   : > { %16056 = vmatpush3.bf16.msra.mxu0 %v17485_v24  ;;  %v21477_v29 = vor.u32 %v11355_v30, %v22452_v41  ;;  %v11391_v24 = vrot.slane %v22458_v4, 1  ;;  %v9412_v21 = vrot.slane %v22459_v46, 7  ;;  %v22183_v30 = vshrl.u32 %v21417_v55, 16  ;;  %v17488_v41 = vld [vmem:[#allocation4 + $0xb0] sm:$0xff]  }
 0x5da   : > { %16057 = vmatprep.subr.bf16.mxu0 %v17486_v37  ;;  %22457 = vst [vmem:[#allocation42_spill] sm:$0xff] %v21486_v57  ;;  %v22463_v4 = vshll.u32 %v21429_v8, 16 }
 0x5db   : > { %22453 = vst [vmem:[#allocation38_spill] sm:$0xff] %v21477_v29  ;;  %v11403_v29 = vrot.slane %v22460_v22, 1  ;;  %v21500_v23 = vor.u32 %v11391_v24, %v22461_v1  ;;  %v22465_v22 = vshrl.u32 %v21341_v28, 16  ;;  %v22466_v1 = vshll.u32 %v21448_v53, 16 }
 0x5dc   : > { %16026 = vmatmul.mubr.bf16.gmra.mrb[40].mxu0 %v9392_v45  ;;  %v11415_v57 = vrot.slane %v22463_v4, 1  ;;  %v22185_v28 = vshrl.u32 %v21462_v10, 16 }
 0x5dd   : > { %22462 = vst [vmem:[#allocation44_spill] sm:$0xff] %v21500_v23  ;;  %16029 = vmatprep.mubr.bf16.mxu0 %v21387_v16  ;;  %16058 = vmatpush3.bf16.msra.mxu0 %v17486_v37  ;;  %v21507_v46 = vor.u32 %v11403_v29, %v22183_v30  ;;  %v9408_v45 = vrot.slane %v22465_v22, 7  ;;  %v11427_v4 = vrot.slane %v22466_v1, 1  ;;  %v22467_v37 = vshll.u32 %v21200_v34, 16 }
 0x5de   : > { %16059 = vmatprep.subr.bf16.mxu0 %v17487_v12  ;;  %v21514_v24 = vor.u32 %v11415_v57, %v22184_v5  ;;  %v22468_v29 = vshrl.u32 %v21350_v47, 16  ;;  %v22469_v22 = vshll.u32 %v21462_v10, 16  ;;  %v9427_v23 = vor.u32 %v22470_v27, %v9424_v35  ;;  %v9309_v47 = vld [vmem:[#allocation3 + $0xf0] sm:$0x80] }
 0x5df   : > { %22464 = vst [vmem:[#allocation50_spill] sm:$0xff] %v21507_v46  ;;  %v9415_v16 = vor.u32 %v22467_v37, %v9412_v21  ;;  %v22186_v57 = vshrl.u32 %v21473_v0, 16  ;;  %v22471_v5 = vshrl.u32 %v21448_v53, 16  ;;  %v22472_v34 = vshll.u32 %v21473_v0, 16 }
 0x5e0   : > { %v9420_v30 = vrot.slane %v22468_v29, 7  ;;  %v11439_v46 = vrot.slane %v22469_v22, 1  ;;  %v17489_v29 = vld [vmem:[#allocation4 + $0xb8] sm:$0xff]   ;;  %v22475_v35 = vshrl.u32 %v21230_v33, 16  ;;  %v22476_v22 = vshrl.u32 %v21228_v49, 16 }
 0x5e1   : > { %v21530_v1 = vor.u32 %v11427_v4, %v22471_v5  ;;  %v11451_v21 = vrot.slane %v22472_v34, 1  ;;  %16060 = vmatpush3.bf16.msra.mxu0 %v17487_v12  ;;  %v9416_v5 = vsel %vm5517_vm6, %v9408_v45, %v9415_v16  ;;  %v9430_v4 = vshrl.u32 %v9307_v9, 16  ;;  %v9311_v16 = vld [vmem:[#allocation3 + $0x108] sm:$0x80] }
 0x5e2   : > { %v21536_v37 = vor.u32 %v11439_v46, %v22185_v28  ;;  %16061 = vmatprep.subr.bf16.mxu0 %v17488_v41  ;;  %v9436_v27 = vrot.slane %v22475_v35, 7  ;;  %v9448_v34 = vrot.slane %v22476_v22, 7  ;;  %v9428_v12 = vsel %vm5517_vm6, %v9420_v30, %v9427_v23  ;;  %v21548_v28 = vld [vmem:[#allocation4 + $0xc0] sm:$0xff]  }
 0x5e3   : > { %v21540_v2 = vor.u32 %v11451_v21, %v22186_v57  ;;  %v9442_v46 = vshrl.u32 %v9309_v47, 16  ;;  %v22477_v21 = vshll.u32 %v21230_v33, 16  ;;  %v22478_v35 = vshll.u32 %v21228_v49, 16 }
 0x5e4   : > { %22473 = vst [vmem:[#allocation41_spill] sm:$0xff] %v21536_v37  ;;  %16030 = vmatmul.mubr.bf16.gmra.mrb[44].mxu0 %v9416_v5  ;;  %v9313_v37 = vld [vmem:[#allocation3 + $0x120] sm:$0x80]  ;;  %v22479_v30 = vshrl.u32 %v21259_v51, 16  ;;  %v9454_v47 = vshrl.u32 %v9311_v16, 16  ;;  %v22480_v5 = vshrl.u32 %v21257_v20, 16 }
 0x5e5   : > { %22474 = vst [vmem:[#allocation45_spill] sm:$0xff] %v21540_v2  ;;  %16033 = vmatprep.mubr.bf16.mxu0 %v9428_v12  ;;  %16062 = vmatpush3.bf16.msra.mxu0 %v17488_v41  ;;  %v9439_v57 = vor.u32 %v22477_v21, %v9436_v27  ;;  %v9432_v2 = vrot.slane %v9430_v4, 7  ;;  %v9451_v45 = vor.u32 %v22478_v35, %v9448_v34  ;;  %v9444_v9 = vrot.slane %v9442_v46, 7  ;;  %v9315_v21 = vld [vmem:[#allocation3 + $0x138] sm:$0x80] }
 0x5e6   : > { %16063 = vmatprep.subr.bf16.mxu0 %v17489_v29  ;;  %v9460_v23 = vrot.slane %v22479_v30, 7  ;;  %v9472_v33 = vrot.slane %v22480_v5, 7  ;;  %v9466_v49 = vshrl.u32 %v9313_v37, 16  ;;  %v22481_v4 = vshll.u32 %v21259_v51, 16  ;;  %v9317_v35 = vld [vmem:[#allocation3 + $0x150] sm:$0x80] }
 0x5e7   : > { %v9440_v41 = vsel %vm5517_vm6, %v9432_v2, %v9439_v57  ;;  %v9452_v27 = vsel %vm5517_vm6, %v9444_v9, %v9451_v45  ;;  %v22482_v34 = vshll.u32 %v21257_v20, 16  ;;  %v22483_v57 = vshrl.u32 %v21287_v6, 16 }
 0x5e8   : > { %v9463_v22 = vor.u32 %v22481_v4, %v9460_v23  ;;  %v9468_v46 = vrot.slane %v9466_v49, 7  ;;  %v9478_v30 = vshrl.u32 %v9315_v21, 16  ;;  %v22484_v45 = vshrl.u32 %v21285_v58, 16  ;;  %v21571_v23 = vld [vmem:[#allocation2] sm:$0xff] }
 0x5e9   : > { %16064 = vmatpush3.bf16.msra.mxu0 %v17489_v29  ;;  %v9456_v29 = vrot.slane %v9454_v47, 7  ;;  %v9475_v12 = vor.u32 %v22482_v34, %v9472_v33  ;;  %v9484_v2 = vrot.slane %v22483_v57, 7  ;;  %v9490_v9 = vshrl.u32 %v9317_v35, 16  ;;  %v9981_v33 = vld [vmem:[#allocation3 + $0x10] sm:$0x1] }
 0x5ea   : > { %16097 = vmatprep.subr.bf16.mxu0 %v21548_v28  ;;  %v9496_v37 = vrot.slane %v22484_v45, 7  ;;  %v10015_v20 = vshll.u32 %v21571_v23, 16  ;;  %v9480_v5 = vrot.slane %v9478_v30, 7 }
 0x5eb   : > { %v9464_v16 = vsel %vm5517_vm6, %v9456_v29, %v9463_v22  ;;  %v9476_v51 = vsel %vm5517_vm6, %v9468_v46, %v9475_v12  ;;  %v9492_v4 = vrot.slane %v9490_v9, 7  ;;  %v9319_v22 = vld [vmem:[#allocation3 + $0x168] sm:$0x80]  ;;  %v10013_v29 = vshrl.u32 %v21571_v23, 16  ;;  %v17635_v23 = vld [vmem:[#allocation3 + $0x98] sm:$0xff] }
 0x5ec   : > { %16034 = vmatmul.mubr.bf16.gmra.mrb[48].mxu0 %v9440_v41  ;;  %v22485_v41 = vshll.u32 %v21287_v6, 16  ;;  %v10017_v34 = vrot.slane %v10015_v20, 1  ;;  %v10020_v12 = vshll.u32 %v9981_v33, 16  ;;  %v22487_v46 = vshrl.u32 %v21313_v36, 16 }
 0x5ed   : > { %16037 = vmatprep.mubr.bf16.mxu0 %v9452_v27  ;;  %v22486_v27 = vshll.u32 %v21285_v58, 16  ;;  %v9502_v6 = vshrl.u32 %v9319_v22, 16  ;;  %v17491_v22 = vld [vmem:[#allocation4 + $0xc8] sm:$0xff]  }
 0x5ee   : > { %v9487_v47 = vor.u32 %v22485_v41, %v9484_v2  ;;  %v9508_v21 = vrot.slane %v22487_v46, 7  ;;  %v21587_v58 = vor.u32 %v10017_v34, %v10013_v29  ;;  %v10022_v2 = vrot.slane %v10020_v12, 1 }
 0x5ef   : > { %v9499_v49 = vor.u32 %v22486_v27, %v9496_v37  ;;  %v9504_v45 = vrot.slane %v9502_v6, 7  ;;  %v9983_v37 = vld [vmem:[#allocation3 + $0x28] sm:$0x1] }
 0x5f0   : > { %v9488_v35 = vsel %vm5517_vm6, %v9480_v5, %v9487_v47  ;;  %v10023_v9 = vsel %vm6209_vm7, %v21587_v58, %v10022_v2  ;;  %v10032_v47 = vshll.u32 %v9983_v37, 16  ;;  %v9993_v2 = vld [vmem:[#allocation3 + $0xa0] sm:$0x1] }
 0x5f1   : > { %v9500_v57 = vsel %vm5517_vm6, %v9492_v4, %v9499_v49  ;;  %v9987_v49 = vld [vmem:[#allocation3 + $0x58] sm:$0x1]  ;;  %v9989_v4 = vld [vmem:[#allocation3 + $0x70] sm:$0x1] }
 0x5f2   : > { %v10034_v33 = vrot.slane %v10032_v47, 1  ;;  %v10056_v34 = vshll.u32 %v9987_v49, 16  ;;  %v10068_v46 = vshll.u32 %v9989_v4, 16  ;;  %v17495_v47 = vld [vmem:[#allocation4 + $0xe8] sm:$0xff]  }
 0x5f4   : > { %16038 = vmatmul.mubr.bf16.gmra.mrb[52].mxu0 %v9464_v16  ;;  %v22488_v16 = vshll.u32 %v21313_v36, 16  ;;  %v10035_v36 = vsel %vm6209_vm7, %v21140_v32, %v10034_v33  ;;  %v10070_v6 = vrot.slane %v10068_v46, 1 }
 0x5f5   : > { %16041 = vmatprep.mubr.bf16.mxu0 %v9476_v51  ;;  %v9985_v51 = vld [vmem:[#allocation3 + $0x40] sm:$0x1] }
 0x5f6   : > { %v9511_v30 = vor.u32 %v22488_v16, %v9508_v21  ;;  %v10044_v5 = vshll.u32 %v9985_v51, 16  ;;  %v17492_v21 = vld [vmem:[#allocation4 + $0xd0] sm:$0xff]   ;;  %v17493_v16 = vld [vmem:[#allocation4 + $0xd8] sm:$0xff]  }
 0x5f8   : > { %v9512_v41 = vsel %vm5517_vm6, %v9504_v45, %v9511_v30  ;;  %v10046_v27 = vrot.slane %v10044_v5, 1  ;;  %v10092_v45 = vshll.u32 %v9993_v2, 16  ;;  %v10005_v2 = vld [vmem:[#allocation3 + $0x130] sm:$0x1] }
 0x5fa   : > { %v10047_v12 = vsel %vm6209_vm7, %v21136_v50, %v10046_v27  ;;  %v10071_v50 = vsel %vm6209_vm7, %v21164_v56, %v10070_v6  ;;  %v10094_v51 = vrot.slane %v10092_v45, 1  ;;  %v17496_v27 = vld [vmem:[#allocation4 + $0xf0] sm:$0xff]   ;;  %v10007_v45 = vld [vmem:[#allocation3 + $0x148] sm:$0x1] }
 0x5fc   : > { %16042 = vmatmul.mubr.bf16.gmra.mrb[56].mxu0 %v9488_v35  ;;  %v10058_v35 = vrot.slane %v10056_v34, 1  ;;  %v10095_v56 = vsel %vm6209_vm7, %v21192_v40, %v10094_v51  ;;  %v17497_v34 = vld [vmem:[#allocation4 + $0xf8] sm:$0xff]   ;;  %v10176_v51 = vshll.u32 %v10007_v45, 16  ;;  %v17499_v45 = vld [vmem:[#allocation4 + $0x108] sm:$0xff]  }
 0x5fd   : > { %16045 = vmatprep.mubr.bf16.mxu0 %v9500_v57  ;;  %v9991_v57 = vld [vmem:[#allocation3 + $0x88] sm:$0x1] }
 0x5fe   : > { %v10059_v32 = vsel %vm6209_vm7, %v21168_v17, %v10058_v35  ;;  %v10080_v30 = vshll.u32 %v9991_v57, 16  ;;  %v10003_v57 = vld [vmem:[#allocation3 + $0x118] sm:$0x1] }
 0x600   : > { %v10082_v37 = vrot.slane %v10080_v30, 1 }
 0x602   : > { %v10083_v17 = vsel %vm6209_vm7, %v21196_v31, %v10082_v37 }
 0x604   : > { %16046 = vmatmul.mubr.bf16.gmra.mrb[60].mxu0 %v9512_v41  ;;  %v9997_v41 = vld [vmem:[#allocation3 + $0xd0] sm:$0x1] }
 0x605   : > { %16065 = vmatprep.mubr.bf16.mxu0 %v10023_v9  ;;  %v9995_v9 = vld [vmem:[#allocation3 + $0xb8] sm:$0x1]  ;;  %v10116_v33 = vshll.u32 %v9997_v41, 16  ;;  %v10178_v41 = vrot.slane %v10176_v51, 1  ;;  %v22495_v51 = vshrl.u32 %v21361_v61, 16 }
 0x606   : > { %v10104_v5 = vshll.u32 %v9995_v9, 16 }
 0x607   : > { %v10118_v4 = vrot.slane %v10116_v33, 1 }
 0x608   : > { %v10106_v49 = vrot.slane %v10104_v5, 1  ;;  %v10179_v5 = vsel %vm6209_vm7, %v21311_v39, %v10178_v41 }
 0x609   : > { %v10119_v40 = vsel %vm6209_vm7, %v21222_v52, %v10118_v4  ;;  %v10164_v52 = vshll.u32 %v10005_v2, 16 }
 0x60a   : > { %v10107_v31 = vsel %vm6209_vm7, %v21226_v26, %v10106_v49  ;;  %v10152_v26 = vshll.u32 %v10003_v57, 16 }
 0x60c   : > { %16066 = vmatmul.mubr.bf16.vlgmr.msra.gmra.mrb[32].mxu0 %v10035_v36  ;;  %v10001_v36 = vld [vmem:[#allocation3 + $0x100] sm:$0x1]  ;;  %v10154_v30 = vrot.slane %v10152_v26, 1 }
 0x60d   : > { %16069 = vmatprep.mubr.bf16.mxu0 %v10047_v12  ;;  %16098 = vmatpush3.bf16.msra.mxu0 %v21548_v28  ;;  %v17494_v28 = vld [vmem:[#allocation4 + $0xe0] sm:$0xff]   ;;  %v10140_v46 = vshll.u32 %v10001_v36, 16 }
 0x60e   : > { %16099 = vmatprep.subr.bf16.mxu0 %v17491_v22  ;;  %v10155_v37 = vsel %vm6209_vm7, %v21283_v43, %v10154_v30  ;;  %v10484_v30 = vld [vmem:[#allocation3 + $0x60] sm:$0x80] }
 0x60f   : > { %v10142_v6 = vrot.slane %v10140_v46, 1 }
 0x611   : > { %16100 = vmatpush3.bf16.msra.mxu0 %v17491_v22  ;;  %v9999_v22 = vld [vmem:[#allocation3 + $0xe8] sm:$0x1] }
 0x612   : > { %16101 = vmatprep.subr.bf16.mxu0 %v17492_v21  ;;  %v10128_v12 = vshll.u32 %v9999_v22, 16  ;;  %v22490_v22 = vshll.u32 %v21343_v14, 16 }
 0x614   : > { %16070 = vmatmul.mubr.bf16.gmra.mrb[36].mxu0 %v10059_v32  ;;  %v10130_v35 = vrot.slane %v10128_v12, 1  ;;  %v10143_v32 = vsel %vm6209_vm7, %v21251_v13, %v10142_v6  ;;  %v10478_v13 = vld [vmem:[#allocation3 + $0x18] sm:$0x80]  ;;  %v22492_v6 = vshrl.u32 %v21359_v11, 16 }
 0x615   : > { %16073 = vmatprep.mubr.bf16.mxu0 %v10071_v50  ;;  %16102 = vmatpush3.bf16.msra.mxu0 %v17492_v21  ;;  %v17498_v21 = vld [vmem:[#allocation4 + $0x100] sm:$0xff]   ;;  %v10166_v50 = vrot.slane %v10164_v52, 1  ;;  %v10511_v43 = vshrl.u32 %v10478_v13, 16  ;;  %v17500_v13 = vld [vmem:[#allocation4 + $0x110] sm:$0xff]  }
 0x616   : > { %16103 = vmatprep.subr.bf16.mxu0 %v17493_v16  ;;  %v10541_v57 = vrot.slane %v22492_v6, 7  ;;  %v22501_v6 = vshll.u32 %v21370_v54, 16 }
 0x617   : > { %v10167_v9 = vsel %vm6209_vm7, %v21279_v15, %v10166_v50  ;;  %v10513_v4 = vrot.slane %v10511_v43, 7  ;;  %v10486_v50 = vld [vmem:[#allocation3 + $0x78] sm:$0x80] }
 0x618   : > { %v10559_v41 = vshrl.u32 %v10486_v50, 16  ;;  %v17503_v50 = vld [vmem:[#allocation4 + $0x128] sm:$0xff]  }
 0x619   : > { %16104 = vmatpush3.bf16.msra.mxu0 %v17493_v16  ;;  %v10131_v16 = vsel %vm6209_vm7, %v21255_v3, %v10130_v35 }
 0x61a   : > { %16105 = vmatprep.subr.bf16.mxu0 %v17494_v28  ;;  %v10561_v43 = vrot.slane %v10559_v41, 7  ;;  %v22504_v41 = vshrl.u32 %v21391_v59, 16 }
 0x61c   : > { %16074 = vmatmul.mubr.bf16.gmra.mrb[40].mxu0 %v10083_v17  ;;  %v10011_v17 = vld [vmem:[#allocation3 + $0x178] sm:$0x1] }
 0x61d   : > { %16077 = vmatprep.mubr.bf16.mxu0 %v10095_v56  ;;  %16106 = vmatpush3.bf16.msra.mxu0 %v17494_v28  ;;  %v10009_v28 = vld [vmem:[#allocation3 + $0x160] sm:$0x1]  ;;  %v10200_v56 = vshll.u32 %v10011_v17, 16 }
 0x61e   : > { %16107 = vmatprep.subr.bf16.mxu0 %v17495_v47  ;;  %v10188_v3 = vshll.u32 %v10009_v28, 16 }
 0x61f   : > { %v10202_v15 = vrot.slane %v10200_v56, 1  ;;  %v22497_v56 = vshll.u32 %v21361_v61, 16 }
 0x621   : > { %16108 = vmatpush3.bf16.msra.mxu0 %v17495_v47  ;;  %v10190_v47 = vrot.slane %v10188_v3, 1  ;;  %v10203_v39 = vsel %vm6209_vm7, %v21339_v63, %v10202_v15  ;;  %v22494_v63 = vshll.u32 %v21359_v11, 16  ;;  %v10488_v15 = vld [vmem:[#allocation3 + $0x90] sm:$0x80] }
 0x622   : > { %16109 = vmatprep.subr.bf16.mxu0 %v17496_v27 }
 0x623   : > { %v10191_v33 = vsel %vm6209_vm7, %v21307_v7, %v10190_v47  ;;  %v21640_v52 = vor.u32 %v22494_v63, %v10541_v57  ;;  %v22496_v47 = vshrl.u32 %v21368_v25, 16  ;;  %v10492_v63 = vld [vmem:[#allocation3 + $0xc0] sm:$0x80] }
 0x624   : > { %16078 = vmatmul.mubr.bf16.gmra.mrb[44].mxu0 %v10107_v31  ;;  %v10482_v31 = vld [vmem:[#allocation3 + $0x48] sm:$0x80] }
 0x625   : > { %16081 = vmatprep.mubr.bf16.mxu0 %v10119_v40  ;;  %16110 = vmatpush3.bf16.msra.mxu0 %v17496_v27  ;;  %v22489_v27 = vshrl.u32 %v21343_v14, 16  ;;  %v22491_v40 = vshrl.u32 %v21352_v38, 16  ;;  %v10535_v35 = vshrl.u32 %v10482_v31, 16  ;;  %v10565_v17 = vrot.slane %v22496_v47, 7 }
 0x626   : > { %16111 = vmatprep.subr.bf16.mxu0 %v17497_v34  ;;  %v10613_v47 = vrot.slane %v22504_v41, 7 }
 0x627   : > { %v10517_v49 = vrot.slane %v22489_v27, 7  ;;  %v10529_v46 = vrot.slane %v22491_v40, 7  ;;  %v22498_v27 = vshll.u32 %v21368_v25, 16  ;;  %v22500_v40 = vshrl.u32 %v21376_v48, 16 }
 0x629   : > { %16112 = vmatpush3.bf16.msra.mxu0 %v17497_v34  ;;  %v10520_v36 = vor.u32 %v22490_v22, %v10517_v49  ;;  %v10480_v34 = vld [vmem:[#allocation3 + $0x30] sm:$0x80]  ;;  %v21656_v49 = vor.u32 %v22498_v27, %v10565_v17  ;;  %v17501_v22 = vld [vmem:[#allocation4 + $0x118] sm:$0xff]   ;;  %v17504_v17 = vld [vmem:[#allocation4 + $0x130] sm:$0xff]   ;;  %v22506_v27 = vshll.u32 %v21391_v59, 16 }
 0x62a   : > { %16145 = vmatprep.subr.bf16.mxu0 %v17498_v21  ;;  %v10523_v12 = vshrl.u32 %v10480_v34, 16  ;;  %v22499_v34 = vshrl.u32 %v21370_v54, 16 }
 0x62b   : > { %v10521_v7 = vsel %vm5517_vm6, %v10513_v4, %v10520_v36  ;;  %v10490_v4 = vld [vmem:[#allocation3 + $0xa8] sm:$0x80]  ;;  %v10571_v36 = vshrl.u32 %v10488_v15, 16  ;;  %v21688_v15 = vor.u32 %v22506_v27, %v10613_v47 }
 0x62c   : > { %16082 = vmatmul.mubr.bf16.gmra.mrb[48].mxu0 %v10131_v16  ;;  %v10525_v2 = vrot.slane %v10523_v12, 7  ;;  %v22493_v16 = vshll.u32 %v21352_v38, 16  ;;  %v10577_v31 = vrot.slane %v22499_v34, 7  ;;  %v10583_v12 = vshrl.u32 %v10490_v4, 16  ;;  %v10496_v4 = vld [vmem:[#allocation3 + $0xf0] sm:$0x80] }
 0x62d   : > { %16085 = vmatprep.mubr.bf16.mxu0 %v10143_v32  ;;  %v10537_v32 = vrot.slane %v10535_v35, 7  ;;  %v10573_v35 = vrot.slane %v10571_v36, 7  ;;  %v10619_v34 = vshrl.u32 %v10496_v4, 16 }
 0x62e   : > { %v21636_v26 = vor.u32 %v22493_v16, %v10529_v46  ;;  %v10589_v46 = vrot.slane %v22500_v40, 7  ;;  %v21668_v57 = vor.u32 %v22501_v6, %v10577_v31  ;;  %v22502_v16 = vshll.u32 %v21376_v48, 16 }
 0x62f   : > { %v10545_v3 = vsel %vm5517_vm6, %v10537_v32, %v21640_v52  ;;  %v22507_v31 = vshrl.u32 %v21396_v60, 16  ;;  %v10621_v6 = vrot.slane %v10619_v34, 7  ;;  %v10506_v34 = vld [vmem:[#allocation3 + $0x168] sm:$0x80] }
 0x630   : > { %v10533_v28 = vsel %vm5517_vm6, %v10525_v2, %v21636_v26  ;;  %v10585_v2 = vrot.slane %v10583_v12, 7  ;;  %v21672_v32 = vor.u32 %v22502_v16, %v10589_v46  ;;  %v22508_v46 = vshrl.u32 %v21406_v19, 16 }
 0x634   : > { %16086 = vmatmul.mubr.bf16.gmra.mrb[52].mxu0 %v10155_v37  ;;  %v10547_v37 = vshrl.u32 %v10484_v30, 16  ;;  %v10494_v30 = vld [vmem:[#allocation3 + $0xd8] sm:$0x80] }
 0x635   : > { %16089 = vmatprep.mubr.bf16.mxu0 %v10167_v9  ;;  %v10553_v9 = vrot.slane %v22495_v51, 7 }
 0x63c   : > { %16090 = vmatmul.mubr.bf16.gmra.mrb[56].mxu0 %v10179_v5  ;;  %v10549_v5 = vrot.slane %v10547_v37, 7  ;;  %v22503_v37 = vshrl.u32 %v21382_v44, 16 }
 0x63d   : > { %16093 = vmatprep.mubr.bf16.mxu0 %v10191_v33  ;;  %v21652_v33 = vor.u32 %v22497_v56, %v10553_v9  ;;  %v10593_v9 = vsel %vm5517_vm6, %v10585_v2, %v21672_v32  ;;  %v22509_v2 = vshll.u32 %v21396_v60, 16 }
 0x63e   : > { %v10601_v51 = vrot.slane %v22503_v37, 7 }
 0x644   : > { %16094 = vmatmul.mubr.bf16.gmra.mrb[60].mxu0 %v10203_v39  ;;  %v10569_v39 = vsel %vm5517_vm6, %v10561_v43, %v21656_v49 }
 0x645   : > { %16113 = vmatprep.mubr.bf16.mxu0 %v10521_v7  ;;  %v17502_v7 = vld [vmem:[#allocation4 + $0x120] sm:$0xff]  }
 0x64c   : > { %16114 = vmatmul.mubr.bf16.vlgmr.msra.gmra.mrb[32].mxu0 %v10533_v28  ;;  %v10595_v28 = vshrl.u32 %v10492_v63, 16 }
 0x64d   : > { %16117 = vmatprep.mubr.bf16.mxu0 %v10545_v3  ;;  %16146 = vmatpush3.bf16.msra.mxu0 %v17498_v21  ;;  %v10557_v21 = vsel %vm5517_vm6, %v10549_v5, %v21652_v33  ;;  %v10607_v3 = vshrl.u32 %v10494_v30, 16  ;;  %v22505_v5 = vshll.u32 %v21382_v44, 16  ;;  %v22510_v30 = vshll.u32 %v21406_v19, 16 }
 0x64e   : > { %16147 = vmatprep.subr.bf16.mxu0 %v17499_v45 }
 0x64f   : > { %v21684_v56 = vor.u32 %v22505_v5, %v10601_v51  ;;  %v10609_v43 = vrot.slane %v10607_v3, 7 }
 0x651   : > { %16148 = vmatpush3.bf16.msra.mxu0 %v17499_v45  ;;  %v10581_v45 = vsel %vm5517_vm6, %v10573_v35, %v21668_v57  ;;  %v10617_v12 = vsel %vm5517_vm6, %v10609_v43, %v21688_v15  ;;  %v17506_v35 = vld [vmem:[#allocation4 + $0x140] sm:$0xff]   ;;  %v22513_v43 = vshll.u32 %v21417_v55, 16 }
 0x652   : > { %16149 = vmatprep.subr.bf16.mxu0 %v17500_v13 }
 0x654   : > { %16118 = vmatmul.mubr.bf16.gmra.mrb[36].mxu0 %v10557_v21  ;;  %v17505_v21 = vld [vmem:[#allocation4 + $0x138] sm:$0xff]  }
 0x655   : > { %16121 = vmatprep.mubr.bf16.mxu0 %v10569_v39  ;;  %16150 = vmatpush3.bf16.msra.mxu0 %v17500_v13  ;;  %v10597_v13 = vrot.slane %v10595_v28, 7  ;;  %v10625_v39 = vrot.slane %v22507_v31, 7  ;;  %v10502_v28 = vld [vmem:[#allocation3 + $0x138] sm:$0x80] }
 0x656   : > { %16151 = vmatprep.subr.bf16.mxu0 %v17501_v22  ;;  %v10655_v47 = vshrl.u32 %v10502_v28, 16 }
 0x657   : > { %v10605_v36 = vsel %vm5517_vm6, %v10597_v13, %v21684_v56  ;;  %v21700_v16 = vor.u32 %v22509_v2, %v10625_v39 }
 0x658   : > { %v10657_v4 = vrot.slane %v10655_v47, 7  ;;  %v22519_v47 = vshrl.u32 %v21473_v0, 16 }
 0x659   : > { %16152 = vmatpush3.bf16.msra.mxu0 %v17501_v22  ;;  %v10498_v22 = vld [vmem:[#allocation3 + $0x108] sm:$0x80]  ;;  %v10629_v37 = vsel %vm5517_vm6, %v10621_v6, %v21700_v16  ;;  %v22516_v6 = vshrl.u32 %v21462_v10, 16 }
 0x65a   : > { %16153 = vmatprep.subr.bf16.mxu0 %v17502_v7  ;;  %v10631_v40 = vshrl.u32 %v10498_v22, 16  ;;  %v22514_v22 = vshll.u32 %v21429_v8, 16 }
 0x65b   : > { %v10685_v2 = vrot.slane %v22516_v6, 7 }
 0x65c   : > { %16122 = vmatmul.mubr.bf16.gmra.mrb[40].mxu0 %v10581_v45  ;;  %v10633_v63 = vrot.slane %v10631_v40, 7  ;;  %v10500_v45 = vld [vmem:[#allocation3 + $0x120] sm:$0x80] }
 0x65d   : > { %16125 = vmatprep.mubr.bf16.mxu0 %v10593_v9  ;;  %16154 = vmatpush3.bf16.msra.mxu0 %v17502_v7  ;;  %v10637_v7 = vrot.slane %v22508_v46, 7  ;;  %v10643_v51 = vshrl.u32 %v10500_v45, 16  ;;  %v22511_v9 = vshrl.u32 %v21417_v55, 16 }
 0x65e   : > { %16155 = vmatprep.subr.bf16.mxu0 %v17503_v50 }
 0x65f   : > { %v10649_v3 = vrot.slane %v22511_v9, 7  ;;  %v10645_v5 = vrot.slane %v10643_v51, 7  ;;  %v10508_v9 = vld [vmem:[#allocation3 + $0x180] sm:$0x80] }
 0x661   : > { %16156 = vmatpush3.bf16.msra.mxu0 %v17503_v50  ;;  %v21704_v50 = vor.u32 %v22510_v30, %v10637_v7  ;;  %v21716_v27 = vor.u32 %v22513_v43, %v10649_v3  ;;  %v10679_v7 = vshrl.u32 %v10506_v34, 16  ;;  %v22517_v30 = vshll.u32 %v21448_v53, 16  ;;  %v17508_v34 = vld [vmem:[#allocation4 + $0x150] sm:$0xff]  }
 0x662   : > { %16157 = vmatprep.subr.bf16.mxu0 %v17504_v17  ;;  %v22520_v43 = vshll.u32 %v21473_v0, 16 }
 0x663   : > { %v10641_v41 = vsel %vm5517_vm6, %v10633_v63, %v21704_v50  ;;  %v10653_v31 = vsel %vm5517_vm6, %v10645_v5, %v21716_v27  ;;  %v10681_v28 = vrot.slane %v10679_v7, 7 }
 0x664   : > { %16126 = vmatmul.mubr.bf16.gmra.mrb[44].mxu0 %v10605_v36  ;;  %v10504_v36 = vld [vmem:[#allocation3 + $0x150] sm:$0x80] }
 0x665   : > { %16129 = vmatprep.mubr.bf16.mxu0 %v10617_v12  ;;  %16158 = vmatpush3.bf16.msra.mxu0 %v17504_v17  ;;  %v22512_v17 = vshrl.u32 %v21429_v8, 16  ;;  %v10667_v39 = vshrl.u32 %v10504_v36, 16  ;;  %v22515_v12 = vshrl.u32 %v21448_v53, 16  ;;  %v17507_v36 = vld [vmem:[#allocation4 + $0x148] sm:$0xff]  }
 0x666   : > { %16159 = vmatprep.subr.bf16.mxu0 %v17505_v21 }
 0x667   : > { %v10661_v13 = vrot.slane %v22512_v17, 7  ;;  %v10673_v40 = vrot.slane %v22515_v12, 7  ;;  %v10669_v63 = vrot.slane %v10667_v39, 7  ;;  %v10697_v17 = vrot.slane %v22519_v47, 7  ;;  %v17510_v39 = vld [vmem:[#allocation4 + $0x160] sm:$0xff]  }
 0x668   : > { %v17518_v47 = vld [vmem:[#allocation4 + $0x1a0] sm:$0xff]  }
 0x669   : > { %16160 = vmatpush3.bf16.msra.mxu0 %v17505_v21  ;;  %v21720_v21 = vor.u32 %v22514_v22, %v10661_v13  ;;  %v21732_v45 = vor.u32 %v22517_v30, %v10673_v40  ;;  %v11243_v40 = vld [vmem:[#allocation3 + $0x88] sm:$0x1]  ;;  %v11247_v30 = vld [vmem:[#allocation3 + $0xb8] sm:$0x1] }
 0x66a   : > { %16193 = vmatprep.subr.bf16.mxu0 %v17506_v35  ;;  %v11322_v6 = vshll.u32 %v11243_v40, 16 }
 0x66b   : > { %v10665_v46 = vsel %vm5517_vm6, %v10657_v4, %v21720_v21  ;;  %v10677_v3 = vsel %vm5517_vm6, %v10669_v63, %v21732_v45  ;;  %v21746_v4 = vor.u32 %v22520_v43, %v10697_v17  ;;  %v11245_v63 = vld [vmem:[#allocation3 + $0xa0] sm:$0x1]  ;;  %v11251_v43 = vld [vmem:[#allocation3 + $0xe8] sm:$0x1] }
 0x66c   : > { %16130 = vmatmul.mubr.bf16.gmra.mrb[48].mxu0 %v10629_v37  ;;  %v22518_v37 = vshll.u32 %v21462_v10, 16 }
 0x66d   : > { %16133 = vmatprep.mubr.bf16.mxu0 %v10641_v41  ;;  %v10691_v41 = vshrl.u32 %v10508_v9, 16  ;;  %v11334_v9 = vshll.u32 %v11245_v63, 16 }
 0x66e   : > { %v21736_v51 = vor.u32 %v22518_v37, %v10685_v2  ;;  %v11324_v2 = vrot.slane %v11322_v6, 1  ;;  %v22521_v37 = vld [vmem:[#allocation37_spill] sm:$0xff] }
 0x66f   : > { %v10693_v5 = vrot.slane %v10691_v41, 7  ;;  %v11346_v41 = vshll.u32 %v11247_v30, 16  ;;  %v11336_v17 = vrot.slane %v11334_v9, 1  ;;  %v22529_v9 = vld [vmem:[#allocation50_spill] sm:$0xff] }
 0x670   : > { %v10689_v13 = vsel %vm5517_vm6, %v10681_v28, %v21736_v51  ;;  %v17517_v28 = vld [vmem:[#allocation4 + $0x198] sm:$0xff]  }
 0x671   : > { %v10701_v22 = vsel %vm5517_vm6, %v10693_v5, %v21746_v4  ;;  %v11249_v5 = vld [vmem:[#allocation3 + $0xd0] sm:$0x1] }
 0x674   : > { %16134 = vmatmul.mubr.bf16.gmra.mrb[52].mxu0 %v10653_v31  ;;  %v17509_v31 = vld [vmem:[#allocation4 + $0x158] sm:$0xff]  }
 0x675   : > { %16137 = vmatprep.mubr.bf16.mxu0 %v10665_v46  ;;  %v17515_v46 = vld [vmem:[#allocation4 + $0x188] sm:$0xff]  }
 0x67c   : > { %16138 = vmatmul.mubr.bf16.gmra.mrb[56].mxu0 %v10677_v3  ;;  %v22522_v3 = vld [vmem:[#allocation36_spill] sm:$0xff] }
 0x67d   : > { %16141 = vmatprep.mubr.bf16.mxu0 %v10689_v13  ;;  %v11348_v13 = vrot.slane %v11346_v41, 1 }
 0x684   : > { %16142 = vmatmul.mubr.bf16.gmra.mrb[60].mxu0 %v10701_v22  ;;  %v17519_v22 = vld [vmem:[#allocation4 + $0x1a8] sm:$0xff]  }
 0x685   : > { %16161 = vmatprep.mubr.bf16.mxu0 %v21343_v14  ;;  %v17511_v14 = vld [vmem:[#allocation4 + $0x168] sm:$0xff]  }
 0x68c   : > { %16162 = vmatmul.mubr.bf16.vlgmr.msra.gmra.mrb[32].mxu0 %v21352_v38  ;;  %v17512_v38 = vld [vmem:[#allocation4 + $0x170] sm:$0xff]  }
 0x68d   : > { %16165 = vmatprep.mubr.bf16.mxu0 %v21359_v11  ;;  %16194 = vmatpush3.bf16.msra.mxu0 %v17506_v35  ;;  %v17513_v11 = vld [vmem:[#allocation4 + $0x178] sm:$0xff]  }
 0x68e   : > { %16195 = vmatprep.subr.bf16.mxu0 %v17507_v36 }
 0x691   : > { %16196 = vmatpush3.bf16.msra.mxu0 %v17507_v36  ;;  %v22523_v36 = vld [vmem:[#allocation35_spill] sm:$0xff] }
 0x692   : > { %16197 = vmatprep.subr.bf16.mxu0 %v17508_v34 }
 0x694   : > { %16166 = vmatmul.mubr.bf16.gmra.mrb[36].mxu0 %v21361_v61  ;;  %v17514_v61 = vld [vmem:[#allocation4 + $0x180] sm:$0xff]  }
 0x695   : > { %16169 = vmatprep.mubr.bf16.mxu0 %v21368_v25  ;;  %16198 = vmatpush3.bf16.msra.mxu0 %v17508_v34  ;;  %v11235_v25 = vld [vmem:[#allocation3 + $0x28] sm:$0x1]  ;;  %v11337_v34 = vsel %vm6209_vm7, %v22523_v36, %v11336_v17 }
 0x696   : > { %16199 = vmatprep.subr.bf16.mxu0 %v17509_v31 }
 0x699   : > { %16200 = vmatpush3.bf16.msra.mxu0 %v17509_v31  ;;  %v11358_v31 = vshll.u32 %v11249_v5, 16  ;;  %v11265_v5 = vld [vmem:[#allocation3 + $0x190] sm:$0x1] }
 0x69a   : > { %16201 = vmatprep.subr.bf16.mxu0 %v17510_v39  ;;  %v11454_v36 = vshll.u32 %v11265_v5, 16  ;;  %v17529_v5 = vld [vmem:[#allocation4 + $0x1f8] sm:$0xff]  }
 0x69c   : > { %16170 = vmatmul.mubr.bf16.gmra.mrb[40].mxu0 %v21370_v54  ;;  %v11274_v54 = vshll.u32 %v11235_v25, 16 }
 0x69d   : > { %16173 = vmatprep.mubr.bf16.mxu0 %v21376_v48  ;;  %16202 = vmatpush3.bf16.msra.mxu0 %v17510_v39  ;;  %v11237_v48 = vld [vmem:[#allocation3 + $0x40] sm:$0x1]  ;;  %v22524_v39 = vld [vmem:[#allocation39_spill] sm:$0xff] }
 0x69e   : > { %16203 = vmatprep.subr.bf16.mxu0 %v17511_v14  ;;  %v11286_v35 = vshll.u32 %v11237_v48, 16  ;;  %v17521_v48 = vld [vmem:[#allocation4 + $0x1b8] sm:$0xff]  }
 0x6a1   : > { %16204 = vmatpush3.bf16.msra.mxu0 %v17511_v14  ;;  %v11349_v14 = vsel %vm6209_vm7, %v22524_v39, %v11348_v13 }
 0x6a2   : > { %16205 = vmatprep.subr.bf16.mxu0 %v17512_v38 }
 0x6a4   : > { %16174 = vmatmul.mubr.bf16.gmra.mrb[44].mxu0 %v21382_v44  ;;  %v11239_v44 = vld [vmem:[#allocation3 + $0x58] sm:$0x1] }
 0x6a5   : > { %16177 = vmatprep.mubr.bf16.mxu0 %v21391_v59  ;;  %16206 = vmatpush3.bf16.msra.mxu0 %v17512_v38  ;;  %v11276_v59 = vrot.slane %v11274_v54, 1  ;;  %v11370_v38 = vshll.u32 %v11251_v43, 16  ;;  %v11253_v54 = vld [vmem:[#allocation3 + $0x100] sm:$0x1]  ;;  %v11733_v43 = vld [vmem:[#allocation3 + $0x30] sm:$0x80] }
 0x6a6   : > { %16207 = vmatprep.subr.bf16.mxu0 %v17513_v11  ;;  %v11766_v39 = vshrl.u32 %v11733_v43, 16 }
 0x6a7   : > { %v11372_v25 = vrot.slane %v11370_v38, 1 }
 0x6a8   : > { %v11768_v38 = vrot.slane %v11766_v39, 7  ;;  %v11755_v39 = vld [vmem:[#allocation3 + $0x138] sm:$0x80] }
 0x6a9   : > { %16208 = vmatpush3.bf16.msra.mxu0 %v17513_v11  ;;  %v17520_v11 = vld [vmem:[#allocation4 + $0x1b0] sm:$0xff]  }
 0x6aa   : > { %16241 = vmatprep.subr.bf16.mxu0 %v17514_v61 }
 0x6ac   : > { %16178 = vmatmul.mubr.bf16.gmra.mrb[48].mxu0 %v21396_v60  ;;  %v11277_v60 = vsel %vm6209_vm7, %v21410_v62, %v11276_v59  ;;  %v17516_v62 = vld [vmem:[#allocation4 + $0x190] sm:$0xff]   ;;  %v11255_v59 = vld [vmem:[#allocation3 + $0x118] sm:$0x1] }
 0x6ad   : > { %16181 = vmatprep.mubr.bf16.mxu0 %v21406_v19  ;;  %v11298_v19 = vshll.u32 %v11239_v44, 16  ;;  %v22525_v44 = vld [vmem:[#allocation38_spill] sm:$0xff] }
 0x6af   : > { %v11300_v12 = vrot.slane %v11298_v19, 1  ;;  %v22526_v19 = vld [vmem:[#allocation40_spill] sm:$0xff] }
 0x6b1   : > { %v11301_v7 = vsel %vm6209_vm7, %v21433_v42, %v11300_v12  ;;  %v11325_v42 = vsel %vm6209_vm7, %v22522_v3, %v11324_v2  ;;  %v11394_v12 = vshll.u32 %v11255_v59, 16  ;;  %v11776_v59 = vsel %vm5517_vm6, %v11768_v38, %v21636_v26  ;;  %v17524_v26 = vld [vmem:[#allocation4 + $0x1d0] sm:$0xff]  }
 0x6b4   : > { %16182 = vmatmul.mubr.bf16.gmra.mrb[52].mxu0 %v21417_v55  ;;  %v11288_v55 = vrot.slane %v11286_v35, 1 }
 0x6b5   : > { %16185 = vmatprep.mubr.bf16.mxu0 %v21429_v8  ;;  %v11241_v8 = vld [vmem:[#allocation3 + $0x70] sm:$0x1] }
 0x6bc   : > { %16186 = vmatmul.mubr.bf16.gmra.mrb[56].mxu0 %v21448_v53  ;;  %v11289_v53 = vsel %vm6209_vm7, %v21421_v18, %v11288_v55  ;;  %v11373_v55 = vsel %vm6209_vm7, %v22526_v19, %v11372_v25  ;;  %v17523_v19 = vld [vmem:[#allocation4 + $0x1c8] sm:$0xff]  }
 0x6bd   : > { %16189 = vmatprep.mubr.bf16.mxu0 %v21462_v10  ;;  %v11310_v10 = vshll.u32 %v11241_v8, 16  ;;  %v17522_v8 = vld [vmem:[#allocation4 + $0x1c0] sm:$0xff]  }
 0x6c4   : > { %16190 = vmatmul.mubr.bf16.gmra.mrb[60].mxu0 %v21473_v0  ;;  %v11312_v0 = vrot.slane %v11310_v10, 1  ;;  %v11259_v10 = vld [vmem:[#allocation3 + $0x148] sm:$0x1] }
 0x6c5   : > { %16209 = vmatprep.mubr.bf16.mxu0 %v11277_v60  ;;  %v11382_v60 = vshll.u32 %v11253_v54, 16  ;;  %v11418_v63 = vshll.u32 %v11259_v10, 16 }
 0x6c6   : > { %v11313_v18 = vsel %vm6209_vm7, %v22521_v37, %v11312_v0  ;;  %v22528_v0 = vld [vmem:[#allocation44_spill] sm:$0xff] }
 0x6c7   : > { %v11384_v40 = vrot.slane %v11382_v60, 1  ;;  %v11261_v37 = vld [vmem:[#allocation3 + $0x160] sm:$0x1]  ;;  %v11741_v60 = vld [vmem:[#allocation3 + $0x90] sm:$0x80] }
 0x6cc   : > { %16210 = vmatmul.mubr.bf16.vlgmr.msra.gmra.mrb[32].mxu0 %v11289_v53  ;;  %v11257_v53 = vld [vmem:[#allocation3 + $0x130] sm:$0x1] }
 0x6cd   : > { %16213 = vmatprep.mubr.bf16.mxu0 %v11301_v7  ;;  %16242 = vmatpush3.bf16.msra.mxu0 %v17514_v61  ;;  %v11360_v61 = vrot.slane %v11358_v31, 1  ;;  %v22527_v7 = vld [vmem:[#allocation42_spill] sm:$0xff] }
 0x6ce   : > { %16243 = vmatprep.subr.bf16.mxu0 %v17515_v46  ;;  %v11385_v6 = vsel %vm6209_vm7, %v22527_v7, %v11384_v40  ;;  %v11743_v7 = vld [vmem:[#allocation3 + $0xa8] sm:$0x80] }
 0x6cf   : > { %v11361_v35 = vsel %vm6209_vm7, %v22525_v44, %v11360_v61  ;;  %v22531_v61 = vld [vmem:[#allocation45_spill] sm:$0xff] }
 0x6d1   : > { %16244 = vmatpush3.bf16.msra.mxu0 %v17515_v46  ;;  %v11396_v46 = vrot.slane %v11394_v12, 1 }
 0x6d2   : > { %16245 = vmatprep.subr.bf16.mxu0 %v17516_v62 }
 0x6d3   : > { %v11397_v2 = vsel %vm6209_vm7, %v22528_v0, %v11396_v46  ;;  %v11814_v46 = vshrl.u32 %v11741_v60, 16  ;;  %v11826_v0 = vshrl.u32 %v11743_v7, 16  ;;  %v17535_v7 = vld [vmem:[#allocation4 + $0x228] sm:$0xff]  }
 0x6d4   : > { %16214 = vmatmul.mubr.bf16.gmra.mrb[36].mxu0 %v11313_v18  ;;  %v11263_v18 = vld [vmem:[#allocation3 + $0x178] sm:$0x1] }
 0x6d5   : > { %16217 = vmatprep.mubr.bf16.mxu0 %v11325_v42  ;;  %16246 = vmatpush3.bf16.msra.mxu0 %v17516_v62  ;;  %v11406_v62 = vshll.u32 %v11257_v53, 16  ;;  %v11430_v42 = vshll.u32 %v11261_v37, 16  ;;  %v11816_v10 = vrot.slane %v11814_v46, 7  ;;  %v11749_v37 = vld [vmem:[#allocation3 + $0xf0] sm:$0x80]  ;;  %v17631_v46 = vld [vmem:[#allocation3 + $0x38] sm:$0xff] }
 0x6d6   : > { %16247 = vmatprep.subr.bf16.mxu0 %v17517_v28 }
 0x6d7   : > { %v11408_v30 = vrot.slane %v11406_v62, 1  ;;  %v11432_v17 = vrot.slane %v11430_v42, 1  ;;  %v17525_v62 = vld [vmem:[#allocation4 + $0x1d8] sm:$0xff]   ;;  %v17528_v42 = vld [vmem:[#allocation4 + $0x1f0] sm:$0xff]  }
 0x6d9   : > { %16248 = vmatpush3.bf16.msra.mxu0 %v17517_v28  ;;  %v11420_v28 = vrot.slane %v11418_v63, 1  ;;  %v11409_v3 = vsel %vm6209_vm7, %v22529_v9, %v11408_v30  ;;  %v11828_v63 = vrot.slane %v11826_v0, 7  ;;  %v17537_v0 = vld [vmem:[#allocation4 + $0x238] sm:$0xff]  }
 0x6da   : > { %16249 = vmatprep.subr.bf16.mxu0 %v17518_v47 }
 0x6db   : > { %v11421_v41 = vsel %vm6209_vm7, %v21514_v24, %v11420_v28  ;;  %v11737_v24 = vld [vmem:[#allocation3 + $0x60] sm:$0x80]  ;;  %v11747_v28 = vld [vmem:[#allocation3 + $0xd8] sm:$0x80] }
 0x6dc   : > { %16218 = vmatmul.mubr.bf16.gmra.mrb[40].mxu0 %v11337_v34  ;;  %v22530_v34 = vld [vmem:[#allocation41_spill] sm:$0xff]  ;;  %v11850_v9 = vshrl.u32 %v11747_v28, 16  ;;  %v17643_v28 = vld [vmem:[#allocation3 + $0x158] sm:$0xff] }
 0x6dd   : > { %16221 = vmatprep.mubr.bf16.mxu0 %v11349_v14  ;;  %16250 = vmatpush3.bf16.msra.mxu0 %v17518_v47  ;;  %v11442_v47 = vshll.u32 %v11263_v18, 16  ;;  %v11456_v14 = vrot.slane %v11454_v36, 1  ;;  %v17527_v18 = vld [vmem:[#allocation4 + $0x1e8] sm:$0xff]   ;;  %v17530_v36 = vld [vmem:[#allocation4 + $0x200] sm:$0xff]  }
 0x6de   : > { %16251 = vmatprep.subr.bf16.mxu0 %v17519_v22 }
 0x6df   : > { %v11444_v13 = vrot.slane %v11442_v47, 1  ;;  %v11457_v25 = vsel %vm6209_vm7, %v22531_v61, %v11456_v14  ;;  %v11757_v14 = vld [vmem:[#allocation3 + $0x150] sm:$0x80] }
 0x6e1   : > { %16252 = vmatpush3.bf16.msra.mxu0 %v17519_v22  ;;  %v11433_v22 = vsel %vm6209_vm7, %v21530_v1, %v11432_v17  ;;  %v11445_v31 = vsel %vm6209_vm7, %v22530_v34, %v11444_v13  ;;  %v11790_v1 = vshrl.u32 %v11737_v24, 16  ;;  %v11751_v17 = vld [vmem:[#allocation3 + $0x108] sm:$0x80]  ;;  %v11753_v13 = vld [vmem:[#allocation3 + $0x120] sm:$0x80] }
 0x6e2   : > { %16253 = vmatprep.subr.bf16.mxu0 %v17520_v11  ;;  %v11874_v43 = vshrl.u32 %v11751_v17, 16 }
 0x6e3   : > { %v11792_v44 = vrot.slane %v11790_v1, 7 }
 0x6e4   : > { %16222 = vmatmul.mubr.bf16.gmra.mrb[44].mxu0 %v11361_v35  ;;  %v11739_v35 = vld [vmem:[#allocation3 + $0x78] sm:$0x80]  ;;  %v11876_v34 = vrot.slane %v11874_v43, 7  ;;  %v12492_v43 = vld [vmem:[#allocation3 + $0x58] sm:$0x1] }
 0x6e5   : > { %16225 = vmatprep.mubr.bf16.mxu0 %v11373_v55  ;;  %16254 = vmatpush3.bf16.msra.mxu0 %v17520_v11  ;;  %v11735_v11 = vld [vmem:[#allocation3 + $0x48] sm:$0x80]  ;;  %v11802_v12 = vshrl.u32 %v11739_v35, 16  ;;  %v11800_v40 = vsel %vm5517_vm6, %v11792_v44, %v21652_v33  ;;  %v11824_v33 = vsel %vm5517_vm6, %v11816_v10, %v21668_v57  ;;  %v11763_v44 = vld [vmem:[#allocation3 + $0x198] sm:$0x80]  ;;  %v17634_v10 = vld [vmem:[#allocation3 + $0x80] sm:$0xff] }
 0x6e6   : > { %16255 = vmatprep.subr.bf16.mxu0 %v17521_v48  ;;  %v11778_v54 = vshrl.u32 %v11735_v11, 16  ;;  %v11884_v38 = vsel %vm5517_vm6, %v11876_v34, %v21704_v50  ;;  %v12541_v34 = vshll.u32 %v12492_v43, 16  ;;  %v12507_v43 = vld [vmem:[#allocation3 + $0x110] sm:$0xff] }
 0x6e7   : > { %v11804_v53 = vrot.slane %v11802_v12, 7 }
 0x6e9   : > { %16256 = vmatpush3.bf16.msra.mxu0 %v17521_v48  ;;  %v11780_v48 = vrot.slane %v11778_v54, 7  ;;  %v11761_v54 = vld [vmem:[#allocation3 + $0x180] sm:$0x80] }
 0x6ea   : > { %16289 = vmatprep.subr.bf16.mxu0 %v17522_v8  ;;  %v11934_v50 = vshrl.u32 %v11761_v54, 16 }
 0x6eb   : > { %v11788_v55 = vsel %vm5517_vm6, %v11780_v48, %v21640_v52  ;;  %v11812_v52 = vsel %vm5517_vm6, %v11804_v53, %v21656_v49  ;;  %v11836_v49 = vsel %vm5517_vm6, %v11828_v63, %v21672_v32  ;;  %v17632_v53 = vld [vmem:[#allocation3 + $0x50] sm:$0xff]  ;;  %v17641_v63 = vld [vmem:[#allocation3 + $0x128] sm:$0xff] }
 0x6ec   : > { %16226 = vmatmul.mubr.bf16.gmra.mrb[48].mxu0 %v11385_v6  ;;  %v11745_v6 = vld [vmem:[#allocation3 + $0xc0] sm:$0x80]  ;;  %v11936_v60 = vrot.slane %v11934_v50, 7 }
 0x6ed   : > { %16229 = vmatprep.mubr.bf16.mxu0 %v11397_v2  ;;  %v11838_v2 = vshrl.u32 %v11745_v6, 16  ;;  %v17636_v6 = vld [vmem:[#allocation3 + $0xb0] sm:$0xff] }
 0x6ef   : > { %v11840_v30 = vrot.slane %v11838_v2, 7  ;;  %v17639_v2 = vld [vmem:[#allocation3 + $0xf8] sm:$0xff] }
 0x6f1   : > { %v11848_v57 = vsel %vm5517_vm6, %v11840_v30, %v21684_v56  ;;  %v17642_v30 = vld [vmem:[#allocation3 + $0x140] sm:$0xff] }
 0x6f4   : > { %16230 = vmatmul.mubr.bf16.gmra.mrb[52].mxu0 %v11409_v3  ;;  %v11862_v3 = vshrl.u32 %v11749_v37, 16  ;;  %v12489_v37 = vld [vmem:[#allocation3 + $0x38] sm:$0xff] }
 0x6f5   : > { %16233 = vmatprep.mubr.bf16.mxu0 %v11421_v41  ;;  %v11852_v41 = vrot.slane %v11850_v9, 7  ;;  %v17644_v9 = vld [vmem:[#allocation3 + $0x170] sm:$0xff]  ;;  %v12522_v17 = vshrl.u32 %v12489_v37, 16 }
 0x6f6   : > { %v11864_v47 = vrot.slane %v11862_v3, 7 }
 0x6f7   : > { %v11860_v32 = vsel %vm5517_vm6, %v11852_v41, %v21688_v15  ;;  %v11898_v15 = vshrl.u32 %v11755_v39, 16  ;;  %v17645_v41 = vld [vmem:[#allocation3 + $0x188] sm:$0xff] }
 0x6f8   : > { %v11872_v56 = vsel %vm5517_vm6, %v11864_v47, %v21700_v16  ;;  %v11910_v16 = vshrl.u32 %v11757_v14, 16  ;;  %v12493_v47 = vld [vmem:[#allocation3 + $0x68] sm:$0xff] }
 0x6f9   : > { %v11900_v24 = vrot.slane %v11898_v15, 7  ;;  %v12495_v15 = vld [vmem:[#allocation3 + $0x80] sm:$0xff] }
 0x6fa   : > { %v11912_v61 = vrot.slane %v11910_v16, 7  ;;  %v12497_v16 = vld [vmem:[#allocation3 + $0x98] sm:$0xff]  ;;  %v12560_v54 = vshll.u32 %v12495_v15, 16 }
 0x6fb   : > { %v12572_v50 = vshll.u32 %v12497_v16, 16 }
 0x6fc   : > { %16234 = vmatmul.mubr.bf16.gmra.mrb[56].mxu0 %v11433_v22  ;;  %v11886_v22 = vshrl.u32 %v11753_v13, 16  ;;  %v11920_v48 = vsel %vm5517_vm6, %v11912_v61, %v21732_v45 }
 0x6fd   : > { %16237 = vmatprep.mubr.bf16.mxu0 %v11445_v31 }
 0x6fe   : > { %v11888_v31 = vrot.slane %v11886_v22, 7  ;;  %v12494_v22 = vld [vmem:[#allocation3 + $0x70] sm:$0x1] }
 0x700   : > { %v11896_v11 = vsel %vm5517_vm6, %v11888_v31, %v21716_v27  ;;  %v11946_v27 = vshrl.u32 %v11763_v44, 16  ;;  %v17646_v31 = vld [vmem:[#allocation2] sm:$0xff]  ;;  %v12498_v44 = vld [vmem:[#allocation3 + $0xa0] sm:$0x1] }
 0x702   : > { %v11948_v12 = vrot.slane %v11946_v27, 7 }
 0x704   : > { %16238 = vmatmul.mubr.bf16.gmra.mrb[60].mxu0 %v11457_v25  ;;  %v11759_v25 = vld [vmem:[#allocation3 + $0x168] sm:$0x80] }
 0x705   : > { %16257 = vmatprep.mubr.bf16.mxu0 %v11776_v59  ;;  %v11908_v59 = vsel %vm5517_vm6, %v11900_v24, %v21720_v21  ;;  %v11922_v1 = vshrl.u32 %v11759_v25, 16  ;;  %v11944_v21 = vsel %vm5517_vm6, %v11936_v60, %v21746_v4  ;;  %v17533_v4 = vld [vmem:[#allocation4 + $0x218] sm:$0xff]   ;;  %v12546_v24 = vshrl.u32 %v12493_v47, 16 }
 0x706   : > { %v12543_v25 = vrot.slane %v12541_v34, 1  ;;  %v12562_v60 = vrot.slane %v12560_v54, 1 }
 0x707   : > { %v11924_v35 = vrot.slane %v11922_v1, 7 }
 0x70c   : > { %16258 = vmatmul.mubr.bf16.vlgmr.msra.gmra.mrb[32].mxu0 %v11788_v55  ;;  %v11932_v55 = vsel %vm5517_vm6, %v11924_v35, %v21736_v51  ;;  %v17532_v51 = vld [vmem:[#allocation4 + $0x210] sm:$0xff]  }
 0x70d   : > { %16261 = vmatprep.mubr.bf16.mxu0 %v11800_v40  ;;  %16290 = vmatpush3.bf16.msra.mxu0 %v17522_v8  ;;  %v17526_v8 = vld [vmem:[#allocation4 + $0x1e0] sm:$0xff]  }
 0x70e   : > { %16291 = vmatprep.subr.bf16.mxu0 %v17523_v19 }
 0x711   : > { %16292 = vmatpush3.bf16.msra.mxu0 %v17523_v19  ;;  %v11952_v19 = vrot.slane %v10013_v29, 7  ;;  %v17633_v29 = vld [vmem:[#allocation3 + $0x68] sm:$0xff] }
 0x712   : > { %16293 = vmatprep.subr.bf16.mxu0 %v17524_v26 }
 0x713   : > { %v11955_v45 = vor.u32 %v11952_v19, %v10015_v20  ;;  %v17534_v20 = vld [vmem:[#allocation4 + $0x220] sm:$0xff]  }
 0x714   : > { %16262 = vmatmul.mubr.bf16.gmra.mrb[36].mxu0 %v11812_v52  ;;  %v17536_v52 = vld [vmem:[#allocation4 + $0x230] sm:$0xff]  }
 0x715   : > { %16265 = vmatprep.mubr.bf16.mxu0 %v11824_v33  ;;  %16294 = vmatpush3.bf16.msra.mxu0 %v17524_v26  ;;  %v11956_v40 = vsel %vm5517_vm6, %v11948_v12, %v11955_v45  ;;  %v17531_v26 = vld [vmem:[#allocation4 + $0x208] sm:$0xff]   ;;  %v17638_v33 = vld [vmem:[#allocation3 + $0xe0] sm:$0xff]  ;;  %v12499_v12 = vld [vmem:[#allocation3 + $0xb0] sm:$0xff]  ;;  %v12558_v45 = vshrl.u32 %v12495_v15, 16 }
 0x716   : > { %16295 = vmatprep.subr.bf16.mxu0 %v17525_v62  ;;  %v12508_v15 = vld [vmem:[#allocation3 + $0x118] sm:$0x1] }
 0x719   : > { %16296 = vmatpush3.bf16.msra.mxu0 %v17525_v62  ;;  %v17637_v62 = vld [vmem:[#allocation3 + $0xc8] sm:$0xff] }
 0x71a   : > { %16297 = vmatprep.subr.bf16.mxu0 %v17526_v8 }
 0x71c   : > { %16266 = vmatmul.mubr.bf16.gmra.mrb[40].mxu0 %v11836_v49  ;;  %v12490_v49 = vld [vmem:[#allocation3 + $0x40] sm:$0x1] }
 0x71d   : > { %16269 = vmatprep.mubr.bf16.mxu0 %v11848_v57  ;;  %16298 = vmatpush3.bf16.msra.mxu0 %v17526_v8  ;;  %v17640_v8 = vld [vmem:[#allocation3 + $0x110] sm:$0xff]  ;;  %v12529_v3 = vshll.u32 %v12490_v49, 16 }
 0x71e   : > { %16299 = vmatprep.subr.bf16.mxu0 %v17527_v18 }
 0x721   : > { %16300 = vmatpush3.bf16.msra.mxu0 %v17527_v18  ;;  %v12524_v18 = vshll.u32 %v12489_v37, 16 }
 0x722   : > { %16301 = vmatprep.subr.bf16.mxu0 %v17528_v42 }
 0x723   : > { %v12526_v57 = vrot.slane %v12524_v18, 1 }
 0x724   : > { %16270 = vmatmul.mubr.bf16.gmra.mrb[44].mxu0 %v11860_v32  ;;  %v12531_v32 = vrot.slane %v12529_v3, 1 }
 0x725   : > { %16273 = vmatprep.mubr.bf16.mxu0 %v11872_v56  ;;  %16302 = vmatpush3.bf16.msra.mxu0 %v17528_v42  ;;  %v12491_v42 = vld [vmem:[#allocation3 + $0x50] sm:$0xff]  ;;  %v12548_v56 = vshll.u32 %v12493_v47, 16 }
 0x726   : > { %16303 = vmatprep.subr.bf16.mxu0 %v17529_v5  ;;  %v12536_v13 = vshll.u32 %v12491_v42, 16 }
 0x727   : > { %v12550_v14 = vrot.slane %v12548_v56, 1 }
 0x729   : > { %16304 = vmatpush3.bf16.msra.mxu0 %v17529_v5  ;;  %v12527_v5 = vor.u32 %v12526_v57, %v12522_v17  ;;  %v12504_v57 = vld [vmem:[#allocation3 + $0xe8] sm:$0x1] }
 0x72a   : > { %16337 = vmatprep.subr.bf16.mxu0 %v17530_v36  ;;  %v12613_v17 = vshll.u32 %v12504_v57, 16 }
 0x72b   : > { %v12532_v39 = vsel %vm6209_vm7, %v12527_v5, %v12531_v32 }
 0x72c   : > { %16274 = vmatmul.mubr.bf16.gmra.mrb[48].mxu0 %v11884_v38  ;;  %v12553_v38 = vshll.u32 %v12494_v22, 16  ;;  %v12509_v22 = vld [vmem:[#allocation3 + $0x128] sm:$0xff] }
 0x72d   : > { %16277 = vmatprep.mubr.bf16.mxu0 %v11896_v11  ;;  %v12534_v11 = vshrl.u32 %v12491_v42, 16  ;;  %v12506_v42 = vld [vmem:[#allocation3 + $0x100] sm:$0x1] }
 0x72e   : > { %v12555_v1 = vrot.slane %v12553_v38, 1  ;;  %v12625_v32 = vshll.u32 %v12506_v42, 16  ;;  %v12520_v42 = vld [vmem:[#allocation3 + $0x1a8] sm:$0x1] }
 0x730   : > { %v12627_v38 = vrot.slane %v12625_v32, 1 }
 0x734   : > { %16278 = vmatmul.mubr.bf16.gmra.mrb[52].mxu0 %v11908_v59  ;;  %v12551_v59 = vor.u32 %v12550_v14, %v12546_v24 }
 0x735   : > { %16281 = vmatprep.mubr.bf16.mxu0 %v11920_v48  ;;  %v12496_v48 = vld [vmem:[#allocation3 + $0x88] sm:$0x1] }
 0x736   : > { %v12565_v27 = vshll.u32 %v12496_v48, 16  ;;  %v12556_v19 = vsel %vm6209_vm7, %v12551_v59, %v12555_v1  ;;  %v12511_v48 = vld [vmem:[#allocation3 + $0x140] sm:$0xff] }
 0x73c   : > { %16282 = vmatmul.mubr.bf16.gmra.mrb[56].mxu0 %v11932_v55  ;;  %v12574_v55 = vrot.slane %v12572_v50, 1  ;;  %v12630_v50 = vshrl.u32 %v12507_v43, 16 }
 0x73d   : > { %16285 = vmatprep.mubr.bf16.mxu0 %v11944_v21  ;;  %v12577_v21 = vshll.u32 %v12498_v44, 16  ;;  %v12513_v44 = vld [vmem:[#allocation3 + $0x158] sm:$0xff] }
 0x744   : > { %16286 = vmatmul.mubr.bf16.gmra.mrb[60].mxu0 %v11956_v40  ;;  %v12501_v40 = vld [vmem:[#allocation3 + $0xc8] sm:$0xff] }
 0x745   : > { %16305 = vmatprep.mubr.bf16.mxu0 %v17631_v46  ;;  %v12570_v46 = vshrl.u32 %v12497_v16, 16  ;;  %v12510_v16 = vld [vmem:[#allocation3 + $0x130] sm:$0x1] }
 0x746   : > { %v12649_v1 = vshll.u32 %v12510_v16, 16  ;;  %v21888_v16 = vld [vmem:[%s22023_s6] ss:$0 sm:$0xff] }
 0x74c   : > { %16306 = vmatmul.mubr.bf16.vlgmr.msra.gmra.mrb[32].mxu0 %v17632_v53  ;;  %v12567_v53 = vrot.slane %v12565_v27, 1 }
 0x74d   : > { %16309 = vmatprep.mubr.bf16.mxu0 %v17633_v29  ;;  %16338 = vmatpush3.bf16.msra.mxu0 %v17530_v36  ;;  %v12538_v36 = vrot.slane %v12536_v13, 1  ;;  %v12584_v29 = vshll.u32 %v12499_v12, 16 }
 0x74e   : > { %16339 = vmatprep.subr.bf16.mxu0 %v17531_v26 }
 0x74f   : > { %v12539_v61 = vor.u32 %v12538_v36, %v12534_v11  ;;  %v12644_v11 = vshll.u32 %v12509_v22, 16 }
 0x751   : > { %16340 = vmatpush3.bf16.msra.mxu0 %v17531_v26  ;;  %v12544_v35 = vsel %vm6209_vm7, %v12539_v61, %v12543_v25  ;;  %v12563_v26 = vor.u32 %v12562_v60, %v12558_v45  ;;  %v12637_v25 = vshll.u32 %v12508_v15, 16  ;;  %v12646_v59 = vrot.slane %v12644_v11, 1  ;;  %v17544_v15 = vld [vmem:[%s22024_s7 + $0x30] sm:$0xff]   ;;  %v17545_v11 = vld [vmem:[%s22024_s7 + $0x38] sm:$0xff]  }
 0x752   : > { %16341 = vmatprep.subr.bf16.mxu0 %v17532_v51  ;;  %v12668_v45 = vshll.u32 %v12513_v44, 16 }
 0x753   : > { %v12639_v27 = vrot.slane %v12637_v25, 1 }
 0x754   : > { %16310 = vmatmul.mubr.bf16.gmra.mrb[36].mxu0 %v17634_v10  ;;  %v12500_v10 = vld [vmem:[#allocation3 + $0xb8] sm:$0x1] }
 0x755   : > { %16313 = vmatprep.mubr.bf16.mxu0 %v17635_v23  ;;  %16342 = vmatpush3.bf16.msra.mxu0 %v17532_v51  ;;  %v12575_v51 = vor.u32 %v12574_v55, %v12570_v46  ;;  %v12596_v23 = vshll.u32 %v12501_v40, 16 }
 0x756   : > { %16343 = vmatprep.subr.bf16.mxu0 %v17533_v4 }
 0x759   : > { %16344 = vmatpush3.bf16.msra.mxu0 %v17533_v4  ;;  %v12579_v4 = vrot.slane %v12577_v21, 1  ;;  %v12651_v21 = vrot.slane %v12649_v1, 1 }
 0x75a   : > { %16345 = vmatprep.subr.bf16.mxu0 %v17534_v20 }
 0x75c   : > { %16314 = vmatmul.mubr.bf16.gmra.mrb[40].mxu0 %v17636_v6  ;;  %v12586_v6 = vrot.slane %v12584_v29, 1 }
 0x75d   : > { %16317 = vmatprep.mubr.bf16.mxu0 %v17637_v62  ;;  %16346 = vmatpush3.bf16.msra.mxu0 %v17534_v20  ;;  %v12502_v20 = vld [vmem:[#allocation3 + $0xd0] sm:$0x1]  ;;  %v12589_v62 = vshll.u32 %v12500_v10, 16 }
 0x75e   : > { %16347 = vmatprep.subr.bf16.mxu0 %v17535_v7  ;;  %v12515_v10 = vld [vmem:[#allocation3 + $0x170] sm:$0xff] }
 0x75f   : > { %v12591_v37 = vrot.slane %v12589_v62, 1  ;;  %v12678_v57 = vshrl.u32 %v12515_v10, 16 }
 0x761   : > { %16348 = vmatpush3.bf16.msra.mxu0 %v17535_v7  ;;  %v12568_v7 = vsel %vm6209_vm7, %v12563_v26, %v12567_v53 }
 0x762   : > { %16349 = vmatprep.subr.bf16.mxu0 %v17536_v52 }
 0x764   : > { %16318 = vmatmul.mubr.bf16.gmra.mrb[44].mxu0 %v17638_v33  ;;  %v12601_v33 = vshll.u32 %v12502_v20, 16  ;;  %v12517_v20 = vld [vmem:[#allocation3 + $0x188] sm:$0xff] }
 0x765   : > { %16321 = vmatprep.mubr.bf16.mxu0 %v17639_v2  ;;  %16350 = vmatpush3.bf16.msra.mxu0 %v17536_v52  ;;  %v12580_v52 = vsel %vm6209_vm7, %v12575_v51, %v12579_v4  ;;  %v12503_v2 = vld [vmem:[#allocation3 + $0xe0] sm:$0xff]  ;;  %v12670_v51 = vrot.slane %v12668_v45, 1 }
 0x766   : > { %16351 = vmatprep.subr.bf16.mxu0 %v17537_v0  ;;  %v12608_v18 = vshll.u32 %v12503_v2, 16  ;;  %v12606_v56 = vshrl.u32 %v12503_v2, 16  ;;  %v12516_v2 = vld [vmem:[#allocation3 + $0x178] sm:$0x1] }
 0x768   : > { %v12610_v47 = vrot.slane %v12608_v18, 1 }
 0x769   : > { %16352 = vmatpush3.bf16.msra.mxu0 %v17537_v0  ;;  %v12598_v0 = vrot.slane %v12596_v23, 1  ;;  %v12654_v23 = vshrl.u32 %v12511_v48, 16 }
 0x76a   : > { %v12611_v34 = vor.u32 %v12610_v47, %v12606_v56 }
 0x76c   : > { %16322 = vmatmul.mubr.bf16.gmra.mrb[48].mxu0 %v17640_v8  ;;  %v12582_v8 = vshrl.u32 %v12499_v12, 16  ;;  %v12512_v12 = vld [vmem:[#allocation3 + $0x148] sm:$0x1] }
 0x76d   : > { %16325 = vmatprep.mubr.bf16.mxu0 %v17641_v63  ;;  %v12505_v63 = vld [vmem:[#allocation3 + $0xf8] sm:$0xff]  ;;  %v12661_v53 = vshll.u32 %v12512_v12, 16 }
 0x76e   : > { %v12620_v3 = vshll.u32 %v12505_v63, 16  ;;  %v12618_v36 = vshrl.u32 %v12505_v63, 16  ;;  %v12518_v63 = vld [vmem:[#allocation3 + $0x190] sm:$0x1] }
 0x76f   : > { %v12663_v62 = vrot.slane %v12661_v53, 1 }
 0x770   : > { %v12622_v5 = vrot.slane %v12620_v3, 1  ;;  %v12690_v3 = vshrl.u32 %v12517_v20, 16 }
 0x772   : > { %v12623_v14 = vor.u32 %v12622_v5, %v12618_v36  ;;  %v12709_v5 = vshll.u32 %v12520_v42, 16  ;;  %v17857_v36 = vmov 0.0  }
 0x773   : > { %16385 = vmatprep.subr.bf16.mxu1 %v17857_v36  ;;  %16401 = vmatprep.mubr.msk.bf16.mxu1 %vm17858_vm8, %v17857_v36 }
 0x774   : > { %16326 = vmatmul.mubr.bf16.gmra.mrb[52].mxu0 %v17642_v30  ;;  %v12594_v30 = vshrl.u32 %v12501_v40, 16  ;;  %v12628_v54 = vsel %vm6209_vm7, %v12623_v14, %v12627_v38  ;;  %v12514_v40 = vld [vmem:[#allocation3 + $0x160] sm:$0x1]  ;;  %v12711_v56 = vrot.slane %v12709_v5, 1  ;;  %v17542_v14 = vld [vmem:[%s22024_s7 + $0x20] sm:$0xff]   ;;  %v17543_v38 = vld [vmem:[%s22024_s7 + $0x28] sm:$0xff]  }
 0x775   : > { %16329 = vmatprep.mubr.bf16.mxu0 %v17643_v28  ;;  %v12587_v28 = vor.u32 %v12586_v6, %v12582_v8  ;;  %v12673_v4 = vshll.u32 %v12514_v40, 16  ;;  %v12692_v8 = vshll.u32 %v12517_v20, 16 }
 0x776   : > { %v12599_v49 = vor.u32 %v12598_v0, %v12594_v30 }
 0x77c   : > { %16330 = vmatmul.mubr.bf16.gmra.mrb[56].mxu0 %v17644_v9  ;;  %v12603_v9 = vrot.slane %v12601_v33, 1  ;;  %v12675_v33 = vrot.slane %v12673_v4, 1 }
 0x77d   : > { %16333 = vmatprep.mubr.bf16.mxu0 %v17645_v41  ;;  %v12592_v41 = vsel %vm6209_vm7, %v12587_v28, %v12591_v37  ;;  %v12685_v37 = vshll.u32 %v12516_v2, 16 }
 0x77e   : > { %v12604_v13 = vsel %vm6209_vm7, %v12599_v49, %v12603_v9  ;;  %v12694_v49 = vrot.slane %v12692_v8, 1  ;;  %v12697_v9 = vshll.u32 %v12518_v63, 16 }
 0x77f   : > { %v12687_v47 = vrot.slane %v12685_v37, 1 }
 0x784   : > { %16334 = vmatmul.mubr.bf16.gmra.mrb[60].mxu0 %v17646_v31  ;;  %v12615_v31 = vrot.slane %v12613_v17, 1  ;;  %v12695_v17 = vor.u32 %v12694_v49, %v12690_v3 }
 0x785   : > { %16353 = vmatprep.mubr.bf16.mxu0 %v12532_v39  ;;  %v12632_v39 = vshll.u32 %v12507_v43, 16 }
 0x786   : > { %v12616_v24 = vsel %vm6209_vm7, %v12611_v34, %v12615_v31  ;;  %v17538_v34 = vld [vmem:[%s22024_s7] sm:$0xff]   ;;  %v17539_v31 = vld [vmem:[%s22024_s7 + $0x8] sm:$0xff]  }
 0x787   : > { %v12634_v61 = vrot.slane %v12632_v39, 1  ;;  %16386 = vmatpush3.bf16.msra.mxu1 %v17538_v34  ;;  %v17541_v39 = vld [vmem:[%s22024_s7 + $0x18] sm:$0xff]  }
 0x788   : > { %16387 = vmatprep.subr.bf16.mxu1 %v17857_v36 }
 0x789   : > { %v12635_v60 = vor.u32 %v12634_v61, %v12630_v50 }
 0x78b   : > { %v12640_v46 = vsel %vm6209_vm7, %v12635_v60, %v12639_v27  ;;  %16388 = vmatpush3.bf16.msra.mxu1 %v17539_v31  ;;  %v17652_v31 = vld [vmem:[#allocation2 + $0x98] sm:$0xff] }
 0x78c   : > { %16354 = vmatmul.mubr.bf16.vlgmr.msra.gmra.mrb[32].mxu0 %v12544_v35  ;;  %v12642_v35 = vshrl.u32 %v12509_v22, 16  ;;  %v12712_v22 = vsel %vm6209_vm7, %v21587_v58, %v12711_v56  ;;  %16389 = vmatprep.subr.bf16.mxu1 %v17857_v36  ;;  %v17540_v58 = vld [vmem:[%s22024_s7 + $0x10] sm:$0xff]  }
 0x78d   : > { %16357 = vmatprep.mubr.bf16.mxu0 %v12556_v19  ;;  %v12656_v19 = vshll.u32 %v12511_v48, 16 }
 0x78e   : > { %v12647_v55 = vor.u32 %v12646_v59, %v12642_v35  ;;  %v17648_v35 = vld [vmem:[#allocation2 + $0x38] sm:$0xff] }
 0x78f   : > { %v12658_v26 = vrot.slane %v12656_v19, 1  ;;  %16390 = vmatpush3.bf16.msra.mxu1 %v17540_v58  ;;  %v12989_v60 = vunpack.c.l.bf16 %v17648_v35  ;;  %v12997_v58 = vunpack.c.l.bf16 %v17652_v31 }
 0x790   : > { %v12652_v29 = vsel %vm6209_vm7, %v12647_v55, %v12651_v21  ;;  %16391 = vmatprep.subr.bf16.mxu1 %v17857_v36  ;;  %v12990_v21 = vunpack.c.h.bf16 %v17648_v35 }
 0x791   : > { %v12659_v6 = vor.u32 %v12658_v26, %v12654_v23 }
 0x793   : > { %v12664_v30 = vsel %vm6209_vm7, %v12659_v6, %v12663_v62  ;;  %16392 = vmatpush3.bf16.msra.mxu1 %v17541_v39 }
 0x794   : > { %16358 = vmatmul.mubr.bf16.gmra.mrb[36].mxu0 %v12568_v7  ;;  %v12666_v7 = vshrl.u32 %v12513_v44, 16  ;;  %16393 = vmatprep.subr.bf16.mxu1 %v17857_v36 }
 0x795   : > { %16361 = vmatprep.mubr.bf16.mxu0 %v12580_v52  ;;  %v12680_v52 = vshll.u32 %v12515_v10, 16 }
 0x796   : > { %v12671_v0 = vor.u32 %v12670_v51, %v12666_v7  ;;  %v17649_v51 = vld [vmem:[#allocation2 + $0x50] sm:$0xff] }
 0x797   : > { %v12682_v28 = vrot.slane %v12680_v52, 1  ;;  %16394 = vmatpush3.bf16.msra.mxu1 %v17542_v14  ;;  %v12991_v4 = vunpack.c.l.bf16 %v17649_v51  ;;  %v17650_v52 = vld [vmem:[#allocation2 + $0x68] sm:$0xff]  ;;  %v12992_v2 = vunpack.c.h.bf16 %v17649_v51 }
 0x798   : > { %v12676_v18 = vsel %vm6209_vm7, %v12671_v0, %v12675_v33  ;;  %16395 = vmatprep.subr.bf16.mxu1 %v17857_v36  ;;  %v12993_v0 = vunpack.c.l.bf16 %v17650_v52  ;;  %v12994_v37 = vunpack.c.h.bf16 %v17650_v52 }
 0x79b   : > { %16396 = vmatpush3.bf16.msra.mxu1 %v17543_v38 }
 0x79c   : > { %16362 = vmatmul.mubr.bf16.gmra.mrb[40].mxu0 %v12592_v41  ;;  %v12683_v41 = vor.u32 %v12682_v28, %v12678_v57  ;;  %16397 = vmatprep.subr.bf16.mxu1 %v17857_v36 }
 0x79d   : > { %16365 = vmatprep.mubr.bf16.mxu0 %v12604_v13  ;;  %v12699_v13 = vrot.slane %v12697_v9, 1 }
 0x79e   : > { %v12688_v32 = vsel %vm6209_vm7, %v12683_v41, %v12687_v47 }
 0x79f   : > { %v12700_v43 = vsel %vm6209_vm7, %v12695_v17, %v12699_v13  ;;  %16398 = vmatpush3.bf16.msra.mxu1 %v17544_v15  ;;  %v17651_v13 = vld [vmem:[#allocation2 + $0x80] sm:$0xff] }
 0x7a0   : > { %16399 = vmatprep.subr.bf16.mxu1 %v17857_v36  ;;  %v12995_v5 = vunpack.c.l.bf16 %v17651_v13  ;;  %v12996_v38 = vunpack.c.h.bf16 %v17651_v13 }
 0x7a3   : > { %16400 = vmatpush3.bf16.msra.mxu1 %v17545_v11 }
 0x7a4   : > { %16366 = vmatmul.mubr.bf16.gmra.mrb[44].mxu0 %v12616_v24  ;;  %16405 = vmatprep.subr.bf16.mxu1 %v17857_v36 }
 0x7a5   : > { %16369 = vmatprep.mubr.bf16.mxu0 %v12628_v54  ;;  %v17647_v54 = vld [vmem:[#allocation2 + $0x20] sm:$0xff] }
 0x7a6   : > { %v12987_v59 = vunpack.c.l.bf16 %v17647_v54  ;;  %v12988_v19 = vunpack.c.h.bf16 %v17647_v54 }
 0x7ac   : > { %16370 = vmatmul.mubr.bf16.gmra.mrb[48].mxu0 %v12640_v46 }
 0x7ad   : > { %16373 = vmatprep.mubr.bf16.mxu0 %v12652_v29 }
 0x7b4   : > { %16374 = vmatmul.mubr.bf16.gmra.mrb[52].mxu0 %v12664_v30 }
 0x7b5   : > { %16377 = vmatprep.mubr.bf16.mxu0 %v12676_v18 }
 0x7bc   : > { %16378 = vmatmul.mubr.bf16.gmra.mrb[56].mxu0 %v12688_v32 }
 0x7bd   : > { %16381 = vmatprep.mubr.bf16.mxu0 %v12700_v43 }
 0x7c4   : > { %16382 = vmatmul.mubr.bf16.gmra.mrb[60].mxu0 %v12712_v22 }
 0x85f   : > { %v16355_v24 = vpop.f32.mrb[32].mxu0 }
 0x860   : > { %v12828_v61 = vpop.f32.mrb[33].mxu0  ;;  %v13028_v25 = vadd.f32 %v16355_v24, %v21888_v16 }
 0x861   : > { %v13026_v1 = vadd.f32 %v21888_v16, %v12828_v61  ;;  %v16356_v48 = vpop.f32.mrb[34].mxu0 }
 0x862   : > { %v13029_v50 = vadd.f32 %v16356_v48, %v21888_v16  ;;  %v12831_v44 = vpop.f32.mrb[35].mxu0  ;;  %v13060_v12 = vadd.f32 %v13028_v25, %v12989_v60  ;;  %v12998_v25 = vunpack.c.h.bf16 %v17652_v31 }
 0x863   : > { %v13058_v27 = vadd.f32 %v13026_v1, %v12987_v59  ;;  %v13027_v55 = vadd.f32 %v21888_v16, %v12831_v44 }
 0x864   : > { %v13061_v40 = vadd.f32 %v13029_v50, %v12990_v21  ;;  %v13092_v10 = vmax.f32 %v13060_v12, 0.0 }
 0x865   : > { %v13059_v45 = vadd.f32 %v13027_v55, %v12988_v19  ;;  %v13090_v46 = vmax.f32 %v13058_v27, 0.0  ;;  %v17653_v19 = vld [vmem:[#allocation2 + $0xb0] sm:$0xff] }
 0x866   : > { %v13093_v62 = vmax.f32 %v13061_v40, 0.0  ;;  %v12999_v55 = vunpack.c.l.bf16 %v17653_v19 }
 0x867   : > { %v13091_v26 = vmax.f32 %v13059_v45, 0.0  ;;  %v16359_v53 = vpop.f32.mrb[36].mxu0 }
 0x868   : > { %v12844_v29 = vpop.f32.mrb[37].mxu0  ;;  %v13032_v20 = vadd.f32 %v16359_v53, %v21888_v16  ;;  %v17654_v53 = vld [vmem:[#allocation2 + $0xc8] sm:$0xff] }
 0x869   : > { %v13122_v23 = vadd.f32 %v13091_v26, %v13090_v46  ;;  %v13030_v7 = vadd.f32 %v21888_v16, %v12844_v29  ;;  %v16360_v6 = vpop.f32.mrb[38].mxu0  ;;  %v13001_v29 = vunpack.c.l.bf16 %v17654_v53 }
 0x86a   : > { %v12847_v33 = vpop.f32.mrb[39].mxu0  ;;  %v13033_v30 = vadd.f32 %v16360_v6, %v21888_v16  ;;  %v13064_v18 = vadd.f32 %v13032_v20, %v12993_v0  ;;  %v13002_v6 = vunpack.c.h.bf16 %v17654_v53 }
 0x86b   : > { %v13123_v8 = vadd.f32 %v13122_v23, %v13092_v10  ;;  %v13062_v63 = vadd.f32 %v13030_v7, %v12991_v4  ;;  %v13031_v28 = vadd.f32 %v21888_v16, %v12847_v33  ;;  %v13000_v4 = vunpack.c.h.bf16 %v17653_v19 }
 0x86c   : > { %v13065_v42 = vadd.f32 %v13033_v30, %v12994_v37  ;;  %v13096_v32 = vmax.f32 %v13064_v18, 0.0  ;;  %v17655_v37 = vld [vmem:[#allocation2 + $0xe0] sm:$0xff] }
 0x86d   : > { %v13094_v49 = vmax.f32 %v13062_v63, 0.0  ;;  %v13124_v9 = vadd.f32 %v13123_v8, %v13093_v62  ;;  %v13063_v57 = vadd.f32 %v13031_v28, %v12992_v2  ;;  %v13003_v18 = vunpack.c.l.bf16 %v17655_v37 }
 0x86e   : > { %v13097_v15 = vmax.f32 %v13065_v42, 0.0 }
 0x86f   : > { %v13125_v3 = vadd.f32 %v13124_v9, %v13094_v49  ;;  %v13095_v41 = vmax.f32 %v13063_v57, 0.0  ;;  %v16363_v47 = vpop.f32.mrb[40].mxu0 }
 0x870   : > { %v12860_v17 = vpop.f32.mrb[41].mxu0  ;;  %v13036_v56 = vadd.f32 %v16363_v47, %v21888_v16 }
 0x871   : > { %v13126_v43 = vadd.f32 %v13125_v3, %v13095_v41  ;;  %v13034_v22 = vadd.f32 %v21888_v16, %v12860_v17  ;;  %v16364_v34 = vpop.f32.mrb[42].mxu0  ;;  %v17656_v41 = vld [vmem:[#allocation2 + $0xf8] sm:$0xff] }
 0x872   : > { %v13037_v39 = vadd.f32 %v16364_v34, %v21888_v16  ;;  %v12863_v14 = vpop.f32.mrb[43].mxu0  ;;  %v13068_v54 = vadd.f32 %v13036_v56, %v12997_v58  ;;  %v13005_v47 = vunpack.c.l.bf16 %v17656_v41  ;;  %v13006_v34 = vunpack.c.h.bf16 %v17656_v41 }
 0x873   : > { %v13127_v11 = vadd.f32 %v13126_v43, %v13096_v32  ;;  %v13066_v24 = vadd.f32 %v13034_v22, %v12995_v5  ;;  %v13035_v61 = vadd.f32 %v21888_v16, %v12863_v14  ;;  %v13004_v5 = vunpack.c.h.bf16 %v17655_v37 }
 0x874   : > { %v13069_v50 = vadd.f32 %v13037_v39, %v12998_v25  ;;  %v13100_v21 = vmax.f32 %v13068_v54, 0.0  ;;  %v17657_v25 = vld [vmem:[#allocation2 + $0x110] sm:$0xff] }
 0x875   : > { %v13098_v59 = vmax.f32 %v13066_v24, 0.0  ;;  %v13128_v1 = vadd.f32 %v13127_v11, %v13097_v15  ;;  %v13067_v48 = vadd.f32 %v13035_v61, %v12996_v38  ;;  %v13007_v54 = vunpack.c.l.bf16 %v17657_v25 }
 0x876   : > { %v13101_v26 = vmax.f32 %v13069_v50, 0.0 }
 0x877   : > { %v13129_v44 = vadd.f32 %v13128_v1, %v13098_v59  ;;  %v13099_v35 = vmax.f32 %v13067_v48, 0.0  ;;  %v16367_v60 = vpop.f32.mrb[44].mxu0 }
 0x878   : > { %v12876_v27 = vpop.f32.mrb[45].mxu0  ;;  %v13040_v45 = vadd.f32 %v16367_v60, %v21888_v16  ;;  %v17658_v60 = vld [vmem:[#allocation2 + $0x128] sm:$0xff] }
 0x879   : > { %v13130_v12 = vadd.f32 %v13129_v44, %v13099_v35  ;;  %v13038_v40 = vadd.f32 %v21888_v16, %v12876_v27  ;;  %v16368_v46 = vpop.f32.mrb[46].mxu0  ;;  %v13009_v27 = vunpack.c.l.bf16 %v17658_v60 }
 0x87a   : > { %v12879_v51 = vpop.f32.mrb[47].mxu0  ;;  %v13041_v20 = vadd.f32 %v16368_v46, %v21888_v16  ;;  %v13072_v62 = vadd.f32 %v13040_v45, %v13001_v29  ;;  %v13010_v46 = vunpack.c.h.bf16 %v17658_v60 }
 0x87b   : > { %v13131_v10 = vadd.f32 %v13130_v12, %v13100_v21  ;;  %v13070_v23 = vadd.f32 %v13038_v40, %v12999_v55  ;;  %v13039_v7 = vadd.f32 %v21888_v16, %v12879_v51  ;;  %v13008_v55 = vunpack.c.h.bf16 %v17657_v25 }
 0x87c   : > { %v13073_v8 = vadd.f32 %v13041_v20, %v13002_v6  ;;  %v13104_v49 = vmax.f32 %v13072_v62, 0.0  ;;  %v17659_v6 = vld [vmem:[#allocation2 + $0x140] sm:$0xff] }
 0x87d   : > { %v13102_v52 = vmax.f32 %v13070_v23, 0.0  ;;  %v13132_v0 = vadd.f32 %v13131_v10, %v13101_v26  ;;  %v13071_v33 = vadd.f32 %v13039_v7, %v13000_v4  ;;  %v13011_v62 = vunpack.c.l.bf16 %v17659_v6 }
 0x87e   : > { %v13105_v32 = vmax.f32 %v13073_v8, 0.0 }
 0x87f   : > { %v13133_v2 = vadd.f32 %v13132_v0, %v13102_v52  ;;  %v13103_v63 = vmax.f32 %v13071_v33, 0.0  ;;  %v16371_v30 = vpop.f32.mrb[48].mxu0 }
 0x880   : > { %v12892_v28 = vpop.f32.mrb[49].mxu0  ;;  %v13044_v57 = vadd.f32 %v16371_v30, %v21888_v16 }
 0x881   : > { %v13134_v9 = vadd.f32 %v13133_v2, %v13103_v63  ;;  %v13042_v3 = vadd.f32 %v21888_v16, %v12892_v28  ;;  %v16372_v42 = vpop.f32.mrb[50].mxu0  ;;  %v17660_v63 = vld [vmem:[#allocation2 + $0x158] sm:$0xff] }
 0x882   : > { %v13045_v17 = vadd.f32 %v16372_v42, %v21888_v16  ;;  %v12895_v13 = vpop.f32.mrb[51].mxu0  ;;  %v13076_v31 = vadd.f32 %v13044_v57, %v13005_v47  ;;  %v13013_v30 = vunpack.c.l.bf16 %v17660_v63  ;;  %v13014_v42 = vunpack.c.h.bf16 %v17660_v63  ;;  %v17553_v63 = vld [vmem:[#allocation9 + $0x38] sm:$0xff]  }
 0x883   : > { %v13135_v43 = vadd.f32 %v13134_v9, %v13104_v49  ;;  %v13074_v56 = vadd.f32 %v13042_v3, %v13003_v18  ;;  %v13043_v22 = vadd.f32 %v21888_v16, %v12895_v13  ;;  %v13012_v18 = vunpack.c.h.bf16 %v17659_v6 }
 0x884   : > { %v13077_v38 = vadd.f32 %v13045_v17, %v13006_v34  ;;  %v13108_v59 = vmax.f32 %v13076_v31, 0.0  ;;  %v17661_v34 = vld [vmem:[#allocation2 + $0x170] sm:$0xff] }
 0x885   : > { %v13106_v58 = vmax.f32 %v13074_v56, 0.0  ;;  %v13136_v39 = vadd.f32 %v13135_v43, %v13105_v32  ;;  %v13075_v14 = vadd.f32 %v13043_v22, %v13004_v5  ;;  %v13015_v31 = vunpack.c.l.bf16 %v17661_v34 }
 0x886   : > { %v13109_v35 = vmax.f32 %v13077_v38, 0.0 }
 0x887   : > { %v13137_v15 = vadd.f32 %v13136_v39, %v13106_v58  ;;  %v13107_v11 = vmax.f32 %v13075_v14, 0.0  ;;  %v16375_v24 = vpop.f32.mrb[52].mxu0 }
 0x888   : > { %v12908_v61 = vpop.f32.mrb[53].mxu0  ;;  %v13048_v48 = vadd.f32 %v16375_v24, %v21888_v16  ;;  %v17662_v24 = vld [vmem:[#allocation2 + $0x188] sm:$0xff] }
 0x889   : > { %v13138_v1 = vadd.f32 %v13137_v15, %v13107_v11  ;;  %v13046_v50 = vadd.f32 %v21888_v16, %v12908_v61  ;;  %v16376_v44 = vpop.f32.mrb[54].mxu0  ;;  %v13017_v61 = vunpack.c.l.bf16 %v17662_v24 }
 0x88a   : > { %v12911_v19 = vpop.f32.mrb[55].mxu0  ;;  %v13049_v45 = vadd.f32 %v16376_v44, %v21888_v16  ;;  %v13080_v26 = vadd.f32 %v13048_v48, %v13009_v27  ;;  %v13018_v44 = vunpack.c.h.bf16 %v17662_v24 }
 0x88b   : > { %v13139_v21 = vadd.f32 %v13138_v1, %v13108_v59  ;;  %v13078_v12 = vadd.f32 %v13046_v50, %v13007_v54  ;;  %v13047_v40 = vadd.f32 %v21888_v16, %v12911_v19  ;;  %v13016_v54 = vunpack.c.h.bf16 %v17661_v34 }
 0x88c   : > { %v13081_v10 = vadd.f32 %v13049_v45, %v13010_v46  ;;  %v13112_v52 = vmax.f32 %v13080_v26, 0.0 }
 0x88d   : > { %v13110_v53 = vmax.f32 %v13078_v12, 0.0  ;;  %v13140_v29 = vadd.f32 %v13139_v21, %v13109_v35  ;;  %v13079_v51 = vadd.f32 %v13047_v40, %v13008_v55 }
 0x88e   : > { %v13113_v49 = vmax.f32 %v13081_v10, 0.0 }
 0x88f   : > { %v13141_v4 = vadd.f32 %v13140_v29, %v13110_v53  ;;  %v13111_v23 = vmax.f32 %v13079_v51, 0.0  ;;  %v16379_v20 = vpop.f32.mrb[56].mxu0 }
 0x890   : > { %v12924_v7 = vpop.f32.mrb[57].mxu0  ;;  %v13052_v33 = vadd.f32 %v16379_v20, %v21888_v16 }
 0x891   : > { %v13142_v0 = vadd.f32 %v13141_v4, %v13111_v23  ;;  %v13050_v2 = vadd.f32 %v21888_v16, %v12924_v7  ;;  %v16380_v8 = vpop.f32.mrb[58].mxu0  ;;  %v17546_v7 = vld [vmem:[#allocation9] sm:$0xff]  }
 0x892   : > { %v13053_v28 = vadd.f32 %v16380_v8, %v21888_v16  ;;  %v12927_v37 = vpop.f32.mrb[59].mxu0  ;;  %v13084_v41 = vadd.f32 %v13052_v33, %v13013_v30  ;;  %v17550_v33 = vld [vmem:[#allocation9 + $0x20] sm:$0xff]   ;;  %v17552_v8 = vld [vmem:[#allocation9 + $0x30] sm:$0xff]   ;;  %v14401_v30 = vld [vmem:[#allocation7] ss:$0 sm:$0xff] }
 0x893   : > { %v13143_v9 = vadd.f32 %v13142_v0, %v13112_v52  ;;  %v13082_v57 = vadd.f32 %v13050_v2, %v13011_v62  ;;  %v13051_v3 = vadd.f32 %v21888_v16, %v12927_v37  ;;  %v17547_v62 = vld [vmem:[#allocation9 + $0x8] sm:$0xff]   ;;  %v17548_v52 = vld [vmem:[#allocation9 + $0x10] sm:$0xff]   ;;  %v17549_v0 = vld [vmem:[#allocation9 + $0x18] sm:$0xff]  }
 0x894   : > { %v13085_v5 = vadd.f32 %v13053_v28, %v13014_v42  ;;  %v13116_v58 = vmax.f32 %v13084_v41, 0.0  ;;  %v17551_v2 = vld [vmem:[#allocation9 + $0x28] sm:$0xff]  }
 0x895   : > { %v13114_v47 = vmax.f32 %v13082_v57, 0.0  ;;  %v13144_v17 = vadd.f32 %v13143_v9, %v13113_v49  ;;  %v13083_v13 = vadd.f32 %v13051_v3, %v13012_v18 }
 0x896   : > { %v13117_v11 = vmax.f32 %v13085_v5, 0.0 }
 0x897   : > { %v13145_v32 = vadd.f32 %v13144_v17, %v13114_v47  ;;  %v13115_v43 = vmax.f32 %v13083_v13, 0.0  ;;  %v16383_v56 = vpop.f32.mrb[60].mxu0 }
 0x898   : > { %v12940_v22 = vpop.f32.mrb[61].mxu0  ;;  %v13056_v14 = vadd.f32 %v16383_v56, %v21888_v16 }
 0x899   : > { %v13146_v39 = vadd.f32 %v13145_v32, %v13115_v43  ;;  %v13054_v38 = vadd.f32 %v21888_v16, %v12940_v22  ;;  %v16384_v15 = vpop.f32.mrb[62].mxu0 }
 0x89a   : > { %v12943_v25 = vpop.f32.mrb[63].mxu0  ;;  %v13057_v48 = vadd.f32 %v16384_v15, %v21888_v16  ;;  %v13088_v35 = vadd.f32 %v13056_v14, %v13017_v61 }
 0x89b   : > { %v13147_v59 = vadd.f32 %v13146_v39, %v13116_v58  ;;  %v13086_v1 = vadd.f32 %v13054_v38, %v13015_v31  ;;  %v13055_v50 = vadd.f32 %v21888_v16, %v12943_v25 }
 0x89c   : > { %v13089_v21 = vadd.f32 %v13057_v48, %v13018_v44  ;;  %v13120_v45 = vmax.f32 %v13088_v35, 0.0 }
 0x89d   : > { %v13118_v60 = vmax.f32 %v13086_v1, 0.0  ;;  %v13148_v27 = vadd.f32 %v13147_v59, %v13117_v11  ;;  %v13087_v19 = vadd.f32 %v13055_v50, %v13016_v54 }
 0x89e   : > { %v13121_v46 = vmax.f32 %v13089_v21, 0.0 }
 0x89f   : > { %v13149_v55 = vadd.f32 %v13148_v27, %v13118_v60  ;;  %v13119_v12 = vmax.f32 %v13087_v19, 0.0 }
 0x8a1   : > { %v13150_v40 = vadd.f32 %v13149_v55, %v13119_v12 }
 0x8a3   : > { %v13151_v26 = vadd.f32 %v13150_v40, %v13120_v45 }
 0x8a5   : > { %v13152_v53 = vadd.f32 %v13151_v26, %v13121_v46 }
 0x8a7   : > { %v13153_v29 = vrot.slane %v13152_v53, 4 }
 0x8a9   : > { %v13154_v51 = vadd.f32 %v13153_v29, %v13152_v53 }
 0x8ab   : > { %v13155_v4 = vrot.slane %v13154_v51, 2 }
 0x8ad   : > { %v13156_v10 = vadd.f32 %v13155_v4, %v13154_v51 }
 0x8af   : > { %v13157_v23 = vrot.slane %v13156_v10, 1 }
 0x8b1   : > { %v13158_v16 = vadd.f32 %v13157_v23, %v13156_v10 }
 0x8b3   : > { %v13159_v20 = vmul.f32 0.00390625, %v13158_v16 }
 0x8b5   : > { %v13161_v6 = vpack.c.bf16 %v13159_v20, %v13159_v20  ;;  %13160 = vst [vmem:[%s451_s14] sm:$0x1] %v13159_v20 }
 0x8b7   : > { %16402 = vmatmul.mubr.bf16.vlgmr.msra.gmra.mrb[64].mxu1 %v13161_v6 }
 0x8b8   : > { %16406 = vmatpush3.bf16.msra.mxu1 %v17546_v7  ;;  %16421 = vmatprep.mubr.msk.bf16.mxu1 %vm17858_vm8, %v17857_v36 }
 0x8b9   : > { %16407 = vmatprep.subr.bf16.mxu1 %v17857_v36 }
 0x8bc   : > { %16408 = vmatpush3.bf16.msra.mxu1 %v17547_v62 }
 0x8bd   : > { %16409 = vmatprep.subr.bf16.mxu1 %v17857_v36 }
 0x8c0   : > { %16410 = vmatpush3.bf16.msra.mxu1 %v17548_v52 }
 0x8c1   : > { %16411 = vmatprep.subr.bf16.mxu1 %v17857_v36 }
 0x8c4   : > { %16412 = vmatpush3.bf16.msra.mxu1 %v17549_v0 }
 0x8c5   : > { %16413 = vmatprep.subr.bf16.mxu1 %v17857_v36 }
 0x8c8   : > { %16414 = vmatpush3.bf16.msra.mxu1 %v17550_v33 }
 0x8c9   : > { %16415 = vmatprep.subr.bf16.mxu1 %v17857_v36 }
 0x8cc   : > { %16416 = vmatpush3.bf16.msra.mxu1 %v17551_v2 }
 0x8cd   : > { %16417 = vmatprep.subr.bf16.mxu1 %v17857_v36 }
 0x8d0   : > { %16418 = vmatpush3.bf16.msra.mxu1 %v17552_v8 }
 0x8d1   : > { %16419 = vmatprep.subr.bf16.mxu1 %v17857_v36 }
 0x8d4   : > { %16420 = vmatpush3.bf16.msra.mxu1 %v17553_v63 }
 0x98a   : > { %v13267_v28 = vpop.f32.mrb[64].mxu1 }
 0x98b   : > { %v13268_v37 = vadd.f32 %v14401_v30, %v13267_v28  ;;  %v16403_v18 = vpop.f32.mrb[65].mxu1 }
 0x98c   : > { %v13270_v49 = vpop.f32.mrb[66].mxu1 }
 0x98d   : > { %v13273_v9 = vmax.f32 %v13268_v37, 0.0  ;;  %v16404_v57 = vpop.f32.mrb[67].mxu1 }
 0x98f   : > { %v13274_v3 = vpack.c.bf16 %v13273_v9, %v13273_v9 }
 0x991   : > { %16422 = vmatmul.mubr.bf16.vlgmr.msra.gmra.mrb[68].mxu1 %v13274_v3 }
 0x992   : > { %17760 = shalt.err (!%p17757_p11)
}
 0x993   : > { %s17761_s15 = scalar_lea.hbm %s21943_s17, 16  ;;  %s17765_s21 = scalar_lea.hbm %s22028_s11, 32 }
 0x994   : > { %p17762_p13 = scmp.ne.s32.totalorder %s21943_s17, %s17761_s15  ;;  %p17766_p6 = scmp.lt.u32.totalorder %s21943_s17, %s22028_s11 }
 0x995   : > { %p17767_p5 = scmp.lt.u32.totalorder %s17765_s21, %s17761_s15  ;;  %p17769_p9 = scmp.lt.u32.totalorder %s17761_s15, %s21943_s17 }
 0x996   : > { %p17763_p1 = pnand %p17762_p13, %p22532_p10 }
 0x997   : > { %p17768_p12 = por %p17767_p5, %p17766_p6 }
 0x998   : > { %p17764_p0 = pneg %p17763_p1 }
 0x999   : > { %p17770_p2 = por %p17769_p9, %p17768_p12 }
 0x99b   : > { %p17771_p3 = pnand %p17770_p2, %p17764_p0 }
 0x99d   : > { %17774 = shalt.err (!%p17771_p3)
}
 0x99e   : > { %17206 = dma.vmem_to_hbm [thread:$0]  (%p22532_p10), %s13405_s27, 16, %s21943_s17, %s13388_s19   ;;  %v14410_v36 = vld [vmem:[%s22027_s10] ss:$0 sm:$0xff] }
 0x99f   : > { %s457_s8 = scalar_lea.vmem [#allocation11], %s21923_s24  ;;  %s21974_s28 = scalar_lea.hbm %s22029_s12, %s14419_s26 }
 0x9a0   : > { %s13417_s16 = sshll.u32 %s457_s8, 4  ;;  %s13392_s17 = scalar_lea.sflag [#allocation12], %s21923_s24  ;;  %s21976_s16 = int_to_ptr.vmem [resolvable:$true] %s13417_s16 }
 0x9a1   : > { %s17775_s27 = scalar_lea.vmem %s21976_s16, 16  ;;  %s17860_s25 = smov [#allocation11]  }
 0x9a2   : > { %p17776_p4 = scmp.ne.s32.totalorder %s21976_s16, %s17775_s27  ;;  %s17779_s19 = sshll.u32 %s17860_s25, 4  ;;  %s17780_s19 = int_to_ptr.vmem [resolvable:$false] %s17779_s19 }
 0x9a3   : > { %s17781_s18 = scalar_lea.vmem %s17780_s19, 32  ;;  %p17782_p11 = scmp.lt.s32.totalorder %s21976_s16, %s17780_s19 }
 0x9a4   : > { %p17777_p7 = pnand %p17776_p4, %p22532_p10  ;;  %p17783_p13 = scmp.lt.s32.totalorder %s17781_s18, %s17775_s27 }
 0x9a6   : > { %p17778_p8 = pneg %p17777_p7  ;;  %p17784_p1 = por %p17783_p13, %p17782_p11 }
 0x9a8   : > { %p17785_p0 = pnand %p17784_p1, %p17778_p8 }
 0xa64   : > { %v13380_v42 = vpop.f32.mrb[68].mxu1 }
 0xa65   : > { %v13381_v41 = vadd.f32 %v14410_v36, %v13380_v42  ;;  %v16423_v47 = vpop.f32.mrb[69].mxu1 }
 0xa66   : > { %v13383_v17 = vpop.f32.mrb[70].mxu1 }
 0xa67   : > { %13386 = vst [vmem:[%s457_s8] sm:$0x1] %v13381_v41  ;;  %v16424_v13 = vpop.f32.mrb[71].mxu1 }
 0xa68   : > { %17788 = shalt.err (!%p17785_p0)
}
 0xa69   : > { %s17789_s24 = scalar_lea.hbm %s21974_s28, 16  ;;  %s17793_s14 = scalar_lea.hbm %s22029_s12, 32 }
 0xa6a   : > { %p17790_p6 = scmp.ne.s32.totalorder %s21974_s28, %s17789_s24  ;;  %p17794_p9 = scmp.lt.u32.totalorder %s21974_s28, %s22029_s12 }
 0xa6b   : > { %p17795_p2 = scmp.lt.u32.totalorder %s17793_s14, %s17789_s24  ;;  %p17797_p4 = scmp.lt.u32.totalorder %s17789_s24, %s21974_s28 }
 0xa6c   : > { %p17791_p5 = pnand %p17790_p6, %p22532_p10 }
 0xa6d   : > { %p17796_p3 = por %p17795_p2, %p17794_p9 }
 0xa6e   : > { %p17792_p12 = pneg %p17791_p5 }
 0xa6f   : > { %p17798_p7 = por %p17797_p4, %p17796_p3 }
 0xa71   : > { %p17799_p8 = pnand %p17798_p7, %p17792_p12 }
 0xa73   : > { %17802 = shalt.err (!%p17799_p8)
}
 0xa74   : > { %17207 = dma.vmem_to_hbm [thread:$0]  (%p22532_p10), %s21976_s16, 16, %s21974_s28, %s13392_s17  }
 0xa75 PF: > { %s22533_s29 = sld [smem:[#allocation19_spill]]  ;;  %s22534_s8 = sld [smem:[#allocation17_spill]] }
 0xa76   : > { %s22535_s20 = sld [smem:[#allocation22_spill]] }
 0xa7b   : > { %p17233_p11 = scmp.ge.s32.totalorder %s22533_s29, 2  ;;  %s13429_s15 = sand.u32 1, %s22534_s8  }
 0xa7c   : > { %p22536_p13 = scmp.ne.s32.totalorder %s22535_s20, 0  ;;  %s13430_s27 = scalar_lea.sflag [#allocation6], %s13429_s15 }
 0xa7e   : > { %p17221_p1 = pnand %p17233_p11, %p22536_p13 }
 0xa80   : > { %17828 = dma.done.wait (!%p17221_p1), %s13430_s27, 16  }
 0xa81   : > { %17830 = vsyncadd (!%p17221_p1), %s13430_s27, 4294967280  ;;  %s13438_s25 = scalar_lea.sflag [#allocation12], %s13429_s15 }
 0xa82   : > { %17832 = dma.done.wait (!%p17221_p1), %s13438_s25, 16  }
 0xa83   : > { %17834 = vsyncadd (!%p17221_p1), %s13438_s25, 4294967280  ;;  %s22537_s24 = sld [smem:[#allocation20_spill]]  ;;  %s22538_s13 = sld [smem:[#allocation18_spill]] }
 0xa84   : > { %s22539_s23 = sld [smem:[#allocation21_spill]]  ;;  %s22540_s21 = smov %s17841_s22 }
 0xa89   : > { %p28_p10 = scmp.ge.s32.totalorder %s22537_s24, 4   ;;  %s22541_s22 = smov %s22538_s13 }
 0xa8b   :  { %30 = sbr.rel (!%p28_p10) target bundleno = 9 (0x9), region = 159 }
 0xa92   :  { %13442 = vsyncpa [#allocation5], 1 }
 0xa93   :  { %13444 = vsyncpa [#allocation5 + $0x1], 1 }
 0xa94   :  { %13445 = vsyncpa [#allocation8], 1 }
 0xa95   :  { %13446 = vsyncpa [#allocation6], 1 }
 0xa96   :  { %13448 = vsyncpa [#allocation6 + $0x1], 1 }
 0xa97   :  { %13449 = vsyncpa [#allocation12], 1 }
 0xa98   :  { %13451 = vsyncpa [#allocation12 + $0x1], 1 }

</bundles_post_ra>
